<compile_context>
chip_gen: v7x
topology: tpu7x:2x2x1
jax: 0.10.0
libtpu: 0.0.40
codegen_flags: <defaults>
</compile_context>

<pallas_src>
import math

import jax
import jax.numpy as jnp
from jax.experimental import pallas as pl
from jax.experimental.pallas import tpu as pltpu

d_model = 512
d_ff = d_model * 4
n_heads = 8
d_k = 64
d_v = 64
LN_EPS = 1e-5  # PyTorch nn.LayerNorm default


def _round_up(x, m):
    return (x + m - 1) // m * m


def _row_tile(n, target=512):
    # Row-tile size: up to `target` rows, always a multiple of 8 (sublane).
    return min(target, _round_up(n, 8))


# ----------------------------------------------------------------------------
# Pallas kernels
# ----------------------------------------------------------------------------
def _matmul_kernel(x_ref, w_ref, o_ref):
    # Row-tiled x @ W with bf16 MXU inputs, f32 accumulation.
    o_ref[...] = jnp.dot(x_ref[...].astype(jnp.bfloat16), w_ref[...],
                         preferred_element_type=jnp.float32)


def _layernorm(y, g, b):
    mu = jnp.mean(y, axis=-1, keepdims=True)
    var = jnp.mean(jnp.square(y - mu), axis=-1, keepdims=True)
    return (y - mu) * jax.lax.rsqrt(var + LN_EPS) * g + b


def _mha_attn_out_kernel(q_ref, k_ref, v_ref, m_ref, res_ref, wo_ref,
                         g_ref, b_ref, out_ref, attn_ref):
    # One batch element per grid step; all heads handled with batched einsums.
    # Fuses: scores -> masked softmax -> context -> Wo projection -> +residual
    # -> LayerNorm, so the context never leaves VMEM.
    q = q_ref[0].astype(jnp.bfloat16)   # (H, Sq, dk)
    k = k_ref[0].astype(jnp.bfloat16)   # (H, Sk, dk)
    v = v_ref[0].astype(jnp.bfloat16)   # (H, Sk, dv)
    mask = m_ref[0]                     # (Sq, Sk) int32 (nonzero = masked)

    # score = Q K^T / sqrt(d_k)
    s = jnp.einsum('hqd,hkd->hqk', q, k, preferred_element_type=jnp.float32)
    s = s * jnp.float32(1.0 / math.sqrt(d_k))
    s = jnp.where(jnp.broadcast_to(mask[None, :, :] != 0, s.shape),
                  jnp.float32(-1e9), s)

    # numerically-stable softmax over the last axis (EUP exp + approx recip)
    s = s - jnp.max(s, axis=-1, keepdims=True)
    e = jnp.exp(s)
    p = e * pl.reciprocal(jnp.sum(e, axis=-1, keepdims=True), approx=True)

    attn_ref[0] = p                                          # (H, Sq, Sk)

    ctx = jnp.einsum('hqk,hkd->hqd', p.astype(jnp.bfloat16), v,
                     preferred_element_type=jnp.float32)     # (H, Sq, dv)
    # Lane-dense combined context (Sq, H*dv), matching PyTorch's
    # transpose(1,2).reshape(..., H*dv) head ordering.
    ctx2 = jnp.concatenate([ctx[h] for h in range(ctx.shape[0])], axis=-1)

    # Fused output projection + residual + LayerNorm.
    y = jnp.dot(ctx2.astype(jnp.bfloat16), wo_ref[...],
                preferred_element_type=jnp.float32) + res_ref[0]
    out_ref[0] = _layernorm(y, g_ref[...], b_ref[...])


def _ffn_kernel(x_ref, w1_ref, w2_ref, g_ref, b_ref, o_ref):
    # LayerNorm(relu(x @ W1) @ W2 + x) fused in one pass (row tile).
    x = x_ref[...]
    h = jnp.maximum(jnp.dot(x.astype(jnp.bfloat16), w1_ref[...],
                            preferred_element_type=jnp.float32), 0.0)
    y = jnp.dot(h.astype(jnp.bfloat16), w2_ref[...],
                preferred_element_type=jnp.float32) + x
    o_ref[...] = _layernorm(y, g_ref[...], b_ref[...])


# ----------------------------------------------------------------------------
# Wrappers (pallas_call plumbing)
# ----------------------------------------------------------------------------
def project(x, w_bf16):
    """x: (N, d_in) f32 @ w: (d_in, d_out) bf16 -> (N, d_out) f32."""
    N, d_in = x.shape
    d_out = w_bf16.shape[1]
    tm = _row_tile(N)
    return pl.pallas_call(
        _matmul_kernel,
        out_shape=jax.ShapeDtypeStruct((N, d_out), jnp.float32),
        grid=(pl.cdiv(N, tm),),
        in_specs=[pl.BlockSpec((tm, d_in), lambda i: (i, 0)),
                  pl.BlockSpec((d_in, d_out), lambda i: (0, 0))],   # resident
        out_specs=pl.BlockSpec((tm, d_out), lambda i: (i, 0)),
        compiler_params=pltpu.CompilerParams(
            dimension_semantics=("parallel",),
            vmem_limit_bytes=48 * 1024 * 1024),
    )(x, w_bf16)


def feed_forward(x, p):
    """FeedForwardNet: LN(relu(x @ W1) @ W2 + x), fused & row-tiled."""
    B, S, _ = x.shape
    N = B * S
    x2 = x.reshape(N, d_model)
    tm = _row_tile(N)
    out = pl.pallas_call(
        _ffn_kernel,
        out_shape=jax.ShapeDtypeStruct((N, d_model), jnp.float32),
        grid=(pl.cdiv(N, tm),),
        in_specs=[pl.BlockSpec((tm, d_model), lambda i: (i, 0)),
                  pl.BlockSpec((d_model, d_ff), lambda i: (0, 0)),  # resident
                  pl.BlockSpec((d_ff, d_model), lambda i: (0, 0)),  # resident
                  pl.BlockSpec((1, d_model), lambda i: (0, 0)),
                  pl.BlockSpec((1, d_model), lambda i: (0, 0))],
        out_specs=pl.BlockSpec((tm, d_model), lambda i: (i, 0)),
        compiler_params=pltpu.CompilerParams(
            dimension_semantics=("parallel",),
            vmem_limit_bytes=48 * 1024 * 1024),   # <= 64 MiB physical on v7x
    )(x2, p["W1"], p["W2"], p["ln_g"], p["ln_b"])
    return out.reshape(B, S, d_model)


def multi_head_attention(q_in, kv_in, mask_bool, p):
    """MutiHeadAttention.forward: fused projections, then one fused
    attention + Wo + residual + LayerNorm kernel per batch element."""
    B, Sq, _ = q_in.shape
    Sk = kv_in.shape[1]
    hk = n_heads * d_k
    q2 = q_in.reshape(B * Sq, d_model)

    if "Wqkv" in p:                       # self-attention: one fused QKV matmul
        qkv = project(q2, p["Wqkv"])      # (B*Sq, 3*H*dk)
        qf, kf, vf = qkv[:, :hk], qkv[:, hk:2 * hk], qkv[:, 2 * hk:]
    else:                                 # cross-attention: Q + fused KV matmul
        kv2 = kv_in.reshape(B * Sk, d_model)
        qf = project(q2, p["Wq"])
        kvp = project(kv2, p["Wkv"])      # (B*Sk, 2*H*dk)
        kf, vf = kvp[:, :hk], kvp[:, hk:]

    Q = qf.reshape(B, Sq, n_heads, d_k).transpose(0, 2, 1, 3)
    K = kf.reshape(B, Sk, n_heads, d_k).transpose(0, 2, 1, 3)
    V = vf.reshape(B, Sk, n_heads, d_v).transpose(0, 2, 1, 3)

    # Mask stays (B, Sq, Sk): no per-head broadcast / redundant HBM traffic.
    mask_i32 = mask_bool.astype(jnp.int32)

    out, attn = pl.pallas_call(
        _mha_attn_out_kernel,
        out_shape=(jax.ShapeDtypeStruct((B, Sq, d_model), jnp.float32),
                   jax.ShapeDtypeStruct((B, n_heads, Sq, Sk), jnp.float32)),
        grid=(B,),
        in_specs=[pl.BlockSpec((1, n_heads, Sq, d_k), lambda b: (b, 0, 0, 0)),
                  pl.BlockSpec((1, n_heads, Sk, d_k), lambda b: (b, 0, 0, 0)),
                  pl.BlockSpec((1, n_heads, Sk, d_v), lambda b: (b, 0, 0, 0)),
                  pl.BlockSpec((1, Sq, Sk), lambda b: (b, 0, 0)),
                  pl.BlockSpec((1, Sq, d_model), lambda b: (b, 0, 0)),   # residual
                  pl.BlockSpec((n_heads * d_v, d_model), lambda b: (0, 0)),  # Wo resident
                  pl.BlockSpec((1, d_model), lambda b: (0, 0)),
                  pl.BlockSpec((1, d_model), lambda b: (0, 0))],
        out_specs=(pl.BlockSpec((1, Sq, d_model), lambda b: (b, 0, 0)),
                   pl.BlockSpec((1, n_heads, Sq, Sk), lambda b: (b, 0, 0, 0))),
        compiler_params=pltpu.CompilerParams(
            dimension_semantics=("parallel",),
            vmem_limit_bytes=48 * 1024 * 1024),
    )(Q, K, V, mask_i32, q_in, p["Wo"], p["ln_g"], p["ln_b"])
    return out, attn


def decoder_layer(dec_inputs, enc_outputs, dec_self_attn_mask,
                  dec_enc_attn_mask, params):
    dec_out, dec_self_attn = multi_head_attention(
        dec_inputs, dec_inputs, dec_self_attn_mask, params["self_attn"])
    dec_out, dec_enc_attn = multi_head_attention(
        dec_out, enc_outputs, dec_enc_attn_mask, params["enc_attn"])
    dec_out = feed_forward(dec_out, params["ffn"])
    return dec_out, dec_self_attn, dec_enc_attn


# ----------------------------------------------------------------------------
# Deterministic parameter initialization + kernel-friendly weight prep
# ----------------------------------------------------------------------------
def init_params(key):
    """Module-style f32 parameters mirroring the PyTorch layers."""
    def w(k, shape):
        return jax.random.normal(k, shape, jnp.float32) * 0.02

    def mha_params(k):
        k1, k2, k3, k4 = jax.random.split(k, 4)
        return dict(
            Wq=w(k1, (d_model, d_k * n_heads)),
            Wk=w(k2, (d_model, d_k * n_heads)),
            Wv=w(k3, (d_model, d_v * n_heads)),
            Wo=w(k4, (d_v * n_heads, d_model)),
            ln_g=jnp.ones((1, d_model), jnp.float32),
            ln_b=jnp.zeros((1, d_model), jnp.float32),
        )

    ka, kb, kc1, kc2 = jax.random.split(key, 4)
    return dict(
        self_attn=mha_params(ka),
        enc_attn=mha_params(kb),
        ffn=dict(
            W1=w(kc1, (d_model, d_ff)),
            W2=w(kc2, (d_ff, d_model)),
            ln_g=jnp.ones((1, d_model), jnp.float32),
            ln_b=jnp.zeros((1, d_model), jnp.float32),
        ),
    )


def prepare_params(params):
    """One-time weight prep: fuse Q/K/V (and K/V) and cast matmul weights to
    bf16 for native MXU rate + halved weight HBM traffic.  LN params stay f32."""
    bf16 = jnp.bfloat16

    def prep_mha(p, fuse_qkv):
        out = dict(Wo=p["Wo"].astype(bf16), ln_g=p["ln_g"], ln_b=p["ln_b"])
        if fuse_qkv:
            out["Wqkv"] = jnp.concatenate(
                [p["Wq"], p["Wk"], p["Wv"]], axis=1).astype(bf16)
        else:
            out["Wq"] = p["Wq"].astype(bf16)
            out["Wkv"] = jnp.concatenate(
                [p["Wk"], p["Wv"]], axis=1).astype(bf16)
        return out

    return dict(
        self_attn=prep_mha(params["self_attn"], True),
        enc_attn=prep_mha(params["enc_attn"], False),
        ffn=dict(W1=params["ffn"]["W1"].astype(bf16),
                 W2=params["ffn"]["W2"].astype(bf16),
                 ln_g=params["ffn"]["ln_g"],
                 ln_b=params["ffn"]["ln_b"]),
    )


# ----------------------------------------------------------------------------
if __name__ == "__main__":
    B, S_dec, S_enc = 2, 8, 8

    root = jax.random.PRNGKey(0)
    k_params, k_dec, k_enc = jax.random.split(root, 3)

    params = prepare_params(init_params(k_params))
    dec_inputs = jax.random.normal(k_dec, (B, S_dec, d_model), jnp.float32)
    enc_outputs = jax.random.normal(k_enc, (B, S_enc, d_model), jnp.float32)

    # causal mask for self-attention (True = masked), no masking for enc-dec
    causal = jnp.triu(jnp.ones((S_dec, S_dec), jnp.bool_), k=1)
    dec_self_attn_mask = jnp.broadcast_to(causal, (B, S_dec, S_dec))
    dec_enc_attn_mask = jnp.zeros((B, S_dec, S_enc), jnp.bool_)

    run = jax.jit(decoder_layer)
    dec_out, self_attn, enc_attn = run(
        dec_inputs, enc_outputs, dec_self_attn_mask, dec_enc_attn_mask, params)
    jax.block_until_ready((dec_out, self_attn, enc_attn))

    assert dec_out.shape == (B, S_dec, d_model)
    assert self_attn.shape == (B, n_heads, S_dec, S_dec)
    assert enc_attn.shape == (B, n_heads, S_dec, S_enc)
    assert bool(jnp.isfinite(dec_out).all())
    assert bool(jnp.isfinite(self_attn).all())
    assert bool(jnp.isfinite(enc_attn).all())

    print("KERNEL_OK")
</pallas_src>

<mosaic_0001>
module attributes {stable_mosaic.version = 11 : i64} {
  func.func @_matmul_kernel(%arg0: i32, %arg1: memref<16x512xf32, #tpu.memory_space<vmem>>, %arg2: memref<512x1536xbf16, #tpu.memory_space<vmem>>, %arg3: memref<16x1536xf32, #tpu.memory_space<vmem>>) attributes {dimension_semantics = [#tpu.dimension_semantics<parallel>], iteration_bounds = array<i64: 1>, scalar_prefetch = 0 : i64, scratch_operands = 0 : i64, tpu.core_type = #tpu.core_type<tc>, window_params = [{transform_indices = @transform_0, window_bounds = array<i64: 16, 512>}, {pipeline_mode = #tpu.pipeline_mode<synchronous>, transform_indices = @transform_1, window_bounds = array<i64: 512, 1536>}, {transform_indices = @transform_2, window_bounds = array<i64: 16, 1536>}]} {
    %c0 = arith.constant 0 : index
    %c0_0 = arith.constant 0 : index
    %0 = vector.load %arg1[%c0, %c0_0] : memref<16x512xf32, #tpu.memory_space<vmem>>, vector<16x512xf32>
    %1 = arith.truncf %0 : vector<16x512xf32> to vector<16x512xbf16>
    %c0_1 = arith.constant 0 : index
    %c0_2 = arith.constant 0 : index
    %2 = vector.load %arg2[%c0_1, %c0_2] : memref<512x1536xbf16, #tpu.memory_space<vmem>>, vector<512x1536xbf16>
    %cst = arith.constant dense<0.000000e+00> : vector<16x1536xf32>
    %3 = tpu.matmul %1, %2, %cst {dimension_numbers = #tpu.dot_dimension_numbers<[1], [0], [0], [1], [0, 0, 1, 1], [], []>} : vector<16x512xbf16>, vector<512x1536xbf16>, vector<16x1536xf32> -> vector<16x1536xf32>
    %c0_3 = arith.constant 0 : index
    %c0_4 = arith.constant 0 : index
    %4 = vector.load %arg3[%c0_3, %c0_4] : memref<16x1536xf32, #tpu.memory_space<vmem>>, vector<16x1536xf32>
    tpu.vector_store %arg3[%c0_3, %c0_4], %3 {strides = array<i32>} : memref<16x1536xf32, #tpu.memory_space<vmem>>, vector<16x1536xf32>,
    return
  }
  func.func @transform_0(%arg0: i32) -> (i32, i32) {
    %c0_i32 = arith.constant 0 : i32
    %c0_i32_0 = arith.constant 0 : i32
    return %arg0, %c0_i32 : i32, i32
  }
  func.func @transform_1(%arg0: i32) -> (i32, i32) {
    %c0_i32 = arith.constant 0 : i32
    %c0_i32_0 = arith.constant 0 : i32
    %c0_i32_1 = arith.constant 0 : i32
    return %c0_i32, %c0_i32_0 : i32, i32
  }
  func.func @transform_2(%arg0: i32) -> (i32, i32) {
    %c0_i32 = arith.constant 0 : i32
    %c0_i32_0 = arith.constant 0 : i32
    return %arg0, %c0_i32 : i32, i32
  }
}

module attributes {stable_mosaic.version = 11 : i64} {
  func.func @_matmul_kernel(%arg0: i32, %arg1: memref<16x512xf32, #tpu.memory_space<vmem>>, %arg2: memref<512x512xbf16, #tpu.memory_space<vmem>>, %arg3: memref<16x512xf32, #tpu.memory_space<vmem>>) attributes {dimension_semantics = [#tpu.dimension_semantics<parallel>], iteration_bounds = array<i64: 1>, scalar_prefetch = 0 : i64, scratch_operands = 0 : i64, tpu.core_type = #tpu.core_type<tc>, window_params = [{transform_indices = @transform_0, window_bounds = array<i64: 16, 512>}, {pipeline_mode = #tpu.pipeline_mode<synchronous>, transform_indices = @transform_1, window_bounds = array<i64: 512, 512>}, {transform_indices = @transform_2, window_bounds = array<i64: 16, 512>}]} {
    %c0 = arith.constant 0 : index
    %c0_0 = arith.constant 0 : index
    %0 = vector.load %arg1[%c0, %c0_0] : memref<16x512xf32, #tpu.memory_space<vmem>>, vector<16x512xf32>
    %1 = arith.truncf %0 : vector<16x512xf32> to vector<16x512xbf16>
    %c0_1 = arith.constant 0 : index
    %c0_2 = arith.constant 0 : index
    %2 = vector.load %arg2[%c0_1, %c0_2] : memref<512x512xbf16, #tpu.memory_space<vmem>>, vector<512x512xbf16>
    %cst = arith.constant dense<0.000000e+00> : vector<16x512xf32>
    %3 = tpu.matmul %1, %2, %cst {dimension_numbers = #tpu.dot_dimension_numbers<[1], [0], [0], [1], [0, 0, 1, 1], [], []>} : vector<16x512xbf16>, vector<512x512xbf16>, vector<16x512xf32> -> vector<16x512xf32>
    %c0_3 = arith.constant 0 : index
    %c0_4 = arith.constant 0 : index
    %4 = vector.load %arg3[%c0_3, %c0_4] : memref<16x512xf32, #tpu.memory_space<vmem>>, vector<16x512xf32>
    tpu.vector_store %arg3[%c0_3, %c0_4], %3 {strides = array<i32>} : memref<16x512xf32, #tpu.memory_space<vmem>>, vector<16x512xf32>,
    return
  }
  func.func @transform_0(%arg0: i32) -> (i32, i32) {
    %c0_i32 = arith.constant 0 : i32
    %c0_i32_0 = arith.constant 0 : i32
    return %arg0, %c0_i32 : i32, i32
  }
  func.func @transform_1(%arg0: i32) -> (i32, i32) {
    %c0_i32 = arith.constant 0 : i32
    %c0_i32_0 = arith.constant 0 : i32
    %c0_i32_1 = arith.constant 0 : i32
    return %c0_i32, %c0_i32_0 : i32, i32
  }
  func.func @transform_2(%arg0: i32) -> (i32, i32) {
    %c0_i32 = arith.constant 0 : i32
    %c0_i32_0 = arith.constant 0 : i32
    return %arg0, %c0_i32 : i32, i32
  }
}

module attributes {stable_mosaic.version = 11 : i64} {
  func.func @_matmul_kernel(%arg0: i32, %arg1: memref<16x512xf32, #tpu.memory_space<vmem>>, %arg2: memref<512x1024xbf16, #tpu.memory_space<vmem>>, %arg3: memref<16x1024xf32, #tpu.memory_space<vmem>>) attributes {dimension_semantics = [#tpu.dimension_semantics<parallel>], iteration_bounds = array<i64: 1>, scalar_prefetch = 0 : i64, scratch_operands = 0 : i64, tpu.core_type = #tpu.core_type<tc>, window_params = [{transform_indices = @transform_0, window_bounds = array<i64: 16, 512>}, {pipeline_mode = #tpu.pipeline_mode<synchronous>, transform_indices = @transform_1, window_bounds = array<i64: 512, 1024>}, {transform_indices = @transform_2, window_bounds = array<i64: 16, 1024>}]} {
    %c0 = arith.constant 0 : index
    %c0_0 = arith.constant 0 : index
    %0 = vector.load %arg1[%c0, %c0_0] : memref<16x512xf32, #tpu.memory_space<vmem>>, vector<16x512xf32>
    %1 = arith.truncf %0 : vector<16x512xf32> to vector<16x512xbf16>
    %c0_1 = arith.constant 0 : index
    %c0_2 = arith.constant 0 : index
    %2 = vector.load %arg2[%c0_1, %c0_2] : memref<512x1024xbf16, #tpu.memory_space<vmem>>, vector<512x1024xbf16>
    %cst = arith.constant dense<0.000000e+00> : vector<16x1024xf32>
    %3 = tpu.matmul %1, %2, %cst {dimension_numbers = #tpu.dot_dimension_numbers<[1], [0], [0], [1], [0, 0, 1, 1], [], []>} : vector<16x512xbf16>, vector<512x1024xbf16>, vector<16x1024xf32> -> vector<16x1024xf32>
    %c0_3 = arith.constant 0 : index
    %c0_4 = arith.constant 0 : index
    %4 = vector.load %arg3[%c0_3, %c0_4] : memref<16x1024xf32, #tpu.memory_space<vmem>>, vector<16x1024xf32>
    tpu.vector_store %arg3[%c0_3, %c0_4], %3 {strides = array<i32>} : memref<16x1024xf32, #tpu.memory_space<vmem>>, vector<16x1024xf32>,
    return
  }
  func.func @transform_0(%arg0: i32) -> (i32, i32) {
    %c0_i32 = arith.constant 0 : i32
    %c0_i32_0 = arith.constant 0 : i32
    return %arg0, %c0_i32 : i32, i32
  }
  func.func @transform_1(%arg0: i32) -> (i32, i32) {
    %c0_i32 = arith.constant 0 : i32
    %c0_i32_0 = arith.constant 0 : i32
    %c0_i32_1 = arith.constant 0 : i32
    return %c0_i32, %c0_i32_0 : i32, i32
  }
  func.func @transform_2(%arg0: i32) -> (i32, i32) {
    %c0_i32 = arith.constant 0 : i32
    %c0_i32_0 = arith.constant 0 : i32
    return %arg0, %c0_i32 : i32, i32
  }
}

module attributes {stable_mosaic.version = 11 : i64} {
  func.func @_mha_attn_out_kernel(%arg0: i32, %arg1: memref<1x8x8x64xf32, #tpu.memory_space<vmem>>, %arg2: memref<1x8x8x64xf32, #tpu.memory_space<vmem>>, %arg3: memref<1x8x8x64xf32, #tpu.memory_space<vmem>>, %arg4: memref<1x8x8xi32, #tpu.memory_space<vmem>>, %arg5: memref<1x8x512xf32, #tpu.memory_space<vmem>>, %arg6: memref<512x512xbf16, #tpu.memory_space<vmem>>, %arg7: memref<1x512xf32, #tpu.memory_space<vmem>>, %arg8: memref<1x512xf32, #tpu.memory_space<vmem>>, %arg9: memref<1x8x512xf32, #tpu.memory_space<vmem>>, %arg10: memref<1x8x8x8xf32, #tpu.memory_space<vmem>>) attributes {dimension_semantics = [#tpu.dimension_semantics<parallel>], iteration_bounds = array<i64: 2>, scalar_prefetch = 0 : i64, scratch_operands = 0 : i64, tpu.core_type = #tpu.core_type<tc>, window_params = [{transform_indices = @transform_0, window_bounds = array<i64: 1, 8, 8, 64>}, {transform_indices = @transform_1, window_bounds = array<i64: 1, 8, 8, 64>}, {transform_indices = @transform_2, window_bounds = array<i64: 1, 8, 8, 64>}, {transform_indices = @transform_3, window_bounds = array<i64: 1, 8, 8>}, {transform_indices = @transform_4, window_bounds = array<i64: 1, 8, 512>}, {pipeline_mode = #tpu.pipeline_mode<synchronous>, transform_indices = @transform_5, window_bounds = array<i64: 512, 512>}, {pipeline_mode = #tpu.pipeline_mode<synchronous>, transform_indices = @transform_6, window_bounds = array<i64: 1, 512>}, {pipeline_mode = #tpu.pipeline_mode<synchronous>, transform_indices = @transform_7, window_bounds = array<i64: 1, 512>}, {transform_indices = @transform_8, window_bounds = array<i64: 1, 8, 512>}, {transform_indices = @transform_9, window_bounds = array<i64: 1, 8, 8, 8>}]} {
    %c0 = arith.constant 0 : index
    %c0_0 = arith.constant 0 : index
    %c0_1 = arith.constant 0 : index
    %c0_2 = arith.constant 0 : index
    %0 = vector.load %arg1[%c0, %c0_0, %c0_1, %c0_2] : memref<1x8x8x64xf32, #tpu.memory_space<vmem>>, vector<1x8x8x64xf32>
    %1 = vector.shape_cast %0 : vector<1x8x8x64xf32> to vector<8x8x64xf32>
    %2 = arith.truncf %1 : vector<8x8x64xf32> to vector<8x8x64xbf16>
    %c0_3 = arith.constant 0 : index
    %c0_4 = arith.constant 0 : index
    %c0_5 = arith.constant 0 : index
    %c0_6 = arith.constant 0 : index
    %3 = vector.load %arg2[%c0_3, %c0_4, %c0_5, %c0_6] : memref<1x8x8x64xf32, #tpu.memory_space<vmem>>, vector<1x8x8x64xf32>
    %4 = vector.shape_cast %3 : vector<1x8x8x64xf32> to vector<8x8x64xf32>
    %5 = arith.truncf %4 : vector<8x8x64xf32> to vector<8x8x64xbf16>
    %c0_7 = arith.constant 0 : index
    %c0_8 = arith.constant 0 : index
    %c0_9 = arith.constant 0 : index
    %c0_10 = arith.constant 0 : index
    %6 = vector.load %arg3[%c0_7, %c0_8, %c0_9, %c0_10] : memref<1x8x8x64xf32, #tpu.memory_space<vmem>>, vector<1x8x8x64xf32>
    %7 = vector.shape_cast %6 : vector<1x8x8x64xf32> to vector<8x8x64xf32>
    %8 = arith.truncf %7 : vector<8x8x64xf32> to vector<8x8x64xbf16>
    %c0_11 = arith.constant 0 : index
    %c0_12 = arith.constant 0 : index
    %c0_13 = arith.constant 0 : index
    %9 = vector.load %arg4[%c0_11, %c0_12, %c0_13] : memref<1x8x8xi32, #tpu.memory_space<vmem>>, vector<1x8x8xi32>
    %10 = vector.shape_cast %9 : vector<1x8x8xi32> to vector<8x8xi32>
    "tpu.trace_start"() <{level = 10 : i32, message = "hqd,hkd->hqk"}> : () -> ()
    %cst = arith.constant dense<0.000000e+00> : vector<8x8x8xf32>
    %11 = tpu.matmul %2, %5, %cst {dimension_numbers = #tpu.dot_dimension_numbers<[2], [2], [1], [1], [0, 0, 0, 1, 1, 1], [0], [0]>} : vector<8x8x64xbf16>, vector<8x8x64xbf16>, vector<8x8x8xf32> -> vector<8x8x8xf32>
    "tpu.trace_stop"() : () -> ()
    %cst_14 = arith.constant 1.250000e-01 : f32
    %12 = vector.broadcast %cst_14 : f32 to vector<8x8x8xf32>
    %13 = arith.mulf %11, %12 : vector<8x8x8xf32>
    %14 = vector.shape_cast %10 : vector<8x8xi32> to vector<1x8x8xi32>
    %c0_i32 = arith.constant 0 : i32
    %15 = vector.broadcast %c0_i32 : i32 to vector<1x8x8xi32>
    %16 = arith.cmpi ne, %14, %15 : vector<1x8x8xi32>
    %17 = vector.shape_cast %16 : vector<1x8x8xi1> to vector<1x8x8xi1>
    %18 = vector.broadcast %17 : vector<1x8x8xi1> to vector<8x8x8xi1>
    %cst_15 = arith.constant -1.000000e+09 : f32
    %19 = vector.broadcast %cst_15 : f32 to vector<8x8x8xf32>
    %20 = arith.select %18, %19, %13 : vector<8x8x8xi1>, vector<8x8x8xf32>
    %cst_16 = arith.constant dense<0xFF800000> : vector<8x8xf32>
    %21 = vector.multi_reduction <maximumf>, %20, %cst_16 [2] : vector<8x8x8xf32> to vector<8x8xf32>
    %22 = vector.shape_cast %21 : vector<8x8xf32> to vector<8x8x1xf32>
    %23 = vector.broadcast %22 : vector<8x8x1xf32> to vector<8x8x8xf32>
    %24 = arith.subf %20, %23 : vector<8x8x8xf32>
    %25 = math.exp %24 : vector<8x8x8xf32>
    %cst_17 = arith.constant dense<0.000000e+00> : vector<8x8xf32>
    %26 = vector.multi_reduction <add>, %25, %cst_17 [2] : vector<8x8x8xf32> to vector<8x8xf32>
    %27 = vector.shape_cast %26 : vector<8x8xf32> to vector<8x8x1xf32>
    %28 = tpu.reciprocal %27 {approx = true} : vector<8x8x1xf32> -> vector<8x8x1xf32>
    %29 = vector.broadcast %28 : vector<8x8x1xf32> to vector<8x8x8xf32>
    %30 = arith.mulf %25, %29 : vector<8x8x8xf32>
    %c0_18 = arith.constant 0 : index
    %c0_19 = arith.constant 0 : index
    %c0_20 = arith.constant 0 : index
    %c0_21 = arith.constant 0 : index
    %31 = vector.load %arg10[%c0_18, %c0_19, %c0_20, %c0_21] : memref<1x8x8x8xf32, #tpu.memory_space<vmem>>, vector<1x8x8x8xf32>
    %32 = vector.shape_cast %31 : vector<1x8x8x8xf32> to vector<8x8x8xf32>
    %33 = vector.shape_cast %30 : vector<8x8x8xf32> to vector<1x8x8x8xf32>
    tpu.vector_store %arg10[%c0_18, %c0_19, %c0_20, %c0_21], %33 {strides = array<i32>} : memref<1x8x8x8xf32, #tpu.memory_space<vmem>>, vector<1x8x8x8xf32>,
    %34 = arith.truncf %30 : vector<8x8x8xf32> to vector<8x8x8xbf16>
    "tpu.trace_start"() <{level = 10 : i32, message = "hqk,hkd->hqd"}> : () -> ()
    %cst_22 = arith.constant dense<0.000000e+00> : vector<8x8x64xf32>
    %35 = tpu.matmul %34, %8, %cst_22 {dimension_numbers = #tpu.dot_dimension_numbers<[2], [1], [1], [2], [0, 0, 0, 1, 1, 2], [0], [0]>} : vector<8x8x8xbf16>, vector<8x8x64xbf16>, vector<8x8x64xf32> -> vector<8x8x64xf32>
    "tpu.trace_stop"() : () -> ()
    %36 = vector.extract_strided_slice %35 {offsets = [0, 0, 0], sizes = [1, 8, 64], strides = [1, 1, 1]} : vector<8x8x64xf32> to vector<1x8x64xf32>
    %37 = vector.shape_cast %36 : vector<1x8x64xf32> to vector<8x64xf32>
    %38 = vector.extract_strided_slice %35 {offsets = [1, 0, 0], sizes = [1, 8, 64], strides = [1, 1, 1]} : vector<8x8x64xf32> to vector<1x8x64xf32>
    %39 = vector.shape_cast %38 : vector<1x8x64xf32> to vector<8x64xf32>
    %40 = vector.extract_strided_slice %35 {offsets = [2, 0, 0], sizes = [1, 8, 64], strides = [1, 1, 1]} : vector<8x8x64xf32> to vector<1x8x64xf32>
    %41 = vector.shape_cast %40 : vector<1x8x64xf32> to vector<8x64xf32>
    %42 = vector.extract_strided_slice %35 {offsets = [3, 0, 0], sizes = [1, 8, 64], strides = [1, 1, 1]} : vector<8x8x64xf32> to vector<1x8x64xf32>
    %43 = vector.shape_cast %42 : vector<1x8x64xf32> to vector<8x64xf32>
    %44 = vector.extract_strided_slice %35 {offsets = [4, 0, 0], sizes = [1, 8, 64], strides = [1, 1, 1]} : vector<8x8x64xf32> to vector<1x8x64xf32>
    %45 = vector.shape_cast %44 : vector<1x8x64xf32> to vector<8x64xf32>
    %46 = vector.extract_strided_slice %35 {offsets = [5, 0, 0], sizes = [1, 8, 64], strides = [1, 1, 1]} : vector<8x8x64xf32> to vector<1x8x64xf32>
    %47 = vector.shape_cast %46 : vector<1x8x64xf32> to vector<8x64xf32>
    %48 = vector.extract_strided_slice %35 {offsets = [6, 0, 0], sizes = [1, 8, 64], strides = [1, 1, 1]} : vector<8x8x64xf32> to vector<1x8x64xf32>
    %49 = vector.shape_cast %48 : vector<1x8x64xf32> to vector<8x64xf32>
    %50 = vector.extract_strided_slice %35 {offsets = [7, 0, 0], sizes = [1, 8, 64], strides = [1, 1, 1]} : vector<8x8x64xf32> to vector<1x8x64xf32>
    %51 = vector.shape_cast %50 : vector<1x8x64xf32> to vector<8x64xf32>
    %52 = tpu.concatenate %37, %39, %41, %43, %45, %47, %49, %51 in 1 : vector<8x64xf32>, vector<8x64xf32>, vector<8x64xf32>, vector<8x64xf32>, vector<8x64xf32>, vector<8x64xf32>, vector<8x64xf32>, vector<8x64xf32> -> vector<8x512xf32>
    %53 = arith.truncf %52 : vector<8x512xf32> to vector<8x512xbf16>
    %c0_23 = arith.constant 0 : index
    %c0_24 = arith.constant 0 : index
    %54 = vector.load %arg6[%c0_23, %c0_24] : memref<512x512xbf16, #tpu.memory_space<vmem>>, vector<512x512xbf16>
    %cst_25 = arith.constant dense<0.000000e+00> : vector<8x512xf32>
    %55 = tpu.matmul %53, %54, %cst_25 {dimension_numbers = #tpu.dot_dimension_numbers<[1], [0], [0], [1], [0, 0, 1, 1], [], []>} : vector<8x512xbf16>, vector<512x512xbf16>, vector<8x512xf32> -> vector<8x512xf32>
    %c0_26 = arith.constant 0 : index
    %c0_27 = arith.constant 0 : index
    %c0_28 = arith.constant 0 : index
    %56 = vector.load %arg5[%c0_26, %c0_27, %c0_28] : memref<1x8x512xf32, #tpu.memory_space<vmem>>, vector<1x8x512xf32>
    %57 = vector.shape_cast %56 : vector<1x8x512xf32> to vector<8x512xf32>
    %58 = arith.addf %55, %57 : vector<8x512xf32>
    %c0_29 = arith.constant 0 : index
    %c0_30 = arith.constant 0 : index
    %59 = vector.load %arg7[%c0_29, %c0_30] : memref<1x512xf32, #tpu.memory_space<vmem>>, vector<1x512xf32>
    %c0_31 = arith.constant 0 : index
    %c0_32 = arith.constant 0 : index
    %60 = vector.load %arg8[%c0_31, %c0_32] : memref<1x512xf32, #tpu.memory_space<vmem>>, vector<1x512xf32>
    %cst_33 = arith.constant dense<0.000000e+00> : vector<8xf32>
    %61 = vector.multi_reduction <add>, %58, %cst_33 [1] : vector<8x512xf32> to vector<8xf32>
    %62 = vector.shape_cast %61 : vector<8xf32> to vector<8x1xf32>
    %cst_34 = arith.constant 5.120000e+02 : f32
    %63 = vector.broadcast %cst_34 : f32 to vector<8x1xf32>
    %64 = arith.divf %62, %63 : vector<8x1xf32>
    %65 = vector.broadcast %64 : vector<8x1xf32> to vector<8x512xf32>
    %66 = arith.subf %58, %65 : vector<8x512xf32>
    %67 = arith.mulf %66, %66 : vector<8x512xf32>
    %cst_35 = arith.constant dense<0.000000e+00> : vector<8xf32>
    %68 = vector.multi_reduction <add>, %67, %cst_35 [1] : vector<8x512xf32> to vector<8xf32>
    %69 = vector.shape_cast %68 : vector<8xf32> to vector<8x1xf32>
    %cst_36 = arith.constant 5.120000e+02 : f32
    %70 = vector.broadcast %cst_36 : f32 to vector<8x1xf32>
    %71 = arith.divf %69, %70 : vector<8x1xf32>
    %72 = vector.broadcast %64 : vector<8x1xf32> to vector<8x512xf32>
    %73 = arith.subf %58, %72 : vector<8x512xf32>
    %cst_37 = arith.constant 9.99999974E-6 : f32
    %74 = vector.broadcast %cst_37 : f32 to vector<8x1xf32>
    %75 = arith.addf %71, %74 : vector<8x1xf32>
    %76 = math.rsqrt %75 : vector<8x1xf32>
    %77 = vector.broadcast %76 : vector<8x1xf32> to vector<8x512xf32>
    %78 = arith.mulf %73, %77 : vector<8x512xf32>
    %79 = vector.broadcast %59 : vector<1x512xf32> to vector<8x512xf32>
    %80 = arith.mulf %78, %79 : vector<8x512xf32>
    %81 = vector.broadcast %60 : vector<1x512xf32> to vector<8x512xf32>
    %82 = arith.addf %80, %81 : vector<8x512xf32>
    %c0_38 = arith.constant 0 : index
    %c0_39 = arith.constant 0 : index
    %c0_40 = arith.constant 0 : index
    %83 = vector.load %arg9[%c0_38, %c0_39, %c0_40] : memref<1x8x512xf32, #tpu.memory_space<vmem>>, vector<1x8x512xf32>
    %84 = vector.shape_cast %83 : vector<1x8x512xf32> to vector<8x512xf32>
    %85 = vector.shape_cast %82 : vector<8x512xf32> to vector<1x8x512xf32>
    tpu.vector_store %arg9[%c0_38, %c0_39, %c0_40], %85 {strides = array<i32>} : memref<1x8x512xf32, #tpu.memory_space<vmem>>, vector<1x8x512xf32>,
    return
  }
  func.func @transform_0(%arg0: i32) -> (i32, i32, i32, i32) {
    %c0_i32 = arith.constant 0 : i32
    %c0_i32_0 = arith.constant 0 : i32
    %c0_i32_1 = arith.constant 0 : i32
    %c0_i32_2 = arith.constant 0 : i32
    return %arg0, %c0_i32, %c0_i32_0, %c0_i32_1 : i32, i32, i32, i32
  }
  func.func @transform_1(%arg0: i32) -> (i32, i32, i32, i32) {
    %c0_i32 = arith.constant 0 : i32
    %c0_i32_0 = arith.constant 0 : i32
    %c0_i32_1 = arith.constant 0 : i32
    %c0_i32_2 = arith.constant 0 : i32
    return %arg0, %c0_i32, %c0_i32_0, %c0_i32_1 : i32, i32, i32, i32
  }
  func.func @transform_2(%arg0: i32) -> (i32, i32, i32, i32) {
    %c0_i32 = arith.constant 0 : i32
    %c0_i32_0 = arith.constant 0 : i32
    %c0_i32_1 = arith.constant 0 : i32
    %c0_i32_2 = arith.constant 0 : i32
    return %arg0, %c0_i32, %c0_i32_0, %c0_i32_1 : i32, i32, i32, i32
  }
  func.func @transform_3(%arg0: i32) -> (i32, i32, i32) {
    %c0_i32 = arith.constant 0 : i32
    %c0_i32_0 = arith.constant 0 : i32
    %c0_i32_1 = arith.constant 0 : i32
    return %arg0, %c0_i32, %c0_i32_0 : i32, i32, i32
  }
  func.func @transform_4(%arg0: i32) -> (i32, i32, i32) {
    %c0_i32 = arith.constant 0 : i32
    %c0_i32_0 = arith.constant 0 : i32
    %c0_i32_1 = arith.constant 0 : i32
    return %arg0, %c0_i32, %c0_i32_0 : i32, i32, i32
  }
  func.func @transform_5(%arg0: i32) -> (i32, i32) {
    %c0_i32 = arith.constant 0 : i32
    %c0_i32_0 = arith.constant 0 : i32
    %c0_i32_1 = arith.constant 0 : i32
    return %c0_i32, %c0_i32_0 : i32, i32
  }
  func.func @transform_6(%arg0: i32) -> (i32, i32) {
    %c0_i32 = arith.constant 0 : i32
    %c0_i32_0 = arith.constant 0 : i32
    %c0_i32_1 = arith.constant 0 : i32
    return %c0_i32, %c0_i32_0 : i32, i32
  }
  func.func @transform_7(%arg0: i32) -> (i32, i32) {
    %c0_i32 = arith.constant 0 : i32
    %c0_i32_0 = arith.constant 0 : i32
    %c0_i32_1 = arith.constant 0 : i32
    return %c0_i32, %c0_i32_0 : i32, i32
  }
  func.func @transform_8(%arg0: i32) -> (i32, i32, i32) {
    %c0_i32 = arith.constant 0 : i32
    %c0_i32_0 = arith.constant 0 : i32
    %c0_i32_1 = arith.constant 0 : i32
    return %arg0, %c0_i32, %c0_i32_0 : i32, i32, i32
  }
  func.func @transform_9(%arg0: i32) -> (i32, i32, i32, i32) {
    %c0_i32 = arith.constant 0 : i32
    %c0_i32_0 = arith.constant 0 : i32
    %c0_i32_1 = arith.constant 0 : i32
    %c0_i32_2 = arith.constant 0 : i32
    return %arg0, %c0_i32, %c0_i32_0, %c0_i32_1 : i32, i32, i32, i32
  }
}

module attributes {stable_mosaic.version = 11 : i64} {
  func.func @_mha_attn_out_kernel(%arg0: i32, %arg1: memref<1x8x8x64xf32, #tpu.memory_space<vmem>>, %arg2: memref<1x8x8x64xf32, #tpu.memory_space<vmem>>, %arg3: memref<1x8x8x64xf32, #tpu.memory_space<vmem>>, %arg4: memref<1x8x8xi32, #tpu.memory_space<vmem>>, %arg5: memref<1x8x512xf32, #tpu.memory_space<vmem>>, %arg6: memref<512x512xbf16, #tpu.memory_space<vmem>>, %arg7: memref<1x512xf32, #tpu.memory_space<vmem>>, %arg8: memref<1x512xf32, #tpu.memory_space<vmem>>, %arg9: memref<1x8x512xf32, #tpu.memory_space<vmem>>, %arg10: memref<1x8x8x8xf32, #tpu.memory_space<vmem>>) attributes {dimension_semantics = [#tpu.dimension_semantics<parallel>], iteration_bounds = array<i64: 2>, scalar_prefetch = 0 : i64, scratch_operands = 0 : i64, tpu.core_type = #tpu.core_type<tc>, window_params = [{transform_indices = @transform_0, window_bounds = array<i64: 1, 8, 8, 64>}, {transform_indices = @transform_1, window_bounds = array<i64: 1, 8, 8, 64>}, {transform_indices = @transform_2, window_bounds = array<i64: 1, 8, 8, 64>}, {transform_indices = @transform_3, window_bounds = array<i64: 1, 8, 8>}, {transform_indices = @transform_4, window_bounds = array<i64: 1, 8, 512>}, {pipeline_mode = #tpu.pipeline_mode<synchronous>, transform_indices = @transform_5, window_bounds = array<i64: 512, 512>}, {pipeline_mode = #tpu.pipeline_mode<synchronous>, transform_indices = @transform_6, window_bounds = array<i64: 1, 512>}, {pipeline_mode = #tpu.pipeline_mode<synchronous>, transform_indices = @transform_7, window_bounds = array<i64: 1, 512>}, {transform_indices = @transform_8, window_bounds = array<i64: 1, 8, 512>}, {transform_indices = @transform_9, window_bounds = array<i64: 1, 8, 8, 8>}]} {
    %c0 = arith.constant 0 : index
    %c0_0 = arith.constant 0 : index
    %c0_1 = arith.constant 0 : index
    %c0_2 = arith.constant 0 : index
    %0 = vector.load %arg1[%c0, %c0_0, %c0_1, %c0_2] : memref<1x8x8x64xf32, #tpu.memory_space<vmem>>, vector<1x8x8x64xf32>
    %1 = vector.shape_cast %0 : vector<1x8x8x64xf32> to vector<8x8x64xf32>
    %2 = arith.truncf %1 : vector<8x8x64xf32> to vector<8x8x64xbf16>
    %c0_3 = arith.constant 0 : index
    %c0_4 = arith.constant 0 : index
    %c0_5 = arith.constant 0 : index
    %c0_6 = arith.constant 0 : index
    %3 = vector.load %arg2[%c0_3, %c0_4, %c0_5, %c0_6] : memref<1x8x8x64xf32, #tpu.memory_space<vmem>>, vector<1x8x8x64xf32>
    %4 = vector.shape_cast %3 : vector<1x8x8x64xf32> to vector<8x8x64xf32>
    %5 = arith.truncf %4 : vector<8x8x64xf32> to vector<8x8x64xbf16>
    %c0_7 = arith.constant 0 : index
    %c0_8 = arith.constant 0 : index
    %c0_9 = arith.constant 0 : index
    %c0_10 = arith.constant 0 : index
    %6 = vector.load %arg3[%c0_7, %c0_8, %c0_9, %c0_10] : memref<1x8x8x64xf32, #tpu.memory_space<vmem>>, vector<1x8x8x64xf32>
    %7 = vector.shape_cast %6 : vector<1x8x8x64xf32> to vector<8x8x64xf32>
    %8 = arith.truncf %7 : vector<8x8x64xf32> to vector<8x8x64xbf16>
    %c0_11 = arith.constant 0 : index
    %c0_12 = arith.constant 0 : index
    %c0_13 = arith.constant 0 : index
    %9 = vector.load %arg4[%c0_11, %c0_12, %c0_13] : memref<1x8x8xi32, #tpu.memory_space<vmem>>, vector<1x8x8xi32>
    %10 = vector.shape_cast %9 : vector<1x8x8xi32> to vector<8x8xi32>
    "tpu.trace_start"() <{level = 10 : i32, message = "hqd,hkd->hqk"}> : () -> ()
    %cst = arith.constant dense<0.000000e+00> : vector<8x8x8xf32>
    %11 = tpu.matmul %2, %5, %cst {dimension_numbers = #tpu.dot_dimension_numbers<[2], [2], [1], [1], [0, 0, 0, 1, 1, 1], [0], [0]>} : vector<8x8x64xbf16>, vector<8x8x64xbf16>, vector<8x8x8xf32> -> vector<8x8x8xf32>
    "tpu.trace_stop"() : () -> ()
    %cst_14 = arith.constant 1.250000e-01 : f32
    %12 = vector.broadcast %cst_14 : f32 to vector<8x8x8xf32>
    %13 = arith.mulf %11, %12 : vector<8x8x8xf32>
    %14 = vector.shape_cast %10 : vector<8x8xi32> to vector<1x8x8xi32>
    %c0_i32 = arith.constant 0 : i32
    %15 = vector.broadcast %c0_i32 : i32 to vector<1x8x8xi32>
    %16 = arith.cmpi ne, %14, %15 : vector<1x8x8xi32>
    %17 = vector.shape_cast %16 : vector<1x8x8xi1> to vector<1x8x8xi1>
    %18 = vector.broadcast %17 : vector<1x8x8xi1> to vector<8x8x8xi1>
    %cst_15 = arith.constant -1.000000e+09 : f32
    %19 = vector.broadcast %cst_15 : f32 to vector<8x8x8xf32>
    %20 = arith.select %18, %19, %13 : vector<8x8x8xi1>, vector<8x8x8xf32>
    %cst_16 = arith.constant dense<0xFF800000> : vector<8x8xf32>
    %21 = vector.multi_reduction <maximumf>, %20, %cst_16 [2] : vector<8x8x8xf32> to vector<8x8xf32>
    %22 = vector.shape_cast %21 : vector<8x8xf32> to vector<8x8x1xf32>
    %23 = vector.broadcast %22 : vector<8x8x1xf32> to vector<8x8x8xf32>
    %24 = arith.subf %20, %23 : vector<8x8x8xf32>
    %25 = math.exp %24 : vector<8x8x8xf32>
    %cst_17 = arith.constant dense<0.000000e+00> : vector<8x8xf32>
    %26 = vector.multi_reduction <add>, %25, %cst_17 [2] : vector<8x8x8xf32> to vector<8x8xf32>
    %27 = vector.shape_cast %26 : vector<8x8xf32> to vector<8x8x1xf32>
    %28 = tpu.reciprocal %27 {approx = true} : vector<8x8x1xf32> -> vector<8x8x1xf32>
    %29 = vector.broadcast %28 : vector<8x8x1xf32> to vector<8x8x8xf32>
    %30 = arith.mulf %25, %29 : vector<8x8x8xf32>
    %c0_18 = arith.constant 0 : index
    %c0_19 = arith.constant 0 : index
    %c0_20 = arith.constant 0 : index
    %c0_21 = arith.constant 0 : index
    %31 = vector.load %arg10[%c0_18, %c0_19, %c0_20, %c0_21] : memref<1x8x8x8xf32, #tpu.memory_space<vmem>>, vector<1x8x8x8xf32>
    %32 = vector.shape_cast %31 : vector<1x8x8x8xf32> to vector<8x8x8xf32>
    %33 = vector.shape_cast %30 : vector<8x8x8xf32> to vector<1x8x8x8xf32>
    tpu.vector_store %arg10[%c0_18, %c0_19, %c0_20, %c0_21], %33 {strides = array<i32>} : memref<1x8x8x8xf32, #tpu.memory_space<vmem>>, vector<1x8x8x8xf32>,
    %34 = arith.truncf %30 : vector<8x8x8xf32> to vector<8x8x8xbf16>
    "tpu.trace_start"() <{level = 10 : i32, message = "hqk,hkd->hqd"}> : () -> ()
    %cst_22 = arith.constant dense<0.000000e+00> : vector<8x8x64xf32>
    %35 = tpu.matmul %34, %8, %cst_22 {dimension_numbers = #tpu.dot_dimension_numbers<[2], [1], [1], [2], [0, 0, 0, 1, 1, 2], [0], [0]>} : vector<8x8x8xbf16>, vector<8x8x64xbf16>, vector<8x8x64xf32> -> vector<8x8x64xf32>
    "tpu.trace_stop"() : () -> ()
    %36 = vector.extract_strided_slice %35 {offsets = [0, 0, 0], sizes = [1, 8, 64], strides = [1, 1, 1]} : vector<8x8x64xf32> to vector<1x8x64xf32>
    %37 = vector.shape_cast %36 : vector<1x8x64xf32> to vector<8x64xf32>
    %38 = vector.extract_strided_slice %35 {offsets = [1, 0, 0], sizes = [1, 8, 64], strides = [1, 1, 1]} : vector<8x8x64xf32> to vector<1x8x64xf32>
    %39 = vector.shape_cast %38 : vector<1x8x64xf32> to vector<8x64xf32>
    %40 = vector.extract_strided_slice %35 {offsets = [2, 0, 0], sizes = [1, 8, 64], strides = [1, 1, 1]} : vector<8x8x64xf32> to vector<1x8x64xf32>
    %41 = vector.shape_cast %40 : vector<1x8x64xf32> to vector<8x64xf32>
    %42 = vector.extract_strided_slice %35 {offsets = [3, 0, 0], sizes = [1, 8, 64], strides = [1, 1, 1]} : vector<8x8x64xf32> to vector<1x8x64xf32>
    %43 = vector.shape_cast %42 : vector<1x8x64xf32> to vector<8x64xf32>
    %44 = vector.extract_strided_slice %35 {offsets = [4, 0, 0], sizes = [1, 8, 64], strides = [1, 1, 1]} : vector<8x8x64xf32> to vector<1x8x64xf32>
    %45 = vector.shape_cast %44 : vector<1x8x64xf32> to vector<8x64xf32>
    %46 = vector.extract_strided_slice %35 {offsets = [5, 0, 0], sizes = [1, 8, 64], strides = [1, 1, 1]} : vector<8x8x64xf32> to vector<1x8x64xf32>
    %47 = vector.shape_cast %46 : vector<1x8x64xf32> to vector<8x64xf32>
    %48 = vector.extract_strided_slice %35 {offsets = [6, 0, 0], sizes = [1, 8, 64], strides = [1, 1, 1]} : vector<8x8x64xf32> to vector<1x8x64xf32>
    %49 = vector.shape_cast %48 : vector<1x8x64xf32> to vector<8x64xf32>
    %50 = vector.extract_strided_slice %35 {offsets = [7, 0, 0], sizes = [1, 8, 64], strides = [1, 1, 1]} : vector<8x8x64xf32> to vector<1x8x64xf32>
    %51 = vector.shape_cast %50 : vector<1x8x64xf32> to vector<8x64xf32>
    %52 = tpu.concatenate %37, %39, %41, %43, %45, %47, %49, %51 in 1 : vector<8x64xf32>, vector<8x64xf32>, vector<8x64xf32>, vector<8x64xf32>, vector<8x64xf32>, vector<8x64xf32>, vector<8x64xf32>, vector<8x64xf32> -> vector<8x512xf32>
    %53 = arith.truncf %52 : vector<8x512xf32> to vector<8x512xbf16>
    %c0_23 = arith.constant 0 : index
    %c0_24 = arith.constant 0 : index
    %54 = vector.load %arg6[%c0_23, %c0_24] : memref<512x512xbf16, #tpu.memory_space<vmem>>, vector<512x512xbf16>
    %cst_25 = arith.constant dense<0.000000e+00> : vector<8x512xf32>
    %55 = tpu.matmul %53, %54, %cst_25 {dimension_numbers = #tpu.dot_dimension_numbers<[1], [0], [0], [1], [0, 0, 1, 1], [], []>} : vector<8x512xbf16>, vector<512x512xbf16>, vector<8x512xf32> -> vector<8x512xf32>
    %c0_26 = arith.constant 0 : index
    %c0_27 = arith.constant 0 : index
    %c0_28 = arith.constant 0 : index
    %56 = vector.load %arg5[%c0_26, %c0_27, %c0_28] : memref<1x8x512xf32, #tpu.memory_space<vmem>>, vector<1x8x512xf32>
    %57 = vector.shape_cast %56 : vector<1x8x512xf32> to vector<8x512xf32>
    %58 = arith.addf %55, %57 : vector<8x512xf32>
    %c0_29 = arith.constant 0 : index
    %c0_30 = arith.constant 0 : index
    %59 = vector.load %arg7[%c0_29, %c0_30] : memref<1x512xf32, #tpu.memory_space<vmem>>, vector<1x512xf32>
    %c0_31 = arith.constant 0 : index
    %c0_32 = arith.constant 0 : index
    %60 = vector.load %arg8[%c0_31, %c0_32] : memref<1x512xf32, #tpu.memory_space<vmem>>, vector<1x512xf32>
    %cst_33 = arith.constant dense<0.000000e+00> : vector<8xf32>
    %61 = vector.multi_reduction <add>, %58, %cst_33 [1] : vector<8x512xf32> to vector<8xf32>
    %62 = vector.shape_cast %61 : vector<8xf32> to vector<8x1xf32>
    %cst_34 = arith.constant 5.120000e+02 : f32
    %63 = vector.broadcast %cst_34 : f32 to vector<8x1xf32>
    %64 = arith.divf %62, %63 : vector<8x1xf32>
    %65 = vector.broadcast %64 : vector<8x1xf32> to vector<8x512xf32>
    %66 = arith.subf %58, %65 : vector<8x512xf32>
    %67 = arith.mulf %66, %66 : vector<8x512xf32>
    %cst_35 = arith.constant dense<0.000000e+00> : vector<8xf32>
    %68 = vector.multi_reduction <add>, %67, %cst_35 [1] : vector<8x512xf32> to vector<8xf32>
    %69 = vector.shape_cast %68 : vector<8xf32> to vector<8x1xf32>
    %cst_36 = arith.constant 5.120000e+02 : f32
    %70 = vector.broadcast %cst_36 : f32 to vector<8x1xf32>
    %71 = arith.divf %69, %70 : vector<8x1xf32>
    %72 = vector.broadcast %64 : vector<8x1xf32> to vector<8x512xf32>
    %73 = arith.subf %58, %72 : vector<8x512xf32>
    %cst_37 = arith.constant 9.99999974E-6 : f32
    %74 = vector.broadcast %cst_37 : f32 to vector<8x1xf32>
    %75 = arith.addf %71, %74 : vector<8x1xf32>
    %76 = math.rsqrt %75 : vector<8x1xf32>
    %77 = vector.broadcast %76 : vector<8x1xf32> to vector<8x512xf32>
    %78 = arith.mulf %73, %77 : vector<8x512xf32>
    %79 = vector.broadcast %59 : vector<1x512xf32> to vector<8x512xf32>
    %80 = arith.mulf %78, %79 : vector<8x512xf32>
    %81 = vector.broadcast %60 : vector<1x512xf32> to vector<8x512xf32>
    %82 = arith.addf %80, %81 : vector<8x512xf32>
    %c0_38 = arith.constant 0 : index
    %c0_39 = arith.constant 0 : index
    %c0_40 = arith.constant 0 : index
    %83 = vector.load %arg9[%c0_38, %c0_39, %c0_40] : memref<1x8x512xf32, #tpu.memory_space<vmem>>, vector<1x8x512xf32>
    %84 = vector.shape_cast %83 : vector<1x8x512xf32> to vector<8x512xf32>
    %85 = vector.shape_cast %82 : vector<8x512xf32> to vector<1x8x512xf32>
    tpu.vector_store %arg9[%c0_38, %c0_39, %c0_40], %85 {strides = array<i32>} : memref<1x8x512xf32, #tpu.memory_space<vmem>>, vector<1x8x512xf32>,
    return
  }
  func.func @transform_0(%arg0: i32) -> (i32, i32, i32, i32) {
    %c0_i32 = arith.constant 0 : i32
    %c0_i32_0 = arith.constant 0 : i32
    %c0_i32_1 = arith.constant 0 : i32
    %c0_i32_2 = arith.constant 0 : i32
    return %arg0, %c0_i32, %c0_i32_0, %c0_i32_1 : i32, i32, i32, i32
  }
  func.func @transform_1(%arg0: i32) -> (i32, i32, i32, i32) {
    %c0_i32 = arith.constant 0 : i32
    %c0_i32_0 = arith.constant 0 : i32
    %c0_i32_1 = arith.constant 0 : i32
    %c0_i32_2 = arith.constant 0 : i32
    return %arg0, %c0_i32, %c0_i32_0, %c0_i32_1 : i32, i32, i32, i32
  }
  func.func @transform_2(%arg0: i32) -> (i32, i32, i32, i32) {
    %c0_i32 = arith.constant 0 : i32
    %c0_i32_0 = arith.constant 0 : i32
    %c0_i32_1 = arith.constant 0 : i32
    %c0_i32_2 = arith.constant 0 : i32
    return %arg0, %c0_i32, %c0_i32_0, %c0_i32_1 : i32, i32, i32, i32
  }
  func.func @transform_3(%arg0: i32) -> (i32, i32, i32) {
    %c0_i32 = arith.constant 0 : i32
    %c0_i32_0 = arith.constant 0 : i32
    %c0_i32_1 = arith.constant 0 : i32
    return %arg0, %c0_i32, %c0_i32_0 : i32, i32, i32
  }
  func.func @transform_4(%arg0: i32) -> (i32, i32, i32) {
    %c0_i32 = arith.constant 0 : i32
    %c0_i32_0 = arith.constant 0 : i32
    %c0_i32_1 = arith.constant 0 : i32
    return %arg0, %c0_i32, %c0_i32_0 : i32, i32, i32
  }
  func.func @transform_5(%arg0: i32) -> (i32, i32) {
    %c0_i32 = arith.constant 0 : i32
    %c0_i32_0 = arith.constant 0 : i32
    %c0_i32_1 = arith.constant 0 : i32
    return %c0_i32, %c0_i32_0 : i32, i32
  }
  func.func @transform_6(%arg0: i32) -> (i32, i32) {
    %c0_i32 = arith.constant 0 : i32
    %c0_i32_0 = arith.constant 0 : i32
    %c0_i32_1 = arith.constant 0 : i32
    return %c0_i32, %c0_i32_0 : i32, i32
  }
  func.func @transform_7(%arg0: i32) -> (i32, i32) {
    %c0_i32 = arith.constant 0 : i32
    %c0_i32_0 = arith.constant 0 : i32
    %c0_i32_1 = arith.constant 0 : i32
    return %c0_i32, %c0_i32_0 : i32, i32
  }
  func.func @transform_8(%arg0: i32) -> (i32, i32, i32) {
    %c0_i32 = arith.constant 0 : i32
    %c0_i32_0 = arith.constant 0 : i32
    %c0_i32_1 = arith.constant 0 : i32
    return %arg0, %c0_i32, %c0_i32_0 : i32, i32, i32
  }
  func.func @transform_9(%arg0: i32) -> (i32, i32, i32, i32) {
    %c0_i32 = arith.constant 0 : i32
    %c0_i32_0 = arith.constant 0 : i32
    %c0_i32_1 = arith.constant 0 : i32
    %c0_i32_2 = arith.constant 0 : i32
    return %arg0, %c0_i32, %c0_i32_0, %c0_i32_1 : i32, i32, i32, i32
  }
}

module attributes {stable_mosaic.version = 11 : i64} {
  func.func @_ffn_kernel(%arg0: i32, %arg1: memref<16x512xf32, #tpu.memory_space<vmem>>, %arg2: memref<512x2048xbf16, #tpu.memory_space<vmem>>, %arg3: memref<2048x512xbf16, #tpu.memory_space<vmem>>, %arg4: memref<1x512xf32, #tpu.memory_space<vmem>>, %arg5: memref<1x512xf32, #tpu.memory_space<vmem>>, %arg6: memref<16x512xf32, #tpu.memory_space<vmem>>) attributes {dimension_semantics = [#tpu.dimension_semantics<parallel>], iteration_bounds = array<i64: 1>, scalar_prefetch = 0 : i64, scratch_operands = 0 : i64, tpu.core_type = #tpu.core_type<tc>, window_params = [{transform_indices = @transform_0, window_bounds = array<i64: 16, 512>}, {pipeline_mode = #tpu.pipeline_mode<synchronous>, transform_indices = @transform_1, window_bounds = array<i64: 512, 2048>}, {pipeline_mode = #tpu.pipeline_mode<synchronous>, transform_indices = @transform_2, window_bounds = array<i64: 2048, 512>}, {pipeline_mode = #tpu.pipeline_mode<synchronous>, transform_indices = @transform_3, window_bounds = array<i64: 1, 512>}, {pipeline_mode = #tpu.pipeline_mode<synchronous>, transform_indices = @transform_4, window_bounds = array<i64: 1, 512>}, {transform_indices = @transform_5, window_bounds = array<i64: 16, 512>}]} {
    %c0 = arith.constant 0 : index
    %c0_0 = arith.constant 0 : index
    %0 = vector.load %arg1[%c0, %c0_0] : memref<16x512xf32, #tpu.memory_space<vmem>>, vector<16x512xf32>
    %1 = arith.truncf %0 : vector<16x512xf32> to vector<16x512xbf16>
    %c0_1 = arith.constant 0 : index
    %c0_2 = arith.constant 0 : index
    %2 = vector.load %arg2[%c0_1, %c0_2] : memref<512x2048xbf16, #tpu.memory_space<vmem>>, vector<512x2048xbf16>
    %cst = arith.constant dense<0.000000e+00> : vector<16x2048xf32>
    %3 = tpu.matmul %1, %2, %cst {dimension_numbers = #tpu.dot_dimension_numbers<[1], [0], [0], [1], [0, 0, 1, 1], [], []>} : vector<16x512xbf16>, vector<512x2048xbf16>, vector<16x2048xf32> -> vector<16x2048xf32>
    %cst_3 = arith.constant 0.000000e+00 : f32
    %4 = vector.broadcast %cst_3 : f32 to vector<16x2048xf32>
    %5 = arith.maximumf %3, %4 : vector<16x2048xf32>
    %6 = arith.truncf %5 : vector<16x2048xf32> to vector<16x2048xbf16>
    %c0_4 = arith.constant 0 : index
    %c0_5 = arith.constant 0 : index
    %7 = vector.load %arg3[%c0_4, %c0_5] : memref<2048x512xbf16, #tpu.memory_space<vmem>>, vector<2048x512xbf16>
    %cst_6 = arith.constant dense<0.000000e+00> : vector<16x512xf32>
    %8 = tpu.matmul %6, %7, %cst_6 {dimension_numbers = #tpu.dot_dimension_numbers<[1], [0], [0], [1], [0, 0, 1, 1], [], []>} : vector<16x2048xbf16>, vector<2048x512xbf16>, vector<16x512xf32> -> vector<16x512xf32>
    %9 = arith.addf %8, %0 : vector<16x512xf32>
    %c0_7 = arith.constant 0 : index
    %c0_8 = arith.constant 0 : index
    %10 = vector.load %arg4[%c0_7, %c0_8] : memref<1x512xf32, #tpu.memory_space<vmem>>, vector<1x512xf32>
    %c0_9 = arith.constant 0 : index
    %c0_10 = arith.constant 0 : index
    %11 = vector.load %arg5[%c0_9, %c0_10] : memref<1x512xf32, #tpu.memory_space<vmem>>, vector<1x512xf32>
    %cst_11 = arith.constant dense<0.000000e+00> : vector<16xf32>
    %12 = vector.multi_reduction <add>, %9, %cst_11 [1] : vector<16x512xf32> to vector<16xf32>
    %13 = vector.shape_cast %12 : vector<16xf32> to vector<16x1xf32>
    %cst_12 = arith.constant 5.120000e+02 : f32
    %14 = vector.broadcast %cst_12 : f32 to vector<16x1xf32>
    %15 = arith.divf %13, %14 : vector<16x1xf32>
    %16 = vector.broadcast %15 : vector<16x1xf32> to vector<16x512xf32>
    %17 = arith.subf %9, %16 : vector<16x512xf32>
    %18 = arith.mulf %17, %17 : vector<16x512xf32>
    %cst_13 = arith.constant dense<0.000000e+00> : vector<16xf32>
    %19 = vector.multi_reduction <add>, %18, %cst_13 [1] : vector<16x512xf32> to vector<16xf32>
    %20 = vector.shape_cast %19 : vector<16xf32> to vector<16x1xf32>
    %cst_14 = arith.constant 5.120000e+02 : f32
    %21 = vector.broadcast %cst_14 : f32 to vector<16x1xf32>
    %22 = arith.divf %20, %21 : vector<16x1xf32>
    %23 = vector.broadcast %15 : vector<16x1xf32> to vector<16x512xf32>
    %24 = arith.subf %9, %23 : vector<16x512xf32>
    %cst_15 = arith.constant 9.99999974E-6 : f32
    %25 = vector.broadcast %cst_15 : f32 to vector<16x1xf32>
    %26 = arith.addf %22, %25 : vector<16x1xf32>
    %27 = math.rsqrt %26 : vector<16x1xf32>
    %28 = vector.broadcast %27 : vector<16x1xf32> to vector<16x512xf32>
    %29 = arith.mulf %24, %28 : vector<16x512xf32>
    %30 = vector.broadcast %10 : vector<1x512xf32> to vector<16x512xf32>
    %31 = arith.mulf %29, %30 : vector<16x512xf32>
    %32 = vector.broadcast %11 : vector<1x512xf32> to vector<16x512xf32>
    %33 = arith.addf %31, %32 : vector<16x512xf32>
    %c0_16 = arith.constant 0 : index
    %c0_17 = arith.constant 0 : index
    %34 = vector.load %arg6[%c0_16, %c0_17] : memref<16x512xf32, #tpu.memory_space<vmem>>, vector<16x512xf32>
    tpu.vector_store %arg6[%c0_16, %c0_17], %33 {strides = array<i32>} : memref<16x512xf32, #tpu.memory_space<vmem>>, vector<16x512xf32>,
    return
  }
  func.func @transform_0(%arg0: i32) -> (i32, i32) {
    %c0_i32 = arith.constant 0 : i32
    %c0_i32_0 = arith.constant 0 : i32
    return %arg0, %c0_i32 : i32, i32
  }
  func.func @transform_1(%arg0: i32) -> (i32, i32) {
    %c0_i32 = arith.constant 0 : i32
    %c0_i32_0 = arith.constant 0 : i32
    %c0_i32_1 = arith.constant 0 : i32
    return %c0_i32, %c0_i32_0 : i32, i32
  }
  func.func @transform_2(%arg0: i32) -> (i32, i32) {
    %c0_i32 = arith.constant 0 : i32
    %c0_i32_0 = arith.constant 0 : i32
    %c0_i32_1 = arith.constant 0 : i32
    return %c0_i32, %c0_i32_0 : i32, i32
  }
  func.func @transform_3(%arg0: i32) -> (i32, i32) {
    %c0_i32 = arith.constant 0 : i32
    %c0_i32_0 = arith.constant 0 : i32
    %c0_i32_1 = arith.constant 0 : i32
    return %c0_i32, %c0_i32_0 : i32, i32
  }
  func.func @transform_4(%arg0: i32) -> (i32, i32) {
    %c0_i32 = arith.constant 0 : i32
    %c0_i32_0 = arith.constant 0 : i32
    %c0_i32_1 = arith.constant 0 : i32
    return %c0_i32, %c0_i32_0 : i32, i32
  }
  func.func @transform_5(%arg0: i32) -> (i32, i32) {
    %c0_i32 = arith.constant 0 : i32
    %c0_i32_0 = arith.constant 0 : i32
    return %arg0, %c0_i32 : i32, i32
  }
}

</mosaic_0001>

<bundles_post_ra>
// kernel: decoder_layer.8
= control target key start
LH: loop header
LB: loop body
LE: loop exit
PB: predicated region body
PF: predicated region fallthrough
CT: control target
= control target key end

     0   :  { %s1750_s1 = inlined_call_operand.vmem [shape: bf16[512,512], index: 1, kind: input, shape index: {}]   ;;  %s1751_s0 = inlined_call_operand.vmem [shape: f32[16,512], index: 0, kind: input, shape index: {}]   ;;  %s1752_s2 = inlined_call_operand.vmem [shape: f32[16,512], index: 2, kind: output, shape index: {}]  }
   0x1   :  { %v1111_v0 = vld [vmem:[%s1750_s1 + $0x4] ss:$16 sps:$4 sm:$0xff]   ;;  %v1113_v1 = vld [vmem:[%s1750_s1 + $0xc] ss:$16 sps:$4 sm:$0xff]   ;;  %v1115_v2 = vld [vmem:[%s1750_s1] ss:$16 sps:$4 sm:$0xff]  }
   0x2   :  { %791 = vmatprep.subr.bf16.mxu0 %v1111_v0  ;;  %v1116_v3 = vld [vmem:[%s1750_s1 + $0x8] ss:$16 sps:$4 sm:$0xff]   ;;  %877 = vmatprep.subr.bf16.mxu1 %v1113_v1  ;;  %v1117_v4 = vld [vmem:[%s1750_s1 + $0x24] ss:$16 sps:$4 sm:$0xff]   ;;  %v1119_v5 = vld [vmem:[%s1750_s1 + $0x2c] ss:$16 sps:$4 sm:$0xff]  }
   0x3   :  { %792 = vmatpush1.bf16.msra.mxu0 %v1115_v2  ;;  %878 = vmatpush1.bf16.msra.mxu1 %v1116_v3  ;;  %v1121_v6 = vld [vmem:[%s1750_s1 + $0x20] ss:$16 sps:$4 sm:$0xff]   ;;  %v1122_v7 = vld [vmem:[%s1750_s1 + $0x28] ss:$16 sps:$4 sm:$0xff]   ;;  %v1123_v8 = vld [vmem:[%s1750_s1 + $0x44] ss:$16 sps:$4 sm:$0xff]  }
   0x4   :  { %793 = vmatprep.subr.bf16.mxu0 %v1117_v4  ;;  %879 = vmatprep.subr.bf16.mxu1 %v1119_v5  ;;  %v1125_v9 = vld [vmem:[%s1750_s1 + $0x4c] ss:$16 sps:$4 sm:$0xff]   ;;  %v1127_v10 = vld [vmem:[%s1750_s1 + $0x40] ss:$16 sps:$4 sm:$0xff]   ;;  %v1128_v11 = vld [vmem:[%s1750_s1 + $0x48] ss:$16 sps:$4 sm:$0xff]  }
   0x5   :  { %v1129_v12 = vld [vmem:[%s1750_s1 + $0x64] ss:$16 sps:$4 sm:$0xff]   ;;  %v1131_v13 = vld [vmem:[%s1750_s1 + $0x6c] ss:$16 sps:$4 sm:$0xff]   ;;  %v1133_v14 = vld [vmem:[%s1750_s1 + $0x60] ss:$16 sps:$4 sm:$0xff]  }
   0x6   :  { %v1134_v15 = vld [vmem:[%s1750_s1 + $0x68] ss:$16 sps:$4 sm:$0xff]   ;;  %v1135_v16 = vld [vmem:[%s1750_s1 + $0x84] ss:$16 sps:$4 sm:$0xff]   ;;  %v1137_v17 = vld [vmem:[%s1750_s1 + $0x8c] ss:$16 sps:$4 sm:$0xff]  }
   0x7   :  { %794 = vmatpush1.bf16.msra.mxu0 %v1121_v6  ;;  %880 = vmatpush1.bf16.msra.mxu1 %v1122_v7  ;;  %v1139_v18 = vld [vmem:[%s1750_s1 + $0x80] ss:$16 sps:$4 sm:$0xff]   ;;  %v1140_v19 = vld [vmem:[%s1750_s1 + $0x88] ss:$16 sps:$4 sm:$0xff]   ;;  %v1141_v20 = vld [vmem:[%s1750_s1 + $0xa4] ss:$16 sps:$4 sm:$0xff]  }
   0x8   :  { %795 = vmatprep.subr.bf16.mxu0 %v1123_v8  ;;  %881 = vmatprep.subr.bf16.mxu1 %v1125_v9  ;;  %v1143_v21 = vld [vmem:[%s1750_s1 + $0xac] ss:$16 sps:$4 sm:$0xff]   ;;  %v1145_v22 = vld [vmem:[%s1750_s1 + $0xa0] ss:$16 sps:$4 sm:$0xff]   ;;  %v1146_v23 = vld [vmem:[%s1750_s1 + $0xa8] ss:$16 sps:$4 sm:$0xff]  }
   0x9   :  { %v1147_v24 = vld [vmem:[%s1750_s1 + $0xc4] ss:$16 sps:$4 sm:$0xff]   ;;  %v1149_v25 = vld [vmem:[%s1750_s1 + $0xcc] ss:$16 sps:$4 sm:$0xff]   ;;  %v1151_v26 = vld [vmem:[%s1750_s1 + $0xc0] ss:$16 sps:$4 sm:$0xff]  }
   0xa   :  { %v1152_v27 = vld [vmem:[%s1750_s1 + $0xc8] ss:$16 sps:$4 sm:$0xff]   ;;  %v1153_v28 = vld [vmem:[%s1750_s1 + $0xe4] ss:$16 sps:$4 sm:$0xff]   ;;  %v1155_v29 = vld [vmem:[%s1750_s1 + $0xec] ss:$16 sps:$4 sm:$0xff]  }
   0xb   :  { %796 = vmatpush1.bf16.msra.mxu0 %v1127_v10  ;;  %882 = vmatpush1.bf16.msra.mxu1 %v1128_v11  ;;  %v1157_v30 = vld [vmem:[%s1750_s1 + $0xe0] ss:$16 sps:$4 sm:$0xff]   ;;  %v1158_v31 = vld [vmem:[%s1750_s1 + $0xe8] ss:$16 sps:$4 sm:$0xff]   ;;  %v1159_v32 = vld [vmem:[%s1750_s1 + $0x104] ss:$16 sps:$4 sm:$0xff]  }
   0xc   :  { %797 = vmatprep.subr.bf16.mxu0 %v1129_v12  ;;  %883 = vmatprep.subr.bf16.mxu1 %v1131_v13  ;;  %v1161_v33 = vld [vmem:[%s1750_s1 + $0x10c] ss:$16 sps:$4 sm:$0xff]   ;;  %v1163_v34 = vld [vmem:[%s1750_s1 + $0x100] ss:$16 sps:$4 sm:$0xff]   ;;  %v1164_v35 = vld [vmem:[%s1750_s1 + $0x108] ss:$16 sps:$4 sm:$0xff]  }
   0xd   :  { %v1165_v36 = vld [vmem:[%s1750_s1 + $0x124] ss:$16 sps:$4 sm:$0xff]   ;;  %v1167_v37 = vld [vmem:[%s1750_s1 + $0x12c] ss:$16 sps:$4 sm:$0xff]   ;;  %v1169_v38 = vld [vmem:[%s1750_s1 + $0x120] ss:$16 sps:$4 sm:$0xff]  }
   0xe   :  { %v1170_v39 = vld [vmem:[%s1750_s1 + $0x128] ss:$16 sps:$4 sm:$0xff]   ;;  %v1171_v40 = vld [vmem:[%s1750_s1 + $0x144] ss:$16 sps:$4 sm:$0xff]   ;;  %v1173_v41 = vld [vmem:[%s1750_s1 + $0x14c] ss:$16 sps:$4 sm:$0xff]  }
   0xf   :  { %798 = vmatpush1.bf16.msra.mxu0 %v1133_v14  ;;  %884 = vmatpush1.bf16.msra.mxu1 %v1134_v15  ;;  %v1175_v42 = vld [vmem:[%s1750_s1 + $0x140] ss:$16 sps:$4 sm:$0xff]   ;;  %v1176_v43 = vld [vmem:[%s1750_s1 + $0x148] ss:$16 sps:$4 sm:$0xff]   ;;  %v1177_v44 = vld [vmem:[%s1750_s1 + $0x164] ss:$16 sps:$4 sm:$0xff]  }
  0x10   :  { %799 = vmatprep.subr.bf16.mxu0 %v1135_v16  ;;  %885 = vmatprep.subr.bf16.mxu1 %v1137_v17  ;;  %v1179_v45 = vld [vmem:[%s1750_s1 + $0x16c] ss:$16 sps:$4 sm:$0xff]   ;;  %v1181_v48 = vld [vmem:[%s1750_s1 + $0x160] ss:$16 sps:$4 sm:$0xff]   ;;  %v1182_v49 = vld [vmem:[%s1750_s1 + $0x168] ss:$16 sps:$4 sm:$0xff]  }
  0x11   :  { %v12_v46 = vld [vmem:[%s1751_s0 + $0x8] sm:$0xff]  ;;  %v1183_v51 = vld [vmem:[%s1750_s1 + $0x184] ss:$16 sps:$4 sm:$0xff]   ;;  %v1187_v53 = vld [vmem:[%s1750_s1 + $0x180] ss:$16 sps:$4 sm:$0xff]  }
  0x12   :  { %v16_v47 = vld [vmem:[%s1751_s0 + $0x28] sm:$0xff]  ;;  %v1189_v55 = vld [vmem:[%s1750_s1 + $0x1a4] ss:$16 sps:$4 sm:$0xff]   ;;  %v1193_v57 = vld [vmem:[%s1750_s1 + $0x1a0] ss:$16 sps:$4 sm:$0xff]  }
  0x13   :  { %800 = vmatpush1.bf16.msra.mxu0 %v1139_v18  ;;  %886 = vmatpush1.bf16.msra.mxu1 %v1140_v19  ;;  %v20_v50 = vpack.c.bf16 %v16_v47, %v12_v46  ;;  %v1185_v52 = vld [vmem:[%s1750_s1 + $0x18c] ss:$16 sps:$4 sm:$0xff]   ;;  %v1188_v54 = vld [vmem:[%s1750_s1 + $0x188] ss:$16 sps:$4 sm:$0xff]   ;;  %v1195_v59 = vld [vmem:[%s1750_s1 + $0x1c4] ss:$16 sps:$4 sm:$0xff]  }
  0x14   :  { %801 = vmatprep.subr.bf16.mxu0 %v1141_v20  ;;  %887 = vmatprep.subr.bf16.mxu1 %v1143_v21  ;;  %v1191_v56 = vld [vmem:[%s1750_s1 + $0x1ac] ss:$16 sps:$4 sm:$0xff]   ;;  %v1194_v58 = vld [vmem:[%s1750_s1 + $0x1a8] ss:$16 sps:$4 sm:$0xff]   ;;  %v1199_v61 = vld [vmem:[%s1750_s1 + $0x1c0] ss:$16 sps:$4 sm:$0xff]  }
  0x15   :  { %823 = vmatprep.mubr.bf16.mxu0 %v20_v50  ;;  %909 = vmatprep.mubr.bf16.mxu1 %v20_v50  ;;  %v1197_v60 = vld [vmem:[%s1750_s1 + $0x1cc] ss:$16 sps:$4 sm:$0xff]   ;;  %v1200_v62 = vld [vmem:[%s1750_s1 + $0x1c8] ss:$16 sps:$4 sm:$0xff]   ;;  %v1201_v63 = vld [vmem:[%s1750_s1 + $0x1e4] ss:$16 sps:$4 sm:$0xff]  }
  0x16   :  { %v1203_v0 = vld [vmem:[%s1750_s1 + $0x1ec] ss:$16 sps:$4 sm:$0xff]   ;;  %v1205_v1 = vld [vmem:[%s1750_s1 + $0x1e0] ss:$16 sps:$4 sm:$0xff]   ;;  %v1206_v2 = vld [vmem:[%s1750_s1 + $0x1e8] ss:$16 sps:$4 sm:$0xff]  }
  0x17   :  { %802 = vmatpush1.bf16.msra.mxu0 %v1145_v22  ;;  %888 = vmatpush1.bf16.msra.mxu1 %v1146_v23  ;;  %v1209_v3 = vld [vmem:[%s1750_s1 + $0x204] ss:$16 sps:$4 sm:$0xff]   ;;  %v1212_v6 = vld [vmem:[%s1750_s1 + $0x20c] ss:$16 sps:$4 sm:$0xff]   ;;  %v1207_v7 = vld [vmem:[%s1750_s1 + $0x200] ss:$16 sps:$4 sm:$0xff]  }
  0x18   :  { %803 = vmatprep.subr.bf16.mxu0 %v1147_v24  ;;  %889 = vmatprep.subr.bf16.mxu1 %v1149_v25  ;;  %v11_v4 = vld [vmem:[%s1751_s0] sm:$0xff]  ;;  %v1210_v8 = vld [vmem:[%s1750_s1 + $0x208] ss:$16 sps:$4 sm:$0xff]   ;;  %v1218_v11 = vld [vmem:[%s1750_s1 + $0x22c] ss:$16 sps:$4 sm:$0xff]  }
  0x19   :  { %v15_v5 = vld [vmem:[%s1751_s0 + $0x20] sm:$0xff]  ;;  %v1216_v13 = vld [vmem:[%s1750_s1 + $0x228] ss:$16 sps:$4 sm:$0xff]   ;;  %v1224_v15 = vld [vmem:[%s1750_s1 + $0x24c] ss:$16 sps:$4 sm:$0xff]  }
  0x1a   :  { %v19_v9 = vpack.c.bf16 %v15_v5, %v11_v4  ;;  %v1215_v10 = vld [vmem:[%s1750_s1 + $0x224] ss:$16 sps:$4 sm:$0xff]   ;;  %v1213_v12 = vld [vmem:[%s1750_s1 + $0x220] ss:$16 sps:$4 sm:$0xff]   ;;  %v1222_v17 = vld [vmem:[%s1750_s1 + $0x248] ss:$16 sps:$4 sm:$0xff]  }
  0x1b   :  { %804 = vmatpush1.bf16.msra.mxu0 %v1151_v26  ;;  %890 = vmatpush1.bf16.msra.mxu1 %v1152_v27  ;;  %v1221_v14 = vld [vmem:[%s1750_s1 + $0x244] ss:$16 sps:$4 sm:$0xff]   ;;  %v1219_v16 = vld [vmem:[%s1750_s1 + $0x240] ss:$16 sps:$4 sm:$0xff]   ;;  %v1230_v19 = vld [vmem:[%s1750_s1 + $0x26c] ss:$16 sps:$4 sm:$0xff]  }
  0x1c   :  { %805 = vmatprep.subr.bf16.mxu0 %v1153_v28  ;;  %891 = vmatprep.subr.bf16.mxu1 %v1155_v29  ;;  %v1227_v18 = vld [vmem:[%s1750_s1 + $0x264] ss:$16 sps:$4 sm:$0xff]   ;;  %v1225_v20 = vld [vmem:[%s1750_s1 + $0x260] ss:$16 sps:$4 sm:$0xff]   ;;  %v1228_v21 = vld [vmem:[%s1750_s1 + $0x268] ss:$16 sps:$4 sm:$0xff]  }
  0x1d   :  { %v1233_v22 = vld [vmem:[%s1750_s1 + $0x284] ss:$16 sps:$4 sm:$0xff]   ;;  %v1236_v23 = vld [vmem:[%s1750_s1 + $0x28c] ss:$16 sps:$4 sm:$0xff]   ;;  %v1231_v24 = vld [vmem:[%s1750_s1 + $0x280] ss:$16 sps:$4 sm:$0xff]  }
  0x1e   :  { %v1234_v25 = vld [vmem:[%s1750_s1 + $0x288] ss:$16 sps:$4 sm:$0xff]   ;;  %v1239_v26 = vld [vmem:[%s1750_s1 + $0x2a4] ss:$16 sps:$4 sm:$0xff]   ;;  %v1242_v27 = vld [vmem:[%s1750_s1 + $0x2ac] ss:$16 sps:$4 sm:$0xff]  }
  0x1f   :  { %806 = vmatpush1.bf16.msra.mxu0 %v1157_v30  ;;  %892 = vmatpush1.bf16.msra.mxu1 %v1158_v31  ;;  %v1237_v28 = vld [vmem:[%s1750_s1 + $0x2a0] ss:$16 sps:$4 sm:$0xff]   ;;  %v1240_v29 = vld [vmem:[%s1750_s1 + $0x2a8] ss:$16 sps:$4 sm:$0xff]   ;;  %v1245_v30 = vld [vmem:[%s1750_s1 + $0x2c4] ss:$16 sps:$4 sm:$0xff]  }
  0x20   :  { %807 = vmatprep.subr.bf16.mxu0 %v1159_v32  ;;  %893 = vmatprep.subr.bf16.mxu1 %v1161_v33  ;;  %v1248_v31 = vld [vmem:[%s1750_s1 + $0x2cc] ss:$16 sps:$4 sm:$0xff]   ;;  %v1261_v47 = vld [vmem:[%s1750_s1 + $0x320] ss:$16 sps:$4 sm:$0xff]   ;;  %v1294_v4 = vld [vmem:[%s1750_s1 + $0x3c8] ss:$16 sps:$4 sm:$0xff]  }
  0x21   :  { %v14_v32 = vld [vmem:[%s1751_s0 + $0x18] sm:$0xff]  ;;  %v1299_v5 = vld [vmem:[%s1750_s1 + $0x3e4] ss:$16 sps:$4 sm:$0xff]  }
  0x22   :  { %v18_v33 = vld [vmem:[%s1751_s0 + $0x38] sm:$0xff] }
  0x23   :  { %808 = vmatpush1.bf16.msra.mxu0 %v1163_v34  ;;  %894 = vmatpush1.bf16.msra.mxu1 %v1164_v35  ;;  %v1243_v34 = vld [vmem:[%s1750_s1 + $0x2c0] ss:$16 sps:$4 sm:$0xff]   ;;  %v1246_v35 = vld [vmem:[%s1750_s1 + $0x2c8] ss:$16 sps:$4 sm:$0xff]   ;;  %v1266_v46 = vld [vmem:[%s1750_s1 + $0x32c] ss:$16 sps:$4 sm:$0xff]  }
  0x24   :  { %809 = vmatprep.subr.bf16.mxu0 %v1165_v36  ;;  %895 = vmatprep.subr.bf16.mxu1 %v1167_v37  ;;  %v22_v36 = vpack.c.bf16 %v18_v33, %v14_v32  ;;  %v1251_v37 = vld [vmem:[%s1750_s1 + $0x2e4] ss:$16 sps:$4 sm:$0xff]   ;;  %v1272_v50 = vld [vmem:[%s1750_s1 + $0x34c] ss:$16 sps:$4 sm:$0xff]  }
  0x27   :  { %810 = vmatpush1.bf16.msra.mxu0 %v1169_v38  ;;  %896 = vmatpush1.bf16.msra.mxu1 %v1170_v39  ;;  %v1254_v38 = vld [vmem:[%s1750_s1 + $0x2ec] ss:$16 sps:$4 sm:$0xff]   ;;  %v1249_v39 = vld [vmem:[%s1750_s1 + $0x2e0] ss:$16 sps:$4 sm:$0xff]  }
  0x28   :  { %811 = vmatprep.subr.bf16.mxu0 %v1171_v40  ;;  %897 = vmatprep.subr.bf16.mxu1 %v1173_v41  ;;  %v1252_v40 = vld [vmem:[%s1750_s1 + $0x2e8] ss:$16 sps:$4 sm:$0xff]   ;;  %v1257_v41 = vld [vmem:[%s1750_s1 + $0x304] ss:$16 sps:$4 sm:$0xff]  }
  0x2b   :  { %812 = vmatpush1.bf16.msra.mxu0 %v1175_v42  ;;  %898 = vmatpush1.bf16.msra.mxu1 %v1176_v43  ;;  %v1260_v42 = vld [vmem:[%s1750_s1 + $0x30c] ss:$16 sps:$4 sm:$0xff]   ;;  %v1255_v43 = vld [vmem:[%s1750_s1 + $0x300] ss:$16 sps:$4 sm:$0xff]  }
  0x2c   :  { %813 = vmatprep.subr.bf16.mxu0 %v1177_v44  ;;  %899 = vmatprep.subr.bf16.mxu1 %v1179_v45  ;;  %v1258_v44 = vld [vmem:[%s1750_s1 + $0x308] ss:$16 sps:$4 sm:$0xff]   ;;  %v1263_v45 = vld [vmem:[%s1750_s1 + $0x324] ss:$16 sps:$4 sm:$0xff]  }
  0x2f   :  { %814 = vmatpush1.bf16.msra.mxu0 %v1181_v48  ;;  %900 = vmatpush1.bf16.msra.mxu1 %v1182_v49  ;;  %v1264_v48 = vld [vmem:[%s1750_s1 + $0x328] ss:$16 sps:$4 sm:$0xff]   ;;  %v1269_v49 = vld [vmem:[%s1750_s1 + $0x344] ss:$16 sps:$4 sm:$0xff]  }
  0x30   :  { %815 = vmatprep.subr.bf16.mxu0 %v1183_v51  ;;  %901 = vmatprep.subr.bf16.mxu1 %v1185_v52  ;;  %v1267_v51 = vld [vmem:[%s1750_s1 + $0x340] ss:$16 sps:$4 sm:$0xff]   ;;  %v1270_v52 = vld [vmem:[%s1750_s1 + $0x348] ss:$16 sps:$4 sm:$0xff]  }
  0x33   :  { %816 = vmatpush1.bf16.msra.mxu0 %v1187_v53  ;;  %902 = vmatpush1.bf16.msra.mxu1 %v1188_v54  ;;  %v1275_v53 = vld [vmem:[%s1750_s1 + $0x364] ss:$16 sps:$4 sm:$0xff]   ;;  %v1278_v54 = vld [vmem:[%s1750_s1 + $0x36c] ss:$16 sps:$4 sm:$0xff]  }
  0x34   :  { %817 = vmatprep.subr.bf16.mxu0 %v1189_v55  ;;  %903 = vmatprep.subr.bf16.mxu1 %v1191_v56  ;;  %v1273_v55 = vld [vmem:[%s1750_s1 + $0x360] ss:$16 sps:$4 sm:$0xff]   ;;  %v1276_v56 = vld [vmem:[%s1750_s1 + $0x368] ss:$16 sps:$4 sm:$0xff]  }
  0x37   :  { %818 = vmatpush1.bf16.msra.mxu0 %v1193_v57  ;;  %904 = vmatpush1.bf16.msra.mxu1 %v1194_v58  ;;  %v1281_v57 = vld [vmem:[%s1750_s1 + $0x384] ss:$16 sps:$4 sm:$0xff]   ;;  %v1284_v58 = vld [vmem:[%s1750_s1 + $0x38c] ss:$16 sps:$4 sm:$0xff]  }
  0x38   :  { %819 = vmatprep.subr.bf16.mxu0 %v1195_v59  ;;  %905 = vmatprep.subr.bf16.mxu1 %v1197_v60  ;;  %v1279_v59 = vld [vmem:[%s1750_s1 + $0x380] ss:$16 sps:$4 sm:$0xff]   ;;  %v1282_v60 = vld [vmem:[%s1750_s1 + $0x388] ss:$16 sps:$4 sm:$0xff]  }
  0x3b   :  { %820 = vmatpush1.bf16.msra.mxu0 %v1199_v61  ;;  %906 = vmatpush1.bf16.msra.mxu1 %v1200_v62  ;;  %v1287_v61 = vld [vmem:[%s1750_s1 + $0x3a4] ss:$16 sps:$4 sm:$0xff]   ;;  %v1290_v62 = vld [vmem:[%s1750_s1 + $0x3ac] ss:$16 sps:$4 sm:$0xff]  }
  0x3c   :  { %821 = vmatprep.subr.bf16.mxu0 %v1201_v63  ;;  %907 = vmatprep.subr.bf16.mxu1 %v1203_v0  ;;  %v1285_v63 = vld [vmem:[%s1750_s1 + $0x3a0] ss:$16 sps:$4 sm:$0xff]   ;;  %v1288_v0 = vld [vmem:[%s1750_s1 + $0x3a8] ss:$16 sps:$4 sm:$0xff]  }
  0x3f   :  { %822 = vmatpush1.bf16.msra.mxu0 %v1205_v1  ;;  %908 = vmatpush1.bf16.msra.mxu1 %v1206_v2  ;;  %v1293_v1 = vld [vmem:[%s1750_s1 + $0x3c4] ss:$16 sps:$4 sm:$0xff]   ;;  %v1296_v2 = vld [vmem:[%s1750_s1 + $0x3cc] ss:$16 sps:$4 sm:$0xff]  }
  0x40   :  { %834 = vmatprep.subr.bf16.mxu0 %v1209_v3  ;;  %920 = vmatprep.subr.bf16.mxu1 %v1212_v6  ;;  %v1291_v3 = vld [vmem:[%s1750_s1 + $0x3c0] ss:$16 sps:$4 sm:$0xff]   ;;  %v1302_v6 = vld [vmem:[%s1750_s1 + $0x3ec] ss:$16 sps:$4 sm:$0xff]  }
  0x42   :  { %824 = vmatmul.mubr.bf16.vlgmr.msra.gmra.mrb[0].mxu0 %v19_v9  ;;  %910 = vmatmul.mubr.bf16.vlgmr.msra.gmra.mrb[0].mxu1 %v19_v9  ;;  %v13_v9 = vld [vmem:[%s1751_s0 + $0x10] sm:$0xff] }
  0x43   :  { %835 = vmatpush1.bf16.msra.mxu0 %v1207_v7  ;;  %921 = vmatpush1.bf16.msra.mxu1 %v1210_v8  ;;  %v1297_v7 = vld [vmem:[%s1750_s1 + $0x3e0] ss:$16 sps:$4 sm:$0xff]   ;;  %v1300_v8 = vld [vmem:[%s1750_s1 + $0x3e8] ss:$16 sps:$4 sm:$0xff]  }
  0x44   :  { %836 = vmatprep.subr.bf16.mxu0 %v1215_v10  ;;  %922 = vmatprep.subr.bf16.mxu1 %v1218_v11  ;;  %v17_v10 = vld [vmem:[%s1751_s0 + $0x30] sm:$0xff] }
  0x45   :  { %866 = vmatprep.mubr.bf16.mxu0 %v22_v36  ;;  %952 = vmatprep.mubr.bf16.mxu1 %v22_v36  ;;  %v21_v11 = vpack.c.bf16 %v17_v10, %v13_v9 }
  0x47   :  { %837 = vmatpush1.bf16.msra.mxu0 %v1213_v12  ;;  %923 = vmatpush1.bf16.msra.mxu1 %v1216_v13 }
  0x48   :  { %838 = vmatprep.subr.bf16.mxu0 %v1221_v14  ;;  %924 = vmatprep.subr.bf16.mxu1 %v1224_v15 }
  0x4b   :  { %839 = vmatpush1.bf16.msra.mxu0 %v1219_v16  ;;  %925 = vmatpush1.bf16.msra.mxu1 %v1222_v17 }
  0x4c   :  { %840 = vmatprep.subr.bf16.mxu0 %v1227_v18  ;;  %926 = vmatprep.subr.bf16.mxu1 %v1230_v19 }
  0x4f   :  { %841 = vmatpush1.bf16.msra.mxu0 %v1225_v20  ;;  %927 = vmatpush1.bf16.msra.mxu1 %v1228_v21 }
  0x50   :  { %842 = vmatprep.subr.bf16.mxu0 %v1233_v22  ;;  %928 = vmatprep.subr.bf16.mxu1 %v1236_v23 }
  0x53   :  { %843 = vmatpush1.bf16.msra.mxu0 %v1231_v24  ;;  %929 = vmatpush1.bf16.msra.mxu1 %v1234_v25 }
  0x54   :  { %844 = vmatprep.subr.bf16.mxu0 %v1239_v26  ;;  %930 = vmatprep.subr.bf16.mxu1 %v1242_v27 }
  0x57   :  { %845 = vmatpush1.bf16.msra.mxu0 %v1237_v28  ;;  %931 = vmatpush1.bf16.msra.mxu1 %v1240_v29 }
  0x58   :  { %846 = vmatprep.subr.bf16.mxu0 %v1245_v30  ;;  %932 = vmatprep.subr.bf16.mxu1 %v1248_v31 }
  0x5b   :  { %847 = vmatpush1.bf16.msra.mxu0 %v1243_v34  ;;  %933 = vmatpush1.bf16.msra.mxu1 %v1246_v35 }
  0x5c   :  { %848 = vmatprep.subr.bf16.mxu0 %v1251_v37  ;;  %934 = vmatprep.subr.bf16.mxu1 %v1254_v38 }
  0x5f   :  { %849 = vmatpush1.bf16.msra.mxu0 %v1249_v39  ;;  %935 = vmatpush1.bf16.msra.mxu1 %v1252_v40 }
  0x60   :  { %850 = vmatprep.subr.bf16.mxu0 %v1257_v41  ;;  %936 = vmatprep.subr.bf16.mxu1 %v1260_v42 }
  0x63   :  { %851 = vmatpush1.bf16.msra.mxu0 %v1255_v43  ;;  %937 = vmatpush1.bf16.msra.mxu1 %v1258_v44 }
  0x64   :  { %852 = vmatprep.subr.bf16.mxu0 %v1263_v45  ;;  %938 = vmatprep.subr.bf16.mxu1 %v1266_v46 }
  0x67   :  { %853 = vmatpush1.bf16.msra.mxu0 %v1261_v47  ;;  %939 = vmatpush1.bf16.msra.mxu1 %v1264_v48 }
  0x68   :  { %854 = vmatprep.subr.bf16.mxu0 %v1269_v49  ;;  %940 = vmatprep.subr.bf16.mxu1 %v1272_v50 }
  0x6b   :  { %855 = vmatpush1.bf16.msra.mxu0 %v1267_v51  ;;  %941 = vmatpush1.bf16.msra.mxu1 %v1270_v52 }
  0x6c   :  { %856 = vmatprep.subr.bf16.mxu0 %v1275_v53  ;;  %942 = vmatprep.subr.bf16.mxu1 %v1278_v54 }
  0x6f   :  { %857 = vmatpush1.bf16.msra.mxu0 %v1273_v55  ;;  %943 = vmatpush1.bf16.msra.mxu1 %v1276_v56 }
  0x70   :  { %858 = vmatprep.subr.bf16.mxu0 %v1281_v57  ;;  %944 = vmatprep.subr.bf16.mxu1 %v1284_v58 }
  0x73   :  { %859 = vmatpush1.bf16.msra.mxu0 %v1279_v59  ;;  %945 = vmatpush1.bf16.msra.mxu1 %v1282_v60 }
  0x74   :  { %860 = vmatprep.subr.bf16.mxu0 %v1287_v61  ;;  %946 = vmatprep.subr.bf16.mxu1 %v1290_v62 }
  0x77   :  { %861 = vmatpush1.bf16.msra.mxu0 %v1285_v63  ;;  %947 = vmatpush1.bf16.msra.mxu1 %v1288_v0 }
  0x78   :  { %862 = vmatprep.subr.bf16.mxu0 %v1293_v1  ;;  %948 = vmatprep.subr.bf16.mxu1 %v1296_v2 }
  0x7b   :  { %863 = vmatpush1.bf16.msra.mxu0 %v1291_v3  ;;  %949 = vmatpush1.bf16.msra.mxu1 %v1294_v4 }
  0x7c   :  { %864 = vmatprep.subr.bf16.mxu0 %v1299_v5  ;;  %950 = vmatprep.subr.bf16.mxu1 %v1302_v6 }
  0x7f   :  { %865 = vmatpush1.bf16.msra.mxu0 %v1297_v7  ;;  %951 = vmatpush1.bf16.msra.mxu1 %v1300_v8 }
  0x82   :  { %867 = vmatmul.mubr.bf16.vlgmr.msra.gmra.mrb[0].mxu0 %v21_v11  ;;  %953 = vmatmul.mubr.bf16.vlgmr.msra.gmra.mrb[0].mxu1 %v21_v11 }
 0x155   :  { %v868_v12 = vpop.f32.mrb[0].mxu0  ;;  %v954_v13 = vpop.f32.mrb[0].mxu1 }
 0x156   :  { %963 = vst [vmem:[%s1752_s2] sm:$0xff] %v868_v12  ;;  %965 = vst [vmem:[%s1752_s2 + $0x10] sm:$0xff] %v954_v13  ;;  %v870_v14 = vpop.f32.mrb[1].mxu0  ;;  %v956_v15 = vpop.f32.mrb[1].mxu1 }
 0x157   :  { %964 = vst [vmem:[%s1752_s2 + $0x8] sm:$0xff] %v870_v14  ;;  %966 = vst [vmem:[%s1752_s2 + $0x18] sm:$0xff] %v956_v15  ;;  %v872_v16 = vpop.f32.mrb[2].mxu0  ;;  %v958_v17 = vpop.f32.mrb[2].mxu1 }
 0x158   :  { %967 = vst [vmem:[%s1752_s2 + $0x20] sm:$0xff] %v872_v16  ;;  %969 = vst [vmem:[%s1752_s2 + $0x30] sm:$0xff] %v958_v17  ;;  %v874_v18 = vpop.f32.mrb[3].mxu0  ;;  %v960_v19 = vpop.f32.mrb[3].mxu1 }
 0x159   :  { %968 = vst [vmem:[%s1752_s2 + $0x28] sm:$0xff] %v874_v18  ;;  %970 = vst [vmem:[%s1752_s2 + $0x38] sm:$0xff] %v960_v19 }

// kernel: decoder_layer.9
= control target key start
LH: loop header
LB: loop body
LE: loop exit
PB: predicated region body
PF: predicated region fallthrough
CT: control target
= control target key end

     0   :  { %s3074_s1 = inlined_call_operand.vmem [shape: bf16[512,1024], index: 1, kind: input, shape index: {}]   ;;  %s3075_s0 = inlined_call_operand.vmem [shape: f32[16,512], index: 0, kind: input, shape index: {}]   ;;  %s3076_s2 = inlined_call_operand.vmem [shape: f32[16,1024], index: 2, kind: output, shape index: {}]  }
   0x1   :  { %v23_v0 = vld [vmem:[%s3074_s1] sm:$0xff]  ;;  %v24_v2 = vld [vmem:[%s3074_s1 + $0x8] sm:$0xff] }
   0x2   :  { %v27_v1 = vld [vmem:[%s3074_s1 + $0x20] sm:$0xff]  ;;  %v28_v4 = vld [vmem:[%s3074_s1 + $0x28] sm:$0xff] }
   0x3   :  { %v1924_v3 = vcombine.high %v23_v0, %v27_v1  ;;  %v1923_v5 = vcombine.low %v23_v0, %v27_v1  ;;  %v31_v6 = vld [vmem:[%s3074_s1 + $0x40] sm:$0xff]  ;;  %v1926_v8 = vcombine.high %v24_v2, %v28_v4  ;;  %v1925_v9 = vcombine.low %v24_v2, %v28_v4  ;;  %v32_v11 = vld [vmem:[%s3074_s1 + $0x48] sm:$0xff] }
   0x4   :  { %v35_v7 = vld [vmem:[%s3074_s1 + $0x60] sm:$0xff]  ;;  %v36_v12 = vld [vmem:[%s3074_s1 + $0x68] sm:$0xff] }
   0x5   :  { %v1932_v10 = vcombine.high %v31_v6, %v35_v7  ;;  %v39_v13 = vld [vmem:[%s3074_s1 + $0x80] sm:$0xff]  ;;  %1559 = vmatprep.subr.bf16.mxu0 %v1924_v3  ;;  %v1934_v14 = vcombine.high %v32_v11, %v36_v12  ;;  %v40_v16 = vld [vmem:[%s3074_s1 + $0x88] sm:$0xff]  ;;  %1645 = vmatprep.subr.bf16.mxu1 %v1926_v8  ;;  %v1931_v18 = vcombine.low %v31_v6, %v35_v7 }
   0x6   :  { %v43_v15 = vld [vmem:[%s3074_s1 + $0xa0] sm:$0xff]  ;;  %v44_v17 = vld [vmem:[%s3074_s1 + $0xa8] sm:$0xff]  ;;  %1560 = vmatpush1.bf16.msra.mxu0 %v1923_v5  ;;  %1646 = vmatpush1.bf16.msra.mxu1 %v1925_v9  ;;  %v1933_v19 = vcombine.low %v32_v11, %v36_v12 }
   0x7   :  { %1561 = vmatprep.subr.bf16.mxu0 %v1932_v10  ;;  %v1940_v20 = vcombine.high %v39_v13, %v43_v15  ;;  %1647 = vmatprep.subr.bf16.mxu1 %v1934_v14  ;;  %v1942_v21 = vcombine.high %v40_v16, %v44_v17  ;;  %v47_v22 = vld [vmem:[%s3074_s1 + $0xc0] sm:$0xff]  ;;  %v48_v24 = vld [vmem:[%s3074_s1 + $0xc8] sm:$0xff]  ;;  %v1939_v26 = vcombine.low %v39_v13, %v43_v15 }
   0x8   :  { %v51_v23 = vld [vmem:[%s3074_s1 + $0xe0] sm:$0xff]  ;;  %v52_v25 = vld [vmem:[%s3074_s1 + $0xe8] sm:$0xff]  ;;  %v1941_v27 = vcombine.low %v40_v16, %v44_v17 }
   0x9   :  { %v1948_v28 = vcombine.high %v47_v22, %v51_v23  ;;  %v1950_v29 = vcombine.high %v48_v24, %v52_v25  ;;  %v55_v30 = vld [vmem:[%s3074_s1 + $0x100] sm:$0xff]  ;;  %v56_v32 = vld [vmem:[%s3074_s1 + $0x108] sm:$0xff]  ;;  %v1947_v34 = vcombine.low %v47_v22, %v51_v23  ;;  %v1949_v35 = vcombine.low %v48_v24, %v52_v25 }
   0xa   :  { %1562 = vmatpush1.bf16.msra.mxu0 %v1931_v18  ;;  %1648 = vmatpush1.bf16.msra.mxu1 %v1933_v19  ;;  %v59_v31 = vld [vmem:[%s3074_s1 + $0x120] sm:$0xff]  ;;  %v60_v33 = vld [vmem:[%s3074_s1 + $0x128] sm:$0xff] }
   0xb   :  { %1563 = vmatprep.subr.bf16.mxu0 %v1940_v20  ;;  %1649 = vmatprep.subr.bf16.mxu1 %v1942_v21  ;;  %v1956_v36 = vcombine.high %v55_v30, %v59_v31  ;;  %v1958_v37 = vcombine.high %v56_v32, %v60_v33  ;;  %v63_v38 = vld [vmem:[%s3074_s1 + $0x140] sm:$0xff]  ;;  %v64_v40 = vld [vmem:[%s3074_s1 + $0x148] sm:$0xff]  ;;  %v1955_v42 = vcombine.low %v55_v30, %v59_v31 }
   0xc   :  { %v67_v39 = vld [vmem:[%s3074_s1 + $0x160] sm:$0xff]  ;;  %v68_v41 = vld [vmem:[%s3074_s1 + $0x168] sm:$0xff]  ;;  %v1957_v43 = vcombine.low %v56_v32, %v60_v33 }
   0xd   :  { %v1964_v44 = vcombine.high %v63_v38, %v67_v39  ;;  %v1966_v45 = vcombine.high %v64_v40, %v68_v41  ;;  %v71_v46 = vld [vmem:[%s3074_s1 + $0x180] sm:$0xff]  ;;  %v72_v48 = vld [vmem:[%s3074_s1 + $0x188] sm:$0xff]  ;;  %v1963_v50 = vcombine.low %v63_v38, %v67_v39  ;;  %v1965_v51 = vcombine.low %v64_v40, %v68_v41 }
   0xe   :  { %1564 = vmatpush1.bf16.msra.mxu0 %v1939_v26  ;;  %1650 = vmatpush1.bf16.msra.mxu1 %v1941_v27  ;;  %v75_v47 = vld [vmem:[%s3074_s1 + $0x1a0] sm:$0xff]  ;;  %v76_v49 = vld [vmem:[%s3074_s1 + $0x1a8] sm:$0xff] }
   0xf   :  { %1565 = vmatprep.subr.bf16.mxu0 %v1948_v28  ;;  %1651 = vmatprep.subr.bf16.mxu1 %v1950_v29  ;;  %v1972_v52 = vcombine.high %v71_v46, %v75_v47  ;;  %v12_v53 = vld [vmem:[%s3075_s0 + $0x8] sm:$0xff]  ;;  %v1974_v55 = vcombine.high %v72_v48, %v76_v49  ;;  %v79_v56 = vld [vmem:[%s3074_s1 + $0x1c0] sm:$0xff]  ;;  %v1971_v61 = vcombine.low %v71_v46, %v75_v47 }
  0x10   :  { %v16_v54 = vld [vmem:[%s3075_s0 + $0x28] sm:$0xff]  ;;  %v83_v57 = vld [vmem:[%s3074_s1 + $0x1e0] sm:$0xff]  ;;  %v1973_v62 = vcombine.low %v72_v48, %v76_v49 }
  0x11   :  { %v2306_v58 = vpack.c.bf16 %v16_v54, %v12_v53  ;;  %v80_v59 = vld [vmem:[%s3074_s1 + $0x1c8] sm:$0xff]  ;;  %v1980_v63 = vcombine.high %v79_v56, %v83_v57  ;;  %v87_v1 = vld [vmem:[%s3074_s1 + $0x200] sm:$0xff]  ;;  %v1979_v5 = vcombine.low %v79_v56, %v83_v57 }
  0x12   :  { %1566 = vmatpush1.bf16.msra.mxu0 %v1947_v34  ;;  %1652 = vmatpush1.bf16.msra.mxu1 %v1949_v35  ;;  %v84_v60 = vld [vmem:[%s3074_s1 + $0x1e8] sm:$0xff]  ;;  %v91_v2 = vld [vmem:[%s3074_s1 + $0x220] sm:$0xff] }
  0x13   :  { %1567 = vmatprep.subr.bf16.mxu0 %v1956_v36  ;;  %1653 = vmatprep.subr.bf16.mxu1 %v1958_v37  ;;  %v1982_v0 = vcombine.high %v80_v59, %v84_v60  ;;  %v88_v3 = vld [vmem:[%s3074_s1 + $0x208] sm:$0xff]  ;;  %v1981_v6 = vcombine.low %v80_v59, %v84_v60  ;;  %v1988_v7 = vcombine.high %v87_v1, %v91_v2  ;;  %v95_v9 = vld [vmem:[%s3074_s1 + $0x240] sm:$0xff] }
  0x14   :  { %1591 = vmatprep.mubr.bf16.mxu0 %v2306_v58  ;;  %1677 = vmatprep.mubr.bf16.mxu1 %v2306_v58  ;;  %v92_v4 = vld [vmem:[%s3074_s1 + $0x228] sm:$0xff]  ;;  %v99_v10 = vld [vmem:[%s3074_s1 + $0x260] sm:$0xff]  ;;  %v1987_v13 = vcombine.low %v87_v1, %v91_v2 }
  0x15   :  { %v1990_v8 = vcombine.high %v88_v3, %v92_v4  ;;  %v96_v11 = vld [vmem:[%s3074_s1 + $0x248] sm:$0xff]  ;;  %v1989_v14 = vcombine.low %v88_v3, %v92_v4  ;;  %v1996_v15 = vcombine.high %v95_v9, %v99_v10  ;;  %v103_v17 = vld [vmem:[%s3074_s1 + $0x280] sm:$0xff]  ;;  %v1995_v21 = vcombine.low %v95_v9, %v99_v10 }
  0x16   :  { %1568 = vmatpush1.bf16.msra.mxu0 %v1955_v42  ;;  %1654 = vmatpush1.bf16.msra.mxu1 %v1957_v43  ;;  %v100_v12 = vld [vmem:[%s3074_s1 + $0x268] sm:$0xff]  ;;  %v107_v18 = vld [vmem:[%s3074_s1 + $0x2a0] sm:$0xff] }
  0x17   :  { %1569 = vmatprep.subr.bf16.mxu0 %v1964_v44  ;;  %1655 = vmatprep.subr.bf16.mxu1 %v1966_v45  ;;  %v1998_v16 = vcombine.high %v96_v11, %v100_v12  ;;  %v104_v19 = vld [vmem:[%s3074_s1 + $0x288] sm:$0xff]  ;;  %v1997_v22 = vcombine.low %v96_v11, %v100_v12  ;;  %v2004_v23 = vcombine.high %v103_v17, %v107_v18  ;;  %v111_v25 = vld [vmem:[%s3074_s1 + $0x2c0] sm:$0xff] }
  0x18   :  { %v108_v20 = vld [vmem:[%s3074_s1 + $0x2a8] sm:$0xff]  ;;  %v115_v26 = vld [vmem:[%s3074_s1 + $0x2e0] sm:$0xff]  ;;  %v2003_v29 = vcombine.low %v103_v17, %v107_v18  ;;  %v14_v17 = vld [vmem:[%s3075_s0 + $0x18] sm:$0xff] }
  0x19   :  { %v2006_v24 = vcombine.high %v104_v19, %v108_v20  ;;  %v112_v27 = vld [vmem:[%s3074_s1 + $0x2c8] sm:$0xff]  ;;  %v2005_v30 = vcombine.low %v104_v19, %v108_v20  ;;  %v2012_v31 = vcombine.high %v111_v25, %v115_v26  ;;  %v119_v33 = vld [vmem:[%s3074_s1 + $0x300] sm:$0xff]  ;;  %v2011_v37 = vcombine.low %v111_v25, %v115_v26  ;;  %v18_v18 = vld [vmem:[%s3075_s0 + $0x38] sm:$0xff] }
  0x1a   :  { %1570 = vmatpush1.bf16.msra.mxu0 %v1963_v50  ;;  %1656 = vmatpush1.bf16.msra.mxu1 %v1965_v51  ;;  %v116_v28 = vld [vmem:[%s3074_s1 + $0x2e8] sm:$0xff]  ;;  %v123_v34 = vld [vmem:[%s3074_s1 + $0x320] sm:$0xff]  ;;  %v2456_v25 = vpack.c.bf16 %v18_v18, %v14_v17 }
  0x1b   :  { %1571 = vmatprep.subr.bf16.mxu0 %v1972_v52  ;;  %1657 = vmatprep.subr.bf16.mxu1 %v1974_v55  ;;  %v2014_v32 = vcombine.high %v112_v27, %v116_v28  ;;  %v120_v35 = vld [vmem:[%s3074_s1 + $0x308] sm:$0xff]  ;;  %v2013_v38 = vcombine.low %v112_v27, %v116_v28  ;;  %v2020_v39 = vcombine.high %v119_v33, %v123_v34  ;;  %v127_v41 = vld [vmem:[%s3074_s1 + $0x340] sm:$0xff] }
  0x1c   :  { %v124_v36 = vld [vmem:[%s3074_s1 + $0x328] sm:$0xff]  ;;  %v131_v42 = vld [vmem:[%s3074_s1 + $0x360] sm:$0xff]  ;;  %v2019_v45 = vcombine.low %v119_v33, %v123_v34 }
  0x1d   :  { %v2022_v40 = vcombine.high %v120_v35, %v124_v36  ;;  %v128_v43 = vld [vmem:[%s3074_s1 + $0x348] sm:$0xff]  ;;  %v2021_v46 = vcombine.low %v120_v35, %v124_v36  ;;  %v2028_v47 = vcombine.high %v127_v41, %v131_v42  ;;  %v135_v49 = vld [vmem:[%s3074_s1 + $0x380] sm:$0xff]  ;;  %v2027_v53 = vcombine.low %v127_v41, %v131_v42 }
  0x1e   :  { %1572 = vmatpush1.bf16.msra.mxu0 %v1971_v61  ;;  %1658 = vmatpush1.bf16.msra.mxu1 %v1973_v62  ;;  %v132_v44 = vld [vmem:[%s3074_s1 + $0x368] sm:$0xff]  ;;  %v139_v50 = vld [vmem:[%s3074_s1 + $0x3a0] sm:$0xff] }
  0x1f   :  { %1573 = vmatprep.subr.bf16.mxu0 %v1980_v63  ;;  %1659 = vmatprep.subr.bf16.mxu1 %v1982_v0  ;;  %v2030_v48 = vcombine.high %v128_v43, %v132_v44  ;;  %v136_v51 = vld [vmem:[%s3074_s1 + $0x388] sm:$0xff]  ;;  %v2029_v54 = vcombine.low %v128_v43, %v132_v44  ;;  %v2036_v55 = vcombine.high %v135_v49, %v139_v50  ;;  %v143_v57 = vld [vmem:[%s3074_s1 + $0x3c0] sm:$0xff] }
  0x20   :  { %v140_v52 = vld [vmem:[%s3074_s1 + $0x3a8] sm:$0xff]  ;;  %v147_v59 = vld [vmem:[%s3074_s1 + $0x3e0] sm:$0xff]  ;;  %v2035_v62 = vcombine.low %v135_v49, %v139_v50 }
  0x21   :  { %v2038_v56 = vcombine.high %v136_v51, %v140_v52  ;;  %v144_v60 = vld [vmem:[%s3074_s1 + $0x3c8] sm:$0xff]  ;;  %v2037_v63 = vcombine.low %v136_v51, %v140_v52  ;;  %v2044_v0 = vcombine.high %v143_v57, %v147_v59  ;;  %v151_v2 = vld [vmem:[%s3074_s1 + $0x400] sm:$0xff] }
  0x22   :  { %1574 = vmatpush1.bf16.msra.mxu0 %v1979_v5  ;;  %1660 = vmatpush1.bf16.msra.mxu1 %v1981_v6  ;;  %v148_v61 = vld [vmem:[%s3074_s1 + $0x3e8] sm:$0xff]  ;;  %v155_v3 = vld [vmem:[%s3074_s1 + $0x420] sm:$0xff]  ;;  %v2043_v6 = vcombine.low %v143_v57, %v147_v59 }
  0x23   :  { %1575 = vmatprep.subr.bf16.mxu0 %v1988_v7  ;;  %1661 = vmatprep.subr.bf16.mxu1 %v1990_v8  ;;  %v2046_v1 = vcombine.high %v144_v60, %v148_v61  ;;  %v152_v4 = vld [vmem:[%s3074_s1 + $0x408] sm:$0xff]  ;;  %v11_v7 = vld [vmem:[%s3075_s0] sm:$0xff]  ;;  %v2045_v9 = vcombine.low %v144_v60, %v148_v61  ;;  %v2052_v10 = vcombine.high %v151_v2, %v155_v3 }
  0x24   :  { %v156_v5 = vld [vmem:[%s3074_s1 + $0x428] sm:$0xff]  ;;  %v15_v8 = vld [vmem:[%s3075_s0 + $0x20] sm:$0xff]  ;;  %v2051_v19 = vcombine.low %v151_v2, %v155_v3 }
  0x25   :  { %v2054_v11 = vcombine.high %v152_v4, %v156_v5  ;;  %v159_v12 = vld [vmem:[%s3074_s1 + $0x440] sm:$0xff]  ;;  %v2053_v20 = vcombine.low %v152_v4, %v156_v5  ;;  %v168_v26 = vld [vmem:[%s3074_s1 + $0x488] sm:$0xff] }
  0x26   :  { %1576 = vmatpush1.bf16.msra.mxu0 %v1987_v13  ;;  %1662 = vmatpush1.bf16.msra.mxu1 %v1989_v14  ;;  %v163_v13 = vld [vmem:[%s3074_s1 + $0x460] sm:$0xff]  ;;  %v160_v14 = vld [vmem:[%s3074_s1 + $0x448] sm:$0xff] }
  0x27   :  { %1577 = vmatprep.subr.bf16.mxu0 %v1996_v15  ;;  %1663 = vmatprep.subr.bf16.mxu1 %v1998_v16  ;;  %v2439_v15 = vpack.c.bf16 %v15_v8, %v11_v7  ;;  %v164_v16 = vld [vmem:[%s3074_s1 + $0x468] sm:$0xff]  ;;  %v2059_v28 = vcombine.low %v159_v12, %v163_v13  ;;  %v179_v33 = vld [vmem:[%s3074_s1 + $0x4e0] sm:$0xff] }
  0x28   :  { %v172_v27 = vld [vmem:[%s3074_s1 + $0x4a8] sm:$0xff]  ;;  %v187_v41 = vld [vmem:[%s3074_s1 + $0x520] sm:$0xff] }
  0x29   :  { %v176_v34 = vld [vmem:[%s3074_s1 + $0x4c8] sm:$0xff]  ;;  %v195_v49 = vld [vmem:[%s3074_s1 + $0x560] sm:$0xff] }
  0x2a   :  { %1578 = vmatpush1.bf16.msra.mxu0 %v1995_v21  ;;  %1664 = vmatpush1.bf16.msra.mxu1 %v1997_v22  ;;  %v2060_v21 = vcombine.high %v159_v12, %v163_v13  ;;  %v2062_v22 = vcombine.high %v160_v14, %v164_v16  ;;  %v180_v35 = vld [vmem:[%s3074_s1 + $0x4e8] sm:$0xff]  ;;  %v203_v57 = vld [vmem:[%s3074_s1 + $0x5a0] sm:$0xff] }
  0x2b   :  { %1579 = vmatprep.subr.bf16.mxu0 %v2004_v23  ;;  %1665 = vmatprep.subr.bf16.mxu1 %v2006_v24  ;;  %v167_v23 = vld [vmem:[%s3074_s1 + $0x480] sm:$0xff]  ;;  %v184_v42 = vld [vmem:[%s3074_s1 + $0x508] sm:$0xff] }
  0x2c   :  { %v171_v24 = vld [vmem:[%s3074_s1 + $0x4a0] sm:$0xff]  ;;  %v188_v43 = vld [vmem:[%s3074_s1 + $0x528] sm:$0xff] }
  0x2d   :  { %v2067_v36 = vcombine.low %v167_v23, %v171_v24  ;;  %v192_v50 = vld [vmem:[%s3074_s1 + $0x548] sm:$0xff]  ;;  %v211_v2 = vld [vmem:[%s3074_s1 + $0x5e0] sm:$0xff] }
  0x2e   :  { %1580 = vmatpush1.bf16.msra.mxu0 %v2003_v29  ;;  %1666 = vmatpush1.bf16.msra.mxu1 %v2005_v30  ;;  %v2061_v29 = vcombine.low %v160_v14, %v164_v16  ;;  %v2068_v30 = vcombine.high %v167_v23, %v171_v24  ;;  %v196_v51 = vld [vmem:[%s3074_s1 + $0x568] sm:$0xff]  ;;  %v223_v18 = vld [vmem:[%s3074_s1 + $0x640] sm:$0xff] }
  0x2f   :  { %1581 = vmatprep.subr.bf16.mxu0 %v2012_v31  ;;  %1667 = vmatprep.subr.bf16.mxu1 %v2014_v32  ;;  %v2070_v31 = vcombine.high %v168_v26, %v172_v27  ;;  %v175_v32 = vld [vmem:[%s3074_s1 + $0x4c0] sm:$0xff]  ;;  %v200_v59 = vld [vmem:[%s3074_s1 + $0x588] sm:$0xff] }
  0x30   :  { %v2075_v44 = vcombine.low %v175_v32, %v179_v33  ;;  %v204_v60 = vld [vmem:[%s3074_s1 + $0x5a8] sm:$0xff] }
  0x31   :  { %v208_v3 = vld [vmem:[%s3074_s1 + $0x5c8] sm:$0xff] }
  0x32   :  { %1582 = vmatpush1.bf16.msra.mxu0 %v2011_v37  ;;  %1668 = vmatpush1.bf16.msra.mxu1 %v2013_v38  ;;  %v2069_v37 = vcombine.low %v168_v26, %v172_v27  ;;  %v2076_v38 = vcombine.high %v175_v32, %v179_v33  ;;  %v212_v4 = vld [vmem:[%s3074_s1 + $0x5e8] sm:$0xff]  ;;  %v231_v27 = vld [vmem:[%s3074_s1 + $0x680] sm:$0xff] }
  0x33   :  { %1583 = vmatprep.subr.bf16.mxu0 %v2020_v39  ;;  %1669 = vmatprep.subr.bf16.mxu1 %v2022_v40  ;;  %v2078_v39 = vcombine.high %v176_v34, %v180_v35  ;;  %v183_v40 = vld [vmem:[%s3074_s1 + $0x500] sm:$0xff]  ;;  %v2110_v8 = vcombine.high %v208_v3, %v212_v4  ;;  %v220_v12 = vld [vmem:[%s3074_s1 + $0x628] sm:$0xff]  ;;  %v2109_v14 = vcombine.low %v208_v3, %v212_v4 }
  0x34   :  { %v2083_v52 = vcombine.low %v183_v40, %v187_v41  ;;  %v271_v4 = vld [vmem:[%s3074_s1 + $0x7c0] sm:$0xff] }
  0x36   :  { %1584 = vmatpush1.bf16.msra.mxu0 %v2019_v45  ;;  %1670 = vmatpush1.bf16.msra.mxu1 %v2021_v46  ;;  %v2077_v45 = vcombine.low %v176_v34, %v180_v35  ;;  %v2084_v46 = vcombine.high %v183_v40, %v187_v41  ;;  %v239_v35 = vld [vmem:[%s3074_s1 + $0x6c0] sm:$0xff] }
  0x37   :  { %1585 = vmatprep.subr.bf16.mxu0 %v2028_v47  ;;  %1671 = vmatprep.subr.bf16.mxu1 %v2030_v48  ;;  %v2086_v47 = vcombine.high %v184_v42, %v188_v43  ;;  %v191_v48 = vld [vmem:[%s3074_s1 + $0x540] sm:$0xff] }
  0x38   :  { %v2091_v61 = vcombine.low %v191_v48, %v195_v49 }
  0x3a   :  { %1586 = vmatpush1.bf16.msra.mxu0 %v2027_v53  ;;  %1672 = vmatpush1.bf16.msra.mxu1 %v2029_v54  ;;  %v2085_v53 = vcombine.low %v184_v42, %v188_v43  ;;  %v2092_v54 = vcombine.high %v191_v48, %v195_v49  ;;  %v247_v43 = vld [vmem:[%s3074_s1 + $0x700] sm:$0xff] }
  0x3b   :  { %1587 = vmatprep.subr.bf16.mxu0 %v2036_v55  ;;  %1673 = vmatprep.subr.bf16.mxu1 %v2038_v56  ;;  %v2094_v55 = vcombine.high %v192_v50, %v196_v51  ;;  %v199_v56 = vld [vmem:[%s3074_s1 + $0x580] sm:$0xff] }
  0x3c   :  { %v2099_v5 = vcombine.low %v199_v56, %v203_v57 }
  0x3e   :  { %1588 = vmatpush1.bf16.msra.mxu0 %v2035_v62  ;;  %1674 = vmatpush1.bf16.msra.mxu1 %v2037_v63  ;;  %v2093_v62 = vcombine.low %v192_v50, %v196_v51  ;;  %v2100_v63 = vcombine.high %v199_v56, %v203_v57  ;;  %v255_v51 = vld [vmem:[%s3074_s1 + $0x740] sm:$0xff] }
  0x3f   :  { %1589 = vmatprep.subr.bf16.mxu0 %v2044_v0  ;;  %1675 = vmatprep.subr.bf16.mxu1 %v2046_v1  ;;  %v2102_v0 = vcombine.high %v200_v59, %v204_v60  ;;  %v207_v1 = vld [vmem:[%s3074_s1 + $0x5c0] sm:$0xff] }
  0x40   :  { %v2108_v7 = vcombine.high %v207_v1, %v211_v2  ;;  %v2107_v13 = vcombine.low %v207_v1, %v211_v2 }
  0x42   :  { %1590 = vmatpush1.bf16.msra.mxu0 %v2043_v6  ;;  %1676 = vmatpush1.bf16.msra.mxu1 %v2045_v9  ;;  %v2101_v6 = vcombine.low %v200_v59, %v204_v60  ;;  %v215_v9 = vld [vmem:[%s3074_s1 + $0x600] sm:$0xff] }
  0x43   :  { %1602 = vmatprep.subr.bf16.mxu0 %v2052_v10  ;;  %1688 = vmatprep.subr.bf16.mxu1 %v2054_v11  ;;  %v219_v10 = vld [vmem:[%s3074_s1 + $0x620] sm:$0xff]  ;;  %v216_v11 = vld [vmem:[%s3074_s1 + $0x608] sm:$0xff] }
  0x44   :  { %v2116_v16 = vcombine.high %v215_v9, %v219_v10  ;;  %v2118_v17 = vcombine.high %v216_v11, %v220_v12  ;;  %v2117_v23 = vcombine.low %v216_v11, %v220_v12  ;;  %v263_v60 = vld [vmem:[%s3074_s1 + $0x780] sm:$0xff]  ;;  %v25_v12 = vld [vmem:[%s3074_s1 + $0x10] sm:$0xff] }
  0x45   :  { %1592 = vmatmul.mubr.bf16.vlgmr.msra.gmra.mrb[0].mxu0 %v2439_v15  ;;  %1678 = vmatmul.mubr.bf16.vlgmr.msra.gmra.mrb[0].mxu1 %v2439_v15 }
  0x46   :  { %1603 = vmatpush1.bf16.msra.mxu0 %v2051_v19  ;;  %1689 = vmatpush1.bf16.msra.mxu1 %v2053_v20  ;;  %v227_v19 = vld [vmem:[%s3074_s1 + $0x660] sm:$0xff]  ;;  %v224_v20 = vld [vmem:[%s3074_s1 + $0x648] sm:$0xff] }
  0x47   :  { %1604 = vmatprep.subr.bf16.mxu0 %v2060_v21  ;;  %1690 = vmatprep.subr.bf16.mxu1 %v2062_v22  ;;  %v228_v21 = vld [vmem:[%s3074_s1 + $0x668] sm:$0xff]  ;;  %v2115_v22 = vcombine.low %v215_v9, %v219_v10  ;;  %v2124_v24 = vcombine.high %v223_v18, %v227_v19 }
  0x48   :  { %1634 = vmatprep.mubr.bf16.mxu0 %v2456_v25  ;;  %1720 = vmatprep.mubr.bf16.mxu1 %v2456_v25  ;;  %v2126_v26 = vcombine.high %v224_v20, %v228_v21  ;;  %v2125_v32 = vcombine.low %v224_v20, %v228_v21 }
  0x4a   :  { %1605 = vmatpush1.bf16.msra.mxu0 %v2059_v28  ;;  %1691 = vmatpush1.bf16.msra.mxu1 %v2061_v29  ;;  %v235_v28 = vld [vmem:[%s3074_s1 + $0x6a0] sm:$0xff]  ;;  %v232_v29 = vld [vmem:[%s3074_s1 + $0x688] sm:$0xff] }
  0x4b   :  { %1606 = vmatprep.subr.bf16.mxu0 %v2068_v30  ;;  %1692 = vmatprep.subr.bf16.mxu1 %v2070_v31  ;;  %v236_v30 = vld [vmem:[%s3074_s1 + $0x6a8] sm:$0xff]  ;;  %v2123_v31 = vcombine.low %v223_v18, %v227_v19  ;;  %v2132_v33 = vcombine.high %v231_v27, %v235_v28  ;;  %v13_v18 = vld [vmem:[%s3075_s0 + $0x10] sm:$0xff] }
  0x4c   :  { %v2134_v34 = vcombine.high %v232_v29, %v236_v30  ;;  %v2133_v40 = vcombine.low %v232_v29, %v236_v30  ;;  %v17_v19 = vld [vmem:[%s3075_s0 + $0x30] sm:$0xff] }
  0x4e   :  { %1607 = vmatpush1.bf16.msra.mxu0 %v2067_v36  ;;  %1693 = vmatpush1.bf16.msra.mxu1 %v2069_v37  ;;  %v243_v36 = vld [vmem:[%s3074_s1 + $0x6e0] sm:$0xff]  ;;  %v240_v37 = vld [vmem:[%s3074_s1 + $0x6c8] sm:$0xff] }
  0x4f   :  { %1608 = vmatprep.subr.bf16.mxu0 %v2076_v38  ;;  %1694 = vmatprep.subr.bf16.mxu1 %v2078_v39  ;;  %v244_v38 = vld [vmem:[%s3074_s1 + $0x6e8] sm:$0xff]  ;;  %v2131_v39 = vcombine.low %v231_v27, %v235_v28  ;;  %v2140_v41 = vcombine.high %v239_v35, %v243_v36  ;;  %v34_v27 = vld [vmem:[%s3074_s1 + $0x58] sm:$0xff] }
  0x50   :  { %v2142_v42 = vcombine.high %v240_v37, %v244_v38  ;;  %v2141_v48 = vcombine.low %v240_v37, %v244_v38  ;;  %v38_v28 = vld [vmem:[%s3074_s1 + $0x78] sm:$0xff] }
  0x51   :  { %v1937_v38 = vcombine.low %v34_v27, %v38_v28 }
  0x52   :  { %1609 = vmatpush1.bf16.msra.mxu0 %v2075_v44  ;;  %1695 = vmatpush1.bf16.msra.mxu1 %v2077_v45  ;;  %v251_v44 = vld [vmem:[%s3074_s1 + $0x720] sm:$0xff]  ;;  %v248_v45 = vld [vmem:[%s3074_s1 + $0x708] sm:$0xff] }
  0x53   :  { %1610 = vmatprep.subr.bf16.mxu0 %v2084_v46  ;;  %1696 = vmatprep.subr.bf16.mxu1 %v2086_v47  ;;  %v252_v46 = vld [vmem:[%s3074_s1 + $0x728] sm:$0xff]  ;;  %v2139_v47 = vcombine.low %v239_v35, %v243_v36  ;;  %v2148_v49 = vcombine.high %v247_v43, %v251_v44  ;;  %v42_v35 = vld [vmem:[%s3074_s1 + $0x98] sm:$0xff] }
  0x54   :  { %v2150_v50 = vcombine.high %v248_v45, %v252_v46  ;;  %v2149_v56 = vcombine.low %v248_v45, %v252_v46  ;;  %v46_v36 = vld [vmem:[%s3074_s1 + $0xb8] sm:$0xff] }
  0x55   :  { %v1945_v46 = vcombine.low %v42_v35, %v46_v36 }
  0x56   :  { %1611 = vmatpush1.bf16.msra.mxu0 %v2083_v52  ;;  %1697 = vmatpush1.bf16.msra.mxu1 %v2085_v53  ;;  %v259_v52 = vld [vmem:[%s3074_s1 + $0x760] sm:$0xff]  ;;  %v256_v53 = vld [vmem:[%s3074_s1 + $0x748] sm:$0xff] }
  0x57   :  { %1612 = vmatprep.subr.bf16.mxu0 %v2092_v54  ;;  %1698 = vmatprep.subr.bf16.mxu1 %v2094_v55  ;;  %v260_v54 = vld [vmem:[%s3074_s1 + $0x768] sm:$0xff]  ;;  %v2147_v55 = vcombine.low %v247_v43, %v251_v44  ;;  %v2156_v57 = vcombine.high %v255_v51, %v259_v52  ;;  %v50_v43 = vld [vmem:[%s3074_s1 + $0xd8] sm:$0xff] }
  0x58   :  { %v2158_v59 = vcombine.high %v256_v53, %v260_v54  ;;  %v2157_v1 = vcombine.low %v256_v53, %v260_v54  ;;  %v54_v44 = vld [vmem:[%s3074_s1 + $0xf8] sm:$0xff] }
  0x59   :  { %v1953_v53 = vcombine.low %v50_v43, %v54_v44 }
  0x5a   :  { %1613 = vmatpush1.bf16.msra.mxu0 %v2091_v61  ;;  %1699 = vmatpush1.bf16.msra.mxu1 %v2093_v62  ;;  %v267_v61 = vld [vmem:[%s3074_s1 + $0x7a0] sm:$0xff]  ;;  %v264_v62 = vld [vmem:[%s3074_s1 + $0x788] sm:$0xff] }
  0x5b   :  { %1614 = vmatprep.subr.bf16.mxu0 %v2100_v63  ;;  %1700 = vmatprep.subr.bf16.mxu1 %v2102_v0  ;;  %v268_v63 = vld [vmem:[%s3074_s1 + $0x7a8] sm:$0xff]  ;;  %v2155_v0 = vcombine.low %v255_v51, %v259_v52  ;;  %v2164_v2 = vcombine.high %v263_v60, %v267_v61  ;;  %v62_v51 = vld [vmem:[%s3074_s1 + $0x138] sm:$0xff] }
  0x5c   :  { %v2166_v3 = vcombine.high %v264_v62, %v268_v63  ;;  %v2165_v9 = vcombine.low %v264_v62, %v268_v63 }
  0x5e   :  { %1615 = vmatpush1.bf16.msra.mxu0 %v2099_v5  ;;  %1701 = vmatpush1.bf16.msra.mxu1 %v2101_v6  ;;  %v275_v5 = vld [vmem:[%s3074_s1 + $0x7e0] sm:$0xff]  ;;  %v272_v6 = vld [vmem:[%s3074_s1 + $0x7c8] sm:$0xff] }
  0x5f   :  { %1616 = vmatprep.subr.bf16.mxu0 %v2108_v7  ;;  %1702 = vmatprep.subr.bf16.mxu1 %v2110_v8  ;;  %v276_v7 = vld [vmem:[%s3074_s1 + $0x7e8] sm:$0xff]  ;;  %v2163_v8 = vcombine.low %v263_v60, %v267_v61  ;;  %v2172_v10 = vcombine.high %v271_v4, %v275_v5  ;;  %v70_v60 = vld [vmem:[%s3074_s1 + $0x178] sm:$0xff] }
  0x60   :  { %v2174_v11 = vcombine.high %v272_v6, %v276_v7  ;;  %v2173_v20 = vcombine.low %v272_v6, %v276_v7 }
  0x62   :  { %1617 = vmatpush1.bf16.msra.mxu0 %v2107_v13  ;;  %1703 = vmatpush1.bf16.msra.mxu1 %v2109_v14  ;;  %v29_v13 = vld [vmem:[%s3074_s1 + $0x30] sm:$0xff]  ;;  %v26_v14 = vld [vmem:[%s3074_s1 + $0x18] sm:$0xff] }
  0x63   :  { %1618 = vmatprep.subr.bf16.mxu0 %v2116_v16  ;;  %1704 = vmatprep.subr.bf16.mxu1 %v2118_v17  ;;  %v30_v16 = vld [vmem:[%s3074_s1 + $0x38] sm:$0xff]  ;;  %v2171_v17 = vcombine.low %v271_v4, %v275_v5  ;;  %v1928_v21 = vcombine.high %v25_v12, %v29_v13  ;;  %v1927_v29 = vcombine.low %v25_v12, %v29_v13 }
  0x64   :  { %v1929_v30 = vcombine.low %v26_v14, %v30_v16  ;;  %v78_v4 = vld [vmem:[%s3074_s1 + $0x1b8] sm:$0xff] }
  0x65   :  { %v86_v12 = vld [vmem:[%s3074_s1 + $0x1f8] sm:$0xff] }
  0x66   :  { %1619 = vmatpush1.bf16.msra.mxu0 %v2115_v22  ;;  %1705 = vmatpush1.bf16.msra.mxu1 %v2117_v23  ;;  %v1930_v22 = vcombine.high %v26_v14, %v30_v16  ;;  %v33_v23 = vld [vmem:[%s3074_s1 + $0x50] sm:$0xff] }
  0x67   :  { %1620 = vmatprep.subr.bf16.mxu0 %v2124_v24  ;;  %1706 = vmatprep.subr.bf16.mxu1 %v2126_v26  ;;  %v37_v24 = vld [vmem:[%s3074_s1 + $0x70] sm:$0xff]  ;;  %v2648_v26 = vpack.c.bf16 %v17_v19, %v13_v18 }
  0x68   :  { %v1935_v37 = vcombine.low %v33_v23, %v37_v24  ;;  %v89_v18 = vld [vmem:[%s3074_s1 + $0x210] sm:$0xff] }
  0x69   :  { %v93_v19 = vld [vmem:[%s3074_s1 + $0x230] sm:$0xff] }
  0x6a   :  { %1621 = vmatpush1.bf16.msra.mxu0 %v2123_v31  ;;  %1707 = vmatpush1.bf16.msra.mxu1 %v2125_v32  ;;  %v1936_v31 = vcombine.high %v33_v23, %v37_v24  ;;  %v1938_v32 = vcombine.high %v34_v27, %v38_v28  ;;  %v1992_v24 = vcombine.high %v89_v18, %v93_v19  ;;  %v97_v28 = vld [vmem:[%s3074_s1 + $0x250] sm:$0xff] }
  0x6b   :  { %1622 = vmatprep.subr.bf16.mxu0 %v2132_v33  ;;  %1708 = vmatprep.subr.bf16.mxu1 %v2134_v34  ;;  %v41_v33 = vld [vmem:[%s3074_s1 + $0x90] sm:$0xff] }
  0x6c   :  { %v45_v34 = vld [vmem:[%s3074_s1 + $0xb0] sm:$0xff] }
  0x6d   :  { %v1943_v45 = vcombine.low %v41_v33, %v45_v34 }
  0x6e   :  { %1623 = vmatpush1.bf16.msra.mxu0 %v2131_v39  ;;  %1709 = vmatpush1.bf16.msra.mxu1 %v2133_v40  ;;  %v1944_v39 = vcombine.high %v41_v33, %v45_v34  ;;  %v1946_v40 = vcombine.high %v42_v35, %v46_v36  ;;  %v105_v36 = vld [vmem:[%s3074_s1 + $0x290] sm:$0xff] }
  0x6f   :  { %1624 = vmatprep.subr.bf16.mxu0 %v2140_v41  ;;  %1710 = vmatprep.subr.bf16.mxu1 %v2142_v42  ;;  %v49_v41 = vld [vmem:[%s3074_s1 + $0xd0] sm:$0xff] }
  0x70   :  { %v53_v42 = vld [vmem:[%s3074_s1 + $0xf0] sm:$0xff] }
  0x71   :  { %v1951_v52 = vcombine.low %v49_v41, %v53_v42 }
  0x72   :  { %1625 = vmatpush1.bf16.msra.mxu0 %v2139_v47  ;;  %1711 = vmatpush1.bf16.msra.mxu1 %v2141_v48  ;;  %v1952_v47 = vcombine.high %v49_v41, %v53_v42  ;;  %v1954_v48 = vcombine.high %v50_v43, %v54_v44  ;;  %v113_v44 = vld [vmem:[%s3074_s1 + $0x2d0] sm:$0xff] }
  0x73   :  { %1626 = vmatprep.subr.bf16.mxu0 %v2148_v49  ;;  %1712 = vmatprep.subr.bf16.mxu1 %v2150_v50  ;;  %v57_v49 = vld [vmem:[%s3074_s1 + $0x110] sm:$0xff] }
  0x74   :  { %v61_v50 = vld [vmem:[%s3074_s1 + $0x130] sm:$0xff] }
  0x75   :  { %v1960_v54 = vcombine.high %v57_v49, %v61_v50  ;;  %v1959_v61 = vcombine.low %v57_v49, %v61_v50 }
  0x76   :  { %1627 = vmatpush1.bf16.msra.mxu0 %v2147_v55  ;;  %1713 = vmatpush1.bf16.msra.mxu1 %v2149_v56  ;;  %v65_v56 = vld [vmem:[%s3074_s1 + $0x150] sm:$0xff] }
  0x77   :  { %1628 = vmatprep.subr.bf16.mxu0 %v2156_v57  ;;  %1714 = vmatprep.subr.bf16.mxu1 %v2158_v59  ;;  %v69_v57 = vld [vmem:[%s3074_s1 + $0x170] sm:$0xff]  ;;  %v66_v59 = vld [vmem:[%s3074_s1 + $0x158] sm:$0xff] }
  0x78   :  { %v1968_v63 = vcombine.high %v65_v56, %v69_v57  ;;  %v1967_v5 = vcombine.low %v65_v56, %v69_v57  ;;  %v1969_v6 = vcombine.low %v66_v59, %v70_v60 }
  0x7a   :  { %1629 = vmatpush1.bf16.msra.mxu0 %v2155_v0  ;;  %1715 = vmatpush1.bf16.msra.mxu1 %v2157_v1  ;;  %v1970_v0 = vcombine.high %v66_v59, %v70_v60  ;;  %v73_v1 = vld [vmem:[%s3074_s1 + $0x190] sm:$0xff] }
  0x7b   :  { %1630 = vmatprep.subr.bf16.mxu0 %v2164_v2  ;;  %1716 = vmatprep.subr.bf16.mxu1 %v2166_v3  ;;  %v77_v2 = vld [vmem:[%s3074_s1 + $0x1b0] sm:$0xff]  ;;  %v74_v3 = vld [vmem:[%s3074_s1 + $0x198] sm:$0xff] }
  0x7c   :  { %v1976_v7 = vcombine.high %v73_v1, %v77_v2  ;;  %v1975_v13 = vcombine.low %v73_v1, %v77_v2  ;;  %v1977_v14 = vcombine.low %v74_v3, %v78_v4  ;;  %v129_v60 = vld [vmem:[%s3074_s1 + $0x350] sm:$0xff] }
  0x7e   :  { %1631 = vmatpush1.bf16.msra.mxu0 %v2163_v8  ;;  %1717 = vmatpush1.bf16.msra.mxu1 %v2165_v9  ;;  %v1978_v8 = vcombine.high %v74_v3, %v78_v4  ;;  %v81_v9 = vld [vmem:[%s3074_s1 + $0x1d0] sm:$0xff] }
  0x7f   :  { %1632 = vmatprep.subr.bf16.mxu0 %v2172_v10  ;;  %1718 = vmatprep.subr.bf16.mxu1 %v2174_v11  ;;  %v85_v10 = vld [vmem:[%s3074_s1 + $0x1f0] sm:$0xff]  ;;  %v82_v11 = vld [vmem:[%s3074_s1 + $0x1d8] sm:$0xff] }
  0x80   :  { %v1984_v16 = vcombine.high %v81_v9, %v85_v10  ;;  %v1985_v23 = vcombine.low %v82_v11, %v86_v12  ;;  %v137_v4 = vld [vmem:[%s3074_s1 + $0x390] sm:$0xff] }
  0x82   :  { %1633 = vmatpush1.bf16.msra.mxu0 %v2171_v17  ;;  %1719 = vmatpush1.bf16.msra.mxu1 %v2173_v20  ;;  %v1986_v17 = vcombine.high %v82_v11, %v86_v12  ;;  %v90_v20 = vld [vmem:[%s3074_s1 + $0x218] sm:$0xff]  ;;  %v145_v12 = vld [vmem:[%s3074_s1 + $0x3d0] sm:$0xff] }
  0x83   :  { %1731 = vmatprep.subr.bf16.mxu0 %v1928_v21  ;;  %1817 = vmatprep.subr.bf16.mxu1 %v1930_v22  ;;  %v94_v21 = vld [vmem:[%s3074_s1 + $0x238] sm:$0xff]  ;;  %v1983_v22 = vcombine.low %v81_v9, %v85_v10 }
  0x84   :  { %v1994_v27 = vcombine.high %v90_v20, %v94_v21  ;;  %v1993_v33 = vcombine.low %v90_v20, %v94_v21  ;;  %v153_v21 = vld [vmem:[%s3074_s1 + $0x410] sm:$0xff] }
  0x85   :  { %1635 = vmatmul.mubr.bf16.vlgmr.msra.gmra.mrb[0].mxu0 %v2648_v26  ;;  %1721 = vmatmul.mubr.bf16.vlgmr.msra.gmra.mrb[0].mxu1 %v2648_v26 }
  0x86   :  { %1732 = vmatpush1.bf16.msra.mxu0 %v1927_v29  ;;  %1818 = vmatpush1.bf16.msra.mxu1 %v1929_v30  ;;  %v101_v29 = vld [vmem:[%s3074_s1 + $0x270] sm:$0xff]  ;;  %v98_v30 = vld [vmem:[%s3074_s1 + $0x258] sm:$0xff] }
  0x87   :  { %1733 = vmatprep.subr.bf16.mxu0 %v1936_v31  ;;  %1819 = vmatprep.subr.bf16.mxu1 %v1938_v32  ;;  %v102_v31 = vld [vmem:[%s3074_s1 + $0x278] sm:$0xff]  ;;  %v1991_v32 = vcombine.low %v89_v18, %v93_v19  ;;  %v2000_v34 = vcombine.high %v97_v28, %v101_v29 }
  0x88   :  { %1763 = vmatprep.mubr.bf16.mxu0 %v2306_v58  ;;  %1849 = vmatprep.mubr.bf16.mxu1 %v2306_v58  ;;  %v58_v58 = vld [vmem:[%s3074_s1 + $0x118] sm:$0xff]  ;;  %v2002_v35 = vcombine.high %v98_v30, %v102_v31  ;;  %v2001_v41 = vcombine.low %v98_v30, %v102_v31  ;;  %v161_v31 = vld [vmem:[%s3074_s1 + $0x450] sm:$0xff] }
  0x89   :  { %v1962_v55 = vcombine.high %v58_v58, %v62_v51  ;;  %v1961_v62 = vcombine.low %v58_v58, %v62_v51  ;;  %v121_v51 = vld [vmem:[%s3074_s1 + $0x310] sm:$0xff] }
  0x8a   :  { %1734 = vmatpush1.bf16.msra.mxu0 %v1935_v37  ;;  %1820 = vmatpush1.bf16.msra.mxu1 %v1937_v38  ;;  %v109_v37 = vld [vmem:[%s3074_s1 + $0x2b0] sm:$0xff]  ;;  %v106_v38 = vld [vmem:[%s3074_s1 + $0x298] sm:$0xff] }
  0x8b   :  { %1735 = vmatprep.subr.bf16.mxu0 %v1944_v39  ;;  %1821 = vmatprep.subr.bf16.mxu1 %v1946_v40  ;;  %v110_v39 = vld [vmem:[%s3074_s1 + $0x2b8] sm:$0xff]  ;;  %v1999_v40 = vcombine.low %v97_v28, %v101_v29  ;;  %v2008_v42 = vcombine.high %v105_v36, %v109_v37 }
  0x8c   :  { %v2010_v43 = vcombine.high %v106_v38, %v110_v39  ;;  %v2009_v49 = vcombine.low %v106_v38, %v110_v39  ;;  %v169_v39 = vld [vmem:[%s3074_s1 + $0x490] sm:$0xff] }
  0x8e   :  { %1736 = vmatpush1.bf16.msra.mxu0 %v1943_v45  ;;  %1822 = vmatpush1.bf16.msra.mxu1 %v1945_v46  ;;  %v117_v45 = vld [vmem:[%s3074_s1 + $0x2f0] sm:$0xff]  ;;  %v114_v46 = vld [vmem:[%s3074_s1 + $0x2d8] sm:$0xff] }
  0x8f   :  { %1737 = vmatprep.subr.bf16.mxu0 %v1952_v47  ;;  %1823 = vmatprep.subr.bf16.mxu1 %v1954_v48  ;;  %v118_v47 = vld [vmem:[%s3074_s1 + $0x2f8] sm:$0xff]  ;;  %v2007_v48 = vcombine.low %v105_v36, %v109_v37  ;;  %v2016_v50 = vcombine.high %v113_v44, %v117_v45 }
  0x90   :  { %v2018_v58 = vcombine.high %v114_v46, %v118_v47  ;;  %v2017_v56 = vcombine.low %v114_v46, %v118_v47  ;;  %v177_v47 = vld [vmem:[%s3074_s1 + $0x4d0] sm:$0xff] }
  0x92   :  { %1738 = vmatpush1.bf16.msra.mxu0 %v1951_v52  ;;  %1824 = vmatpush1.bf16.msra.mxu1 %v1953_v53  ;;  %v125_v52 = vld [vmem:[%s3074_s1 + $0x330] sm:$0xff]  ;;  %v122_v53 = vld [vmem:[%s3074_s1 + $0x318] sm:$0xff] }
  0x93   :  { %1739 = vmatprep.subr.bf16.mxu0 %v1960_v54  ;;  %1825 = vmatprep.subr.bf16.mxu1 %v1962_v55  ;;  %v126_v54 = vld [vmem:[%s3074_s1 + $0x338] sm:$0xff]  ;;  %v2015_v55 = vcombine.low %v113_v44, %v117_v45  ;;  %v2024_v57 = vcombine.high %v121_v51, %v125_v52 }
  0x94   :  { %v2026_v59 = vcombine.high %v122_v53, %v126_v54  ;;  %v2025_v1 = vcombine.low %v122_v53, %v126_v54  ;;  %v185_v53 = vld [vmem:[%s3074_s1 + $0x510] sm:$0xff] }
  0x95   :  { %v189_v54 = vld [vmem:[%s3074_s1 + $0x530] sm:$0xff] }
  0x96   :  { %1740 = vmatpush1.bf16.msra.mxu0 %v1959_v61  ;;  %1826 = vmatpush1.bf16.msra.mxu1 %v1961_v62  ;;  %v133_v61 = vld [vmem:[%s3074_s1 + $0x370] sm:$0xff]  ;;  %v130_v62 = vld [vmem:[%s3074_s1 + $0x358] sm:$0xff] }
  0x97   :  { %1741 = vmatprep.subr.bf16.mxu0 %v1968_v63  ;;  %1827 = vmatprep.subr.bf16.mxu1 %v1970_v0  ;;  %v134_v63 = vld [vmem:[%s3074_s1 + $0x378] sm:$0xff]  ;;  %v2023_v0 = vcombine.low %v121_v51, %v125_v52  ;;  %v2032_v2 = vcombine.high %v129_v60, %v133_v61 }
  0x98   :  { %v2034_v3 = vcombine.high %v130_v62, %v134_v63  ;;  %v2033_v9 = vcombine.low %v130_v62, %v134_v63  ;;  %v197_v62 = vld [vmem:[%s3074_s1 + $0x570] sm:$0xff]  ;;  %v194_v63 = vld [vmem:[%s3074_s1 + $0x558] sm:$0xff] }
  0x9a   :  { %1742 = vmatpush1.bf16.msra.mxu0 %v1967_v5  ;;  %1828 = vmatpush1.bf16.msra.mxu1 %v1969_v6  ;;  %v141_v5 = vld [vmem:[%s3074_s1 + $0x3b0] sm:$0xff]  ;;  %v138_v6 = vld [vmem:[%s3074_s1 + $0x398] sm:$0xff] }
  0x9b   :  { %1743 = vmatprep.subr.bf16.mxu0 %v1976_v7  ;;  %1829 = vmatprep.subr.bf16.mxu1 %v1978_v8  ;;  %v142_v7 = vld [vmem:[%s3074_s1 + $0x3b8] sm:$0xff]  ;;  %v2031_v8 = vcombine.low %v129_v60, %v133_v61  ;;  %v2040_v10 = vcombine.high %v137_v4, %v141_v5  ;;  %v193_v61 = vld [vmem:[%s3074_s1 + $0x550] sm:$0xff] }
  0x9c   :  { %v2042_v11 = vcombine.high %v138_v6, %v142_v7  ;;  %v2041_v18 = vcombine.low %v138_v6, %v142_v7  ;;  %v205_v6 = vld [vmem:[%s3074_s1 + $0x5b0] sm:$0xff]  ;;  %v202_v7 = vld [vmem:[%s3074_s1 + $0x598] sm:$0xff] }
  0x9e   :  { %1744 = vmatpush1.bf16.msra.mxu0 %v1975_v13  ;;  %1830 = vmatpush1.bf16.msra.mxu1 %v1977_v14  ;;  %v149_v13 = vld [vmem:[%s3074_s1 + $0x3f0] sm:$0xff]  ;;  %v146_v14 = vld [vmem:[%s3074_s1 + $0x3d8] sm:$0xff] }
  0x9f   :  { %1745 = vmatprep.subr.bf16.mxu0 %v1984_v16  ;;  %1831 = vmatprep.subr.bf16.mxu1 %v1986_v17  ;;  %v150_v16 = vld [vmem:[%s3074_s1 + $0x3f8] sm:$0xff]  ;;  %v2039_v17 = vcombine.low %v137_v4, %v141_v5  ;;  %v2048_v19 = vcombine.high %v145_v12, %v149_v13  ;;  %v201_v5 = vld [vmem:[%s3074_s1 + $0x590] sm:$0xff] }
  0xa0   :  { %v2050_v20 = vcombine.high %v146_v14, %v150_v16  ;;  %v2049_v28 = vcombine.low %v146_v14, %v150_v16  ;;  %v213_v14 = vld [vmem:[%s3074_s1 + $0x5f0] sm:$0xff]  ;;  %v210_v16 = vld [vmem:[%s3074_s1 + $0x5d8] sm:$0xff] }
  0xa2   :  { %1746 = vmatpush1.bf16.msra.mxu0 %v1983_v22  ;;  %1832 = vmatpush1.bf16.msra.mxu1 %v1985_v23  ;;  %v157_v22 = vld [vmem:[%s3074_s1 + $0x430] sm:$0xff]  ;;  %v154_v23 = vld [vmem:[%s3074_s1 + $0x418] sm:$0xff] }
  0xa3   :  { %1747 = vmatprep.subr.bf16.mxu0 %v1992_v24  ;;  %1833 = vmatprep.subr.bf16.mxu1 %v1994_v27  ;;  %v158_v24 = vld [vmem:[%s3074_s1 + $0x438] sm:$0xff]  ;;  %v2047_v27 = vcombine.low %v145_v12, %v149_v13  ;;  %v2056_v29 = vcombine.high %v153_v21, %v157_v22  ;;  %v209_v13 = vld [vmem:[%s3074_s1 + $0x5d0] sm:$0xff] }
  0xa4   :  { %v2058_v30 = vcombine.high %v154_v23, %v158_v24  ;;  %v2057_v36 = vcombine.low %v154_v23, %v158_v24  ;;  %v221_v23 = vld [vmem:[%s3074_s1 + $0x630] sm:$0xff]  ;;  %v218_v24 = vld [vmem:[%s3074_s1 + $0x618] sm:$0xff] }
  0xa6   :  { %1748 = vmatpush1.bf16.msra.mxu0 %v1991_v32  ;;  %1834 = vmatpush1.bf16.msra.mxu1 %v1993_v33  ;;  %v165_v32 = vld [vmem:[%s3074_s1 + $0x470] sm:$0xff]  ;;  %v162_v33 = vld [vmem:[%s3074_s1 + $0x458] sm:$0xff] }
  0xa7   :  { %1749 = vmatprep.subr.bf16.mxu0 %v2000_v34  ;;  %1835 = vmatprep.subr.bf16.mxu1 %v2002_v35  ;;  %v166_v34 = vld [vmem:[%s3074_s1 + $0x478] sm:$0xff]  ;;  %v2055_v35 = vcombine.low %v153_v21, %v157_v22  ;;  %v2064_v37 = vcombine.high %v161_v31, %v165_v32  ;;  %v217_v22 = vld [vmem:[%s3074_s1 + $0x610] sm:$0xff] }
  0xa8   :  { %v2066_v38 = vcombine.high %v162_v33, %v166_v34  ;;  %v2065_v44 = vcombine.low %v162_v33, %v166_v34  ;;  %v229_v33 = vld [vmem:[%s3074_s1 + $0x670] sm:$0xff]  ;;  %v226_v34 = vld [vmem:[%s3074_s1 + $0x658] sm:$0xff] }
  0xaa   :  { %1750 = vmatpush1.bf16.msra.mxu0 %v1999_v40  ;;  %1836 = vmatpush1.bf16.msra.mxu1 %v2001_v41  ;;  %v173_v40 = vld [vmem:[%s3074_s1 + $0x4b0] sm:$0xff]  ;;  %v170_v41 = vld [vmem:[%s3074_s1 + $0x498] sm:$0xff] }
  0xab   :  { %1751 = vmatprep.subr.bf16.mxu0 %v2008_v42  ;;  %1837 = vmatprep.subr.bf16.mxu1 %v2010_v43  ;;  %v174_v42 = vld [vmem:[%s3074_s1 + $0x4b8] sm:$0xff]  ;;  %v2063_v43 = vcombine.low %v161_v31, %v165_v32  ;;  %v2072_v45 = vcombine.high %v169_v39, %v173_v40  ;;  %v225_v32 = vld [vmem:[%s3074_s1 + $0x650] sm:$0xff] }
  0xac   :  { %v2074_v46 = vcombine.high %v170_v41, %v174_v42 }
  0xae   :  { %1752 = vmatpush1.bf16.msra.mxu0 %v2007_v48  ;;  %1838 = vmatpush1.bf16.msra.mxu1 %v2009_v49  ;;  %v181_v48 = vld [vmem:[%s3074_s1 + $0x4f0] sm:$0xff]  ;;  %v182_v49 = vld [vmem:[%s3074_s1 + $0x4f8] sm:$0xff] }
  0xaf   :  { %1753 = vmatprep.subr.bf16.mxu0 %v2016_v50  ;;  %1839 = vmatprep.subr.bf16.mxu1 %v2018_v58  ;;  %v2071_v50 = vcombine.low %v169_v39, %v173_v40  ;;  %v2073_v58 = vcombine.low %v170_v41, %v174_v42  ;;  %v2080_v51 = vcombine.high %v177_v47, %v181_v48  ;;  %v233_v40 = vld [vmem:[%s3074_s1 + $0x690] sm:$0xff]  ;;  %v234_v42 = vld [vmem:[%s3074_s1 + $0x698] sm:$0xff] }
  0xb0   :  { %v237_v41 = vld [vmem:[%s3074_s1 + $0x6b0] sm:$0xff] }
  0xb2   :  { %1754 = vmatpush1.bf16.msra.mxu0 %v2015_v55  ;;  %1840 = vmatpush1.bf16.msra.mxu1 %v2017_v56  ;;  %v190_v55 = vld [vmem:[%s3074_s1 + $0x538] sm:$0xff]  ;;  %v2079_v56 = vcombine.low %v177_v47, %v181_v48  ;;  %v241_v48 = vld [vmem:[%s3074_s1 + $0x6d0] sm:$0xff] }
  0xb3   :  { %1755 = vmatprep.subr.bf16.mxu0 %v2024_v57  ;;  %1841 = vmatprep.subr.bf16.mxu1 %v2026_v59  ;;  %v2088_v59 = vcombine.high %v185_v53, %v189_v54 }
  0xb6   :  { %1756 = vmatpush1.bf16.msra.mxu0 %v2023_v0  ;;  %1842 = vmatpush1.bf16.msra.mxu1 %v2025_v1  ;;  %v198_v0 = vld [vmem:[%s3074_s1 + $0x578] sm:$0xff]  ;;  %v2087_v1 = vcombine.low %v185_v53, %v189_v54  ;;  %v249_v54 = vld [vmem:[%s3074_s1 + $0x710] sm:$0xff] }
  0xb7   :  { %1757 = vmatprep.subr.bf16.mxu0 %v2032_v2  ;;  %1843 = vmatprep.subr.bf16.mxu1 %v2034_v3  ;;  %v2096_v3 = vcombine.high %v193_v61, %v197_v62  ;;  %v2098_v4 = vcombine.high %v194_v63, %v198_v0 }
  0xba   :  { %1758 = vmatpush1.bf16.msra.mxu0 %v2031_v8  ;;  %1844 = vmatpush1.bf16.msra.mxu1 %v2033_v9  ;;  %v206_v8 = vld [vmem:[%s3074_s1 + $0x5b8] sm:$0xff]  ;;  %v2095_v9 = vcombine.low %v193_v61, %v197_v62  ;;  %v257_v62 = vld [vmem:[%s3074_s1 + $0x750] sm:$0xff] }
  0xbb   :  { %1759 = vmatprep.subr.bf16.mxu0 %v2040_v10  ;;  %1845 = vmatprep.subr.bf16.mxu1 %v2042_v11  ;;  %v2097_v10 = vcombine.low %v194_v63, %v198_v0  ;;  %v2104_v11 = vcombine.high %v201_v5, %v205_v6  ;;  %v2106_v12 = vcombine.high %v202_v7, %v206_v8  ;;  %v261_v63 = vld [vmem:[%s3074_s1 + $0x770] sm:$0xff]  ;;  %v258_v0 = vld [vmem:[%s3074_s1 + $0x758] sm:$0xff] }
  0xbe   :  { %1760 = vmatpush1.bf16.msra.mxu0 %v2039_v17  ;;  %1846 = vmatpush1.bf16.msra.mxu1 %v2041_v18  ;;  %v214_v17 = vld [vmem:[%s3074_s1 + $0x5f8] sm:$0xff]  ;;  %v2103_v18 = vcombine.low %v201_v5, %v205_v6  ;;  %v265_v6 = vld [vmem:[%s3074_s1 + $0x790] sm:$0xff] }
  0xbf   :  { %1761 = vmatprep.subr.bf16.mxu0 %v2048_v19  ;;  %1847 = vmatprep.subr.bf16.mxu1 %v2050_v20  ;;  %v2105_v19 = vcombine.low %v202_v7, %v206_v8  ;;  %v2112_v20 = vcombine.high %v209_v13, %v213_v14  ;;  %v2114_v21 = vcombine.high %v210_v16, %v214_v17  ;;  %v269_v7 = vld [vmem:[%s3074_s1 + $0x7b0] sm:$0xff]  ;;  %v266_v8 = vld [vmem:[%s3074_s1 + $0x798] sm:$0xff] }
  0xc2   :  { %1762 = vmatpush1.bf16.msra.mxu0 %v2047_v27  ;;  %1848 = vmatpush1.bf16.msra.mxu1 %v2049_v28  ;;  %v222_v27 = vld [vmem:[%s3074_s1 + $0x638] sm:$0xff]  ;;  %v2111_v28 = vcombine.low %v209_v13, %v213_v14  ;;  %v273_v14 = vld [vmem:[%s3074_s1 + $0x7d0] sm:$0xff] }
  0xc3   :  { %1774 = vmatprep.subr.bf16.mxu0 %v2056_v29  ;;  %1860 = vmatprep.subr.bf16.mxu1 %v2058_v30  ;;  %v2113_v29 = vcombine.low %v210_v16, %v214_v17  ;;  %v2120_v30 = vcombine.high %v217_v22, %v221_v23  ;;  %v2122_v31 = vcombine.high %v218_v24, %v222_v27  ;;  %v277_v16 = vld [vmem:[%s3074_s1 + $0x7f0] sm:$0xff]  ;;  %v274_v17 = vld [vmem:[%s3074_s1 + $0x7d8] sm:$0xff] }
  0xc5   :  { %1764 = vmatmul.mubr.bf16.vlgmr.msra.gmra.mrb[4].mxu0 %v2439_v15  ;;  %1850 = vmatmul.mubr.bf16.vlgmr.msra.gmra.mrb[4].mxu1 %v2439_v15  ;;  %v178_v15 = vld [vmem:[%s3074_s1 + $0x4d8] sm:$0xff] }
  0xc6   :  { %1775 = vmatpush1.bf16.msra.mxu0 %v2055_v35  ;;  %1861 = vmatpush1.bf16.msra.mxu1 %v2057_v36  ;;  %v2082_v52 = vcombine.high %v178_v15, %v182_v49  ;;  %v2081_v57 = vcombine.low %v178_v15, %v182_v49  ;;  %v230_v35 = vld [vmem:[%s3074_s1 + $0x678] sm:$0xff]  ;;  %v2119_v36 = vcombine.low %v217_v22, %v221_v23  ;;  %v245_v15 = vld [vmem:[%s3074_s1 + $0x6f0] sm:$0xff] }
  0xc7   :  { %1776 = vmatprep.subr.bf16.mxu0 %v2064_v37  ;;  %1862 = vmatprep.subr.bf16.mxu1 %v2066_v38  ;;  %v2121_v37 = vcombine.low %v218_v24, %v222_v27  ;;  %v2128_v38 = vcombine.high %v225_v32, %v229_v33  ;;  %v2130_v39 = vcombine.high %v226_v34, %v230_v35  ;;  %v242_v49 = vld [vmem:[%s3074_s1 + $0x6d8] sm:$0xff] }
  0xc8   :  { %1806 = vmatprep.mubr.bf16.mxu0 %v2456_v25  ;;  %1892 = vmatprep.mubr.bf16.mxu1 %v2456_v25  ;;  %v186_v25 = vld [vmem:[%s3074_s1 + $0x518] sm:$0xff]  ;;  %v2175_v23 = vcombine.low %v273_v14, %v277_v16 }
  0xc9   :  { %v2090_v60 = vcombine.high %v186_v25, %v190_v55  ;;  %v2089_v2 = vcombine.low %v186_v25, %v190_v55  ;;  %v253_v25 = vld [vmem:[%s3074_s1 + $0x730] sm:$0xff]  ;;  %v250_v55 = vld [vmem:[%s3074_s1 + $0x718] sm:$0xff] }
  0xca   :  { %1777 = vmatpush1.bf16.msra.mxu0 %v2063_v43  ;;  %1863 = vmatpush1.bf16.msra.mxu1 %v2065_v44  ;;  %v238_v43 = vld [vmem:[%s3074_s1 + $0x6b8] sm:$0xff]  ;;  %v2127_v44 = vcombine.low %v225_v32, %v229_v33 }
  0xcb   :  { %1778 = vmatprep.subr.bf16.mxu0 %v2072_v45  ;;  %1864 = vmatprep.subr.bf16.mxu1 %v2074_v46  ;;  %v2129_v45 = vcombine.low %v226_v34, %v230_v35  ;;  %v2136_v46 = vcombine.high %v233_v40, %v237_v41  ;;  %v2138_v47 = vcombine.high %v234_v42, %v238_v43 }
  0xce   :  { %1779 = vmatpush1.bf16.msra.mxu0 %v2071_v50  ;;  %1865 = vmatpush1.bf16.msra.mxu1 %v2073_v58  ;;  %v246_v50 = vld [vmem:[%s3074_s1 + $0x6f8] sm:$0xff]  ;;  %v2135_v58 = vcombine.low %v233_v40, %v237_v41 }
  0xcf   :  { %1780 = vmatprep.subr.bf16.mxu0 %v2080_v51  ;;  %1866 = vmatprep.subr.bf16.mxu1 %v2082_v52  ;;  %v2137_v51 = vcombine.low %v234_v42, %v238_v43  ;;  %v2144_v52 = vcombine.high %v241_v48, %v245_v15  ;;  %v2146_v53 = vcombine.high %v242_v49, %v246_v50 }
  0xd2   :  { %1781 = vmatpush1.bf16.msra.mxu0 %v2079_v56  ;;  %1867 = vmatpush1.bf16.msra.mxu1 %v2081_v57  ;;  %v254_v56 = vld [vmem:[%s3074_s1 + $0x738] sm:$0xff]  ;;  %v2143_v57 = vcombine.low %v241_v48, %v245_v15 }
  0xd3   :  { %1782 = vmatprep.subr.bf16.mxu0 %v2088_v59  ;;  %1868 = vmatprep.subr.bf16.mxu1 %v2090_v60  ;;  %v2145_v59 = vcombine.low %v242_v49, %v246_v50  ;;  %v2152_v60 = vcombine.high %v249_v54, %v253_v25  ;;  %v2154_v61 = vcombine.high %v250_v55, %v254_v56 }
  0xd6   :  { %1783 = vmatpush1.bf16.msra.mxu0 %v2087_v1  ;;  %1869 = vmatpush1.bf16.msra.mxu1 %v2089_v2  ;;  %v262_v1 = vld [vmem:[%s3074_s1 + $0x778] sm:$0xff]  ;;  %v2151_v2 = vcombine.low %v249_v54, %v253_v25 }
  0xd7   :  { %1784 = vmatprep.subr.bf16.mxu0 %v2096_v3  ;;  %1870 = vmatprep.subr.bf16.mxu1 %v2098_v4  ;;  %v2153_v3 = vcombine.low %v250_v55, %v254_v56  ;;  %v2160_v4 = vcombine.high %v257_v62, %v261_v63  ;;  %v2162_v5 = vcombine.high %v258_v0, %v262_v1 }
  0xda   :  { %1785 = vmatpush1.bf16.msra.mxu0 %v2095_v9  ;;  %1871 = vmatpush1.bf16.msra.mxu1 %v2097_v10  ;;  %v270_v9 = vld [vmem:[%s3074_s1 + $0x7b8] sm:$0xff]  ;;  %v2159_v10 = vcombine.low %v257_v62, %v261_v63 }
  0xdb   :  { %1786 = vmatprep.subr.bf16.mxu0 %v2104_v11  ;;  %1872 = vmatprep.subr.bf16.mxu1 %v2106_v12  ;;  %v2161_v11 = vcombine.low %v258_v0, %v262_v1  ;;  %v2168_v12 = vcombine.high %v265_v6, %v269_v7  ;;  %v2170_v13 = vcombine.high %v266_v8, %v270_v9 }
  0xde   :  { %1787 = vmatpush1.bf16.msra.mxu0 %v2103_v18  ;;  %1873 = vmatpush1.bf16.msra.mxu1 %v2105_v19  ;;  %v278_v18 = vld [vmem:[%s3074_s1 + $0x7f8] sm:$0xff]  ;;  %v2167_v19 = vcombine.low %v265_v6, %v269_v7 }
  0xdf   :  { %1788 = vmatprep.subr.bf16.mxu0 %v2112_v20  ;;  %1874 = vmatprep.subr.bf16.mxu1 %v2114_v21  ;;  %v2169_v20 = vcombine.low %v266_v8, %v270_v9  ;;  %v2176_v21 = vcombine.high %v273_v14, %v277_v16  ;;  %v2178_v22 = vcombine.high %v274_v17, %v278_v18 }
  0xe0   :  { %v2177_v24 = vcombine.low %v274_v17, %v278_v18 }
  0xe2   :  { %1789 = vmatpush1.bf16.msra.mxu0 %v2111_v28  ;;  %1875 = vmatpush1.bf16.msra.mxu1 %v2113_v29 }
  0xe3   :  { %1790 = vmatprep.subr.bf16.mxu0 %v2120_v30  ;;  %1876 = vmatprep.subr.bf16.mxu1 %v2122_v31 }
  0xe6   :  { %1791 = vmatpush1.bf16.msra.mxu0 %v2119_v36  ;;  %1877 = vmatpush1.bf16.msra.mxu1 %v2121_v37 }
  0xe7   :  { %1792 = vmatprep.subr.bf16.mxu0 %v2128_v38  ;;  %1878 = vmatprep.subr.bf16.mxu1 %v2130_v39 }
  0xea   :  { %1793 = vmatpush1.bf16.msra.mxu0 %v2127_v44  ;;  %1879 = vmatpush1.bf16.msra.mxu1 %v2129_v45 }
  0xeb   :  { %1794 = vmatprep.subr.bf16.mxu0 %v2136_v46  ;;  %1880 = vmatprep.subr.bf16.mxu1 %v2138_v47 }
  0xee   :  { %1795 = vmatpush1.bf16.msra.mxu0 %v2135_v58  ;;  %1881 = vmatpush1.bf16.msra.mxu1 %v2137_v51 }
  0xef   :  { %1796 = vmatprep.subr.bf16.mxu0 %v2144_v52  ;;  %1882 = vmatprep.subr.bf16.mxu1 %v2146_v53 }
  0xf2   :  { %1797 = vmatpush1.bf16.msra.mxu0 %v2143_v57  ;;  %1883 = vmatpush1.bf16.msra.mxu1 %v2145_v59 }
  0xf3   :  { %1798 = vmatprep.subr.bf16.mxu0 %v2152_v60  ;;  %1884 = vmatprep.subr.bf16.mxu1 %v2154_v61 }
  0xf6   :  { %1799 = vmatpush1.bf16.msra.mxu0 %v2151_v2  ;;  %1885 = vmatpush1.bf16.msra.mxu1 %v2153_v3 }
  0xf7   :  { %1800 = vmatprep.subr.bf16.mxu0 %v2160_v4  ;;  %1886 = vmatprep.subr.bf16.mxu1 %v2162_v5 }
  0xfa   :  { %1801 = vmatpush1.bf16.msra.mxu0 %v2159_v10  ;;  %1887 = vmatpush1.bf16.msra.mxu1 %v2161_v11 }
  0xfb   :  { %1802 = vmatprep.subr.bf16.mxu0 %v2168_v12  ;;  %1888 = vmatprep.subr.bf16.mxu1 %v2170_v13 }
  0xfe   :  { %1803 = vmatpush1.bf16.msra.mxu0 %v2167_v19  ;;  %1889 = vmatpush1.bf16.msra.mxu1 %v2169_v20 }
  0xff   :  { %1804 = vmatprep.subr.bf16.mxu0 %v2176_v21  ;;  %1890 = vmatprep.subr.bf16.mxu1 %v2178_v22 }
 0x102   :  { %1805 = vmatpush1.bf16.msra.mxu0 %v2175_v23  ;;  %1891 = vmatpush1.bf16.msra.mxu1 %v2177_v24 }
 0x105   :  { %1807 = vmatmul.mubr.bf16.vlgmr.msra.gmra.mrb[4].mxu0 %v2648_v26  ;;  %1893 = vmatmul.mubr.bf16.vlgmr.msra.gmra.mrb[4].mxu1 %v2648_v26 }
 0x158   :  { %v1636_v27 = vpop.f32.mrb[0].mxu0  ;;  %v1722_v28 = vpop.f32.mrb[0].mxu1 }
 0x159   :  { %1903 = vst [vmem:[%s3076_s2] sm:$0xff] %v1636_v27  ;;  %v1638_v29 = vpop.f32.mrb[1].mxu0  ;;  %1905 = vst [vmem:[%s3076_s2 + $0x10] sm:$0xff] %v1722_v28  ;;  %v1724_v30 = vpop.f32.mrb[1].mxu1 }
 0x15a   :  { %1904 = vst [vmem:[%s3076_s2 + $0x8] sm:$0xff] %v1638_v29  ;;  %v1640_v31 = vpop.f32.mrb[2].mxu0  ;;  %1906 = vst [vmem:[%s3076_s2 + $0x18] sm:$0xff] %v1724_v30  ;;  %v1726_v26 = vpop.f32.mrb[2].mxu1 }
 0x15b   :  { %1911 = vst [vmem:[%s3076_s2 + $0x40] sm:$0xff] %v1640_v31  ;;  %v1642_v32 = vpop.f32.mrb[3].mxu0  ;;  %1913 = vst [vmem:[%s3076_s2 + $0x50] sm:$0xff] %v1726_v26  ;;  %v1728_v33 = vpop.f32.mrb[3].mxu1 }
 0x15c   :  { %1912 = vst [vmem:[%s3076_s2 + $0x48] sm:$0xff] %v1642_v32  ;;  %1914 = vst [vmem:[%s3076_s2 + $0x58] sm:$0xff] %v1728_v33 }
 0x1d8   :  { %v1808_v34 = vpop.f32.mrb[4].mxu0  ;;  %v1894_v35 = vpop.f32.mrb[4].mxu1 }
 0x1d9   :  { %1907 = vst [vmem:[%s3076_s2 + $0x20] sm:$0xff] %v1808_v34  ;;  %v1810_v36 = vpop.f32.mrb[5].mxu0  ;;  %1909 = vst [vmem:[%s3076_s2 + $0x30] sm:$0xff] %v1894_v35  ;;  %v1896_v37 = vpop.f32.mrb[5].mxu1 }
 0x1da   :  { %1908 = vst [vmem:[%s3076_s2 + $0x28] sm:$0xff] %v1810_v36  ;;  %v1812_v38 = vpop.f32.mrb[6].mxu0  ;;  %1910 = vst [vmem:[%s3076_s2 + $0x38] sm:$0xff] %v1896_v37  ;;  %v1898_v39 = vpop.f32.mrb[6].mxu1 }
 0x1db   :  { %1915 = vst [vmem:[%s3076_s2 + $0x60] sm:$0xff] %v1812_v38  ;;  %v1814_v40 = vpop.f32.mrb[7].mxu0  ;;  %1917 = vst [vmem:[%s3076_s2 + $0x70] sm:$0xff] %v1898_v39  ;;  %v1900_v41 = vpop.f32.mrb[7].mxu1 }
 0x1dc   :  { %1916 = vst [vmem:[%s3076_s2 + $0x68] sm:$0xff] %v1814_v40  ;;  %1918 = vst [vmem:[%s3076_s2 + $0x78] sm:$0xff] %v1900_v41 }

// kernel: decoder_layer.7
= control target key start
LH: loop header
LB: loop body
LE: loop exit
PB: predicated region body
PF: predicated region fallthrough
CT: control target
= control target key end

     0   :  { %s3990_s0 = inlined_call_operand.vmem [shape: f32[2,8,8,64], index: 0, kind: input, shape index: {}]   ;;  %s3991_s1 = inlined_call_operand.vmem [shape: f32[2,8,8,64], index: 1, kind: input, shape index: {}]   ;;  %s3992_s2 = inlined_call_operand.vmem [shape: f32[2,8,8,64], index: 2, kind: input, shape index: {}]   ;;  %s3993_s3 = inlined_call_operand.vmem [shape: s32[2,8,8], index: 3, kind: input, shape index: {}]   ;;  %s3994_s4 = inlined_call_operand.vmem [shape: f32[2,8,512], index: 4, kind: input, shape index: {}]   ;;  %s3995_s5 = inlined_call_operand.vmem [shape: bf16[512,512], index: 5, kind: input, shape index: {}]   ;;  %s3996_s6 = inlined_call_operand.vmem [shape: f32[1,512], index: 6, kind: input, shape index: {}]   ;;  %s3997_s7 = inlined_call_operand.vmem [shape: f32[1,512], index: 7, kind: input, shape index: {}]   ;;  %s3998_s8 = inlined_call_operand.vmem [shape: f32[2,8,512], index: 8, kind: output, shape index: {0}]   ;;  %s3999_s9 = inlined_call_operand.hbm [shape: f32[2,8,8,8], index: 9, kind: output, shape index: {1}]  }
   0x1   :  { %4001 = sst [smem:[#allocation5_spill]] %s3990_s0 }
   0x2   :  { %15 = vsyncpa [#allocation3], 0 }
   0x3   :  { %17 = vsyncpa [#allocation3 + $0x1], 0  ;;  %s3244_s30 = smov 0   ;;  %s3246_s10 = smov 0  }
   0x4   :  { %s3248_s11 = smov 0   ;;  %s3250_s12 = smov 0  }
   0x5 LB: > { %s3265_s13 = sadd.s32 4294967295, %s3186_s12   ;;  %s2533_s14 = sadd.s32 4294967294, %s3186_s12   ;;  %s3186_s12 = sphi %s3250_s12, %s4009_s12   ;;  %s3182_s11 = sphi %s3248_s11, %s4008_s11   ;;  %s3178_s10 = sphi %s3246_s10, %s4007_s10   ;;  %s3174_s30 = sphi %s3244_s30, %s4006_s30  }
   0x6   : > { %s3269_s15 = sadd.s32 1, %s3186_s12   ;;  %s249_s16 = sadd.s32 1, %s3182_s11 }
   0x7   : > { %s246_s17 = ssub.s32 %s3186_s12, %s3269_s15  ;;  %p259_p0 = scmp.ne.s32.totalorder %s3182_s11, %s3178_s10 }
   0x8   : > { %p247_p1 = scmp.eq.s32.totalorder %s246_s17, 0  ;;  %p260_p2 = scmp.eq.s32.totalorder %s3265_s13, 1 }
   0x9   : > { %p265_p3 = scmp.ne.s32.totalorder %s3178_s10, %s3174_s30  ;;  %p266_p4 = scmp.eq.s32.totalorder %s2533_s14, 1 }
   0xa   : > { %s3280_s18 = scalar_select %p247_p1, %s3182_s11, %s249_s16  }
   0xb   : > { %p3282_p5 = por %p260_p2, %p259_p0  ;;  %p3286_p6 = por %p266_p4, %p265_p3 }
   0xc   : > { %p2536_p7 = scmp.ge.s32.totalorder %s3186_s12, 1  ;;  %p332_p8 = scmp.lt.s32.totalorder %s3186_s12, 3 }
   0xe   : > { %p333_p9 = pnand %p2536_p7, %p332_p8 }
   0xf   : > { %p392_p10 = scmp.lt.s32.totalorder (!%p333_p9), %s3265_s13, 1  ;;  %v3188_v0 = vmov (!%p333_p9), 0.0   ;;  %vm3189_vm0 = vmmov (!%p333_p9), 0   ;;  %vm471_vm1 = vcmask (!%p333_p9), 523264   ;;  %s4004_s0 = sld [smem:[#allocation5_spill]] (!%p333_p9)  ;;  %vm859_vm3 = vcmask (!%p333_p9), 64512  }
  0x10   : > { %336 = sbr.rel (%p333_p9) target bundleno = 1517 (0x5ed), region = 52  ;;  %2736 = vmatprep.subr.bf16.mxu0 (!%p333_p9), %v3188_v0  ;;  %2742 = vmatprep.subr.bf16.mxu1 (!%p333_p9), %v3188_v0  ;;  %vm967_vm4 = vcmask (!%p333_p9), 1043456   ;;  %s4005_s24 = sand.u32 (!%p333_p9), 1, %s3178_s10  }
  0x11   : > { %2738 = vmatprep.mubr.msk.bf16.mxu0 (!%p333_p9), %vm3189_vm0, %v3188_v0  ;;  %2744 = vmatprep.mubr.msk.bf16.mxu1 (!%p333_p9), %vm3189_vm0, %v3188_v0 }
  0x17   : > { %s3296_s21 = scalar_select %p392_p10, %s3265_s13, 1 }
  0x19   : > { %s3303_s22 = sshll.u32 %s3296_s21, 6  ;;  %s2544_s29 = sshll.u32 %s3296_s21, 3 }
  0x1a   : > { %s3309_s25 = scalar_lea.vmem %s3991_s1, %s3303_s22  ;;  %s3317_s28 = scalar_lea.vmem %s4004_s0, %s3303_s22 }
  0x1b   : > { %v438_v1 = vld [vmem:[%s3309_s25] sm:$0xff]  ;;  %v439_v2 = vld [vmem:[%s3309_s25 + $0x8] sm:$0xff]  ;;  %v441_v5 = vld [vmem:[%s3309_s25 + $0x18] sm:$0xff]  ;;  %s410_s17 = scalar_lea.vmem %s3993_s3, %s2544_s29  ;;  %s2703_s29 = sshll.u32 %s3265_s13, 10 }
  0x1c   : > { %v446_v3 = vpack.c.bf16 %v438_v1, %v438_v1  ;;  %v447_v4 = vpack.c.bf16 %v439_v2, %v439_v2  ;;  %v440_v6 = vld [vmem:[%s3309_s25 + $0x10] sm:$0xff]  ;;  %v422_v9 = vld [vmem:[%s3317_s28] sm:$0xff]  ;;  %v423_v10 = vld [vmem:[%s3317_s28 + $0x8] sm:$0xff]  ;;  %v449_v11 = vpack.c.bf16 %v441_v5, %v441_v5  ;;  %s3928_s23 = scalar_lea.hbm %s3999_s9, %s2703_s29  ;;  %s3934_s0 = scalar_lea.sflag [#allocation3], %s4005_s24 }
  0x1d   : > { %v448_v12 = vpack.c.bf16 %v440_v6, %v440_v6  ;;  %v430_v13 = vpack.c.bf16 %v422_v9, %v422_v9  ;;  %v431_v14 = vpack.c.bf16 %v423_v10, %v423_v10  ;;  %v443_v15 = vld [vmem:[%s3309_s25 + $0x28] sm:$0xff]  ;;  %v442_v18 = vld [vmem:[%s3309_s25 + $0x20] sm:$0xff]  ;;  %v425_v19 = vld [vmem:[%s3317_s28 + $0x18] sm:$0xff]  ;;  %s3191_s13 = smov [#allocation2]  }
  0x1e   : > { %v476_v7 = vsel %vm471_vm1, %v446_v3, 0  ;;  %v522_v8 = vsel %vm471_vm1, %v447_v4, 0  ;;  %v614_v16 = vsel %vm471_vm1, %v449_v11, 0  ;;  %v424_v20 = vld [vmem:[%s3317_s28 + $0x10] sm:$0xff]  ;;  %v451_v21 = vpack.c.bf16 %v443_v15, %v443_v15  ;;  %v445_v25 = vld [vmem:[%s3309_s25 + $0x38] sm:$0xff]  ;;  %v427_v27 = vld [vmem:[%s3317_s28 + $0x28] sm:$0xff] }
  0x1f   : > { %2737 = vmatpush3.bf16.xpose.msra.mxu0 %v476_v7  ;;  %2743 = vmatpush3.bf16.xpose.msra.mxu1 %v522_v8  ;;  %v568_v17 = vsel %vm471_vm1, %v448_v12, 0  ;;  %v450_v22 = vpack.c.bf16 %v442_v18, %v442_v18  ;;  %v433_v23 = vpack.c.bf16 %v425_v19, %v425_v19  ;;  %v432_v24 = vpack.c.bf16 %v424_v20, %v424_v20  ;;  %v444_v29 = vld [vmem:[%s3309_s25 + $0x30] sm:$0xff]  ;;  %v426_v30 = vld [vmem:[%s3317_s28 + $0x20] sm:$0xff]  ;;  %v429_v36 = vld [vmem:[%s3317_s28 + $0x38] sm:$0xff]  ;;  %s3424_s25 = scalar_lea.vmem %s3992_s2, %s3303_s22  ;;  %s4000_s22 = sand.u32 1, %s3178_s10  }
  0x20   : > { %2754 = vmatprep.subr.bf16.mxu1 %v3188_v0  ;;  %2748 = vmatprep.subr.bf16.mxu0 %v3188_v0  ;;  %v706_v26 = vsel %vm471_vm1, %v451_v21, 0  ;;  %v453_v31 = vpack.c.bf16 %v445_v25, %v445_v25  ;;  %v435_v32 = vpack.c.bf16 %v427_v27, %v427_v27  ;;  %v452_v33 = vpack.c.bf16 %v444_v29, %v444_v29  ;;  %v428_v38 = vld [vmem:[%s3317_s28 + $0x30] sm:$0xff]  ;;  %v470_v41 = vld [vmem:[%s410_s17] sm:$0xff]  ;;  %s2537_s26 = sshll.u32 %s4000_s22, 6  ;;  %s2701_s22 = sshll.u32 %s3296_s21, 5 }
  0x21   : > { %v660_v28 = vsel %vm471_vm1, %v450_v22, 0  ;;  %v434_v35 = vpack.c.bf16 %v426_v30, %v426_v30  ;;  %v437_v39 = vpack.c.bf16 %v429_v36, %v429_v36  ;;  %v436_v40 = vpack.c.bf16 %v428_v38, %v428_v38  ;;  %s3438_s27 = scalar_lea.vmem [#allocation2], %s2537_s26  ;;  %s3190_s26 = smov 64  }
  0x22   : > { %v798_v34 = vsel %vm471_vm1, %v453_v31, 0  ;;  %v752_v37 = vsel %vm471_vm1, %v452_v33, 0  ;;  %vm848_vm2 = vcmp.ne.s32.totalorder %v470_v41, 0  ;;  %s415_s28 = scalar_lea.vmem %s3994_s4, %s2701_s22  ;;  %s2398_s14 = sshll.u32 %s3438_s27, 4  ;;  %s3930_s14 = int_to_ptr.vmem [resolvable:$true] %s2398_s14 }
  0x26   : > { %2739 = vmatmul.mubr.msk.bf16.vlgmr.msra.gmra.mrb[0].mxu0 %vm471_vm1, %v430_v13  ;;  %2745 = vmatmul.mubr.msk.bf16.vlgmr.msra.gmra.mrb[0].mxu1 %vm471_vm1, %v431_v14 }
  0x27   : > { %2755 = vmatpush3.bf16.xpose.msra.mxu1 %v614_v16  ;;  %2749 = vmatpush3.bf16.xpose.msra.mxu0 %v568_v17 }
  0x28   : > { %2756 = vmatprep.mubr.msk.bf16.mxu1 %vm3189_vm0, %v3188_v0  ;;  %2766 = vmatprep.subr.bf16.mxu1 %v3188_v0 }
  0x29   : > { %2750 = vmatprep.mubr.msk.bf16.mxu0 %vm3189_vm0, %v3188_v0  ;;  %2760 = vmatprep.subr.bf16.mxu0 %v3188_v0 }
  0x2e   : > { %2757 = vmatmul.mubr.msk.bf16.vlgmr.msra.gmra.mrb[4].mxu1 %vm471_vm1, %v433_v23  ;;  %2751 = vmatmul.mubr.msk.bf16.vlgmr.msra.gmra.mrb[4].mxu0 %vm471_vm1, %v432_v24 }
  0x2f   : > { %2767 = vmatpush3.bf16.xpose.msra.mxu1 %v706_v26  ;;  %2768 = vmatprep.mubr.msk.bf16.mxu1 %vm3189_vm0, %v3188_v0 }
  0x30   : > { %2778 = vmatprep.subr.bf16.mxu1 %v3188_v0  ;;  %2761 = vmatpush3.bf16.xpose.msra.mxu0 %v660_v28 }
  0x31   : > { %2762 = vmatprep.mubr.msk.bf16.mxu0 %vm3189_vm0, %v3188_v0  ;;  %2772 = vmatprep.subr.bf16.mxu0 %v3188_v0 }
  0x36   : > { %2769 = vmatmul.mubr.msk.bf16.vlgmr.msra.gmra.mrb[8].mxu1 %vm471_vm1, %v435_v32 }
  0x37   : > { %2779 = vmatpush3.bf16.xpose.msra.mxu1 %v798_v34  ;;  %2780 = vmatprep.mubr.msk.bf16.mxu1 %vm3189_vm0, %v3188_v0 }
  0x38   : > { %2763 = vmatmul.mubr.msk.bf16.vlgmr.msra.gmra.mrb[8].mxu0 %vm471_vm1, %v434_v35  ;;  %2790 = vmatprep.subr.bf16.mxu1 %v3188_v0 }
  0x39   : > { %2773 = vmatpush3.bf16.xpose.msra.mxu0 %v752_v37  ;;  %2774 = vmatprep.mubr.msk.bf16.mxu0 %vm3189_vm0, %v3188_v0 }
  0x3a   : > { %2784 = vmatprep.subr.bf16.mxu0 %v3188_v0 }
  0x3e   : > { %2781 = vmatmul.mubr.msk.bf16.vlgmr.msra.gmra.mrb[12].mxu1 %vm471_vm1, %v437_v39 }
  0x3f   : > { %2792 = vmatprep.mubr.msk.bf16.mxu1 %vm3189_vm0, %v3188_v0 }
  0x40   : > { %2775 = vmatmul.mubr.msk.bf16.vlgmr.msra.gmra.mrb[12].mxu0 %vm471_vm1, %v436_v40 }
  0x41   : > { %2786 = vmatprep.mubr.msk.bf16.mxu0 %vm3189_vm0, %v3188_v0 }
  0xf9   : > { %v512_v42 = vpop.f32.mrb[0].mxu0  ;;  %v558_v43 = vpop.f32.mrb[0].mxu1 }
  0xfa   : > { %v840_v44 = vmul.f32 0.125, %v512_v42  ;;  %v841_v45 = vmul.f32 0.125, %v558_v43  ;;  %v2746_v46 = vpop.f32.mrb[1].mxu1  ;;  %v2740_v47 = vpop.f32.mrb[1].mxu0 }
  0xfb   : > { %v561_v48 = vpop.f32.mrb[2].mxu1  ;;  %v515_v49 = vpop.f32.mrb[2].mxu0 }
  0xfc   : > { %v2747_v50 = vpop.f32.mrb[3].mxu1  ;;  %v852_v51 = vsel %vm848_vm2, -1e+09, %v841_v45  ;;  %v851_v52 = vsel %vm848_vm2, -1e+09, %v840_v44  ;;  %v2741_v53 = vpop.f32.mrb[3].mxu0 }
  0xfd   : > { %v863_v54 = vsel %vm859_vm3, %v852_v51, -inf  ;;  %v860_v55 = vsel %vm859_vm3, %v851_v52, -inf }
  0xfe   : > { %864 = vmax.xlane.f32.xlu0 %v863_v54  ;;  %861 = vmax.xlane.f32.xlu1 %v860_v55 }
 0x101   : > { %v650_v56 = vpop.f32.mrb[4].mxu1  ;;  %v604_v57 = vpop.f32.mrb[4].mxu0 }
 0x102   : > { %v843_v58 = vmul.f32 0.125, %v650_v56  ;;  %v2758_v59 = vpop.f32.mrb[5].mxu1  ;;  %v842_v60 = vmul.f32 0.125, %v604_v57  ;;  %v2752_v61 = vpop.f32.mrb[5].mxu0 }
 0x103   : > { %v653_v62 = vpop.f32.mrb[6].mxu1  ;;  %v607_v63 = vpop.f32.mrb[6].mxu0 }
 0x104   : > { %v2759_v1 = vpop.f32.mrb[7].mxu1  ;;  %v854_v2 = vsel %vm848_vm2, -1e+09, %v843_v58  ;;  %v853_v3 = vsel %vm848_vm2, -1e+09, %v842_v60  ;;  %v2753_v4 = vpop.f32.mrb[7].mxu0 }
 0x105   : > { %v869_v5 = vsel %vm859_vm3, %v854_v2, -inf  ;;  %v866_v6 = vsel %vm859_vm3, %v853_v3, -inf }
 0x106   : > { %870 = vmax.xlane.f32.xlu0 %v869_v5  ;;  %v454_v5 = vld [vmem:[%s3424_s25] sm:$0xff] }
 0x109   : > { %v742_v7 = vpop.f32.mrb[8].mxu1 }
 0x10a   : > { %v845_v8 = vmul.f32 0.125, %v742_v7  ;;  %867 = vmax.xlane.f32.xlu0 %v866_v6  ;;  %v2770_v9 = vpop.f32.mrb[9].mxu1  ;;  %v462_v6 = vpack.c.bf16 %v454_v5, %v454_v5  ;;  %v2931_v5 = vld [vmem:[%s3995_s5 + $0xa8] ss:$16 sps:$4 sm:$0xff]  }
 0x10b   : > { %v745_v10 = vpop.f32.mrb[10].mxu1  ;;  %v696_v21 = vpop.f32.mrb[8].mxu0 }
 0x10c   : > { %v856_v11 = vsel %vm848_vm2, -1e+09, %v845_v8  ;;  %v2771_v12 = vpop.f32.mrb[11].mxu1  ;;  %v844_v22 = vmul.f32 0.125, %v696_v21  ;;  %v2764_v23 = vpop.f32.mrb[9].mxu0  ;;  %v969_v7 = vsel %vm967_vm4, %v462_v6, 0 }
 0x10d   : > { %v875_v13 = vsel %vm859_vm3, %v856_v11, -inf  ;;  %v699_v24 = vpop.f32.mrb[10].mxu0  ;;  %2785 = vmatpush3.bf16.msra.mxu0 %v969_v7  ;;  %v457_v12 = vld [vmem:[%s3424_s25 + $0x18] sm:$0xff] }
 0x10e   : > { %876 = vmax.xlane.f32.xlu1 %v875_v13  ;;  %v3390_v25 = vsel %vm848_vm2, -1e+09, %v844_v22  ;;  %v2765_v26 = vpop.f32.mrb[11].mxu0  ;;  %2796 = vmatprep.subr.bf16.mxu0 %v3188_v0  ;;  %v2939_v6 = vld [vmem:[%s3995_s5 + $0xcc] ss:$16 sps:$4 sm:$0xff]  }
 0x10f   : > { %v872_v49 = vsel %vm859_vm3, %v3390_v25, -inf  ;;  %v456_v26 = vld [vmem:[%s3424_s25 + $0x10] sm:$0xff]  ;;  %v2937_v7 = vld [vmem:[%s3995_s5 + $0xc8] ss:$16 sps:$4 sm:$0xff]  }
 0x111   : > { %v834_v14 = vpop.f32.mrb[12].mxu1 }
 0x112   : > { %v847_v15 = vmul.f32 0.125, %v834_v14  ;;  %v2782_v16 = vpop.f32.mrb[13].mxu1 }
 0x113   : > { %v837_v17 = vpop.f32.mrb[14].mxu1  ;;  %v788_v27 = vpop.f32.mrb[12].mxu0 }
 0x114   : > { %v858_v18 = vsel %vm848_vm2, -1e+09, %v847_v15  ;;  %v2783_v19 = vpop.f32.mrb[15].mxu1  ;;  %v846_v28 = vmul.f32 0.125, %v788_v27  ;;  %v2776_v29 = vpop.f32.mrb[13].mxu0  ;;  %v465_v15 = vpack.c.bf16 %v457_v12, %v457_v12 }
 0x115   : > { %v881_v20 = vsel %vm859_vm3, %v858_v18, -inf  ;;  %v791_v30 = vpop.f32.mrb[14].mxu0  ;;  %v2957_v12 = vld [vmem:[%s3995_s5 + $0x12c] ss:$16 sps:$4 sm:$0xff]  }
 0x116   : > { %882 = vmax.xlane.f32.xlu1 %v881_v20  ;;  %v3393_v31 = vsel %vm848_vm2, -1e+09, %v846_v28  ;;  %v2777_v32 = vpop.f32.mrb[15].mxu0  ;;  %v1107_v22 = vsel %vm967_vm4, %v465_v15, 0  ;;  %v2963_v15 = vld [vmem:[%s3995_s5 + $0x14c] ss:$16 sps:$4 sm:$0xff]  }
 0x117   : > { %v878_v57 = vsel %vm859_vm3, %v3393_v31, -inf }
 0x18b   : > { %v865_v33 = vpop.xlane.xlu0 %864  ;;  %v862_v34 = vpop.xlane.xlu1 %861 }
 0x18c   : > { %v885_v35 = vsub.f32 %v852_v51, %v865_v33  ;;  %v884_v37 = vsub.f32 %v851_v52, %v862_v34 }
 0x18e   : > { %v894_v36 = vmul.f32 1.442695, %v885_v35  ;;  %v892_v38 = vmul.f32 1.442695, %v884_v37 }
 0x190   : > { %3090 = vpow2.f32 %v894_v36 }
 0x191   : > { %3092 = vpow2.f32 %v892_v38 }
 0x193   : > { %v871_v39 = vpop.xlane.xlu0 %870 }
 0x194   : > { %v887_v40 = vsub.f32 %v854_v2, %v871_v39  ;;  %v455_v2 = vld [vmem:[%s3424_s25 + $0x8] sm:$0xff] }
 0x196   : > { %v898_v42 = vmul.f32 1.442695, %v887_v40 }
 0x197   : > { %v868_v43 = vpop.xlane.xlu0 %867 }
 0x198   : > { %3094 = vpow2.f32 %v898_v42  ;;  %v886_v44 = vsub.f32 %v853_v3, %v868_v43  ;;  %v463_v3 = vpack.c.bf16 %v455_v2, %v455_v2  ;;  %v461_v43 = vld [vmem:[%s3424_s25 + $0x38] sm:$0xff] }
 0x199   : > { %v2927_v2 = vld [vmem:[%s3995_s5 + $0x8c] ss:$16 sps:$4 sm:$0xff]  }
 0x19a   : > { %v3091_v45 = vpop.eup %3090  ;;  %v896_v46 = vmul.f32 1.442695, %v886_v44  ;;  %v1015_v4 = vsel %vm967_vm4, %v463_v3, 0  ;;  %v2925_v3 = vld [vmem:[%s3995_s5 + $0x88] ss:$16 sps:$4 sm:$0xff]  }
 0x19b   : > { %v877_v41 = vpop.xlane.xlu1 %876  ;;  %v911_v47 = vsel %vm859_vm3, %v3091_v45, 0.0  ;;  %v3398_v51 = vpop.eup %3092  ;;  %2791 = vmatpush3.bf16.msra.mxu1 %v1015_v4  ;;  %v2933_v4 = vld [vmem:[%s3995_s5 + $0xac] ss:$16 sps:$4 sm:$0xff]  }
 0x19c   : > { %3096 = vpow2.f32 %v896_v46  ;;  %v889_v48 = vsub.f32 %v856_v11, %v877_v41  ;;  %912 = vadd.xlane.f32.xlu0 %v911_v47  ;;  %v908_v55 = vsel %vm859_vm3, %v3398_v51, 0.0  ;;  %2802 = vmatprep.subr.bf16.mxu1 %v3188_v0 }
 0x19e   : > { %v902_v50 = vmul.f32 1.442695, %v889_v48 }
 0x1a0   : > { %3098 = vpow2.f32 %v902_v50  ;;  %873 = vmax.xlane.f32.xlu0 %v872_v49 }
 0x1a2   : > { %v3400_v52 = vpop.eup %3094 }
 0x1a3   : > { %v883_v53 = vpop.xlane.xlu1 %882  ;;  %v917_v54 = vsel %vm859_vm3, %v3400_v52, 0.0 }
 0x1a4   : > { %v891_v56 = vsub.f32 %v858_v18, %v883_v53  ;;  %918 = vadd.xlane.f32.xlu1 %v917_v54  ;;  %909 = vadd.xlane.f32.xlu0 %v908_v55  ;;  %v458_v54 = vld [vmem:[%s3424_s25 + $0x20] sm:$0xff] }
 0x1a5   : > { %v466_v55 = vpack.c.bf16 %v458_v54, %v458_v54  ;;  %v2960_v54 = vld [vmem:[%s3995_s5 + $0x144] ss:$16 sps:$4 sm:$0xff]  }
 0x1a6   : > { %v3408_v58 = vpop.eup %3096  ;;  %v906_v59 = vmul.f32 1.442695, %v891_v56 }
 0x1a7   : > { %v914_v60 = vsel %vm859_vm3, %v3408_v58, 0.0  ;;  %v1153_v56 = vsel %vm967_vm4, %v466_v55, 0  ;;  %v2958_v55 = vld [vmem:[%s3995_s5 + $0x140] ss:$16 sps:$4 sm:$0xff]  }
 0x1a8   : > { %3100 = vpow2.f32 %v906_v59  ;;  %915 = vadd.xlane.f32.xlu0 %v914_v60  ;;  %879 = vmax.xlane.f32.xlu1 %v878_v57  ;;  %v2901_v57 = vld [vmem:[%s3995_s5 + $0x8] ss:$16 sps:$4 sm:$0xff]   ;;  %v2909_v59 = vld [vmem:[%s3995_s5 + $0x2c] ss:$16 sps:$4 sm:$0xff]  }
 0x1a9   : > { %v2907_v60 = vld [vmem:[%s3995_s5 + $0x28] ss:$16 sps:$4 sm:$0xff]  }
 0x1aa   : > { %v3412_v61 = vpop.eup %3098 }
 0x1ab   : > { %v923_v62 = vsel %vm859_vm3, %v3412_v61, 0.0 }
 0x1ac   : > { %924 = vadd.xlane.f32.xlu1 %v923_v62  ;;  %v2913_v62 = vld [vmem:[%s3995_s5 + $0x48] ss:$16 sps:$4 sm:$0xff]  }
 0x1b2   : > { %v3416_v63 = vpop.eup %3100 }
 0x1b3   : > { %v929_v1 = vsel %vm859_vm3, %v3416_v63, 0.0 }
 0x1b4   : > { %930 = vadd.xlane.f32.xlu1 %v929_v1  ;;  %v2919_v1 = vld [vmem:[%s3995_s5 + $0x68] ss:$16 sps:$4 sm:$0xff]  }
 0x229   : > { %v913_v8 = vpop.xlane.xlu0 %912 }
 0x22a   : > { %3102 = vrcp.f32 %v913_v8  ;;  %v2945_v8 = vld [vmem:[%s3995_s5 + $0xec] ss:$16 sps:$4 sm:$0xff]  }
 0x22d   : > { %v874_v9 = vpop.xlane.xlu0 %873 }
 0x22e   : > { %v888_v10 = vsub.f32 %v3390_v25, %v874_v9  ;;  %v459_v25 = vld [vmem:[%s3424_s25 + $0x28] sm:$0xff] }
 0x22f   : > { %v467_v28 = vpack.c.bf16 %v459_v25, %v459_v25  ;;  %v2943_v9 = vld [vmem:[%s3995_s5 + $0xe8] ss:$16 sps:$4 sm:$0xff]  }
 0x230   : > { %v900_v11 = vmul.f32 1.442695, %v888_v10  ;;  %v2951_v10 = vld [vmem:[%s3995_s5 + $0x10c] ss:$16 sps:$4 sm:$0xff]  }
 0x231   : > { %v919_v13 = vpop.xlane.xlu1 %918  ;;  %v910_v14 = vpop.xlane.xlu0 %909  ;;  %v1199_v37 = vsel %vm967_vm4, %v467_v28, 0  ;;  %v2900_v28 = vld [vmem:[%s3995_s5 + $0x4] ss:$16 sps:$4 sm:$0xff]  }
 0x232   : > { %3104 = vpow2.f32 %v900_v11  ;;  %v2949_v11 = vld [vmem:[%s3995_s5 + $0x108] ss:$16 sps:$4 sm:$0xff]  }
 0x233   : > { %3106 = vrcp.f32 %v919_v13 }
 0x234   : > { %v3103_v16 = vpop.eup %3102  ;;  %3108 = vrcp.f32 %v910_v14  ;;  %v2955_v14 = vld [vmem:[%s3995_s5 + $0x128] ss:$16 sps:$4 sm:$0xff]  }
 0x235   : > { %v941_v17 = vmul.f32 %v3103_v16, %v3091_v45  ;;  %v916_v18 = vpop.xlane.xlu0 %915  ;;  %v880_v19 = vpop.xlane.xlu1 %879  ;;  %v469_v45 = vpack.c.bf16 %v461_v43, %v461_v43  ;;  %v2961_v16 = vld [vmem:[%s3995_s5 + $0x148] ss:$16 sps:$4 sm:$0xff]   ;;  %v2924_v43 = vld [vmem:[%s3995_s5 + $0x84] ss:$16 sps:$4 sm:$0xff]  }
 0x236   : > { %3110 = vrcp.f32 %v916_v18  ;;  %v890_v20 = vsub.f32 %v3393_v31, %v880_v19  ;;  %v464_v31 = vpack.c.bf16 %v456_v26, %v456_v26  ;;  %v460_v18 = vld [vmem:[%s3424_s25 + $0x30] sm:$0xff]  ;;  %s3124_s25 = scalar_lea.vmem %s3930_s14, 1024 }
 0x237   : > { %949 = vst.msk [vmem:[%s3438_s27 + $0x8] sm:$0xff] %vm859_vm3, %v941_v17  ;;  %v957_v21 = vpack.c.bf16 %v941_v17, %v941_v17  ;;  %v1291_v49 = vsel %vm967_vm4, %v469_v45, 0  ;;  %v2969_v17 = vld [vmem:[%s3995_s5 + $0x16c] ss:$16 sps:$4 sm:$0xff]   ;;  %v2930_v45 = vld [vmem:[%s3995_s5 + $0xa4] ss:$16 sps:$4 sm:$0xff]   ;;  %p3125_p11 = scmp.ne.s32.totalorder %s3930_s14, %s3124_s25 }
 0x238   : > { %v904_v23 = vmul.f32 1.442695, %v890_v20  ;;  %v1061_v42 = vsel %vm967_vm4, %v464_v31, 0  ;;  %v2967_v20 = vld [vmem:[%s3995_s5 + $0x168] ss:$16 sps:$4 sm:$0xff]  }
 0x239   : > { %2793 = vmatmul.mubr.msk.bf16.vlgmr.msra.gmra.mrb[16].mxu1 %vm859_vm3, %v957_v21  ;;  %v925_v24 = vpop.xlane.xlu1 %924  ;;  %v468_v21 = vpack.c.bf16 %v460_v18, %v460_v18  ;;  %v2988_v18 = vld [vmem:[%s3995_s5 + $0x1e0] ss:$16 sps:$4 sm:$0xff]   ;;  %p3126_p12 = pnand %p3125_p11, %p3282_p5 }
 0x23a   : > { %3112 = vpow2.f32 %v904_v23  ;;  %2803 = vmatpush3.bf16.msra.mxu1 %v1107_v22  ;;  %2804 = vmatprep.mubr.msk.bf16.mxu1 %vm3189_vm0, %v3188_v0  ;;  %v2975_v22 = vld [vmem:[%s3995_s5 + $0x18c] ss:$16 sps:$4 sm:$0xff]  }
 0x23b   : > { %3114 = vrcp.f32 %v925_v24  ;;  %2814 = vmatprep.subr.bf16.mxu1 %v3188_v0  ;;  %v1245_v26 = vsel %vm967_vm4, %v468_v21, 0  ;;  %p3127_p13 = pneg %p3126_p12 }
 0x23c   : > { %v3449_v27 = vpop.eup %3104 }
 0x23d   : > { %v3107_v29 = vpop.eup %3106  ;;  %v920_v30 = vsel %vm859_vm3, %v3449_v27, 0.0 }
 0x23e   : > { %v3109_v32 = vpop.eup %3108  ;;  %v943_v33 = vmul.f32 %v3107_v29, %v3400_v52  ;;  %921 = vadd.xlane.f32.xlu0 %v920_v30  ;;  %v2973_v29 = vld [vmem:[%s3995_s5 + $0x188] ss:$16 sps:$4 sm:$0xff]  }
 0x23f   : > { %v940_v34 = vmul.f32 %v3109_v32, %v3398_v51  ;;  %v2979_v30 = vld [vmem:[%s3995_s5 + $0x1a8] ss:$16 sps:$4 sm:$0xff]   ;;  %v2987_v32 = vld [vmem:[%s3995_s5 + $0x1cc] ss:$16 sps:$4 sm:$0xff]  }
 0x240   : > { %v3111_v35 = vpop.eup %3110  ;;  %951 = vst.msk [vmem:[%s3438_s27 + $0x18] sm:$0xff] %vm859_vm3, %v943_v33  ;;  %v959_v36 = vpack.c.bf16 %v943_v33, %v943_v33 }
 0x241   : > { %948 = vst.msk [vmem:[%s3438_s27] sm:$0xff] %vm859_vm3, %v940_v34  ;;  %v942_v38 = vmul.f32 %v3111_v35, %v3408_v58  ;;  %v956_v39 = vpack.c.bf16 %v940_v34, %v940_v34  ;;  %v931_v40 = vpop.xlane.xlu1 %930  ;;  %v2903_v58 = vld [vmem:[%s3995_s5 + $0xc] ss:$16 sps:$4 sm:$0xff]   ;;  %v2898_v34 = vld [vmem:[%s3995_s5] ss:$16 sps:$4 sm:$0xff]  }
 0x242   : > { %2805 = vmatmul.mubr.msk.bf16.vlgmr.msra.gmra.mrb[20].mxu1 %vm859_vm3, %v959_v36  ;;  %3116 = vrcp.f32 %v931_v40  ;;  %v2906_v35 = vld [vmem:[%s3995_s5 + $0x24] ss:$16 sps:$4 sm:$0xff]   ;;  %v2985_v36 = vld [vmem:[%s3995_s5 + $0x1c8] ss:$16 sps:$4 sm:$0xff]  }
 0x243   : > { %950 = vst.msk [vmem:[%s3438_s27 + $0x10] sm:$0xff] %vm859_vm3, %v942_v38  ;;  %2787 = vmatmul.mubr.msk.bf16.vlgmr.msra.gmra.mrb[16].mxu0 %vm859_vm3, %v956_v39  ;;  %2815 = vmatpush3.bf16.msra.mxu1 %v1199_v37  ;;  %v958_v50 = vpack.c.bf16 %v942_v38, %v942_v38  ;;  %v2904_v37 = vld [vmem:[%s3995_s5 + $0x20] ss:$16 sps:$4 sm:$0xff]   ;;  %v2912_v38 = vld [vmem:[%s3995_s5 + $0x44] ss:$16 sps:$4 sm:$0xff]  }
 0x244   : > { %v3467_v44 = vpop.eup %3112  ;;  %2797 = vmatpush3.bf16.msra.mxu0 %v1061_v42  ;;  %2798 = vmatprep.mubr.msk.bf16.mxu0 %vm3189_vm0, %v3188_v0  ;;  %v2910_v39 = vld [vmem:[%s3995_s5 + $0x40] ss:$16 sps:$4 sm:$0xff]   ;;  %v2918_v40 = vld [vmem:[%s3995_s5 + $0x64] ss:$16 sps:$4 sm:$0xff]  }
 0x245   : > { %v3115_v46 = vpop.eup %3114  ;;  %v926_v41 = vsel %vm859_vm3, %v3467_v44, 0.0  ;;  %2816 = vmatprep.mubr.msk.bf16.mxu1 %vm3189_vm0, %v3188_v0  ;;  %2826 = vmatprep.subr.bf16.mxu1 %v3188_v0  ;;  %v2916_v42 = vld [vmem:[%s3995_s5 + $0x60] ss:$16 sps:$4 sm:$0xff]  }
 0x246   : > { %v945_v47 = vmul.f32 %v3115_v46, %v3412_v61  ;;  %927 = vadd.xlane.f32.xlu1 %v926_v41  ;;  %2808 = vmatprep.subr.bf16.mxu0 %v3188_v0  ;;  %v2915_v61 = vld [vmem:[%s3995_s5 + $0x4c] ss:$16 sps:$4 sm:$0xff]   ;;  %v2928_v46 = vld [vmem:[%s3995_s5 + $0xa0] ss:$16 sps:$4 sm:$0xff]   ;;  %v2936_v41 = vld [vmem:[%s3995_s5 + $0xc4] ss:$16 sps:$4 sm:$0xff]  }
 0x248   : > { %953 = vst.msk [vmem:[%s3438_s27 + $0x28] sm:$0xff] %vm859_vm3, %v945_v47  ;;  %v961_v48 = vpack.c.bf16 %v945_v47, %v945_v47  ;;  %v2934_v47 = vld [vmem:[%s3995_s5 + $0xc0] ss:$16 sps:$4 sm:$0xff]  }
 0x24a   : > { %2817 = vmatmul.mubr.msk.bf16.vlgmr.msra.gmra.mrb[24].mxu1 %vm859_vm3, %v961_v48  ;;  %v2942_v48 = vld [vmem:[%s3995_s5 + $0xe4] ss:$16 sps:$4 sm:$0xff]  }
 0x24b   : > { %2799 = vmatmul.mubr.msk.bf16.vlgmr.msra.gmra.mrb[20].mxu0 %vm859_vm3, %v958_v50  ;;  %2827 = vmatpush3.bf16.msra.mxu1 %v1291_v49  ;;  %v2940_v49 = vld [vmem:[%s3995_s5 + $0xe0] ss:$16 sps:$4 sm:$0xff]   ;;  %v2948_v50 = vld [vmem:[%s3995_s5 + $0x104] ss:$16 sps:$4 sm:$0xff]  }
 0x24c   : > { %v3117_v51 = vpop.eup %3116  ;;  %2828 = vmatprep.mubr.msk.bf16.mxu1 %vm3189_vm0, %v3188_v0  ;;  %2810 = vmatprep.mubr.msk.bf16.mxu0 %vm3189_vm0, %v3188_v0 }
 0x24d   : > { %v947_v52 = vmul.f32 %v3117_v51, %v3416_v63  ;;  %2809 = vmatpush3.bf16.msra.mxu0 %v1153_v56  ;;  %2211 = vmatprep.subr.bf16.mxu1 %v2903_v58  ;;  %v2921_v63 = vld [vmem:[%s3995_s5 + $0x6c] ss:$16 sps:$4 sm:$0xff]   ;;  %v2946_v51 = vld [vmem:[%s3995_s5 + $0x100] ss:$16 sps:$4 sm:$0xff]   ;;  %v2966_v56 = vld [vmem:[%s3995_s5 + $0x164] ss:$16 sps:$4 sm:$0xff]  }
 0x24e   : > { %2820 = vmatprep.subr.bf16.mxu0 %v3188_v0 }
 0x24f   : > { %955 = vst.msk [vmem:[%s3438_s27 + $0x38] sm:$0xff] %vm859_vm3, %v947_v52  ;;  %v963_v53 = vpack.c.bf16 %v947_v52, %v947_v52  ;;  %v2954_v52 = vld [vmem:[%s3995_s5 + $0x124] ss:$16 sps:$4 sm:$0xff]  }
 0x252   : > { %2829 = vmatmul.mubr.msk.bf16.vlgmr.msra.gmra.mrb[28].mxu1 %vm859_vm3, %v963_v53  ;;  %v2952_v53 = vld [vmem:[%s3995_s5 + $0x120] ss:$16 sps:$4 sm:$0xff]  }
 0x253   : > { %2212 = vmatpush1.bf16.msra.mxu1 %v2901_v57  ;;  %v2993_v57 = vld [vmem:[%s3995_s5 + $0x1ec] ss:$16 sps:$4 sm:$0xff]  }
 0x254   : > { %2213 = vmatprep.subr.bf16.mxu1 %v2909_v59  ;;  %v2964_v59 = vld [vmem:[%s3995_s5 + $0x160] ss:$16 sps:$4 sm:$0xff]  }
 0x257   : > { %2214 = vmatpush1.bf16.msra.mxu1 %v2907_v60  ;;  %v2991_v60 = vld [vmem:[%s3995_s5 + $0x1e8] ss:$16 sps:$4 sm:$0xff]  }
 0x258   : > { %2215 = vmatprep.subr.bf16.mxu1 %v2915_v61 }
 0x25b   : > { %2216 = vmatpush1.bf16.msra.mxu1 %v2913_v62  ;;  %v2972_v62 = vld [vmem:[%s3995_s5 + $0x184] ss:$16 sps:$4 sm:$0xff]  }
 0x25c   : > { %2217 = vmatprep.subr.bf16.mxu1 %v2921_v63 }
 0x25f   : > { %2218 = vmatpush1.bf16.msra.mxu1 %v2919_v1 }
 0x260   : > { %2219 = vmatprep.subr.bf16.mxu1 %v2927_v2  ;;  %v2999_v2 = vld [vmem:[%s3995_s5 + $0x20c] ss:$16 sps:$4 sm:$0xff]  }
 0x263   : > { %2220 = vmatpush1.bf16.msra.mxu1 %v2925_v3  ;;  %v2970_v3 = vld [vmem:[%s3995_s5 + $0x180] ss:$16 sps:$4 sm:$0xff]  }
 0x264   : > { %2221 = vmatprep.subr.bf16.mxu1 %v2933_v4  ;;  %v2978_v4 = vld [vmem:[%s3995_s5 + $0x1a4] ss:$16 sps:$4 sm:$0xff]  }
 0x267   : > { %2222 = vmatpush1.bf16.msra.mxu1 %v2931_v5  ;;  %v2976_v5 = vld [vmem:[%s3995_s5 + $0x1a0] ss:$16 sps:$4 sm:$0xff]  }
 0x268   : > { %2223 = vmatprep.subr.bf16.mxu1 %v2939_v6 }
 0x26b   : > { %2224 = vmatpush1.bf16.msra.mxu1 %v2937_v7  ;;  %v2984_v7 = vld [vmem:[%s3995_s5 + $0x1c4] ss:$16 sps:$4 sm:$0xff]  }
 0x26c   : > { %2225 = vmatprep.subr.bf16.mxu1 %v2945_v8 }
 0x26f   : > { %2226 = vmatpush1.bf16.msra.mxu1 %v2943_v9 }
 0x270   : > { %2227 = vmatprep.subr.bf16.mxu1 %v2951_v10 }
 0x273   : > { %2228 = vmatpush1.bf16.msra.mxu1 %v2949_v11 }
 0x274   : > { %2229 = vmatprep.subr.bf16.mxu1 %v2957_v12 }
 0x277   : > { %2230 = vmatpush1.bf16.msra.mxu1 %v2955_v14 }
 0x278   : > { %2231 = vmatprep.subr.bf16.mxu1 %v2963_v15  ;;  %v2982_v15 = vld [vmem:[%s3995_s5 + $0x1c0] ss:$16 sps:$4 sm:$0xff]  }
 0x27b   : > { %2232 = vmatpush1.bf16.msra.mxu1 %v2961_v16 }
 0x27c   : > { %2233 = vmatprep.subr.bf16.mxu1 %v2969_v17  ;;  %v2990_v17 = vld [vmem:[%s3995_s5 + $0x1e4] ss:$16 sps:$4 sm:$0xff]  }
 0x27f   : > { %2234 = vmatpush1.bf16.msra.mxu1 %v2967_v20  ;;  %v2996_v20 = vld [vmem:[%s3995_s5 + $0x204] ss:$16 sps:$4 sm:$0xff]  }
 0x280   : > { %2235 = vmatprep.subr.bf16.mxu1 %v2975_v22 }
 0x283   : > { %2236 = vmatpush1.bf16.msra.mxu1 %v2973_v29 }
 0x2cb   : > { %v922_v13 = vpop.xlane.xlu0 %921 }
 0x2cc   : > { %3118 = vrcp.f32 %v922_v13 }
 0x2d3   : > { %v928_v19 = vpop.xlane.xlu1 %927 }
 0x2d4   : > { %3120 = vrcp.f32 %v928_v19 }
 0x2d6   : > { %v3119_v23 = vpop.eup %3118 }
 0x2d7   : > { %v944_v24 = vmul.f32 %v3119_v23, %v3449_v27  ;;  %v2981_v27 = vld [vmem:[%s3995_s5 + $0x1ac] ss:$16 sps:$4 sm:$0xff]  }
 0x2d8   : > { %2237 = vmatprep.subr.bf16.mxu1 %v2981_v27 }
 0x2d9   : > { %952 = vst.msk [vmem:[%s3438_s27 + $0x20] sm:$0xff] %vm859_vm3, %v944_v24  ;;  %v960_v25 = vpack.c.bf16 %v944_v24, %v944_v24  ;;  %2238 = vmatpush1.bf16.msra.mxu1 %v2979_v30 }
 0x2da   : > { %2239 = vmatprep.subr.bf16.mxu1 %v2987_v32 }
 0x2db   : > { %2811 = vmatmul.mubr.msk.bf16.vlgmr.msra.gmra.mrb[24].mxu0 %vm859_vm3, %v960_v25 }
 0x2dc   : > { %2821 = vmatpush3.bf16.msra.mxu0 %v1245_v26  ;;  %2822 = vmatprep.mubr.msk.bf16.mxu0 %vm3189_vm0, %v3188_v0 }
 0x2dd   : > { %2129 = vmatprep.subr.bf16.mxu0 %v2900_v28  ;;  %2240 = vmatpush1.bf16.msra.mxu1 %v2985_v36 }
 0x2de   : > { %v3121_v31 = vpop.eup %3120  ;;  %2241 = vmatprep.subr.bf16.mxu1 %v2993_v57  ;;  %v3026_v57 = vld [vmem:[%s3995_s5 + $0x2a4] ss:$16 sps:$4 sm:$0xff]  }
 0x2df   : > { %v946_v33 = vmul.f32 %v3121_v31, %v3467_v44  ;;  %v2922_v44 = vld [vmem:[%s3995_s5 + $0x80] ss:$16 sps:$4 sm:$0xff]  }
 0x2e1   : > { %954 = vst.msk [vmem:[%s3438_s27 + $0x30] sm:$0xff] %vm859_vm3, %v946_v33  ;;  %v962_v0 = vpack.c.bf16 %v946_v33, %v946_v33  ;;  %2242 = vmatpush1.bf16.msra.mxu1 %v2991_v60  ;;  %v3027_v60 = vld [vmem:[%s3995_s5 + $0x2a8] ss:$16 sps:$4 sm:$0xff]   ;;  %s3128_s27 = sshll.u32 %s3191_s13, 4  ;;  %s3129_s27 = int_to_ptr.vmem [resolvable:$false] %s3128_s27 }
 0x2e2   : > { %2252 = vmatprep.subr.bf16.mxu1 %v2999_v2  ;;  %v3038_v2 = vld [vmem:[%s3995_s5 + $0x2e4] ss:$16 sps:$4 sm:$0xff]   ;;  %p3131_p0 = scmp.lt.s32.totalorder %s3930_s14, %s3129_s27 }
 0x2e3   : > { %2823 = vmatmul.mubr.msk.bf16.vlgmr.msra.gmra.mrb[28].mxu0 %vm859_vm3, %v962_v0 }
 0x2e4   : > { %2130 = vmatpush1.bf16.msra.mxu0 %v2898_v34 }
 0x2e5   : > { %2131 = vmatprep.subr.bf16.mxu0 %v2906_v35 }
 0x2e8   : > { %2132 = vmatpush1.bf16.msra.mxu0 %v2904_v37 }
 0x2e9   : > { %2133 = vmatprep.subr.bf16.mxu0 %v2912_v38 }
 0x2ec   : > { %2134 = vmatpush1.bf16.msra.mxu0 %v2910_v39  ;;  %v2994_v39 = vld [vmem:[%s3995_s5 + $0x200] ss:$16 sps:$4 sm:$0xff]  }
 0x2ed   : > { %2135 = vmatprep.subr.bf16.mxu0 %v2918_v40  ;;  %v2997_v40 = vld [vmem:[%s3995_s5 + $0x208] ss:$16 sps:$4 sm:$0xff]  }
 0x2f0   : > { %2136 = vmatpush1.bf16.msra.mxu0 %v2916_v42  ;;  %v3002_v42 = vld [vmem:[%s3995_s5 + $0x224] ss:$16 sps:$4 sm:$0xff]  }
 0x2f1   : > { %2137 = vmatprep.subr.bf16.mxu0 %v2924_v43  ;;  %v3005_v43 = vld [vmem:[%s3995_s5 + $0x22c] ss:$16 sps:$4 sm:$0xff]  }
 0x2f4   : > { %2138 = vmatpush1.bf16.msra.mxu0 %v2922_v44  ;;  %v3000_v44 = vld [vmem:[%s3995_s5 + $0x220] ss:$16 sps:$4 sm:$0xff]  }
 0x2f5   : > { %2139 = vmatprep.subr.bf16.mxu0 %v2930_v45  ;;  %v3003_v45 = vld [vmem:[%s3995_s5 + $0x228] ss:$16 sps:$4 sm:$0xff]  }
 0x2f8   : > { %2140 = vmatpush1.bf16.msra.mxu0 %v2928_v46  ;;  %v3008_v46 = vld [vmem:[%s3995_s5 + $0x244] ss:$16 sps:$4 sm:$0xff]  }
 0x2f9   : > { %2141 = vmatprep.subr.bf16.mxu0 %v2936_v41  ;;  %v3011_v41 = vld [vmem:[%s3995_s5 + $0x24c] ss:$16 sps:$4 sm:$0xff]  }
 0x2fc   : > { %2142 = vmatpush1.bf16.msra.mxu0 %v2934_v47  ;;  %v3006_v47 = vld [vmem:[%s3995_s5 + $0x240] ss:$16 sps:$4 sm:$0xff]  }
 0x2fd   : > { %2143 = vmatprep.subr.bf16.mxu0 %v2942_v48  ;;  %v3009_v48 = vld [vmem:[%s3995_s5 + $0x248] ss:$16 sps:$4 sm:$0xff]  }
 0x300   : > { %2144 = vmatpush1.bf16.msra.mxu0 %v2940_v49  ;;  %v3014_v49 = vld [vmem:[%s3995_s5 + $0x264] ss:$16 sps:$4 sm:$0xff]  }
 0x301   : > { %2145 = vmatprep.subr.bf16.mxu0 %v2948_v50  ;;  %v3017_v50 = vld [vmem:[%s3995_s5 + $0x26c] ss:$16 sps:$4 sm:$0xff]  }
 0x304   : > { %2146 = vmatpush1.bf16.msra.mxu0 %v2946_v51  ;;  %v3012_v51 = vld [vmem:[%s3995_s5 + $0x260] ss:$16 sps:$4 sm:$0xff]  }
 0x305   : > { %2147 = vmatprep.subr.bf16.mxu0 %v2954_v52  ;;  %v3015_v52 = vld [vmem:[%s3995_s5 + $0x268] ss:$16 sps:$4 sm:$0xff]  }
 0x308   : > { %2148 = vmatpush1.bf16.msra.mxu0 %v2952_v53  ;;  %v3020_v53 = vld [vmem:[%s3995_s5 + $0x284] ss:$16 sps:$4 sm:$0xff]  }
 0x309   : > { %2149 = vmatprep.subr.bf16.mxu0 %v2960_v54  ;;  %v3023_v54 = vld [vmem:[%s3995_s5 + $0x28c] ss:$16 sps:$4 sm:$0xff]  }
 0x30c   : > { %v1051_v58 = vpop.f32.mrb[16].mxu1  ;;  %2150 = vmatpush1.bf16.msra.mxu0 %v2958_v55  ;;  %v3018_v55 = vld [vmem:[%s3995_s5 + $0x280] ss:$16 sps:$4 sm:$0xff]  }
 0x30d   : > { %v2794_v61 = vpop.f32.mrb[17].mxu1  ;;  %2151 = vmatprep.subr.bf16.mxu0 %v2966_v56  ;;  %v3021_v56 = vld [vmem:[%s3995_s5 + $0x288] ss:$16 sps:$4 sm:$0xff]  }
 0x30e   : > { %v1054_v63 = vpop.f32.mrb[18].mxu1  ;;  %v3032_v61 = vld [vmem:[%s3995_s5 + $0x2c4] ss:$16 sps:$4 sm:$0xff]  }
 0x30f   : > { %v2795_v1 = vpop.f32.mrb[19].mxu1  ;;  %v3030_v63 = vld [vmem:[%s3995_s5 + $0x2c0] ss:$16 sps:$4 sm:$0xff]  }
 0x310   : > { %2152 = vmatpush1.bf16.msra.mxu0 %v2964_v59  ;;  %v3024_v59 = vld [vmem:[%s3995_s5 + $0x2a0] ss:$16 sps:$4 sm:$0xff]   ;;  %v3033_v1 = vld [vmem:[%s3995_s5 + $0x2c8] ss:$16 sps:$4 sm:$0xff]  }
 0x311   : > { %2153 = vmatprep.subr.bf16.mxu0 %v2972_v62  ;;  %v3035_v62 = vld [vmem:[%s3995_s5 + $0x2cc] ss:$16 sps:$4 sm:$0xff]  }
 0x314   : > { %2154 = vmatpush1.bf16.msra.mxu0 %v2970_v3  ;;  %v3041_v3 = vld [vmem:[%s3995_s5 + $0x2ec] ss:$16 sps:$4 sm:$0xff]  }
 0x315   : > { %v1143_v6 = vpop.f32.mrb[20].mxu1  ;;  %2155 = vmatprep.subr.bf16.mxu0 %v2978_v4  ;;  %v3036_v4 = vld [vmem:[%s3995_s5 + $0x2e0] ss:$16 sps:$4 sm:$0xff]  }
 0x316   : > { %v1005_v8 = vpop.f32.mrb[16].mxu0  ;;  %v2888_v9 = vpack.i.bf16 %v1051_v58, %v1143_v6  ;;  %v2806_v10 = vpop.f32.mrb[21].mxu1  ;;  %v3029_v58 = vld [vmem:[%s3995_s5 + $0x2ac] ss:$16 sps:$4 sm:$0xff]   ;;  %v3044_v6 = vld [vmem:[%s3995_s5 + $0x304] ss:$16 sps:$4 sm:$0xff]  }
 0x317   : > { %v2788_v11 = vpop.f32.mrb[17].mxu0  ;;  %v1146_v12 = vpop.f32.mrb[22].mxu1  ;;  %v3045_v10 = vld [vmem:[%s3995_s5 + $0x308] ss:$16 sps:$4 sm:$0xff]  }
 0x318   : > { %v1008_v13 = vpop.f32.mrb[18].mxu0  ;;  %v2807_v14 = vpop.f32.mrb[23].mxu1  ;;  %2889 = vrot.lane.b32.xlu0 %v2888_v9, %s3190_s26  ;;  %2156 = vmatpush1.bf16.msra.mxu0 %v2976_v5  ;;  %v3039_v5 = vld [vmem:[%s3995_s5 + $0x2e8] ss:$16 sps:$4 sm:$0xff]   ;;  %v3042_v9 = vld [vmem:[%s3995_s5 + $0x300] ss:$16 sps:$4 sm:$0xff]  }
 0x319   : > { %v2789_v16 = vpop.f32.mrb[19].mxu0  ;;  %2157 = vmatprep.subr.bf16.mxu0 %v2984_v7  ;;  %v3047_v7 = vld [vmem:[%s3995_s5 + $0x30c] ss:$16 sps:$4 sm:$0xff]   ;;  %v3050_v12 = vld [vmem:[%s3995_s5 + $0x324] ss:$16 sps:$4 sm:$0xff]  }
 0x31a   : > { %v3053_v13 = vld [vmem:[%s3995_s5 + $0x32c] ss:$16 sps:$4 sm:$0xff]  }
 0x31c   : > { %2158 = vmatpush1.bf16.msra.mxu0 %v2982_v15 }
 0x31d   : > { %v1235_v19 = vpop.f32.mrb[24].mxu1  ;;  %2159 = vmatprep.subr.bf16.mxu0 %v2990_v17  ;;  %v3048_v17 = vld [vmem:[%s3995_s5 + $0x320] ss:$16 sps:$4 sm:$0xff]  }
 0x31e   : > { %v1097_v21 = vpop.f32.mrb[20].mxu0  ;;  %v2818_v22 = vpop.f32.mrb[25].mxu1 }
 0x31f   : > { %v2800_v23 = vpop.f32.mrb[21].mxu0  ;;  %v1238_v24 = vpop.f32.mrb[26].mxu1 }
 0x320   : > { %v1100_v25 = vpop.f32.mrb[22].mxu0  ;;  %v2819_v26 = vpop.f32.mrb[27].mxu1  ;;  %2160 = vmatpush1.bf16.msra.mxu0 %v2988_v18  ;;  %v3051_v18 = vld [vmem:[%s3995_s5 + $0x328] ss:$16 sps:$4 sm:$0xff]   ;;  %v3054_v23 = vld [vmem:[%s3995_s5 + $0x340] ss:$16 sps:$4 sm:$0xff]  }
 0x321   : > { %v2801_v28 = vpop.f32.mrb[23].mxu0  ;;  %2170 = vmatprep.subr.bf16.mxu0 %v2996_v20  ;;  %v3059_v20 = vld [vmem:[%s3995_s5 + $0x34c] ss:$16 sps:$4 sm:$0xff]   ;;  %v3057_v24 = vld [vmem:[%s3995_s5 + $0x348] ss:$16 sps:$4 sm:$0xff]  }
 0x325   : > { %v1327_v29 = vpop.f32.mrb[28].mxu1 }
 0x326   : > { %v2893_v27 = vpack.i.bf16 %v1235_v19, %v1327_v29  ;;  %v2830_v30 = vpop.f32.mrb[29].mxu1  ;;  %v3056_v19 = vld [vmem:[%s3995_s5 + $0x344] ss:$16 sps:$4 sm:$0xff]  }
 0x327   : > { %v1330_v31 = vpop.f32.mrb[30].mxu1  ;;  %v3065_v30 = vld [vmem:[%s3995_s5 + $0x36c] ss:$16 sps:$4 sm:$0xff]  }
 0x328   : > { %2894 = vrot.lane.b32.xlu1 %v2893_v27, %s3190_s26  ;;  %v2831_v32 = vpop.f32.mrb[31].mxu1  ;;  %v3062_v27 = vld [vmem:[%s3995_s5 + $0x364] ss:$16 sps:$4 sm:$0xff]   ;;  %s3130_s26 = scalar_lea.vmem %s3129_s27, 2048 }
 0x329   : > { %v3060_v32 = vld [vmem:[%s3995_s5 + $0x360] ss:$16 sps:$4 sm:$0xff]   ;;  %p3132_p1 = scmp.lt.s32.totalorder %s3130_s26, %s3124_s25 }
 0x32b   : > { %p3133_p2 = por %p3132_p1, %p3131_p0 }
 0x32d   : > { %p3134_p3 = pnand %p3133_p2, %p3127_p13 }
 0x38a   : > { %v2890_v33 = vpop.permute.xlu0 %2889 }
 0x38b   : > { %v2892_v34 = vunpack.i.h.bf16 %v2890_v33  ;;  %v2891_v0 = vunpack.i.l.bf16 %v2890_v33  ;;  %v3063_v33 = vld [vmem:[%s3995_s5 + $0x368] ss:$16 sps:$4 sm:$0xff]  }
 0x38d   : > { %v1349_v35 = vsel %vm471_vm1, %v1005_v8, %v2892_v34  ;;  %v1350_v36 = vsel %vm471_vm1, %v1097_v21, %v2891_v0  ;;  %v3068_v34 = vld [vmem:[%s3995_s5 + $0x384] ss:$16 sps:$4 sm:$0xff]   ;;  %v3071_v0 = vld [vmem:[%s3995_s5 + $0x38c] ss:$16 sps:$4 sm:$0xff]  }
 0x38e   : > { %v1353_v37 = vpack.c.bf16 %v1349_v35, %v1349_v35  ;;  %v1354_v38 = vpack.c.bf16 %v1350_v36, %v1350_v36  ;;  %v3066_v35 = vld [vmem:[%s3995_s5 + $0x380] ss:$16 sps:$4 sm:$0xff]   ;;  %v3069_v36 = vld [vmem:[%s3995_s5 + $0x388] ss:$16 sps:$4 sm:$0xff]  }
 0x390   : > { %2161 = vmatprep.mubr.bf16.mxu0 %v1354_v38  ;;  %2243 = vmatprep.mubr.bf16.mxu1 %v1354_v38  ;;  %v3077_v38 = vld [vmem:[%s3995_s5 + $0x3ac] ss:$16 sps:$4 sm:$0xff]  }
 0x391   : > { %2162 = vmatmul.mubr.bf16.vlgmr.msra.gmra.mrb[32].mxu0 %v1353_v37  ;;  %2244 = vmatmul.mubr.bf16.vlgmr.msra.gmra.mrb[32].mxu1 %v1353_v37  ;;  %v3074_v37 = vld [vmem:[%s3995_s5 + $0x3a4] ss:$16 sps:$4 sm:$0xff]  }
 0x392   : > { %2171 = vmatpush1.bf16.msra.mxu0 %v2994_v39  ;;  %2253 = vmatpush1.bf16.msra.mxu1 %v2997_v40  ;;  %v3072_v39 = vld [vmem:[%s3995_s5 + $0x3a0] ss:$16 sps:$4 sm:$0xff]   ;;  %v3075_v40 = vld [vmem:[%s3995_s5 + $0x3a8] ss:$16 sps:$4 sm:$0xff]  }
 0x393   : > { %2172 = vmatprep.subr.bf16.mxu0 %v3002_v42  ;;  %2254 = vmatprep.subr.bf16.mxu1 %v3005_v43  ;;  %v3080_v42 = vld [vmem:[%s3995_s5 + $0x3c4] ss:$16 sps:$4 sm:$0xff]   ;;  %v3083_v43 = vld [vmem:[%s3995_s5 + $0x3cc] ss:$16 sps:$4 sm:$0xff]  }
 0x396   : > { %2173 = vmatpush1.bf16.msra.mxu0 %v3000_v44  ;;  %2255 = vmatpush1.bf16.msra.mxu1 %v3003_v45  ;;  %v3078_v44 = vld [vmem:[%s3995_s5 + $0x3c0] ss:$16 sps:$4 sm:$0xff]   ;;  %v3081_v45 = vld [vmem:[%s3995_s5 + $0x3c8] ss:$16 sps:$4 sm:$0xff]  }
 0x397   : > { %2174 = vmatprep.subr.bf16.mxu0 %v3008_v46  ;;  %2256 = vmatprep.subr.bf16.mxu1 %v3011_v41  ;;  %v3086_v46 = vld [vmem:[%s3995_s5 + $0x3e4] ss:$16 sps:$4 sm:$0xff]   ;;  %v3089_v41 = vld [vmem:[%s3995_s5 + $0x3ec] ss:$16 sps:$4 sm:$0xff]  }
 0x39a   : > { %2175 = vmatpush1.bf16.msra.mxu0 %v3006_v47  ;;  %2257 = vmatpush1.bf16.msra.mxu1 %v3009_v48  ;;  %v3816_v16 = vpop.permute.xlu1 %2894  ;;  %v3084_v48 = vld [vmem:[%s3995_s5 + $0x3e0] ss:$16 sps:$4 sm:$0xff]  }
 0x39b   : > { %2176 = vmatprep.subr.bf16.mxu0 %v3014_v49  ;;  %2258 = vmatprep.subr.bf16.mxu1 %v3017_v50  ;;  %v2896_v21 = vunpack.i.l.bf16 %v3816_v16  ;;  %v2897_v47 = vunpack.i.h.bf16 %v3816_v16  ;;  %v3087_v49 = vld [vmem:[%s3995_s5 + $0x3e8] ss:$16 sps:$4 sm:$0xff]  }
 0x39e   : > { %2177 = vmatpush1.bf16.msra.mxu0 %v3012_v51  ;;  %2259 = vmatpush1.bf16.msra.mxu1 %v3015_v52  ;;  %v1485_v52 = vld [vmem:[%s415_s28] sm:$0xff] }
 0x39f   : > { %2178 = vmatprep.subr.bf16.mxu0 %v3020_v53  ;;  %2260 = vmatprep.subr.bf16.mxu1 %v3023_v54  ;;  %v1486_v53 = vld [vmem:[%s415_s28 + $0x8] sm:$0xff] }
 0x3a2   : > { %2179 = vmatpush1.bf16.msra.mxu0 %v3018_v55  ;;  %2261 = vmatpush1.bf16.msra.mxu1 %v3021_v56 }
 0x3a3   : > { %2180 = vmatprep.subr.bf16.mxu0 %v3026_v57  ;;  %2262 = vmatprep.subr.bf16.mxu1 %v3029_v58  ;;  %v1487_v57 = vld [vmem:[%s415_s28 + $0x10] sm:$0xff] }
 0x3a6   : > { %2181 = vmatpush1.bf16.msra.mxu0 %v3024_v59  ;;  %2263 = vmatpush1.bf16.msra.mxu1 %v3027_v60 }
 0x3a7   : > { %2182 = vmatprep.subr.bf16.mxu0 %v3032_v61  ;;  %2264 = vmatprep.subr.bf16.mxu1 %v3035_v62 }
 0x3aa   : > { %2183 = vmatpush1.bf16.msra.mxu0 %v3030_v63  ;;  %2265 = vmatpush1.bf16.msra.mxu1 %v3033_v1  ;;  %v1488_v63 = vld [vmem:[%s415_s28 + $0x18] sm:$0xff] }
 0x3ab   : > { %2184 = vmatprep.subr.bf16.mxu0 %v3038_v2  ;;  %2266 = vmatprep.subr.bf16.mxu1 %v3041_v3 }
 0x3ae   : > { %2185 = vmatpush1.bf16.msra.mxu0 %v3036_v4  ;;  %2267 = vmatpush1.bf16.msra.mxu1 %v3039_v5  ;;  %v3802_v8 = vpop.f32.mrb[24].mxu0 }
 0x3af   : > { %v2812_v11 = vpop.f32.mrb[25].mxu0  ;;  %2186 = vmatprep.subr.bf16.mxu0 %v3044_v6  ;;  %2268 = vmatprep.subr.bf16.mxu1 %v3047_v7  ;;  %v1351_v50 = vsel %vm471_vm1, %v3802_v8, %v2897_v47 }
 0x3b0   : > { %v1192_v14 = vpop.f32.mrb[26].mxu0  ;;  %v1355_v51 = vpack.c.bf16 %v1351_v50, %v1351_v50 }
 0x3b1   : > { %v2813_v15 = vpop.f32.mrb[27].mxu0 }
 0x3b2   : > { %2187 = vmatpush1.bf16.msra.mxu0 %v3042_v9  ;;  %2269 = vmatpush1.bf16.msra.mxu1 %v3045_v10 }
 0x3b3   : > { %2188 = vmatprep.subr.bf16.mxu0 %v3050_v12  ;;  %2270 = vmatprep.subr.bf16.mxu1 %v3053_v13 }
 0x3b6   : > { %2189 = vmatpush1.bf16.msra.mxu0 %v3048_v17  ;;  %2271 = vmatpush1.bf16.msra.mxu1 %v3051_v18  ;;  %v1281_v22 = vpop.f32.mrb[28].mxu0 }
 0x3b7   : > { %v1352_v25 = vsel %vm471_vm1, %v1281_v22, %v2896_v21  ;;  %v2824_v26 = vpop.f32.mrb[29].mxu0  ;;  %2190 = vmatprep.subr.bf16.mxu0 %v3056_v19  ;;  %2272 = vmatprep.subr.bf16.mxu1 %v3059_v20 }
 0x3b8   : > { %v1356_v28 = vpack.c.bf16 %v1352_v25, %v1352_v25  ;;  %v1284_v29 = vpop.f32.mrb[30].mxu0 }
 0x3b9   : > { %v2825_v31 = vpop.f32.mrb[31].mxu0 }
 0x3ba   : > { %2191 = vmatpush1.bf16.msra.mxu0 %v3054_v23  ;;  %2273 = vmatpush1.bf16.msra.mxu1 %v3057_v24 }
 0x3bb   : > { %2202 = vmatprep.mubr.bf16.mxu0 %v1356_v28  ;;  %2284 = vmatprep.mubr.bf16.mxu1 %v1356_v28 }
 0x3bc   : > { %2192 = vmatprep.subr.bf16.mxu0 %v3062_v27  ;;  %2274 = vmatprep.subr.bf16.mxu1 %v3065_v30 }
 0x3be   : > { %2193 = vmatpush1.bf16.msra.mxu0 %v3060_v32  ;;  %2275 = vmatpush1.bf16.msra.mxu1 %v3063_v33 }
 0x3bf   : > { %2194 = vmatprep.subr.bf16.mxu0 %v3068_v34  ;;  %2276 = vmatprep.subr.bf16.mxu1 %v3071_v0 }
 0x3c2   : > { %2195 = vmatpush1.bf16.msra.mxu0 %v3066_v35  ;;  %2277 = vmatpush1.bf16.msra.mxu1 %v3069_v36 }
 0x3c3   : > { %2196 = vmatprep.subr.bf16.mxu0 %v3074_v37  ;;  %2278 = vmatprep.subr.bf16.mxu1 %v3077_v38 }
 0x3c6   : > { %2197 = vmatpush1.bf16.msra.mxu0 %v3072_v39  ;;  %2279 = vmatpush1.bf16.msra.mxu1 %v3075_v40 }
 0x3c7   : > { %2198 = vmatprep.subr.bf16.mxu0 %v3080_v42  ;;  %2280 = vmatprep.subr.bf16.mxu1 %v3083_v43 }
 0x3ca   : > { %2199 = vmatpush1.bf16.msra.mxu0 %v3078_v44  ;;  %2281 = vmatpush1.bf16.msra.mxu1 %v3081_v45 }
 0x3cb   : > { %2200 = vmatprep.subr.bf16.mxu0 %v3086_v46  ;;  %2282 = vmatprep.subr.bf16.mxu1 %v3089_v41 }
 0x3ce   : > { %2201 = vmatpush1.bf16.msra.mxu0 %v3084_v48  ;;  %2283 = vmatpush1.bf16.msra.mxu1 %v3087_v49 }
 0x3d1   : > { %2203 = vmatmul.mubr.bf16.vlgmr.msra.gmra.mrb[32].mxu0 %v1355_v51  ;;  %2285 = vmatmul.mubr.bf16.vlgmr.msra.gmra.mrb[32].mxu1 %v1355_v51 }
 0x4a4   : > { %v2204_v54 = vpop.f32.mrb[32].mxu0  ;;  %v2286_v55 = vpop.f32.mrb[32].mxu1 }
 0x4a5   : > { %v2832_v56 = vadd.f32 %v2204_v54, %v1485_v52  ;;  %v2206_v58 = vpop.f32.mrb[33].mxu0  ;;  %v2288_v59 = vpop.f32.mrb[33].mxu1  ;;  %v2834_v3 = vadd.f32 %v2286_v55, %v1487_v57 }
 0x4a6   : > { %v2833_v60 = vadd.f32 %v2206_v58, %v1486_v53  ;;  %v2208_v61 = vpop.f32.mrb[34].mxu0  ;;  %v2290_v62 = vpop.f32.mrb[34].mxu1  ;;  %v2835_v5 = vadd.f32 %v2288_v59, %v1488_v63 }
 0x4a7   : > { %v2209_v1 = vpop.f32.mrb[35].mxu0  ;;  %v2291_v2 = vpop.f32.mrb[35].mxu1 }
 0x4a8   : > { %v2295_v4 = vadd.f32 %v2833_v60, %v2832_v56 }
 0x4aa   : > { %v2296_v6 = vadd.f32 %v2834_v3, %v2295_v4 }
 0x4ac   : > { %v2297_v7 = vadd.f32 %v2835_v5, %v2296_v6 }
 0x4ae   : > { %2298 = vadd.xlane.f32.xlu1 %v2297_v7 }
 0x53b   : > { %v2299_v8 = vpop.xlane.xlu1 %2298 }
 0x53c   : > { %v2301_v9 = vmul.f32 0.001953125, %v2299_v8 }
 0x53e   : > { %v3907_v10 = vsub.f32 %v2832_v56, %v2301_v9  ;;  %v3909_v11 = vsub.f32 %v2833_v60, %v2301_v9  ;;  %v3911_v12 = vsub.f32 %v2834_v3, %v2301_v9  ;;  %v3913_v13 = vsub.f32 %v2835_v5, %v2301_v9 }
 0x540   : > { %v2306_v14 = vmul.f32 %v3907_v10, %v3907_v10  ;;  %v2307_v15 = vmul.f32 %v3909_v11, %v3909_v11  ;;  %v2308_v16 = vmul.f32 %v3911_v12, %v3911_v12  ;;  %v2309_v18 = vmul.f32 %v3913_v13, %v3913_v13 }
 0x542   : > { %v2310_v17 = vadd.f32 %v2307_v15, %v2306_v14 }
 0x544   : > { %v2311_v19 = vadd.f32 %v2310_v17, %v2308_v16 }
 0x546   : > { %v2312_v20 = vadd.f32 %v2311_v19, %v2309_v18 }
 0x548   : > { %2313 = vadd.xlane.f32.xlu0 %v2312_v20 }
 0x549   : > { %3137 = shalt.err (!%p3134_p3)
}
 0x54a   : > { %s3138_s28 = scalar_lea.hbm %s3928_s23, 1024  ;;  %s3142_s17 = scalar_lea.hbm %s3999_s9, 2048 }
 0x54b   : > { %p3139_p4 = scmp.ne.s32.totalorder %s3928_s23, %s3138_s28  ;;  %p3143_p9 = scmp.lt.u32.totalorder %s3928_s23, %s3999_s9 }
 0x54c   : > { %p3144_p10 = scmp.lt.u32.totalorder %s3142_s17, %s3138_s28  ;;  %p3146_p12 = scmp.lt.u32.totalorder %s3138_s28, %s3928_s23 }
 0x54d   : > { %p3140_p7 = pnand %p3139_p4, %p3282_p5 }
 0x54e   : > { %p3145_p11 = por %p3144_p10, %p3143_p9 }
 0x54f   : > { %p3141_p8 = pneg %p3140_p7 }
 0x550   : > { %p3147_p13 = por %p3146_p12, %p3145_p11 }
 0x552   : > { %p3148_p0 = pnand %p3147_p13, %p3141_p8 }
 0x554   : > { %3151 = shalt.err (!%p3148_p0)
}
 0x555   : > { %s3192_s25 = smov 128   ;;  %s3193_s27 = smov 8   ;;  %v2323_v23 = vlaneseq  ;;  %v2293_v30 = vld [vmem:[%s3996_s6] sm:$0xf] }
 0x556   : > { %2844 = dma.vmem_to_hbm [thread:$0]  (%p3282_p5), %s3930_s14, 1024, %s3928_s23, %s3934_s0, %s3192_s25, %s3192_s25, %s3193_s27  }
 0x557   : > { %v2324_v25 = vshrl.u32 %v2323_v23, 7  ;;  %v2294_v31 = vld [vmem:[%s3997_s7] sm:$0xf]  ;;  %s420_s23 = scalar_lea.vmem %s3998_s8, %s2701_s22 }
 0x559   : > { %v2325_v26 = vsub.s32 0, %v2324_v25  ;;  %v2329_v28 = vsub.s32 1, %v2324_v25  ;;  %v2333_v29 = vsub.s32 2, %v2324_v25  ;;  %v2337_v27 = vsub.s32 3, %v2324_v25 }
 0x55b   : > { %v2326_v32 = vrot.slane %v2293_v30, %v2325_v26  ;;  %v2330_v33 = vrot.slane %v2293_v30, %v2329_v28  ;;  %v2334_v34 = vrot.slane %v2293_v30, %v2333_v29  ;;  %v2338_v0 = vrot.slane %v2293_v30, %v2337_v27 }
 0x55c   : > { %v2351_v36 = vrot.slane %v2294_v31, %v2325_v26  ;;  %v2355_v37 = vrot.slane %v2294_v31, %v2329_v28  ;;  %v2359_v38 = vrot.slane %v2294_v31, %v2333_v29  ;;  %v2363_v39 = vrot.slane %v2294_v31, %v2337_v27 }
 0x5d5   : > { %v2314_v21 = vpop.xlane.xlu0 %2313 }
 0x5d6   : > { %v2315_v22 = vmul.f32 0.001953125, %v2314_v21 }
 0x5d8   : > { %v2316_v24 = vadd.f32 1e-05, %v2315_v22 }
 0x5da   : > { %3122 = vrsqrt.f32 %v2316_v24 }
 0x5e4   : > { %v3123_v35 = vpop.eup %3122 }
 0x5e5   : > { %v2318_v40 = vmul.f32 %v3123_v35, %v3907_v10  ;;  %v2319_v42 = vmul.f32 %v3123_v35, %v3909_v11  ;;  %v2320_v43 = vmul.f32 %v3123_v35, %v3911_v12  ;;  %v2321_v44 = vmul.f32 %v3123_v35, %v3913_v13 }
 0x5e7   : > { %v2343_v45 = vmul.f32 %v2326_v32, %v2318_v40  ;;  %v2344_v46 = vmul.f32 %v2330_v33, %v2319_v42  ;;  %v2345_v41 = vmul.f32 %v2334_v34, %v2320_v43  ;;  %v2346_v47 = vmul.f32 %v2338_v0, %v2321_v44 }
 0x5e9   : > { %v2368_v48 = vadd.f32 %v2351_v36, %v2343_v45  ;;  %v2369_v49 = vadd.f32 %v2355_v37, %v2344_v46  ;;  %v2370_v50 = vadd.f32 %v2359_v38, %v2345_v41  ;;  %v2371_v51 = vadd.f32 %v2363_v39, %v2346_v47 }
 0x5eb   : > { %2372 = vst [vmem:[%s420_s23] sm:$0xff] %v2368_v48  ;;  %2373 = vst [vmem:[%s420_s23 + $0x8] sm:$0xff] %v2369_v49 }
 0x5ec   : > { %2374 = vst [vmem:[%s420_s23 + $0x10] sm:$0xff] %v2370_v50  ;;  %2375 = vst [vmem:[%s420_s23 + $0x18] sm:$0xff] %v2371_v51 }
 0x5ed PF: > { %p2850_p5 = scmp.ge.s32.totalorder %s3186_s12, 2  ;;  %s2421_s0 = sand.u32 1, %s3174_s30  }
 0x5ee   : > { %s2422_s21 = scalar_lea.sflag [#allocation3], %s2421_s0 }
 0x5ef   : > { %p2847_p1 = pnand %p2850_p5, %p3286_p6 }
 0x5f1   : > { %3169 = dma.done.wait (!%p2847_p1), %s2422_s21, 1024  }
 0x5f2   : > { %3171 = vsyncadd (!%p2847_p1), %s2422_s21, 4294966272  ;;  %p20_p2 = scmp.ge.s32.totalorder %s3269_s15, 4   ;;  %s4006_s30 = smov %s3178_s10 }
 0x5f3   : > { %s4007_s10 = smov %s3182_s11  ;;  %s4008_s11 = smov %s3280_s18 }
 0x5f4   : > { %s4009_s12 = smov %s3269_s15  ;;  %22 = sbr.rel (!%p20_p2) target bundleno = 5 (0x5), region = 111 }
 0x5fb   :  { %2427 = vsyncpa [#allocation3], 1 }
 0x5fc   :  { %2429 = vsyncpa [#allocation3 + $0x1], 1 }

// kernel: decoder_layer.6
= control target key start
LH: loop header
LB: loop body
LE: loop exit
PB: predicated region body
PF: predicated region fallthrough
CT: control target
= control target key end

     0   :  { %7 = vsyncpa [#allocation3], 0  ;;  %s4088_s0 = inlined_call_operand.hbm [shape: f32[16,512], index: 0, kind: input, shape index: {}]   ;;  %s4089_s1 = inlined_call_operand.hbm [shape: bf16[512,1536], index: 1, kind: input, shape index: {}]   ;;  %s4090_s2 = inlined_call_operand.vmem [shape: f32[16,1536], index: 2, kind: output, shape index: {}]  }
   0x1   :  { %8 = vsyncpa [#allocation5], 0  ;;  %s3939_s9 = smov [#allocation2]   ;;  %s3891_s13 = scalar_lea.hbm %s4088_s0, 1024 }
   0x2   :  { %s14_s10 = sshll.u32 %s3939_s9, 4  ;;  %p3892_p0 = scmp.ne.s32.totalorder %s4088_s0, %s3891_s13  ;;  %s15_s10 = int_to_ptr.vmem [resolvable:$true] %s14_s10 }
   0x3   :  { %p3895_p1 = scmp.lt.u32.totalorder %s3891_s13, %s4088_s0 }
   0x5   :  { %p3897_p2 = pnand %p3895_p1, %p3892_p0 }
   0x7   :  { %3900 = shalt.err (!%p3897_p2)
}
   0x8   :  { %s3901_s18 = scalar_lea.vmem %s15_s10, 1024  ;;  %p3906_p4 = scmp.lt.s32.totalorder %s15_s10, %s15_s10 }
   0x9   :  { %p3902_p3 = scmp.ne.s32.totalorder %s15_s10, %s3901_s18  ;;  %p3907_p5 = scmp.lt.s32.totalorder %s3901_s18, %s3901_s18 }
   0xb   :  { %p3908_p6 = por %p3907_p5, %p3906_p4 }
   0xd   :  { %p3909_p7 = pnand %p3908_p6, %p3902_p3 }
   0xf   :  { %3912 = shalt.err (!%p3909_p7)
}
  0x10   :  { %s3940_s19 = smov 512   ;;  %s3941_s20 = smov 32  }
  0x11   :  { %20 = dma.hbm_to_vmem [thread:$0]  %s4088_s0, 1024, %s15_s10, [#allocation3], %s3940_s19, %s3940_s19, %s3941_s20  }
  0x12   :  { %s3942_s23 = smov [#allocation4]   ;;  %s3913_s27 = scalar_lea.hbm %s4089_s1, 49152 }
  0x13   :  { %s26_s24 = sshll.u32 %s3942_s23, 4  ;;  %p3914_p8 = scmp.ne.s32.totalorder %s4089_s1, %s3913_s27  ;;  %s27_s24 = int_to_ptr.vmem [resolvable:$true] %s26_s24 }
  0x14   :  { %p3917_p9 = scmp.lt.u32.totalorder %s3913_s27, %s4089_s1 }
  0x16   :  { %p3919_p10 = pnand %p3917_p9, %p3914_p8 }
  0x18   :  { %3922 = shalt.err (!%p3919_p10)
}
  0x19   :  { %s3923_s4 = scalar_lea.vmem %s27_s24, 49152  ;;  %p3928_p12 = scmp.lt.s32.totalorder %s27_s24, %s27_s24 }
  0x1a   :  { %p3924_p11 = scmp.ne.s32.totalorder %s27_s24, %s3923_s4  ;;  %p3929_p13 = scmp.lt.s32.totalorder %s3923_s4, %s3923_s4 }
  0x1c   :  { %p3930_p0 = por %p3929_p13, %p3928_p12 }
  0x1e   :  { %p3931_p1 = pnand %p3930_p0, %p3924_p11 }
  0x20   :  { %3934 = shalt.err (!%p3931_p1)
}
  0x21   :  { %s3943_s0 = smov 768   ;;  %s3944_s5 = smov 48  }
  0x22   :  { %32 = dma.hbm_to_vmem [thread:$0]  %s4089_s1, 49152, %s27_s24, [#allocation5], %s3943_s0, %s3943_s0, %s3944_s5  }
  0x23   :  { %3935 = dma.done.wait [#allocation3], 1024  }
  0x24   :  { %3936 = vsyncadd [#allocation3], 4294966272 }
  0x25   :  { %3937 = dma.done.wait [#allocation5], 49152  }
  0x26   :  { %3938 = vsyncadd [#allocation5], 4294918144  ;;  %v3315_v0 = vld [vmem:[#allocation4 + $0x4] ss:$48 sps:$4 sm:$0xff]   ;;  %v3317_v1 = vld [vmem:[#allocation4 + $0xc] ss:$48 sps:$4 sm:$0xff]  }
  0x27   :  { %2355 = vmatprep.subr.bf16.mxu0 %v3315_v0  ;;  %v3319_v2 = vld [vmem:[#allocation4] ss:$48 sps:$4 sm:$0xff]   ;;  %v3320_v3 = vld [vmem:[#allocation4 + $0x8] ss:$48 sps:$4 sm:$0xff]   ;;  %2441 = vmatprep.subr.bf16.mxu1 %v3317_v1  ;;  %v3321_v4 = vld [vmem:[#allocation4 + $0x64] ss:$48 sps:$4 sm:$0xff]  }
  0x28   :  { %2356 = vmatpush1.bf16.msra.mxu0 %v3319_v2  ;;  %2442 = vmatpush1.bf16.msra.mxu1 %v3320_v3  ;;  %v3323_v5 = vld [vmem:[#allocation4 + $0x6c] ss:$48 sps:$4 sm:$0xff]   ;;  %v3325_v6 = vld [vmem:[#allocation4 + $0x60] ss:$48 sps:$4 sm:$0xff]   ;;  %v3326_v7 = vld [vmem:[#allocation4 + $0x68] ss:$48 sps:$4 sm:$0xff]  }
  0x29   :  { %2357 = vmatprep.subr.bf16.mxu0 %v3321_v4  ;;  %2443 = vmatprep.subr.bf16.mxu1 %v3323_v5  ;;  %v3327_v8 = vld [vmem:[#allocation4 + $0xc4] ss:$48 sps:$4 sm:$0xff]   ;;  %v3329_v9 = vld [vmem:[#allocation4 + $0xcc] ss:$48 sps:$4 sm:$0xff]   ;;  %v3331_v10 = vld [vmem:[#allocation4 + $0xc0] ss:$48 sps:$4 sm:$0xff]  }
  0x2a   :  { %v3332_v11 = vld [vmem:[#allocation4 + $0xc8] ss:$48 sps:$4 sm:$0xff]   ;;  %v3333_v12 = vld [vmem:[#allocation4 + $0x124] ss:$48 sps:$4 sm:$0xff]   ;;  %v3335_v13 = vld [vmem:[#allocation4 + $0x12c] ss:$48 sps:$4 sm:$0xff]  }
  0x2b   :  { %v3337_v14 = vld [vmem:[#allocation4 + $0x120] ss:$48 sps:$4 sm:$0xff]   ;;  %v3338_v15 = vld [vmem:[#allocation4 + $0x128] ss:$48 sps:$4 sm:$0xff]   ;;  %v3339_v16 = vld [vmem:[#allocation4 + $0x184] ss:$48 sps:$4 sm:$0xff]  }
  0x2c   :  { %2358 = vmatpush1.bf16.msra.mxu0 %v3325_v6  ;;  %2444 = vmatpush1.bf16.msra.mxu1 %v3326_v7  ;;  %v3341_v17 = vld [vmem:[#allocation4 + $0x18c] ss:$48 sps:$4 sm:$0xff]   ;;  %v3343_v18 = vld [vmem:[#allocation4 + $0x180] ss:$48 sps:$4 sm:$0xff]   ;;  %v3344_v19 = vld [vmem:[#allocation4 + $0x188] ss:$48 sps:$4 sm:$0xff]  }
  0x2d   :  { %2359 = vmatprep.subr.bf16.mxu0 %v3327_v8  ;;  %2445 = vmatprep.subr.bf16.mxu1 %v3329_v9  ;;  %v3345_v20 = vld [vmem:[#allocation4 + $0x1e4] ss:$48 sps:$4 sm:$0xff]   ;;  %v3347_v21 = vld [vmem:[#allocation4 + $0x1ec] ss:$48 sps:$4 sm:$0xff]   ;;  %v3349_v22 = vld [vmem:[#allocation4 + $0x1e0] ss:$48 sps:$4 sm:$0xff]  }
  0x2e   :  { %v3350_v23 = vld [vmem:[#allocation4 + $0x1e8] ss:$48 sps:$4 sm:$0xff]   ;;  %v3351_v24 = vld [vmem:[#allocation4 + $0x244] ss:$48 sps:$4 sm:$0xff]   ;;  %v3353_v25 = vld [vmem:[#allocation4 + $0x24c] ss:$48 sps:$4 sm:$0xff]  }
  0x2f   :  { %v3355_v26 = vld [vmem:[#allocation4 + $0x240] ss:$48 sps:$4 sm:$0xff]   ;;  %v3356_v27 = vld [vmem:[#allocation4 + $0x248] ss:$48 sps:$4 sm:$0xff]   ;;  %v3357_v28 = vld [vmem:[#allocation4 + $0x2a4] ss:$48 sps:$4 sm:$0xff]  }
  0x30   :  { %2360 = vmatpush1.bf16.msra.mxu0 %v3331_v10  ;;  %2446 = vmatpush1.bf16.msra.mxu1 %v3332_v11  ;;  %v3359_v29 = vld [vmem:[#allocation4 + $0x2ac] ss:$48 sps:$4 sm:$0xff]   ;;  %v3361_v30 = vld [vmem:[#allocation4 + $0x2a0] ss:$48 sps:$4 sm:$0xff]   ;;  %v3362_v31 = vld [vmem:[#allocation4 + $0x2a8] ss:$48 sps:$4 sm:$0xff]  }
  0x31   :  { %2361 = vmatprep.subr.bf16.mxu0 %v3333_v12  ;;  %2447 = vmatprep.subr.bf16.mxu1 %v3335_v13  ;;  %v3363_v32 = vld [vmem:[#allocation4 + $0x304] ss:$48 sps:$4 sm:$0xff]   ;;  %v3365_v33 = vld [vmem:[#allocation4 + $0x30c] ss:$48 sps:$4 sm:$0xff]   ;;  %v3367_v34 = vld [vmem:[#allocation4 + $0x300] ss:$48 sps:$4 sm:$0xff]  }
  0x32   :  { %v3368_v35 = vld [vmem:[#allocation4 + $0x308] ss:$48 sps:$4 sm:$0xff]   ;;  %v3369_v36 = vld [vmem:[#allocation4 + $0x364] ss:$48 sps:$4 sm:$0xff]   ;;  %v3371_v37 = vld [vmem:[#allocation4 + $0x36c] ss:$48 sps:$4 sm:$0xff]  }
  0x33   :  { %v3373_v38 = vld [vmem:[#allocation4 + $0x360] ss:$48 sps:$4 sm:$0xff]   ;;  %v3374_v39 = vld [vmem:[#allocation4 + $0x368] ss:$48 sps:$4 sm:$0xff]   ;;  %v3375_v40 = vld [vmem:[#allocation4 + $0x3c4] ss:$48 sps:$4 sm:$0xff]  }
  0x34   :  { %2362 = vmatpush1.bf16.msra.mxu0 %v3337_v14  ;;  %2448 = vmatpush1.bf16.msra.mxu1 %v3338_v15  ;;  %v3377_v41 = vld [vmem:[#allocation4 + $0x3cc] ss:$48 sps:$4 sm:$0xff]   ;;  %v3379_v42 = vld [vmem:[#allocation4 + $0x3c0] ss:$48 sps:$4 sm:$0xff]   ;;  %v3380_v43 = vld [vmem:[#allocation4 + $0x3c8] ss:$48 sps:$4 sm:$0xff]  }
  0x35   :  { %2363 = vmatprep.subr.bf16.mxu0 %v3339_v16  ;;  %2449 = vmatprep.subr.bf16.mxu1 %v3341_v17  ;;  %v3381_v44 = vld [vmem:[#allocation4 + $0x424] ss:$48 sps:$4 sm:$0xff]   ;;  %v3383_v45 = vld [vmem:[#allocation4 + $0x42c] ss:$48 sps:$4 sm:$0xff]   ;;  %v3385_v48 = vld [vmem:[#allocation4 + $0x420] ss:$48 sps:$4 sm:$0xff]  }
  0x36   :  { %v40_v46 = vld [vmem:[#allocation2 + $0x8] sm:$0xff]  ;;  %v3387_v51 = vld [vmem:[#allocation4 + $0x484] ss:$48 sps:$4 sm:$0xff]   ;;  %v3391_v53 = vld [vmem:[#allocation4 + $0x480] ss:$48 sps:$4 sm:$0xff]  }
  0x37   :  { %v44_v47 = vld [vmem:[#allocation2 + $0x28] sm:$0xff]  ;;  %v3393_v55 = vld [vmem:[#allocation4 + $0x4e4] ss:$48 sps:$4 sm:$0xff]   ;;  %v3397_v57 = vld [vmem:[#allocation4 + $0x4e0] ss:$48 sps:$4 sm:$0xff]  }
  0x38   :  { %2364 = vmatpush1.bf16.msra.mxu0 %v3343_v18  ;;  %2450 = vmatpush1.bf16.msra.mxu1 %v3344_v19  ;;  %v3386_v49 = vld [vmem:[#allocation4 + $0x428] ss:$48 sps:$4 sm:$0xff]   ;;  %v3984_v50 = vpack.c.bf16 %v44_v47, %v40_v46  ;;  %v3389_v52 = vld [vmem:[#allocation4 + $0x48c] ss:$48 sps:$4 sm:$0xff]   ;;  %v3399_v59 = vld [vmem:[#allocation4 + $0x544] ss:$48 sps:$4 sm:$0xff]  }
  0x39   :  { %2365 = vmatprep.subr.bf16.mxu0 %v3345_v20  ;;  %2451 = vmatprep.subr.bf16.mxu1 %v3347_v21  ;;  %v3392_v54 = vld [vmem:[#allocation4 + $0x488] ss:$48 sps:$4 sm:$0xff]   ;;  %v3395_v56 = vld [vmem:[#allocation4 + $0x4ec] ss:$48 sps:$4 sm:$0xff]   ;;  %v3403_v61 = vld [vmem:[#allocation4 + $0x540] ss:$48 sps:$4 sm:$0xff]  }
  0x3a   :  { %2387 = vmatprep.mubr.bf16.mxu0 %v3984_v50  ;;  %2473 = vmatprep.mubr.bf16.mxu1 %v3984_v50  ;;  %v3398_v58 = vld [vmem:[#allocation4 + $0x4e8] ss:$48 sps:$4 sm:$0xff]   ;;  %v3401_v60 = vld [vmem:[#allocation4 + $0x54c] ss:$48 sps:$4 sm:$0xff]   ;;  %v3405_v63 = vld [vmem:[#allocation4 + $0x5a4] ss:$48 sps:$4 sm:$0xff]  }
  0x3b   :  { %v3404_v62 = vld [vmem:[#allocation4 + $0x548] ss:$48 sps:$4 sm:$0xff]   ;;  %v3407_v0 = vld [vmem:[#allocation4 + $0x5ac] ss:$48 sps:$4 sm:$0xff]   ;;  %v3409_v1 = vld [vmem:[#allocation4 + $0x5a0] ss:$48 sps:$4 sm:$0xff]  }
  0x3c   :  { %2366 = vmatpush1.bf16.msra.mxu0 %v3349_v22  ;;  %2452 = vmatpush1.bf16.msra.mxu1 %v3350_v23  ;;  %v3410_v2 = vld [vmem:[#allocation4 + $0x5a8] ss:$48 sps:$4 sm:$0xff]   ;;  %v3413_v3 = vld [vmem:[#allocation4 + $0x604] ss:$48 sps:$4 sm:$0xff]   ;;  %v3416_v6 = vld [vmem:[#allocation4 + $0x60c] ss:$48 sps:$4 sm:$0xff]  }
  0x3d   :  { %2367 = vmatprep.subr.bf16.mxu0 %v3351_v24  ;;  %2453 = vmatprep.subr.bf16.mxu1 %v3353_v25  ;;  %v39_v4 = vld [vmem:[#allocation2] sm:$0xff]  ;;  %v3414_v8 = vld [vmem:[#allocation4 + $0x608] ss:$48 sps:$4 sm:$0xff]   ;;  %v3422_v11 = vld [vmem:[#allocation4 + $0x66c] ss:$48 sps:$4 sm:$0xff]  }
  0x3e   :  { %v43_v5 = vld [vmem:[#allocation2 + $0x20] sm:$0xff]  ;;  %v3420_v13 = vld [vmem:[#allocation4 + $0x668] ss:$48 sps:$4 sm:$0xff]   ;;  %v3428_v15 = vld [vmem:[#allocation4 + $0x6cc] ss:$48 sps:$4 sm:$0xff]  }
  0x3f   :  { %v3411_v7 = vld [vmem:[#allocation4 + $0x600] ss:$48 sps:$4 sm:$0xff]   ;;  %v3988_v9 = vpack.c.bf16 %v43_v5, %v39_v4  ;;  %v3419_v10 = vld [vmem:[#allocation4 + $0x664] ss:$48 sps:$4 sm:$0xff]   ;;  %v3426_v17 = vld [vmem:[#allocation4 + $0x6c8] ss:$48 sps:$4 sm:$0xff]  }
  0x40   :  { %2368 = vmatpush1.bf16.msra.mxu0 %v3355_v26  ;;  %2454 = vmatpush1.bf16.msra.mxu1 %v3356_v27  ;;  %v3417_v12 = vld [vmem:[#allocation4 + $0x660] ss:$48 sps:$4 sm:$0xff]   ;;  %v3425_v14 = vld [vmem:[#allocation4 + $0x6c4] ss:$48 sps:$4 sm:$0xff]   ;;  %v3434_v19 = vld [vmem:[#allocation4 + $0x72c] ss:$48 sps:$4 sm:$0xff]  }
  0x41   :  { %2369 = vmatprep.subr.bf16.mxu0 %v3357_v28  ;;  %2455 = vmatprep.subr.bf16.mxu1 %v3359_v29  ;;  %v3423_v16 = vld [vmem:[#allocation4 + $0x6c0] ss:$48 sps:$4 sm:$0xff]   ;;  %v3431_v18 = vld [vmem:[#allocation4 + $0x724] ss:$48 sps:$4 sm:$0xff]   ;;  %v3432_v21 = vld [vmem:[#allocation4 + $0x728] ss:$48 sps:$4 sm:$0xff]  }
  0x42   :  { %v3429_v20 = vld [vmem:[#allocation4 + $0x720] ss:$48 sps:$4 sm:$0xff]   ;;  %v3437_v22 = vld [vmem:[#allocation4 + $0x784] ss:$48 sps:$4 sm:$0xff]   ;;  %v3440_v23 = vld [vmem:[#allocation4 + $0x78c] ss:$48 sps:$4 sm:$0xff]  }
  0x43   :  { %v3435_v24 = vld [vmem:[#allocation4 + $0x780] ss:$48 sps:$4 sm:$0xff]   ;;  %v3438_v25 = vld [vmem:[#allocation4 + $0x788] ss:$48 sps:$4 sm:$0xff]   ;;  %v3443_v26 = vld [vmem:[#allocation4 + $0x7e4] ss:$48 sps:$4 sm:$0xff]  }
  0x44   :  { %2370 = vmatpush1.bf16.msra.mxu0 %v3361_v30  ;;  %2456 = vmatpush1.bf16.msra.mxu1 %v3362_v31  ;;  %v3446_v27 = vld [vmem:[#allocation4 + $0x7ec] ss:$48 sps:$4 sm:$0xff]   ;;  %v3441_v28 = vld [vmem:[#allocation4 + $0x7e0] ss:$48 sps:$4 sm:$0xff]   ;;  %v3444_v29 = vld [vmem:[#allocation4 + $0x7e8] ss:$48 sps:$4 sm:$0xff]  }
  0x45   :  { %2371 = vmatprep.subr.bf16.mxu0 %v3363_v32  ;;  %2457 = vmatprep.subr.bf16.mxu1 %v3365_v33  ;;  %v3449_v30 = vld [vmem:[#allocation4 + $0x844] ss:$48 sps:$4 sm:$0xff]   ;;  %v3452_v31 = vld [vmem:[#allocation4 + $0x84c] ss:$48 sps:$4 sm:$0xff]   ;;  %v3447_v33 = vld [vmem:[#allocation4 + $0x840] ss:$48 sps:$4 sm:$0xff]  }
  0x46   :  { %v42_v32 = vld [vmem:[#allocation2 + $0x18] sm:$0xff]  ;;  %v3465_v47 = vld [vmem:[#allocation4 + $0x960] ss:$48 sps:$4 sm:$0xff]  }
  0x47   :  { %v3470_v46 = vld [vmem:[#allocation4 + $0x96c] ss:$48 sps:$4 sm:$0xff]   ;;  %v3495_v4 = vld [vmem:[#allocation4 + $0xb40] ss:$48 sps:$4 sm:$0xff]   ;;  %v3498_v5 = vld [vmem:[#allocation4 + $0xb48] ss:$48 sps:$4 sm:$0xff]  }
  0x48   :  { %2372 = vmatpush1.bf16.msra.mxu0 %v3367_v34  ;;  %2458 = vmatpush1.bf16.msra.mxu1 %v3368_v35  ;;  %v3450_v34 = vld [vmem:[#allocation4 + $0x848] ss:$48 sps:$4 sm:$0xff]  }
  0x49   :  { %2373 = vmatprep.subr.bf16.mxu0 %v3369_v36  ;;  %2459 = vmatprep.subr.bf16.mxu1 %v3371_v37  ;;  %v46_v35 = vld [vmem:[#allocation2 + $0x38] sm:$0xff]  ;;  %v3455_v36 = vld [vmem:[#allocation4 + $0x8a4] ss:$48 sps:$4 sm:$0xff]  }
  0x4a   :  { %v3992_v37 = vpack.c.bf16 %v46_v35, %v42_v32  ;;  %v3531_v32 = vld [vmem:[#allocation4 + $0x190] ss:$48 sps:$4 sm:$0xff]   ;;  %v3542_v35 = vld [vmem:[#allocation4 + $0x1fc] ss:$48 sps:$4 sm:$0xff]  }
  0x4c   :  { %2374 = vmatpush1.bf16.msra.mxu0 %v3373_v38  ;;  %2460 = vmatpush1.bf16.msra.mxu1 %v3374_v39  ;;  %v3458_v38 = vld [vmem:[#allocation4 + $0x8ac] ss:$48 sps:$4 sm:$0xff]   ;;  %v3453_v39 = vld [vmem:[#allocation4 + $0x8a0] ss:$48 sps:$4 sm:$0xff]  }
  0x4d   :  { %2375 = vmatprep.subr.bf16.mxu0 %v3375_v40  ;;  %2461 = vmatprep.subr.bf16.mxu1 %v3377_v41  ;;  %v3456_v40 = vld [vmem:[#allocation4 + $0x8a8] ss:$48 sps:$4 sm:$0xff]   ;;  %v3461_v41 = vld [vmem:[#allocation4 + $0x904] ss:$48 sps:$4 sm:$0xff]  }
  0x50   :  { %2376 = vmatpush1.bf16.msra.mxu0 %v3379_v42  ;;  %2462 = vmatpush1.bf16.msra.mxu1 %v3380_v43  ;;  %v3464_v42 = vld [vmem:[#allocation4 + $0x90c] ss:$48 sps:$4 sm:$0xff]   ;;  %v3459_v43 = vld [vmem:[#allocation4 + $0x900] ss:$48 sps:$4 sm:$0xff]  }
  0x51   :  { %2377 = vmatprep.subr.bf16.mxu0 %v3381_v44  ;;  %2463 = vmatprep.subr.bf16.mxu1 %v3383_v45  ;;  %v3462_v44 = vld [vmem:[#allocation4 + $0x908] ss:$48 sps:$4 sm:$0xff]   ;;  %v3467_v45 = vld [vmem:[#allocation4 + $0x964] ss:$48 sps:$4 sm:$0xff]  }
  0x54   :  { %2378 = vmatpush1.bf16.msra.mxu0 %v3385_v48  ;;  %2464 = vmatpush1.bf16.msra.mxu1 %v3386_v49  ;;  %v3468_v48 = vld [vmem:[#allocation4 + $0x968] ss:$48 sps:$4 sm:$0xff]   ;;  %v3473_v49 = vld [vmem:[#allocation4 + $0x9c4] ss:$48 sps:$4 sm:$0xff]  }
  0x55   :  { %2379 = vmatprep.subr.bf16.mxu0 %v3387_v51  ;;  %2465 = vmatprep.subr.bf16.mxu1 %v3389_v52  ;;  %v3476_v51 = vld [vmem:[#allocation4 + $0x9cc] ss:$48 sps:$4 sm:$0xff]   ;;  %v3471_v52 = vld [vmem:[#allocation4 + $0x9c0] ss:$48 sps:$4 sm:$0xff]  }
  0x58   :  { %2380 = vmatpush1.bf16.msra.mxu0 %v3391_v53  ;;  %2466 = vmatpush1.bf16.msra.mxu1 %v3392_v54  ;;  %v3474_v53 = vld [vmem:[#allocation4 + $0x9c8] ss:$48 sps:$4 sm:$0xff]   ;;  %v3479_v54 = vld [vmem:[#allocation4 + $0xa24] ss:$48 sps:$4 sm:$0xff]  }
  0x59   :  { %2381 = vmatprep.subr.bf16.mxu0 %v3393_v55  ;;  %2467 = vmatprep.subr.bf16.mxu1 %v3395_v56  ;;  %v3482_v55 = vld [vmem:[#allocation4 + $0xa2c] ss:$48 sps:$4 sm:$0xff]   ;;  %v3477_v56 = vld [vmem:[#allocation4 + $0xa20] ss:$48 sps:$4 sm:$0xff]  }
  0x5c   :  { %2382 = vmatpush1.bf16.msra.mxu0 %v3397_v57  ;;  %2468 = vmatpush1.bf16.msra.mxu1 %v3398_v58  ;;  %v3480_v57 = vld [vmem:[#allocation4 + $0xa28] ss:$48 sps:$4 sm:$0xff]   ;;  %v3485_v58 = vld [vmem:[#allocation4 + $0xa84] ss:$48 sps:$4 sm:$0xff]  }
  0x5d   :  { %2383 = vmatprep.subr.bf16.mxu0 %v3399_v59  ;;  %2469 = vmatprep.subr.bf16.mxu1 %v3401_v60  ;;  %v3488_v59 = vld [vmem:[#allocation4 + $0xa8c] ss:$48 sps:$4 sm:$0xff]   ;;  %v3483_v60 = vld [vmem:[#allocation4 + $0xa80] ss:$48 sps:$4 sm:$0xff]  }
  0x60   :  { %2384 = vmatpush1.bf16.msra.mxu0 %v3403_v61  ;;  %2470 = vmatpush1.bf16.msra.mxu1 %v3404_v62  ;;  %v3486_v61 = vld [vmem:[#allocation4 + $0xa88] ss:$48 sps:$4 sm:$0xff]   ;;  %v3491_v62 = vld [vmem:[#allocation4 + $0xae4] ss:$48 sps:$4 sm:$0xff]  }
  0x61   :  { %2385 = vmatprep.subr.bf16.mxu0 %v3405_v63  ;;  %2471 = vmatprep.subr.bf16.mxu1 %v3407_v0  ;;  %v3494_v63 = vld [vmem:[#allocation4 + $0xaec] ss:$48 sps:$4 sm:$0xff]   ;;  %v3489_v0 = vld [vmem:[#allocation4 + $0xae0] ss:$48 sps:$4 sm:$0xff]  }
  0x64   :  { %2386 = vmatpush1.bf16.msra.mxu0 %v3409_v1  ;;  %2472 = vmatpush1.bf16.msra.mxu1 %v3410_v2  ;;  %v3492_v1 = vld [vmem:[#allocation4 + $0xae8] ss:$48 sps:$4 sm:$0xff]   ;;  %v3497_v2 = vld [vmem:[#allocation4 + $0xb44] ss:$48 sps:$4 sm:$0xff]  }
  0x65   :  { %2398 = vmatprep.subr.bf16.mxu0 %v3413_v3  ;;  %2484 = vmatprep.subr.bf16.mxu1 %v3416_v6  ;;  %v3500_v3 = vld [vmem:[#allocation4 + $0xb4c] ss:$48 sps:$4 sm:$0xff]   ;;  %v3503_v6 = vld [vmem:[#allocation4 + $0xba4] ss:$48 sps:$4 sm:$0xff]  }
  0x67   :  { %2388 = vmatmul.mubr.bf16.vlgmr.msra.gmra.mrb[0].mxu0 %v3988_v9  ;;  %2474 = vmatmul.mubr.bf16.vlgmr.msra.gmra.mrb[0].mxu1 %v3988_v9 }
  0x68   :  { %2399 = vmatpush1.bf16.msra.mxu0 %v3411_v7  ;;  %2485 = vmatpush1.bf16.msra.mxu1 %v3414_v8  ;;  %v3506_v7 = vld [vmem:[#allocation4 + $0xbac] ss:$48 sps:$4 sm:$0xff]   ;;  %v3501_v8 = vld [vmem:[#allocation4 + $0xba0] ss:$48 sps:$4 sm:$0xff]  }
  0x69   :  { %2400 = vmatprep.subr.bf16.mxu0 %v3419_v10  ;;  %2486 = vmatprep.subr.bf16.mxu1 %v3422_v11  ;;  %v3504_v10 = vld [vmem:[#allocation4 + $0xba8] ss:$48 sps:$4 sm:$0xff]   ;;  %v41_v11 = vld [vmem:[#allocation2 + $0x10] sm:$0xff] }
  0x6a   :  { %2430 = vmatprep.mubr.bf16.mxu0 %v3992_v37  ;;  %2516 = vmatprep.mubr.bf16.mxu1 %v3992_v37 }
  0x6c   :  { %2401 = vmatpush1.bf16.msra.mxu0 %v3417_v12  ;;  %2487 = vmatpush1.bf16.msra.mxu1 %v3420_v13  ;;  %v45_v12 = vld [vmem:[#allocation2 + $0x30] sm:$0xff] }
  0x6d   :  { %2402 = vmatprep.subr.bf16.mxu0 %v3425_v14  ;;  %2488 = vmatprep.subr.bf16.mxu1 %v3428_v15  ;;  %v3509_v13 = vld [vmem:[#allocation4 + $0x14] ss:$48 sps:$4 sm:$0xff]   ;;  %v3512_v14 = vld [vmem:[#allocation4 + $0x1c] ss:$48 sps:$4 sm:$0xff]   ;;  %v3996_v15 = vpack.c.bf16 %v45_v12, %v41_v11  ;;  %v3591_v11 = vld [vmem:[#allocation4 + $0x550] ss:$48 sps:$4 sm:$0xff]  }
  0x6e   :  { %v3594_v12 = vld [vmem:[#allocation4 + $0x558] ss:$48 sps:$4 sm:$0xff]  }
  0x70   :  { %2403 = vmatpush1.bf16.msra.mxu0 %v3423_v16  ;;  %2489 = vmatpush1.bf16.msra.mxu1 %v3426_v17  ;;  %v3507_v16 = vld [vmem:[#allocation4 + $0x10] ss:$48 sps:$4 sm:$0xff]   ;;  %v3510_v17 = vld [vmem:[#allocation4 + $0x18] ss:$48 sps:$4 sm:$0xff]  }
  0x71   :  { %2404 = vmatprep.subr.bf16.mxu0 %v3431_v18  ;;  %2490 = vmatprep.subr.bf16.mxu1 %v3434_v19  ;;  %v3515_v18 = vld [vmem:[#allocation4 + $0x74] ss:$48 sps:$4 sm:$0xff]   ;;  %v3518_v19 = vld [vmem:[#allocation4 + $0x7c] ss:$48 sps:$4 sm:$0xff]  }
  0x74   :  { %2405 = vmatpush1.bf16.msra.mxu0 %v3429_v20  ;;  %2491 = vmatpush1.bf16.msra.mxu1 %v3432_v21  ;;  %v3513_v20 = vld [vmem:[#allocation4 + $0x70] ss:$48 sps:$4 sm:$0xff]   ;;  %v3516_v21 = vld [vmem:[#allocation4 + $0x78] ss:$48 sps:$4 sm:$0xff]  }
  0x75   :  { %2406 = vmatprep.subr.bf16.mxu0 %v3437_v22  ;;  %2492 = vmatprep.subr.bf16.mxu1 %v3440_v23  ;;  %v3521_v22 = vld [vmem:[#allocation4 + $0xd4] ss:$48 sps:$4 sm:$0xff]   ;;  %v3524_v23 = vld [vmem:[#allocation4 + $0xdc] ss:$48 sps:$4 sm:$0xff]  }
  0x78   :  { %2407 = vmatpush1.bf16.msra.mxu0 %v3435_v24  ;;  %2493 = vmatpush1.bf16.msra.mxu1 %v3438_v25  ;;  %v3519_v24 = vld [vmem:[#allocation4 + $0xd0] ss:$48 sps:$4 sm:$0xff]   ;;  %v3522_v25 = vld [vmem:[#allocation4 + $0xd8] ss:$48 sps:$4 sm:$0xff]  }
  0x79   :  { %2408 = vmatprep.subr.bf16.mxu0 %v3443_v26  ;;  %2494 = vmatprep.subr.bf16.mxu1 %v3446_v27  ;;  %v3527_v26 = vld [vmem:[#allocation4 + $0x134] ss:$48 sps:$4 sm:$0xff]   ;;  %v3530_v27 = vld [vmem:[#allocation4 + $0x13c] ss:$48 sps:$4 sm:$0xff]  }
  0x7c   :  { %2409 = vmatpush1.bf16.msra.mxu0 %v3441_v28  ;;  %2495 = vmatpush1.bf16.msra.mxu1 %v3444_v29  ;;  %v3525_v28 = vld [vmem:[#allocation4 + $0x130] ss:$48 sps:$4 sm:$0xff]   ;;  %v3528_v29 = vld [vmem:[#allocation4 + $0x138] ss:$48 sps:$4 sm:$0xff]  }
  0x7d   :  { %2410 = vmatprep.subr.bf16.mxu0 %v3449_v30  ;;  %2496 = vmatprep.subr.bf16.mxu1 %v3452_v31  ;;  %v3533_v30 = vld [vmem:[#allocation4 + $0x194] ss:$48 sps:$4 sm:$0xff]   ;;  %v3536_v31 = vld [vmem:[#allocation4 + $0x19c] ss:$48 sps:$4 sm:$0xff]  }
  0x80   :  { %2411 = vmatpush1.bf16.msra.mxu0 %v3447_v33  ;;  %2497 = vmatpush1.bf16.msra.mxu1 %v3450_v34  ;;  %v3534_v33 = vld [vmem:[#allocation4 + $0x198] ss:$48 sps:$4 sm:$0xff]   ;;  %v3539_v34 = vld [vmem:[#allocation4 + $0x1f4] ss:$48 sps:$4 sm:$0xff]  }
  0x81   :  { %2412 = vmatprep.subr.bf16.mxu0 %v3455_v36  ;;  %2498 = vmatprep.subr.bf16.mxu1 %v3458_v38  ;;  %v3537_v36 = vld [vmem:[#allocation4 + $0x1f0] ss:$48 sps:$4 sm:$0xff]   ;;  %v3540_v38 = vld [vmem:[#allocation4 + $0x1f8] ss:$48 sps:$4 sm:$0xff]  }
  0x84   :  { %2413 = vmatpush1.bf16.msra.mxu0 %v3453_v39  ;;  %2499 = vmatpush1.bf16.msra.mxu1 %v3456_v40  ;;  %v3545_v39 = vld [vmem:[#allocation4 + $0x254] ss:$48 sps:$4 sm:$0xff]   ;;  %v3548_v40 = vld [vmem:[#allocation4 + $0x25c] ss:$48 sps:$4 sm:$0xff]  }
  0x85   :  { %2414 = vmatprep.subr.bf16.mxu0 %v3461_v41  ;;  %2500 = vmatprep.subr.bf16.mxu1 %v3464_v42  ;;  %v3543_v41 = vld [vmem:[#allocation4 + $0x250] ss:$48 sps:$4 sm:$0xff]   ;;  %v3546_v42 = vld [vmem:[#allocation4 + $0x258] ss:$48 sps:$4 sm:$0xff]  }
  0x88   :  { %2415 = vmatpush1.bf16.msra.mxu0 %v3459_v43  ;;  %2501 = vmatpush1.bf16.msra.mxu1 %v3462_v44  ;;  %v3551_v43 = vld [vmem:[#allocation4 + $0x2b4] ss:$48 sps:$4 sm:$0xff]   ;;  %v3554_v44 = vld [vmem:[#allocation4 + $0x2bc] ss:$48 sps:$4 sm:$0xff]  }
  0x89   :  { %2416 = vmatprep.subr.bf16.mxu0 %v3467_v45  ;;  %2502 = vmatprep.subr.bf16.mxu1 %v3470_v46  ;;  %v3549_v45 = vld [vmem:[#allocation4 + $0x2b0] ss:$48 sps:$4 sm:$0xff]   ;;  %v3552_v46 = vld [vmem:[#allocation4 + $0x2b8] ss:$48 sps:$4 sm:$0xff]  }
  0x8c   :  { %2417 = vmatpush1.bf16.msra.mxu0 %v3465_v47  ;;  %2503 = vmatpush1.bf16.msra.mxu1 %v3468_v48  ;;  %v3557_v47 = vld [vmem:[#allocation4 + $0x314] ss:$48 sps:$4 sm:$0xff]   ;;  %v3560_v48 = vld [vmem:[#allocation4 + $0x31c] ss:$48 sps:$4 sm:$0xff]  }
  0x8d   :  { %2418 = vmatprep.subr.bf16.mxu0 %v3473_v49  ;;  %2504 = vmatprep.subr.bf16.mxu1 %v3476_v51  ;;  %v3555_v49 = vld [vmem:[#allocation4 + $0x310] ss:$48 sps:$4 sm:$0xff]   ;;  %v3558_v51 = vld [vmem:[#allocation4 + $0x318] ss:$48 sps:$4 sm:$0xff]  }
  0x90   :  { %2419 = vmatpush1.bf16.msra.mxu0 %v3471_v52  ;;  %2505 = vmatpush1.bf16.msra.mxu1 %v3474_v53  ;;  %v3563_v52 = vld [vmem:[#allocation4 + $0x374] ss:$48 sps:$4 sm:$0xff]   ;;  %v3566_v53 = vld [vmem:[#allocation4 + $0x37c] ss:$48 sps:$4 sm:$0xff]  }
  0x91   :  { %2420 = vmatprep.subr.bf16.mxu0 %v3479_v54  ;;  %2506 = vmatprep.subr.bf16.mxu1 %v3482_v55  ;;  %v3561_v54 = vld [vmem:[#allocation4 + $0x370] ss:$48 sps:$4 sm:$0xff]   ;;  %v3564_v55 = vld [vmem:[#allocation4 + $0x378] ss:$48 sps:$4 sm:$0xff]  }
  0x94   :  { %2421 = vmatpush1.bf16.msra.mxu0 %v3477_v56  ;;  %2507 = vmatpush1.bf16.msra.mxu1 %v3480_v57  ;;  %v3569_v56 = vld [vmem:[#allocation4 + $0x3d4] ss:$48 sps:$4 sm:$0xff]   ;;  %v3572_v57 = vld [vmem:[#allocation4 + $0x3dc] ss:$48 sps:$4 sm:$0xff]  }
  0x95   :  { %2422 = vmatprep.subr.bf16.mxu0 %v3485_v58  ;;  %2508 = vmatprep.subr.bf16.mxu1 %v3488_v59  ;;  %v3567_v58 = vld [vmem:[#allocation4 + $0x3d0] ss:$48 sps:$4 sm:$0xff]   ;;  %v3570_v59 = vld [vmem:[#allocation4 + $0x3d8] ss:$48 sps:$4 sm:$0xff]  }
  0x98   :  { %2423 = vmatpush1.bf16.msra.mxu0 %v3483_v60  ;;  %2509 = vmatpush1.bf16.msra.mxu1 %v3486_v61  ;;  %v3575_v60 = vld [vmem:[#allocation4 + $0x434] ss:$48 sps:$4 sm:$0xff]   ;;  %v3578_v61 = vld [vmem:[#allocation4 + $0x43c] ss:$48 sps:$4 sm:$0xff]  }
  0x99   :  { %2424 = vmatprep.subr.bf16.mxu0 %v3491_v62  ;;  %2510 = vmatprep.subr.bf16.mxu1 %v3494_v63  ;;  %v3573_v62 = vld [vmem:[#allocation4 + $0x430] ss:$48 sps:$4 sm:$0xff]   ;;  %v3576_v63 = vld [vmem:[#allocation4 + $0x438] ss:$48 sps:$4 sm:$0xff]  }
  0x9c   :  { %2425 = vmatpush1.bf16.msra.mxu0 %v3489_v0  ;;  %2511 = vmatpush1.bf16.msra.mxu1 %v3492_v1  ;;  %v3581_v0 = vld [vmem:[#allocation4 + $0x494] ss:$48 sps:$4 sm:$0xff]   ;;  %v3584_v1 = vld [vmem:[#allocation4 + $0x49c] ss:$48 sps:$4 sm:$0xff]  }
  0x9d   :  { %2426 = vmatprep.subr.bf16.mxu0 %v3497_v2  ;;  %2512 = vmatprep.subr.bf16.mxu1 %v3500_v3  ;;  %v3579_v2 = vld [vmem:[#allocation4 + $0x490] ss:$48 sps:$4 sm:$0xff]   ;;  %v3582_v3 = vld [vmem:[#allocation4 + $0x498] ss:$48 sps:$4 sm:$0xff]  }
  0xa0   :  { %2427 = vmatpush1.bf16.msra.mxu0 %v3495_v4  ;;  %2513 = vmatpush1.bf16.msra.mxu1 %v3498_v5  ;;  %v3587_v4 = vld [vmem:[#allocation4 + $0x4f4] ss:$48 sps:$4 sm:$0xff]   ;;  %v3590_v5 = vld [vmem:[#allocation4 + $0x4fc] ss:$48 sps:$4 sm:$0xff]  }
  0xa1   :  { %2428 = vmatprep.subr.bf16.mxu0 %v3503_v6  ;;  %2514 = vmatprep.subr.bf16.mxu1 %v3506_v7  ;;  %v3585_v6 = vld [vmem:[#allocation4 + $0x4f0] ss:$48 sps:$4 sm:$0xff]   ;;  %v3588_v7 = vld [vmem:[#allocation4 + $0x4f8] ss:$48 sps:$4 sm:$0xff]  }
  0xa4   :  { %2429 = vmatpush1.bf16.msra.mxu0 %v3501_v8  ;;  %2515 = vmatpush1.bf16.msra.mxu1 %v3504_v10  ;;  %v3593_v8 = vld [vmem:[#allocation4 + $0x554] ss:$48 sps:$4 sm:$0xff]   ;;  %v3596_v10 = vld [vmem:[#allocation4 + $0x55c] ss:$48 sps:$4 sm:$0xff]  }
  0xa5   :  { %2527 = vmatprep.subr.bf16.mxu0 %v3509_v13  ;;  %2613 = vmatprep.subr.bf16.mxu1 %v3512_v14  ;;  %v3599_v13 = vld [vmem:[#allocation4 + $0x5b4] ss:$48 sps:$4 sm:$0xff]   ;;  %v3602_v14 = vld [vmem:[#allocation4 + $0x5bc] ss:$48 sps:$4 sm:$0xff]  }
  0xa7   :  { %2431 = vmatmul.mubr.bf16.vlgmr.msra.gmra.mrb[0].mxu0 %v3996_v15  ;;  %2517 = vmatmul.mubr.bf16.vlgmr.msra.gmra.mrb[0].mxu1 %v3996_v15 }
  0xa8   :  { %2528 = vmatpush1.bf16.msra.mxu0 %v3507_v16  ;;  %2614 = vmatpush1.bf16.msra.mxu1 %v3510_v17  ;;  %v3597_v16 = vld [vmem:[#allocation4 + $0x5b0] ss:$48 sps:$4 sm:$0xff]   ;;  %v3600_v17 = vld [vmem:[#allocation4 + $0x5b8] ss:$48 sps:$4 sm:$0xff]  }
  0xa9   :  { %2529 = vmatprep.subr.bf16.mxu0 %v3515_v18  ;;  %2615 = vmatprep.subr.bf16.mxu1 %v3518_v19  ;;  %v3605_v18 = vld [vmem:[#allocation4 + $0x614] ss:$48 sps:$4 sm:$0xff]   ;;  %v3608_v19 = vld [vmem:[#allocation4 + $0x61c] ss:$48 sps:$4 sm:$0xff]  }
  0xaa   :  { %2559 = vmatprep.mubr.bf16.mxu0 %v3984_v50  ;;  %2645 = vmatprep.mubr.bf16.mxu1 %v3984_v50 }
  0xac   :  { %2530 = vmatpush1.bf16.msra.mxu0 %v3513_v20  ;;  %2616 = vmatpush1.bf16.msra.mxu1 %v3516_v21  ;;  %v3603_v20 = vld [vmem:[#allocation4 + $0x610] ss:$48 sps:$4 sm:$0xff]   ;;  %v3606_v21 = vld [vmem:[#allocation4 + $0x618] ss:$48 sps:$4 sm:$0xff]  }
  0xad   :  { %2531 = vmatprep.subr.bf16.mxu0 %v3521_v22  ;;  %2617 = vmatprep.subr.bf16.mxu1 %v3524_v23  ;;  %v3611_v22 = vld [vmem:[#allocation4 + $0x674] ss:$48 sps:$4 sm:$0xff]   ;;  %v3614_v23 = vld [vmem:[#allocation4 + $0x67c] ss:$48 sps:$4 sm:$0xff]  }
  0xb0   :  { %2532 = vmatpush1.bf16.msra.mxu0 %v3519_v24  ;;  %2618 = vmatpush1.bf16.msra.mxu1 %v3522_v25  ;;  %v3609_v24 = vld [vmem:[#allocation4 + $0x670] ss:$48 sps:$4 sm:$0xff]   ;;  %v3612_v25 = vld [vmem:[#allocation4 + $0x678] ss:$48 sps:$4 sm:$0xff]  }
  0xb1   :  { %2533 = vmatprep.subr.bf16.mxu0 %v3527_v26  ;;  %2619 = vmatprep.subr.bf16.mxu1 %v3530_v27  ;;  %v3617_v26 = vld [vmem:[#allocation4 + $0x6d4] ss:$48 sps:$4 sm:$0xff]   ;;  %v3620_v27 = vld [vmem:[#allocation4 + $0x6dc] ss:$48 sps:$4 sm:$0xff]  }
  0xb4   :  { %2534 = vmatpush1.bf16.msra.mxu0 %v3525_v28  ;;  %2620 = vmatpush1.bf16.msra.mxu1 %v3528_v29  ;;  %v3615_v28 = vld [vmem:[#allocation4 + $0x6d0] ss:$48 sps:$4 sm:$0xff]   ;;  %v3618_v29 = vld [vmem:[#allocation4 + $0x6d8] ss:$48 sps:$4 sm:$0xff]  }
  0xb5   :  { %2535 = vmatprep.subr.bf16.mxu0 %v3533_v30  ;;  %2621 = vmatprep.subr.bf16.mxu1 %v3536_v31  ;;  %v3623_v30 = vld [vmem:[#allocation4 + $0x734] ss:$48 sps:$4 sm:$0xff]   ;;  %v3626_v31 = vld [vmem:[#allocation4 + $0x73c] ss:$48 sps:$4 sm:$0xff]  }
  0xb8   :  { %2536 = vmatpush1.bf16.msra.mxu0 %v3531_v32  ;;  %2622 = vmatpush1.bf16.msra.mxu1 %v3534_v33  ;;  %v3621_v32 = vld [vmem:[#allocation4 + $0x730] ss:$48 sps:$4 sm:$0xff]   ;;  %v3624_v33 = vld [vmem:[#allocation4 + $0x738] ss:$48 sps:$4 sm:$0xff]  }
  0xb9   :  { %2537 = vmatprep.subr.bf16.mxu0 %v3539_v34  ;;  %2623 = vmatprep.subr.bf16.mxu1 %v3542_v35  ;;  %v3629_v34 = vld [vmem:[#allocation4 + $0x794] ss:$48 sps:$4 sm:$0xff]   ;;  %v3632_v35 = vld [vmem:[#allocation4 + $0x79c] ss:$48 sps:$4 sm:$0xff]  }
  0xbc   :  { %2538 = vmatpush1.bf16.msra.mxu0 %v3537_v36  ;;  %2624 = vmatpush1.bf16.msra.mxu1 %v3540_v38  ;;  %v3627_v36 = vld [vmem:[#allocation4 + $0x790] ss:$48 sps:$4 sm:$0xff]   ;;  %v3630_v38 = vld [vmem:[#allocation4 + $0x798] ss:$48 sps:$4 sm:$0xff]  }
  0xbd   :  { %2539 = vmatprep.subr.bf16.mxu0 %v3545_v39  ;;  %2625 = vmatprep.subr.bf16.mxu1 %v3548_v40  ;;  %v3635_v39 = vld [vmem:[#allocation4 + $0x7f4] ss:$48 sps:$4 sm:$0xff]   ;;  %v3638_v40 = vld [vmem:[#allocation4 + $0x7fc] ss:$48 sps:$4 sm:$0xff]  }
  0xc0   :  { %2540 = vmatpush1.bf16.msra.mxu0 %v3543_v41  ;;  %2626 = vmatpush1.bf16.msra.mxu1 %v3546_v42  ;;  %v3633_v41 = vld [vmem:[#allocation4 + $0x7f0] ss:$48 sps:$4 sm:$0xff]   ;;  %v3636_v42 = vld [vmem:[#allocation4 + $0x7f8] ss:$48 sps:$4 sm:$0xff]  }
  0xc1   :  { %2541 = vmatprep.subr.bf16.mxu0 %v3551_v43  ;;  %2627 = vmatprep.subr.bf16.mxu1 %v3554_v44  ;;  %v3641_v43 = vld [vmem:[#allocation4 + $0x854] ss:$48 sps:$4 sm:$0xff]   ;;  %v3644_v44 = vld [vmem:[#allocation4 + $0x85c] ss:$48 sps:$4 sm:$0xff]  }
  0xc4   :  { %2542 = vmatpush1.bf16.msra.mxu0 %v3549_v45  ;;  %2628 = vmatpush1.bf16.msra.mxu1 %v3552_v46  ;;  %v3639_v45 = vld [vmem:[#allocation4 + $0x850] ss:$48 sps:$4 sm:$0xff]   ;;  %v3642_v46 = vld [vmem:[#allocation4 + $0x858] ss:$48 sps:$4 sm:$0xff]  }
  0xc5   :  { %2543 = vmatprep.subr.bf16.mxu0 %v3557_v47  ;;  %2629 = vmatprep.subr.bf16.mxu1 %v3560_v48  ;;  %v3647_v47 = vld [vmem:[#allocation4 + $0x8b4] ss:$48 sps:$4 sm:$0xff]   ;;  %v3650_v48 = vld [vmem:[#allocation4 + $0x8bc] ss:$48 sps:$4 sm:$0xff]  }
  0xc8   :  { %2544 = vmatpush1.bf16.msra.mxu0 %v3555_v49  ;;  %2630 = vmatpush1.bf16.msra.mxu1 %v3558_v51  ;;  %v3645_v49 = vld [vmem:[#allocation4 + $0x8b0] ss:$48 sps:$4 sm:$0xff]   ;;  %v3648_v51 = vld [vmem:[#allocation4 + $0x8b8] ss:$48 sps:$4 sm:$0xff]  }
  0xc9   :  { %2545 = vmatprep.subr.bf16.mxu0 %v3563_v52  ;;  %2631 = vmatprep.subr.bf16.mxu1 %v3566_v53  ;;  %v3653_v52 = vld [vmem:[#allocation4 + $0x914] ss:$48 sps:$4 sm:$0xff]   ;;  %v3656_v53 = vld [vmem:[#allocation4 + $0x91c] ss:$48 sps:$4 sm:$0xff]  }
  0xcc   :  { %2546 = vmatpush1.bf16.msra.mxu0 %v3561_v54  ;;  %2632 = vmatpush1.bf16.msra.mxu1 %v3564_v55  ;;  %v3651_v54 = vld [vmem:[#allocation4 + $0x910] ss:$48 sps:$4 sm:$0xff]   ;;  %v3654_v55 = vld [vmem:[#allocation4 + $0x918] ss:$48 sps:$4 sm:$0xff]  }
  0xcd   :  { %2547 = vmatprep.subr.bf16.mxu0 %v3569_v56  ;;  %2633 = vmatprep.subr.bf16.mxu1 %v3572_v57  ;;  %v3659_v56 = vld [vmem:[#allocation4 + $0x974] ss:$48 sps:$4 sm:$0xff]   ;;  %v3662_v57 = vld [vmem:[#allocation4 + $0x97c] ss:$48 sps:$4 sm:$0xff]  }
  0xd0   :  { %2548 = vmatpush1.bf16.msra.mxu0 %v3567_v58  ;;  %2634 = vmatpush1.bf16.msra.mxu1 %v3570_v59  ;;  %v3657_v58 = vld [vmem:[#allocation4 + $0x970] ss:$48 sps:$4 sm:$0xff]   ;;  %v3660_v59 = vld [vmem:[#allocation4 + $0x978] ss:$48 sps:$4 sm:$0xff]  }
  0xd1   :  { %2549 = vmatprep.subr.bf16.mxu0 %v3575_v60  ;;  %2635 = vmatprep.subr.bf16.mxu1 %v3578_v61  ;;  %v3665_v60 = vld [vmem:[#allocation4 + $0x9d4] ss:$48 sps:$4 sm:$0xff]   ;;  %v3668_v61 = vld [vmem:[#allocation4 + $0x9dc] ss:$48 sps:$4 sm:$0xff]  }
  0xd4   :  { %2550 = vmatpush1.bf16.msra.mxu0 %v3573_v62  ;;  %2636 = vmatpush1.bf16.msra.mxu1 %v3576_v63  ;;  %v3663_v62 = vld [vmem:[#allocation4 + $0x9d0] ss:$48 sps:$4 sm:$0xff]   ;;  %v3666_v63 = vld [vmem:[#allocation4 + $0x9d8] ss:$48 sps:$4 sm:$0xff]  }
  0xd5   :  { %2551 = vmatprep.subr.bf16.mxu0 %v3581_v0  ;;  %2637 = vmatprep.subr.bf16.mxu1 %v3584_v1  ;;  %v3671_v0 = vld [vmem:[#allocation4 + $0xa34] ss:$48 sps:$4 sm:$0xff]   ;;  %v3674_v1 = vld [vmem:[#allocation4 + $0xa3c] ss:$48 sps:$4 sm:$0xff]  }
  0xd8   :  { %2552 = vmatpush1.bf16.msra.mxu0 %v3579_v2  ;;  %2638 = vmatpush1.bf16.msra.mxu1 %v3582_v3  ;;  %v3669_v2 = vld [vmem:[#allocation4 + $0xa30] ss:$48 sps:$4 sm:$0xff]   ;;  %v3672_v3 = vld [vmem:[#allocation4 + $0xa38] ss:$48 sps:$4 sm:$0xff]  }
  0xd9   :  { %2553 = vmatprep.subr.bf16.mxu0 %v3587_v4  ;;  %2639 = vmatprep.subr.bf16.mxu1 %v3590_v5  ;;  %v3677_v4 = vld [vmem:[#allocation4 + $0xa94] ss:$48 sps:$4 sm:$0xff]   ;;  %v3680_v5 = vld [vmem:[#allocation4 + $0xa9c] ss:$48 sps:$4 sm:$0xff]  }
  0xdc   :  { %2554 = vmatpush1.bf16.msra.mxu0 %v3585_v6  ;;  %2640 = vmatpush1.bf16.msra.mxu1 %v3588_v7  ;;  %v3675_v6 = vld [vmem:[#allocation4 + $0xa90] ss:$48 sps:$4 sm:$0xff]   ;;  %v3678_v7 = vld [vmem:[#allocation4 + $0xa98] ss:$48 sps:$4 sm:$0xff]  }
  0xdd   :  { %2555 = vmatprep.subr.bf16.mxu0 %v3593_v8  ;;  %2641 = vmatprep.subr.bf16.mxu1 %v3596_v10  ;;  %v3683_v8 = vld [vmem:[#allocation4 + $0xaf4] ss:$48 sps:$4 sm:$0xff]   ;;  %v3686_v10 = vld [vmem:[#allocation4 + $0xafc] ss:$48 sps:$4 sm:$0xff]  }
  0xe0   :  { %2556 = vmatpush1.bf16.msra.mxu0 %v3591_v11  ;;  %2642 = vmatpush1.bf16.msra.mxu1 %v3594_v12  ;;  %v3681_v11 = vld [vmem:[#allocation4 + $0xaf0] ss:$48 sps:$4 sm:$0xff]   ;;  %v3684_v12 = vld [vmem:[#allocation4 + $0xaf8] ss:$48 sps:$4 sm:$0xff]  }
  0xe1   :  { %2557 = vmatprep.subr.bf16.mxu0 %v3599_v13  ;;  %2643 = vmatprep.subr.bf16.mxu1 %v3602_v14  ;;  %v3689_v13 = vld [vmem:[#allocation4 + $0xb54] ss:$48 sps:$4 sm:$0xff]   ;;  %v3692_v14 = vld [vmem:[#allocation4 + $0xb5c] ss:$48 sps:$4 sm:$0xff]  }
  0xe4   :  { %2558 = vmatpush1.bf16.msra.mxu0 %v3597_v16  ;;  %2644 = vmatpush1.bf16.msra.mxu1 %v3600_v17  ;;  %v3687_v16 = vld [vmem:[#allocation4 + $0xb50] ss:$48 sps:$4 sm:$0xff]   ;;  %v3690_v17 = vld [vmem:[#allocation4 + $0xb58] ss:$48 sps:$4 sm:$0xff]  }
  0xe5   :  { %2570 = vmatprep.subr.bf16.mxu0 %v3605_v18  ;;  %2656 = vmatprep.subr.bf16.mxu1 %v3608_v19  ;;  %v3695_v18 = vld [vmem:[#allocation4 + $0xbb4] ss:$48 sps:$4 sm:$0xff]   ;;  %v3698_v19 = vld [vmem:[#allocation4 + $0xbbc] ss:$48 sps:$4 sm:$0xff]  }
  0xe7   :  { %2560 = vmatmul.mubr.bf16.vlgmr.msra.gmra.mrb[4].mxu0 %v3988_v9  ;;  %2646 = vmatmul.mubr.bf16.vlgmr.msra.gmra.mrb[4].mxu1 %v3988_v9 }
  0xe8   :  { %2571 = vmatpush1.bf16.msra.mxu0 %v3603_v20  ;;  %2657 = vmatpush1.bf16.msra.mxu1 %v3606_v21  ;;  %v3693_v20 = vld [vmem:[#allocation4 + $0xbb0] ss:$48 sps:$4 sm:$0xff]   ;;  %v3696_v21 = vld [vmem:[#allocation4 + $0xbb8] ss:$48 sps:$4 sm:$0xff]  }
  0xe9   :  { %2572 = vmatprep.subr.bf16.mxu0 %v3611_v22  ;;  %2658 = vmatprep.subr.bf16.mxu1 %v3614_v23  ;;  %v3701_v22 = vld [vmem:[#allocation4 + $0x24] ss:$48 sps:$4 sm:$0xff]   ;;  %v3704_v23 = vld [vmem:[#allocation4 + $0x2c] ss:$48 sps:$4 sm:$0xff]  }
  0xea   :  { %2602 = vmatprep.mubr.bf16.mxu0 %v3992_v37  ;;  %2688 = vmatprep.mubr.bf16.mxu1 %v3992_v37 }
  0xec   :  { %2573 = vmatpush1.bf16.msra.mxu0 %v3609_v24  ;;  %2659 = vmatpush1.bf16.msra.mxu1 %v3612_v25  ;;  %v3699_v24 = vld [vmem:[#allocation4 + $0x20] ss:$48 sps:$4 sm:$0xff]   ;;  %v3702_v25 = vld [vmem:[#allocation4 + $0x28] ss:$48 sps:$4 sm:$0xff]  }
  0xed   :  { %2574 = vmatprep.subr.bf16.mxu0 %v3617_v26  ;;  %2660 = vmatprep.subr.bf16.mxu1 %v3620_v27  ;;  %v3707_v26 = vld [vmem:[#allocation4 + $0x84] ss:$48 sps:$4 sm:$0xff]   ;;  %v3710_v27 = vld [vmem:[#allocation4 + $0x8c] ss:$48 sps:$4 sm:$0xff]  }
  0xf0   :  { %2575 = vmatpush1.bf16.msra.mxu0 %v3615_v28  ;;  %2661 = vmatpush1.bf16.msra.mxu1 %v3618_v29  ;;  %v3705_v28 = vld [vmem:[#allocation4 + $0x80] ss:$48 sps:$4 sm:$0xff]   ;;  %v3708_v29 = vld [vmem:[#allocation4 + $0x88] ss:$48 sps:$4 sm:$0xff]  }
  0xf1   :  { %2576 = vmatprep.subr.bf16.mxu0 %v3623_v30  ;;  %2662 = vmatprep.subr.bf16.mxu1 %v3626_v31  ;;  %v3713_v30 = vld [vmem:[#allocation4 + $0xe4] ss:$48 sps:$4 sm:$0xff]   ;;  %v3716_v31 = vld [vmem:[#allocation4 + $0xec] ss:$48 sps:$4 sm:$0xff]  }
  0xf4   :  { %2577 = vmatpush1.bf16.msra.mxu0 %v3621_v32  ;;  %2663 = vmatpush1.bf16.msra.mxu1 %v3624_v33  ;;  %v3711_v32 = vld [vmem:[#allocation4 + $0xe0] ss:$48 sps:$4 sm:$0xff]   ;;  %v3714_v33 = vld [vmem:[#allocation4 + $0xe8] ss:$48 sps:$4 sm:$0xff]  }
  0xf5   :  { %2578 = vmatprep.subr.bf16.mxu0 %v3629_v34  ;;  %2664 = vmatprep.subr.bf16.mxu1 %v3632_v35  ;;  %v3719_v34 = vld [vmem:[#allocation4 + $0x144] ss:$48 sps:$4 sm:$0xff]   ;;  %v3722_v35 = vld [vmem:[#allocation4 + $0x14c] ss:$48 sps:$4 sm:$0xff]  }
  0xf8   :  { %2579 = vmatpush1.bf16.msra.mxu0 %v3627_v36  ;;  %2665 = vmatpush1.bf16.msra.mxu1 %v3630_v38  ;;  %v3717_v36 = vld [vmem:[#allocation4 + $0x140] ss:$48 sps:$4 sm:$0xff]   ;;  %v3720_v38 = vld [vmem:[#allocation4 + $0x148] ss:$48 sps:$4 sm:$0xff]  }
  0xf9   :  { %2580 = vmatprep.subr.bf16.mxu0 %v3635_v39  ;;  %2666 = vmatprep.subr.bf16.mxu1 %v3638_v40  ;;  %v3725_v39 = vld [vmem:[#allocation4 + $0x1a4] ss:$48 sps:$4 sm:$0xff]   ;;  %v3728_v40 = vld [vmem:[#allocation4 + $0x1ac] ss:$48 sps:$4 sm:$0xff]  }
  0xfc   :  { %2581 = vmatpush1.bf16.msra.mxu0 %v3633_v41  ;;  %2667 = vmatpush1.bf16.msra.mxu1 %v3636_v42  ;;  %v3723_v41 = vld [vmem:[#allocation4 + $0x1a0] ss:$48 sps:$4 sm:$0xff]   ;;  %v3731_v42 = vld [vmem:[#allocation4 + $0x204] ss:$48 sps:$4 sm:$0xff]  }
  0xfd   :  { %2582 = vmatprep.subr.bf16.mxu0 %v3641_v43  ;;  %2668 = vmatprep.subr.bf16.mxu1 %v3644_v44  ;;  %v3734_v43 = vld [vmem:[#allocation4 + $0x20c] ss:$48 sps:$4 sm:$0xff]   ;;  %v3729_v44 = vld [vmem:[#allocation4 + $0x200] ss:$48 sps:$4 sm:$0xff]  }
 0x100   :  { %2583 = vmatpush1.bf16.msra.mxu0 %v3639_v45  ;;  %2669 = vmatpush1.bf16.msra.mxu1 %v3642_v46  ;;  %v3732_v45 = vld [vmem:[#allocation4 + $0x208] ss:$48 sps:$4 sm:$0xff]   ;;  %v3737_v46 = vld [vmem:[#allocation4 + $0x264] ss:$48 sps:$4 sm:$0xff]  }
 0x101   :  { %2584 = vmatprep.subr.bf16.mxu0 %v3647_v47  ;;  %2670 = vmatprep.subr.bf16.mxu1 %v3650_v48  ;;  %v3740_v47 = vld [vmem:[#allocation4 + $0x26c] ss:$48 sps:$4 sm:$0xff]   ;;  %v3735_v48 = vld [vmem:[#allocation4 + $0x260] ss:$48 sps:$4 sm:$0xff]  }
 0x104   :  { %2585 = vmatpush1.bf16.msra.mxu0 %v3645_v49  ;;  %2671 = vmatpush1.bf16.msra.mxu1 %v3648_v51  ;;  %v3738_v49 = vld [vmem:[#allocation4 + $0x268] ss:$48 sps:$4 sm:$0xff]   ;;  %v3743_v51 = vld [vmem:[#allocation4 + $0x2c4] ss:$48 sps:$4 sm:$0xff]  }
 0x105   :  { %2586 = vmatprep.subr.bf16.mxu0 %v3653_v52  ;;  %2672 = vmatprep.subr.bf16.mxu1 %v3656_v53  ;;  %v3746_v52 = vld [vmem:[#allocation4 + $0x2cc] ss:$48 sps:$4 sm:$0xff]   ;;  %v3741_v53 = vld [vmem:[#allocation4 + $0x2c0] ss:$48 sps:$4 sm:$0xff]  }
 0x108   :  { %2587 = vmatpush1.bf16.msra.mxu0 %v3651_v54  ;;  %2673 = vmatpush1.bf16.msra.mxu1 %v3654_v55  ;;  %v3744_v54 = vld [vmem:[#allocation4 + $0x2c8] ss:$48 sps:$4 sm:$0xff]   ;;  %v3749_v55 = vld [vmem:[#allocation4 + $0x324] ss:$48 sps:$4 sm:$0xff]  }
 0x109   :  { %2588 = vmatprep.subr.bf16.mxu0 %v3659_v56  ;;  %2674 = vmatprep.subr.bf16.mxu1 %v3662_v57  ;;  %v3752_v56 = vld [vmem:[#allocation4 + $0x32c] ss:$48 sps:$4 sm:$0xff]   ;;  %v3747_v57 = vld [vmem:[#allocation4 + $0x320] ss:$48 sps:$4 sm:$0xff]  }
 0x10c   :  { %2589 = vmatpush1.bf16.msra.mxu0 %v3657_v58  ;;  %2675 = vmatpush1.bf16.msra.mxu1 %v3660_v59  ;;  %v3750_v58 = vld [vmem:[#allocation4 + $0x328] ss:$48 sps:$4 sm:$0xff]   ;;  %v3755_v59 = vld [vmem:[#allocation4 + $0x384] ss:$48 sps:$4 sm:$0xff]  }
 0x10d   :  { %2590 = vmatprep.subr.bf16.mxu0 %v3665_v60  ;;  %2676 = vmatprep.subr.bf16.mxu1 %v3668_v61  ;;  %v3758_v60 = vld [vmem:[#allocation4 + $0x38c] ss:$48 sps:$4 sm:$0xff]   ;;  %v3753_v61 = vld [vmem:[#allocation4 + $0x380] ss:$48 sps:$4 sm:$0xff]  }
 0x110   :  { %2591 = vmatpush1.bf16.msra.mxu0 %v3663_v62  ;;  %2677 = vmatpush1.bf16.msra.mxu1 %v3666_v63  ;;  %v3756_v62 = vld [vmem:[#allocation4 + $0x388] ss:$48 sps:$4 sm:$0xff]   ;;  %v3761_v63 = vld [vmem:[#allocation4 + $0x3e4] ss:$48 sps:$4 sm:$0xff]  }
 0x111   :  { %2592 = vmatprep.subr.bf16.mxu0 %v3671_v0  ;;  %2678 = vmatprep.subr.bf16.mxu1 %v3674_v1  ;;  %v3764_v0 = vld [vmem:[#allocation4 + $0x3ec] ss:$48 sps:$4 sm:$0xff]   ;;  %v3759_v1 = vld [vmem:[#allocation4 + $0x3e0] ss:$48 sps:$4 sm:$0xff]  }
 0x114   :  { %2593 = vmatpush1.bf16.msra.mxu0 %v3669_v2  ;;  %2679 = vmatpush1.bf16.msra.mxu1 %v3672_v3  ;;  %v3762_v2 = vld [vmem:[#allocation4 + $0x3e8] ss:$48 sps:$4 sm:$0xff]   ;;  %v3767_v3 = vld [vmem:[#allocation4 + $0x444] ss:$48 sps:$4 sm:$0xff]  }
 0x115   :  { %2594 = vmatprep.subr.bf16.mxu0 %v3677_v4  ;;  %2680 = vmatprep.subr.bf16.mxu1 %v3680_v5  ;;  %v3770_v4 = vld [vmem:[#allocation4 + $0x44c] ss:$48 sps:$4 sm:$0xff]   ;;  %v3765_v5 = vld [vmem:[#allocation4 + $0x440] ss:$48 sps:$4 sm:$0xff]  }
 0x118   :  { %2595 = vmatpush1.bf16.msra.mxu0 %v3675_v6  ;;  %2681 = vmatpush1.bf16.msra.mxu1 %v3678_v7  ;;  %v3768_v6 = vld [vmem:[#allocation4 + $0x448] ss:$48 sps:$4 sm:$0xff]   ;;  %v3773_v7 = vld [vmem:[#allocation4 + $0x4a4] ss:$48 sps:$4 sm:$0xff]  }
 0x119   :  { %2596 = vmatprep.subr.bf16.mxu0 %v3683_v8  ;;  %2682 = vmatprep.subr.bf16.mxu1 %v3686_v10  ;;  %v3776_v8 = vld [vmem:[#allocation4 + $0x4ac] ss:$48 sps:$4 sm:$0xff]   ;;  %v3771_v10 = vld [vmem:[#allocation4 + $0x4a0] ss:$48 sps:$4 sm:$0xff]  }
 0x11c   :  { %2597 = vmatpush1.bf16.msra.mxu0 %v3681_v11  ;;  %2683 = vmatpush1.bf16.msra.mxu1 %v3684_v12  ;;  %v3774_v11 = vld [vmem:[#allocation4 + $0x4a8] ss:$48 sps:$4 sm:$0xff]   ;;  %v3779_v12 = vld [vmem:[#allocation4 + $0x504] ss:$48 sps:$4 sm:$0xff]  }
 0x11d   :  { %2598 = vmatprep.subr.bf16.mxu0 %v3689_v13  ;;  %2684 = vmatprep.subr.bf16.mxu1 %v3692_v14  ;;  %v3782_v13 = vld [vmem:[#allocation4 + $0x50c] ss:$48 sps:$4 sm:$0xff]   ;;  %v3777_v14 = vld [vmem:[#allocation4 + $0x500] ss:$48 sps:$4 sm:$0xff]  }
 0x120   :  { %2599 = vmatpush1.bf16.msra.mxu0 %v3687_v16  ;;  %2685 = vmatpush1.bf16.msra.mxu1 %v3690_v17  ;;  %v3780_v16 = vld [vmem:[#allocation4 + $0x508] ss:$48 sps:$4 sm:$0xff]   ;;  %v3785_v17 = vld [vmem:[#allocation4 + $0x564] ss:$48 sps:$4 sm:$0xff]  }
 0x121   :  { %2600 = vmatprep.subr.bf16.mxu0 %v3695_v18  ;;  %2686 = vmatprep.subr.bf16.mxu1 %v3698_v19  ;;  %v3788_v18 = vld [vmem:[#allocation4 + $0x56c] ss:$48 sps:$4 sm:$0xff]   ;;  %v3783_v19 = vld [vmem:[#allocation4 + $0x560] ss:$48 sps:$4 sm:$0xff]  }
 0x124   :  { %2601 = vmatpush1.bf16.msra.mxu0 %v3693_v20  ;;  %2687 = vmatpush1.bf16.msra.mxu1 %v3696_v21  ;;  %v3786_v20 = vld [vmem:[#allocation4 + $0x568] ss:$48 sps:$4 sm:$0xff]   ;;  %v3791_v21 = vld [vmem:[#allocation4 + $0x5c4] ss:$48 sps:$4 sm:$0xff]  }
 0x125   :  { %2699 = vmatprep.subr.bf16.mxu0 %v3701_v22  ;;  %2785 = vmatprep.subr.bf16.mxu1 %v3704_v23  ;;  %v3794_v22 = vld [vmem:[#allocation4 + $0x5cc] ss:$48 sps:$4 sm:$0xff]   ;;  %v3789_v23 = vld [vmem:[#allocation4 + $0x5c0] ss:$48 sps:$4 sm:$0xff]  }
 0x127   :  { %2603 = vmatmul.mubr.bf16.vlgmr.msra.gmra.mrb[4].mxu0 %v3996_v15  ;;  %2689 = vmatmul.mubr.bf16.vlgmr.msra.gmra.mrb[4].mxu1 %v3996_v15 }
 0x128   :  { %2700 = vmatpush1.bf16.msra.mxu0 %v3699_v24  ;;  %2786 = vmatpush1.bf16.msra.mxu1 %v3702_v25  ;;  %v3792_v24 = vld [vmem:[#allocation4 + $0x5c8] ss:$48 sps:$4 sm:$0xff]   ;;  %v3797_v25 = vld [vmem:[#allocation4 + $0x624] ss:$48 sps:$4 sm:$0xff]  }
 0x129   :  { %2701 = vmatprep.subr.bf16.mxu0 %v3707_v26  ;;  %2787 = vmatprep.subr.bf16.mxu1 %v3710_v27  ;;  %v3800_v26 = vld [vmem:[#allocation4 + $0x62c] ss:$48 sps:$4 sm:$0xff]   ;;  %v3795_v27 = vld [vmem:[#allocation4 + $0x620] ss:$48 sps:$4 sm:$0xff]  }
 0x12a   :  { %2731 = vmatprep.mubr.bf16.mxu0 %v3984_v50  ;;  %2817 = vmatprep.mubr.bf16.mxu1 %v3984_v50  ;;  %v3726_v50 = vld [vmem:[#allocation4 + $0x1a8] ss:$48 sps:$4 sm:$0xff]  }
 0x12c   :  { %2702 = vmatpush1.bf16.msra.mxu0 %v3705_v28  ;;  %2788 = vmatpush1.bf16.msra.mxu1 %v3708_v29  ;;  %v3798_v28 = vld [vmem:[#allocation4 + $0x628] ss:$48 sps:$4 sm:$0xff]   ;;  %v3803_v29 = vld [vmem:[#allocation4 + $0x684] ss:$48 sps:$4 sm:$0xff]  }
 0x12d   :  { %2703 = vmatprep.subr.bf16.mxu0 %v3713_v30  ;;  %2789 = vmatprep.subr.bf16.mxu1 %v3716_v31  ;;  %v3806_v30 = vld [vmem:[#allocation4 + $0x68c] ss:$48 sps:$4 sm:$0xff]   ;;  %v3801_v31 = vld [vmem:[#allocation4 + $0x680] ss:$48 sps:$4 sm:$0xff]  }
 0x130   :  { %2704 = vmatpush1.bf16.msra.mxu0 %v3711_v32  ;;  %2790 = vmatpush1.bf16.msra.mxu1 %v3714_v33  ;;  %v3804_v32 = vld [vmem:[#allocation4 + $0x688] ss:$48 sps:$4 sm:$0xff]   ;;  %v3809_v33 = vld [vmem:[#allocation4 + $0x6e4] ss:$48 sps:$4 sm:$0xff]  }
 0x131   :  { %2705 = vmatprep.subr.bf16.mxu0 %v3719_v34  ;;  %2791 = vmatprep.subr.bf16.mxu1 %v3722_v35  ;;  %v3812_v34 = vld [vmem:[#allocation4 + $0x6ec] ss:$48 sps:$4 sm:$0xff]   ;;  %v3807_v35 = vld [vmem:[#allocation4 + $0x6e0] ss:$48 sps:$4 sm:$0xff]  }
 0x134   :  { %2706 = vmatpush1.bf16.msra.mxu0 %v3717_v36  ;;  %2792 = vmatpush1.bf16.msra.mxu1 %v3720_v38  ;;  %v3810_v36 = vld [vmem:[#allocation4 + $0x6e8] ss:$48 sps:$4 sm:$0xff]   ;;  %v3815_v38 = vld [vmem:[#allocation4 + $0x744] ss:$48 sps:$4 sm:$0xff]  }
 0x135   :  { %2707 = vmatprep.subr.bf16.mxu0 %v3725_v39  ;;  %2793 = vmatprep.subr.bf16.mxu1 %v3728_v40  ;;  %v3813_v39 = vld [vmem:[#allocation4 + $0x740] ss:$48 sps:$4 sm:$0xff]   ;;  %v3816_v40 = vld [vmem:[#allocation4 + $0x748] ss:$48 sps:$4 sm:$0xff]  }
 0x138   :  { %2708 = vmatpush1.bf16.msra.mxu0 %v3723_v41  ;;  %2794 = vmatpush1.bf16.msra.mxu1 %v3726_v50  ;;  %v3821_v41 = vld [vmem:[#allocation4 + $0x7a4] ss:$48 sps:$4 sm:$0xff]   ;;  %v3824_v50 = vld [vmem:[#allocation4 + $0x7ac] ss:$48 sps:$4 sm:$0xff]  }
 0x139   :  { %2709 = vmatprep.subr.bf16.mxu0 %v3731_v42  ;;  %2795 = vmatprep.subr.bf16.mxu1 %v3734_v43  ;;  %v3819_v42 = vld [vmem:[#allocation4 + $0x7a0] ss:$48 sps:$4 sm:$0xff]   ;;  %v3827_v43 = vld [vmem:[#allocation4 + $0x804] ss:$48 sps:$4 sm:$0xff]  }
 0x13c   :  { %2710 = vmatpush1.bf16.msra.mxu0 %v3729_v44  ;;  %2796 = vmatpush1.bf16.msra.mxu1 %v3732_v45  ;;  %v3830_v44 = vld [vmem:[#allocation4 + $0x80c] ss:$48 sps:$4 sm:$0xff]   ;;  %v3825_v45 = vld [vmem:[#allocation4 + $0x800] ss:$48 sps:$4 sm:$0xff]  }
 0x13d   :  { %2711 = vmatprep.subr.bf16.mxu0 %v3737_v46  ;;  %2797 = vmatprep.subr.bf16.mxu1 %v3740_v47  ;;  %v3828_v46 = vld [vmem:[#allocation4 + $0x808] ss:$48 sps:$4 sm:$0xff]   ;;  %v3833_v47 = vld [vmem:[#allocation4 + $0x864] ss:$48 sps:$4 sm:$0xff]  }
 0x140   :  { %2712 = vmatpush1.bf16.msra.mxu0 %v3735_v48  ;;  %2798 = vmatpush1.bf16.msra.mxu1 %v3738_v49  ;;  %v3836_v48 = vld [vmem:[#allocation4 + $0x86c] ss:$48 sps:$4 sm:$0xff]  }
 0x141   :  { %2713 = vmatprep.subr.bf16.mxu0 %v3743_v51  ;;  %2799 = vmatprep.subr.bf16.mxu1 %v3746_v52 }
 0x144   :  { %2714 = vmatpush1.bf16.msra.mxu0 %v3741_v53  ;;  %2800 = vmatpush1.bf16.msra.mxu1 %v3744_v54 }
 0x145   :  { %2715 = vmatprep.subr.bf16.mxu0 %v3749_v55  ;;  %2801 = vmatprep.subr.bf16.mxu1 %v3752_v56  ;;  %v3831_v56 = vld [vmem:[#allocation4 + $0x860] ss:$48 sps:$4 sm:$0xff]  }
 0x148   :  { %2716 = vmatpush1.bf16.msra.mxu0 %v3747_v57  ;;  %2802 = vmatpush1.bf16.msra.mxu1 %v3750_v58  ;;  %v3834_v57 = vld [vmem:[#allocation4 + $0x868] ss:$48 sps:$4 sm:$0xff]  }
 0x149   :  { %2717 = vmatprep.subr.bf16.mxu0 %v3755_v59  ;;  %2803 = vmatprep.subr.bf16.mxu1 %v3758_v60  ;;  %v3839_v60 = vld [vmem:[#allocation4 + $0x8c4] ss:$48 sps:$4 sm:$0xff]  }
 0x14c   :  { %2718 = vmatpush1.bf16.msra.mxu0 %v3753_v61  ;;  %2804 = vmatpush1.bf16.msra.mxu1 %v3756_v62  ;;  %v3842_v61 = vld [vmem:[#allocation4 + $0x8cc] ss:$48 sps:$4 sm:$0xff]   ;;  %v3837_v62 = vld [vmem:[#allocation4 + $0x8c0] ss:$48 sps:$4 sm:$0xff]  }
 0x14d   :  { %2719 = vmatprep.subr.bf16.mxu0 %v3761_v63  ;;  %2805 = vmatprep.subr.bf16.mxu1 %v3764_v0  ;;  %v3840_v63 = vld [vmem:[#allocation4 + $0x8c8] ss:$48 sps:$4 sm:$0xff]   ;;  %v3845_v0 = vld [vmem:[#allocation4 + $0x924] ss:$48 sps:$4 sm:$0xff]  }
 0x150   :  { %2720 = vmatpush1.bf16.msra.mxu0 %v3759_v1  ;;  %2806 = vmatpush1.bf16.msra.mxu1 %v3762_v2  ;;  %v3848_v1 = vld [vmem:[#allocation4 + $0x92c] ss:$48 sps:$4 sm:$0xff]   ;;  %v3843_v2 = vld [vmem:[#allocation4 + $0x920] ss:$48 sps:$4 sm:$0xff]  }
 0x151   :  { %2721 = vmatprep.subr.bf16.mxu0 %v3767_v3  ;;  %2807 = vmatprep.subr.bf16.mxu1 %v3770_v4  ;;  %v3846_v3 = vld [vmem:[#allocation4 + $0x928] ss:$48 sps:$4 sm:$0xff]   ;;  %v3851_v4 = vld [vmem:[#allocation4 + $0x984] ss:$48 sps:$4 sm:$0xff]  }
 0x154   :  { %2722 = vmatpush1.bf16.msra.mxu0 %v3765_v5  ;;  %2808 = vmatpush1.bf16.msra.mxu1 %v3768_v6  ;;  %v3854_v5 = vld [vmem:[#allocation4 + $0x98c] ss:$48 sps:$4 sm:$0xff]   ;;  %v3849_v6 = vld [vmem:[#allocation4 + $0x980] ss:$48 sps:$4 sm:$0xff]  }
 0x155   :  { %2723 = vmatprep.subr.bf16.mxu0 %v3773_v7  ;;  %2809 = vmatprep.subr.bf16.mxu1 %v3776_v8  ;;  %v3852_v7 = vld [vmem:[#allocation4 + $0x988] ss:$48 sps:$4 sm:$0xff]   ;;  %v3857_v8 = vld [vmem:[#allocation4 + $0x9e4] ss:$48 sps:$4 sm:$0xff]  }
 0x158   :  { %2724 = vmatpush1.bf16.msra.mxu0 %v3771_v10  ;;  %2810 = vmatpush1.bf16.msra.mxu1 %v3774_v11  ;;  %v3860_v10 = vld [vmem:[#allocation4 + $0x9ec] ss:$48 sps:$4 sm:$0xff]   ;;  %v3855_v11 = vld [vmem:[#allocation4 + $0x9e0] ss:$48 sps:$4 sm:$0xff]  }
 0x159   :  { %2725 = vmatprep.subr.bf16.mxu0 %v3779_v12  ;;  %2811 = vmatprep.subr.bf16.mxu1 %v3782_v13  ;;  %v3858_v12 = vld [vmem:[#allocation4 + $0x9e8] ss:$48 sps:$4 sm:$0xff]   ;;  %v3863_v13 = vld [vmem:[#allocation4 + $0xa44] ss:$48 sps:$4 sm:$0xff]  }
 0x15c   :  { %2726 = vmatpush1.bf16.msra.mxu0 %v3777_v14  ;;  %2812 = vmatpush1.bf16.msra.mxu1 %v3780_v16  ;;  %v3866_v14 = vld [vmem:[#allocation4 + $0xa4c] ss:$48 sps:$4 sm:$0xff]   ;;  %v3861_v16 = vld [vmem:[#allocation4 + $0xa40] ss:$48 sps:$4 sm:$0xff]  }
 0x15d   :  { %2727 = vmatprep.subr.bf16.mxu0 %v3785_v17  ;;  %2813 = vmatprep.subr.bf16.mxu1 %v3788_v18  ;;  %v3864_v17 = vld [vmem:[#allocation4 + $0xa48] ss:$48 sps:$4 sm:$0xff]   ;;  %v3869_v18 = vld [vmem:[#allocation4 + $0xaa4] ss:$48 sps:$4 sm:$0xff]  }
 0x160   :  { %2728 = vmatpush1.bf16.msra.mxu0 %v3783_v19  ;;  %2814 = vmatpush1.bf16.msra.mxu1 %v3786_v20  ;;  %v3872_v19 = vld [vmem:[#allocation4 + $0xaac] ss:$48 sps:$4 sm:$0xff]   ;;  %v3867_v20 = vld [vmem:[#allocation4 + $0xaa0] ss:$48 sps:$4 sm:$0xff]  }
 0x161   :  { %2729 = vmatprep.subr.bf16.mxu0 %v3791_v21  ;;  %2815 = vmatprep.subr.bf16.mxu1 %v3794_v22  ;;  %v3870_v21 = vld [vmem:[#allocation4 + $0xaa8] ss:$48 sps:$4 sm:$0xff]   ;;  %v3875_v22 = vld [vmem:[#allocation4 + $0xb04] ss:$48 sps:$4 sm:$0xff]  }
 0x164   :  { %2730 = vmatpush1.bf16.msra.mxu0 %v3789_v23  ;;  %2816 = vmatpush1.bf16.msra.mxu1 %v3792_v24  ;;  %v3878_v23 = vld [vmem:[#allocation4 + $0xb0c] ss:$48 sps:$4 sm:$0xff]   ;;  %v3873_v24 = vld [vmem:[#allocation4 + $0xb00] ss:$48 sps:$4 sm:$0xff]  }
 0x165   :  { %2742 = vmatprep.subr.bf16.mxu0 %v3797_v25  ;;  %2828 = vmatprep.subr.bf16.mxu1 %v3800_v26  ;;  %v3876_v25 = vld [vmem:[#allocation4 + $0xb08] ss:$48 sps:$4 sm:$0xff]   ;;  %v3881_v26 = vld [vmem:[#allocation4 + $0xb64] ss:$48 sps:$4 sm:$0xff]  }
 0x167   :  { %2732 = vmatmul.mubr.bf16.vlgmr.msra.gmra.mrb[8].mxu0 %v3988_v9  ;;  %2818 = vmatmul.mubr.bf16.vlgmr.msra.gmra.mrb[8].mxu1 %v3988_v9  ;;  %v3818_v9 = vld [vmem:[#allocation4 + $0x74c] ss:$48 sps:$4 sm:$0xff]  }
 0x168   :  { %2743 = vmatpush1.bf16.msra.mxu0 %v3795_v27  ;;  %2829 = vmatpush1.bf16.msra.mxu1 %v3798_v28  ;;  %v3884_v27 = vld [vmem:[#allocation4 + $0xb6c] ss:$48 sps:$4 sm:$0xff]   ;;  %v3879_v28 = vld [vmem:[#allocation4 + $0xb60] ss:$48 sps:$4 sm:$0xff]  }
 0x169   :  { %2744 = vmatprep.subr.bf16.mxu0 %v3803_v29  ;;  %2830 = vmatprep.subr.bf16.mxu1 %v3806_v30  ;;  %v3882_v29 = vld [vmem:[#allocation4 + $0xb68] ss:$48 sps:$4 sm:$0xff]   ;;  %v3887_v30 = vld [vmem:[#allocation4 + $0xbc4] ss:$48 sps:$4 sm:$0xff]  }
 0x16a   :  { %2774 = vmatprep.mubr.bf16.mxu0 %v3992_v37  ;;  %2860 = vmatprep.mubr.bf16.mxu1 %v3992_v37  ;;  %v3822_v37 = vld [vmem:[#allocation4 + $0x7a8] ss:$48 sps:$4 sm:$0xff]  }
 0x16c   :  { %2745 = vmatpush1.bf16.msra.mxu0 %v3801_v31  ;;  %2831 = vmatpush1.bf16.msra.mxu1 %v3804_v32  ;;  %v3890_v31 = vld [vmem:[#allocation4 + $0xbcc] ss:$48 sps:$4 sm:$0xff]   ;;  %v3885_v32 = vld [vmem:[#allocation4 + $0xbc0] ss:$48 sps:$4 sm:$0xff]  }
 0x16d   :  { %2746 = vmatprep.subr.bf16.mxu0 %v3809_v33  ;;  %2832 = vmatprep.subr.bf16.mxu1 %v3812_v34  ;;  %v3888_v33 = vld [vmem:[#allocation4 + $0xbc8] ss:$48 sps:$4 sm:$0xff]  }
 0x170   :  { %2747 = vmatpush1.bf16.msra.mxu0 %v3807_v35  ;;  %2833 = vmatpush1.bf16.msra.mxu1 %v3810_v36 }
 0x171   :  { %2748 = vmatprep.subr.bf16.mxu0 %v3815_v38  ;;  %2834 = vmatprep.subr.bf16.mxu1 %v3818_v9 }
 0x174   :  { %2749 = vmatpush1.bf16.msra.mxu0 %v3813_v39  ;;  %2835 = vmatpush1.bf16.msra.mxu1 %v3816_v40 }
 0x175   :  { %2750 = vmatprep.subr.bf16.mxu0 %v3821_v41  ;;  %2836 = vmatprep.subr.bf16.mxu1 %v3824_v50 }
 0x178   :  { %2751 = vmatpush1.bf16.msra.mxu0 %v3819_v42  ;;  %2837 = vmatpush1.bf16.msra.mxu1 %v3822_v37 }
 0x179   :  { %2752 = vmatprep.subr.bf16.mxu0 %v3827_v43  ;;  %2838 = vmatprep.subr.bf16.mxu1 %v3830_v44 }
 0x17a   :  { %v2432_v49 = vpop.f32.mrb[0].mxu0  ;;  %v2518_v51 = vpop.f32.mrb[0].mxu1 }
 0x17b   :  { %2871 = vst [vmem:[%s4090_s2] sm:$0xff] %v2432_v49  ;;  %2873 = vst [vmem:[%s4090_s2 + $0x10] sm:$0xff] %v2518_v51  ;;  %v2434_v52 = vpop.f32.mrb[1].mxu0  ;;  %v2520_v53 = vpop.f32.mrb[1].mxu1 }
 0x17c   :  { %2872 = vst [vmem:[%s4090_s2 + $0x8] sm:$0xff] %v2434_v52  ;;  %2874 = vst [vmem:[%s4090_s2 + $0x18] sm:$0xff] %v2520_v53  ;;  %v2436_v54 = vpop.f32.mrb[2].mxu0  ;;  %v2522_v55 = vpop.f32.mrb[2].mxu1  ;;  %2753 = vmatpush1.bf16.msra.mxu0 %v3825_v45  ;;  %2839 = vmatpush1.bf16.msra.mxu1 %v3828_v46 }
 0x17d   :  { %2883 = vst [vmem:[%s4090_s2 + $0x60] sm:$0xff] %v2436_v54  ;;  %2885 = vst [vmem:[%s4090_s2 + $0x70] sm:$0xff] %v2522_v55  ;;  %v2438_v58 = vpop.f32.mrb[3].mxu0  ;;  %v2524_v59 = vpop.f32.mrb[3].mxu1  ;;  %2754 = vmatprep.subr.bf16.mxu0 %v3833_v47  ;;  %2840 = vmatprep.subr.bf16.mxu1 %v3836_v48 }
 0x17e   :  { %2884 = vst [vmem:[%s4090_s2 + $0x68] sm:$0xff] %v2438_v58  ;;  %2886 = vst [vmem:[%s4090_s2 + $0x78] sm:$0xff] %v2524_v59 }
 0x180   :  { %2755 = vmatpush1.bf16.msra.mxu0 %v3831_v56  ;;  %2841 = vmatpush1.bf16.msra.mxu1 %v3834_v57 }
 0x181   :  { %2756 = vmatprep.subr.bf16.mxu0 %v3839_v60  ;;  %2842 = vmatprep.subr.bf16.mxu1 %v3842_v61 }
 0x184   :  { %2757 = vmatpush1.bf16.msra.mxu0 %v3837_v62  ;;  %2843 = vmatpush1.bf16.msra.mxu1 %v3840_v63 }
 0x185   :  { %2758 = vmatprep.subr.bf16.mxu0 %v3845_v0  ;;  %2844 = vmatprep.subr.bf16.mxu1 %v3848_v1 }
 0x188   :  { %2759 = vmatpush1.bf16.msra.mxu0 %v3843_v2  ;;  %2845 = vmatpush1.bf16.msra.mxu1 %v3846_v3 }
 0x189   :  { %2760 = vmatprep.subr.bf16.mxu0 %v3851_v4  ;;  %2846 = vmatprep.subr.bf16.mxu1 %v3854_v5 }
 0x18c   :  { %2761 = vmatpush1.bf16.msra.mxu0 %v3849_v6  ;;  %2847 = vmatpush1.bf16.msra.mxu1 %v3852_v7 }
 0x18d   :  { %2762 = vmatprep.subr.bf16.mxu0 %v3857_v8  ;;  %2848 = vmatprep.subr.bf16.mxu1 %v3860_v10 }
 0x190   :  { %2763 = vmatpush1.bf16.msra.mxu0 %v3855_v11  ;;  %2849 = vmatpush1.bf16.msra.mxu1 %v3858_v12 }
 0x191   :  { %2764 = vmatprep.subr.bf16.mxu0 %v3863_v13  ;;  %2850 = vmatprep.subr.bf16.mxu1 %v3866_v14 }
 0x194   :  { %2765 = vmatpush1.bf16.msra.mxu0 %v3861_v16  ;;  %2851 = vmatpush1.bf16.msra.mxu1 %v3864_v17 }
 0x195   :  { %2766 = vmatprep.subr.bf16.mxu0 %v3869_v18  ;;  %2852 = vmatprep.subr.bf16.mxu1 %v3872_v19 }
 0x198   :  { %2767 = vmatpush1.bf16.msra.mxu0 %v3867_v20  ;;  %2853 = vmatpush1.bf16.msra.mxu1 %v3870_v21 }
 0x199   :  { %2768 = vmatprep.subr.bf16.mxu0 %v3875_v22  ;;  %2854 = vmatprep.subr.bf16.mxu1 %v3878_v23 }
 0x19c   :  { %2769 = vmatpush1.bf16.msra.mxu0 %v3873_v24  ;;  %2855 = vmatpush1.bf16.msra.mxu1 %v3876_v25 }
 0x19d   :  { %2770 = vmatprep.subr.bf16.mxu0 %v3881_v26  ;;  %2856 = vmatprep.subr.bf16.mxu1 %v3884_v27 }
 0x1a0   :  { %2771 = vmatpush1.bf16.msra.mxu0 %v3879_v28  ;;  %2857 = vmatpush1.bf16.msra.mxu1 %v3882_v29 }
 0x1a1   :  { %2772 = vmatprep.subr.bf16.mxu0 %v3887_v30  ;;  %2858 = vmatprep.subr.bf16.mxu1 %v3890_v31 }
 0x1a4   :  { %2773 = vmatpush1.bf16.msra.mxu0 %v3885_v32  ;;  %2859 = vmatpush1.bf16.msra.mxu1 %v3888_v33 }
 0x1a7   :  { %2775 = vmatmul.mubr.bf16.vlgmr.msra.gmra.mrb[8].mxu0 %v3996_v15  ;;  %2861 = vmatmul.mubr.bf16.vlgmr.msra.gmra.mrb[8].mxu1 %v3996_v15 }
 0x1fa   :  { %v2604_v34 = vpop.f32.mrb[4].mxu0  ;;  %v2690_v35 = vpop.f32.mrb[4].mxu1 }
 0x1fb   :  { %2875 = vst [vmem:[%s4090_s2 + $0x20] sm:$0xff] %v2604_v34  ;;  %2877 = vst [vmem:[%s4090_s2 + $0x30] sm:$0xff] %v2690_v35  ;;  %v2606_v36 = vpop.f32.mrb[5].mxu0  ;;  %v2692_v38 = vpop.f32.mrb[5].mxu1 }
 0x1fc   :  { %2876 = vst [vmem:[%s4090_s2 + $0x28] sm:$0xff] %v2606_v36  ;;  %2878 = vst [vmem:[%s4090_s2 + $0x38] sm:$0xff] %v2692_v38  ;;  %v2608_v15 = vpop.f32.mrb[6].mxu0  ;;  %v2694_v9 = vpop.f32.mrb[6].mxu1 }
 0x1fd   :  { %2887 = vst [vmem:[%s4090_s2 + $0x80] sm:$0xff] %v2608_v15  ;;  %2889 = vst [vmem:[%s4090_s2 + $0x90] sm:$0xff] %v2694_v9  ;;  %v2610_v39 = vpop.f32.mrb[7].mxu0  ;;  %v2696_v40 = vpop.f32.mrb[7].mxu1 }
 0x1fe   :  { %2888 = vst [vmem:[%s4090_s2 + $0x88] sm:$0xff] %v2610_v39  ;;  %2890 = vst [vmem:[%s4090_s2 + $0x98] sm:$0xff] %v2696_v40 }
 0x27a   :  { %v2776_v41 = vpop.f32.mrb[8].mxu0  ;;  %v2862_v50 = vpop.f32.mrb[8].mxu1 }
 0x27b   :  { %2879 = vst [vmem:[%s4090_s2 + $0x40] sm:$0xff] %v2776_v41  ;;  %2881 = vst [vmem:[%s4090_s2 + $0x50] sm:$0xff] %v2862_v50  ;;  %v2778_v42 = vpop.f32.mrb[9].mxu0  ;;  %v2864_v37 = vpop.f32.mrb[9].mxu1 }
 0x27c   :  { %2880 = vst [vmem:[%s4090_s2 + $0x48] sm:$0xff] %v2778_v42  ;;  %2882 = vst [vmem:[%s4090_s2 + $0x58] sm:$0xff] %v2864_v37  ;;  %v2780_v43 = vpop.f32.mrb[10].mxu0  ;;  %v2866_v44 = vpop.f32.mrb[10].mxu1 }
 0x27d   :  { %2891 = vst [vmem:[%s4090_s2 + $0xa0] sm:$0xff] %v2780_v43  ;;  %2893 = vst [vmem:[%s4090_s2 + $0xb0] sm:$0xff] %v2866_v44  ;;  %v2782_v45 = vpop.f32.mrb[11].mxu0  ;;  %v2868_v46 = vpop.f32.mrb[11].mxu1 }
 0x27e   :  { %2892 = vst [vmem:[%s4090_s2 + $0xa8] sm:$0xff] %v2782_v45  ;;  %2894 = vst [vmem:[%s4090_s2 + $0xb8] sm:$0xff] %v2868_v46 }
 0x27f   :  { %2899 = vsyncpa [#allocation3], 1 }
 0x280   :  { %2900 = vsyncpa [#allocation5], 1 }

// kernel: decoder_layer.10
= control target key start
LH: loop header
LB: loop body
LE: loop exit
PB: predicated region body
PF: predicated region fallthrough
CT: control target
= control target key end

     0   :  { %15 = vsyncpa [#allocation3], 0  ;;  %s3718_s0 = inlined_call_operand.vmem [shape: f32[2,8,8,64], index: 0, kind: input, shape index: {}]   ;;  %s3719_s1 = inlined_call_operand.vmem [shape: f32[2,8,8,64], index: 1, kind: input, shape index: {}]   ;;  %s3720_s2 = inlined_call_operand.vmem [shape: f32[2,8,8,64], index: 2, kind: input, shape index: {}]   ;;  %s3721_s3 = inlined_call_operand.vmem [shape: s32[2,8,8], index: 3, kind: input, shape index: {}]   ;;  %s3722_s4 = inlined_call_operand.vmem [shape: f32[2,8,512], index: 4, kind: input, shape index: {}]   ;;  %s3723_s5 = inlined_call_operand.hbm [shape: bf16[512,512], index: 5, kind: input, shape index: {}]   ;;  %s3724_s6 = inlined_call_operand.vmem [shape: f32[1,512], index: 6, kind: input, shape index: {}]   ;;  %s3725_s7 = inlined_call_operand.vmem [shape: f32[1,512], index: 7, kind: input, shape index: {}]   ;;  %s3726_s8 = inlined_call_operand.vmem [shape: f32[2,8,512], index: 8, kind: output, shape index: {0}]   ;;  %s3727_s9 = inlined_call_operand.hbm [shape: f32[2,8,8,8], index: 9, kind: output, shape index: {1}]  }
   0x1   :  { %16 = vsyncpa [#allocation4], 0 }
   0x2   :  { %18 = vsyncpa [#allocation4 + $0x1], 0  ;;  %s3321_s30 = smov 0   ;;  %s3323_s10 = smov 0  }
   0x3   :  { %s3325_s11 = smov 0   ;;  %s3327_s12 = smov 0  }
   0x4 LB: > { %s3342_s13 = sadd.s32 4294967295, %s3260_s12   ;;  %s2560_s14 = sadd.s32 4294967294, %s3260_s12   ;;  %s3260_s12 = sphi %s3327_s12, %s3743_s12   ;;  %s3256_s11 = sphi %s3325_s11, %s3742_s11   ;;  %s3252_s10 = sphi %s3323_s10, %s3741_s10   ;;  %s3248_s30 = sphi %s3321_s30, %s3740_s30  }
   0x5   : > { %s3346_s15 = sadd.s32 1, %s3260_s12   ;;  %s250_s16 = sadd.s32 1, %s3256_s11 }
   0x6   : > { %s247_s17 = ssub.s32 %s3260_s12, %s3346_s15  ;;  %p260_p0 = scmp.ne.s32.totalorder %s3256_s11, %s3252_s10 }
   0x7   : > { %p248_p1 = scmp.eq.s32.totalorder %s247_s17, 0  ;;  %p261_p2 = scmp.eq.s32.totalorder %s3342_s13, 1 }
   0x8   : > { %p266_p3 = scmp.ne.s32.totalorder %s3252_s10, %s3248_s30  ;;  %p267_p4 = scmp.eq.s32.totalorder %s2560_s14, 1 }
   0x9   : > { %s3357_s18 = scalar_select %p248_p1, %s3256_s11, %s250_s16  }
   0xa   : > { %p3359_p5 = por %p261_p2, %p260_p0  ;;  %p3363_p6 = por %p267_p4, %p266_p3 }
   0xb   : > { %p2561_p7 = scmp.ge.s32.totalorder %s3260_s12, 1  ;;  %p274_p8 = scmp.lt.s32.totalorder %s3260_s12, 3 }
   0xc   : > { %s3731_s19 = scalar_select %p3359_p5, 1, 0 }
   0xd   : > { %s3732_s20 = scalar_select %p3363_p6, 1, 0 }
   0xe   : > { %p3728_p9 = scmp.eq.s32.totalorder %s3342_s13, 0  ;;  %p3370_p10 = pnand %p2561_p7, %p274_p8 }
   0xf   : > { %s3262_s22 = smov [#allocation2]   ;;  %s3166_s27 = scalar_lea.hbm %s3723_s5, 16384 }
  0x10   : > { %s3733_s21 = scalar_select %p3370_p10, 1, 0 }
  0x11   : > { %s286_s23 = sshll.u32 %s3262_s22, 4  ;;  %p2879_p11 = pneg %p3370_p10  ;;  %s287_s23 = int_to_ptr.vmem [resolvable:$true] %s286_s23 }
  0x12   : > { %p3167_p13 = scmp.ne.s32.totalorder %s3723_s5, %s3166_s27  ;;  %p3173_p3 = scmp.lt.u32.totalorder %s3166_s27, %s3723_s5 }
  0x13   : > { %p3378_p12 = pnand %p3728_p9, %p2879_p11 }
  0x15   : > { %p3168_p0 = pneg %p3378_p12 }
  0x17   : > { %p3169_p1 = pnand %p3168_p0, %p3167_p13 }
  0x19   : > { %p3170_p2 = pneg %p3169_p1 }
  0x1b   : > { %p3175_p4 = pnand %p3173_p3, %p3170_p2 }
  0x1d   : > { %3178 = shalt.err (!%p3175_p4)
}
  0x1e   : > { %s3179_s17 = scalar_lea.vmem %s287_s23, 16384  ;;  %p3187_p9 = scmp.lt.s32.totalorder %s287_s23, %s287_s23 }
  0x1f   : > { %p3180_p7 = scmp.ne.s32.totalorder %s287_s23, %s3179_s17  ;;  %p3188_p6 = scmp.lt.s32.totalorder %s3179_s17, %s3179_s17 }
  0x21   : > { %p3182_p8 = pnand %p3180_p7, %p3168_p0  ;;  %p3189_p5 = por %p3188_p6, %p3187_p9 }
  0x23   : > { %p3183_p11 = pneg %p3182_p8 }
  0x25   : > { %p3190_p10 = pnand %p3189_p5, %p3183_p11 }
  0x27   : > { %3193 = shalt.err (!%p3190_p10)
}
  0x28   : > { %s3263_s22 = smov 256   ;;  %s3264_s25 = smov 16  }
  0x29   : > { %2882 = dma.hbm_to_vmem [thread:$0]  (!%p3378_p12), %s3723_s5, 16384, %s287_s23, [#allocation3], %s3263_s22, %s3263_s22, %s3264_s25  }
  0x2a   : > { %p3735_p13 = scmp.ne.s32.totalorder %s3733_s21, 0 }
  0x2b   : > { %p3736_p1 = scmp.eq.s32.totalorder (!%p3735_p13), %s3342_s13, 0 }
  0x2c   : > { %347 = sbr.rel (%p3735_p13) target bundleno = 1548 (0x60c), region = 52 }
  0x33   : > { %3239 = dma.done.wait (%p3736_p1), [#allocation3], 16384   ;;  %p3737_p0 = pmov %p3736_p1 }
  0x34   : > { %p407_p5 = scmp.lt.s32.totalorder %s3342_s13, 1  ;;  %v3265_v0 = vmov 0.0   ;;  %vm3266_vm0 = vmmov 0   ;;  %vm486_vm1 = vcmask 523264   ;;  %vm874_vm3 = vcmask 64512   ;;  %s2732_s23 = sshll.u32 %s3342_s13, 10 }
  0x35   : > { %3241 = vsyncadd (%p3737_p0), [#allocation3], 4294950912  ;;  %2765 = vmatprep.subr.bf16.mxu0 %v3265_v0  ;;  %2771 = vmatprep.subr.bf16.mxu1 %v3265_v0  ;;  %vm982_vm4 = vcmask 1043456   ;;  %p3738_p9 = scmp.ne.s32.totalorder %s3731_s19, 0 }
  0x36   : > { %s3408_s24 = scalar_select %p407_p5, %s3342_s13, 1  ;;  %2767 = vmatprep.mubr.msk.bf16.mxu0 %vm3266_vm0, %v3265_v0  ;;  %2773 = vmatprep.mubr.msk.bf16.mxu1 %vm3266_vm0, %v3265_v0 }
  0x37   : > { %s3268_s13 = smov [#allocation5]  }
  0x38   : > { %s3415_s21 = sshll.u32 %s3408_s24, 6  ;;  %s2573_s22 = sshll.u32 %s3408_s24, 3 }
  0x39   : > { %s3421_s29 = scalar_lea.vmem %s3719_s1, %s3415_s21  ;;  %s3429_s17 = scalar_lea.vmem %s3718_s0, %s3415_s21 }
  0x3a   : > { %v453_v1 = vld [vmem:[%s3421_s29] sm:$0xff]  ;;  %v454_v2 = vld [vmem:[%s3421_s29 + $0x8] sm:$0xff]  ;;  %v456_v5 = vld [vmem:[%s3421_s29 + $0x18] sm:$0xff]  ;;  %s425_s28 = scalar_lea.vmem %s3721_s3, %s2573_s22  ;;  %s2730_s22 = sshll.u32 %s3408_s24, 5 }
  0x3b   : > { %v461_v3 = vpack.c.bf16 %v453_v1, %v453_v1  ;;  %v462_v4 = vpack.c.bf16 %v454_v2, %v454_v2  ;;  %v455_v6 = vld [vmem:[%s3421_s29 + $0x10] sm:$0xff]  ;;  %v437_v9 = vld [vmem:[%s3429_s17] sm:$0xff]  ;;  %v438_v10 = vld [vmem:[%s3429_s17 + $0x8] sm:$0xff]  ;;  %v464_v11 = vpack.c.bf16 %v456_v5, %v456_v5 }
  0x3c   : > { %v463_v12 = vpack.c.bf16 %v455_v6, %v455_v6  ;;  %v445_v13 = vpack.c.bf16 %v437_v9, %v437_v9  ;;  %v446_v14 = vpack.c.bf16 %v438_v10, %v438_v10  ;;  %v458_v15 = vld [vmem:[%s3421_s29 + $0x28] sm:$0xff]  ;;  %v457_v18 = vld [vmem:[%s3421_s29 + $0x20] sm:$0xff]  ;;  %v440_v19 = vld [vmem:[%s3429_s17 + $0x18] sm:$0xff] }
  0x3d   : > { %v491_v7 = vsel %vm486_vm1, %v461_v3, 0  ;;  %v537_v8 = vsel %vm486_vm1, %v462_v4, 0  ;;  %v629_v16 = vsel %vm486_vm1, %v464_v11, 0  ;;  %v439_v20 = vld [vmem:[%s3429_s17 + $0x10] sm:$0xff]  ;;  %v466_v21 = vpack.c.bf16 %v458_v15, %v458_v15  ;;  %v460_v25 = vld [vmem:[%s3421_s29 + $0x38] sm:$0xff]  ;;  %v442_v27 = vld [vmem:[%s3429_s17 + $0x28] sm:$0xff] }
  0x3e   : > { %2766 = vmatpush3.bf16.xpose.msra.mxu0 %v491_v7  ;;  %2772 = vmatpush3.bf16.xpose.msra.mxu1 %v537_v8  ;;  %v583_v17 = vsel %vm486_vm1, %v463_v12, 0  ;;  %v465_v22 = vpack.c.bf16 %v457_v18, %v457_v18  ;;  %v448_v23 = vpack.c.bf16 %v440_v19, %v440_v19  ;;  %v447_v24 = vpack.c.bf16 %v439_v20, %v439_v20  ;;  %v459_v29 = vld [vmem:[%s3421_s29 + $0x30] sm:$0xff]  ;;  %v441_v30 = vld [vmem:[%s3429_s17 + $0x20] sm:$0xff]  ;;  %v444_v36 = vld [vmem:[%s3429_s17 + $0x38] sm:$0xff]  ;;  %s3536_s29 = scalar_lea.vmem %s3720_s2, %s3415_s21  ;;  %s404_s21 = sand.u32 1, %s3252_s10  }
  0x3f   : > { %2783 = vmatprep.subr.bf16.mxu1 %v3265_v0  ;;  %2777 = vmatprep.subr.bf16.mxu0 %v3265_v0  ;;  %v721_v26 = vsel %vm486_vm1, %v466_v21, 0  ;;  %v468_v31 = vpack.c.bf16 %v460_v25, %v460_v25  ;;  %v450_v32 = vpack.c.bf16 %v442_v27, %v442_v27  ;;  %v467_v33 = vpack.c.bf16 %v459_v29, %v459_v29  ;;  %v443_v38 = vld [vmem:[%s3429_s17 + $0x30] sm:$0xff]  ;;  %v485_v41 = vld [vmem:[%s425_s28] sm:$0xff]  ;;  %s2566_s14 = sshll.u32 %s404_s21, 6  ;;  %s3267_s17 = smov 64  }
  0x40   : > { %v675_v28 = vsel %vm486_vm1, %v465_v22, 0  ;;  %v449_v35 = vpack.c.bf16 %v441_v30, %v441_v30  ;;  %v452_v39 = vpack.c.bf16 %v444_v36, %v444_v36  ;;  %v451_v40 = vpack.c.bf16 %v443_v38, %v443_v38  ;;  %s3550_s16 = scalar_lea.vmem [#allocation5], %s2566_s14  ;;  %s430_s28 = scalar_lea.vmem %s3722_s4, %s2730_s22 }
  0x41   : > { %v813_v34 = vsel %vm486_vm1, %v468_v31, 0  ;;  %v767_v37 = vsel %vm486_vm1, %v467_v33, 0  ;;  %vm863_vm2 = vcmp.ne.s32.totalorder %v485_v41, 0  ;;  %s2413_s27 = sshll.u32 %s3550_s16, 4  ;;  %s3662_s25 = scalar_lea.sflag [#allocation4], %s404_s21  ;;  %s3658_s27 = int_to_ptr.vmem [resolvable:$true] %s2413_s27 }
  0x42   : > { %s3194_s26 = scalar_lea.vmem %s3658_s27, 1024 }
  0x43   : > { %p3195_p6 = scmp.ne.s32.totalorder %s3658_s27, %s3194_s26 }
  0x45   : > { %2768 = vmatmul.mubr.msk.bf16.vlgmr.msra.gmra.mrb[0].mxu0 %vm486_vm1, %v445_v13  ;;  %2774 = vmatmul.mubr.msk.bf16.vlgmr.msra.gmra.mrb[0].mxu1 %vm486_vm1, %v446_v14  ;;  %p3196_p10 = pnand %p3195_p6, %p3738_p9 }
  0x46   : > { %2784 = vmatpush3.bf16.xpose.msra.mxu1 %v629_v16  ;;  %2778 = vmatpush3.bf16.xpose.msra.mxu0 %v583_v17 }
  0x47   : > { %2785 = vmatprep.mubr.msk.bf16.mxu1 %vm3266_vm0, %v3265_v0  ;;  %2795 = vmatprep.subr.bf16.mxu1 %v3265_v0  ;;  %p3197_p12 = pneg %p3196_p10 }
  0x48   : > { %2779 = vmatprep.mubr.msk.bf16.mxu0 %vm3266_vm0, %v3265_v0  ;;  %2789 = vmatprep.subr.bf16.mxu0 %v3265_v0 }
  0x4d   : > { %2786 = vmatmul.mubr.msk.bf16.vlgmr.msra.gmra.mrb[4].mxu1 %vm486_vm1, %v448_v23  ;;  %2780 = vmatmul.mubr.msk.bf16.vlgmr.msra.gmra.mrb[4].mxu0 %vm486_vm1, %v447_v24 }
  0x4e   : > { %2796 = vmatpush3.bf16.xpose.msra.mxu1 %v721_v26  ;;  %2797 = vmatprep.mubr.msk.bf16.mxu1 %vm3266_vm0, %v3265_v0 }
  0x4f   : > { %2807 = vmatprep.subr.bf16.mxu1 %v3265_v0  ;;  %2790 = vmatpush3.bf16.xpose.msra.mxu0 %v675_v28 }
  0x50   : > { %2791 = vmatprep.mubr.msk.bf16.mxu0 %vm3266_vm0, %v3265_v0  ;;  %2801 = vmatprep.subr.bf16.mxu0 %v3265_v0 }
  0x55   : > { %2798 = vmatmul.mubr.msk.bf16.vlgmr.msra.gmra.mrb[8].mxu1 %vm486_vm1, %v450_v32 }
  0x56   : > { %2808 = vmatpush3.bf16.xpose.msra.mxu1 %v813_v34  ;;  %2809 = vmatprep.mubr.msk.bf16.mxu1 %vm3266_vm0, %v3265_v0 }
  0x57   : > { %2792 = vmatmul.mubr.msk.bf16.vlgmr.msra.gmra.mrb[8].mxu0 %vm486_vm1, %v449_v35  ;;  %2819 = vmatprep.subr.bf16.mxu1 %v3265_v0 }
  0x58   : > { %2802 = vmatpush3.bf16.xpose.msra.mxu0 %v767_v37  ;;  %2803 = vmatprep.mubr.msk.bf16.mxu0 %vm3266_vm0, %v3265_v0 }
  0x59   : > { %2813 = vmatprep.subr.bf16.mxu0 %v3265_v0 }
  0x5d   : > { %2810 = vmatmul.mubr.msk.bf16.vlgmr.msra.gmra.mrb[12].mxu1 %vm486_vm1, %v452_v39 }
  0x5e   : > { %2821 = vmatprep.mubr.msk.bf16.mxu1 %vm3266_vm0, %v3265_v0 }
  0x5f   : > { %2804 = vmatmul.mubr.msk.bf16.vlgmr.msra.gmra.mrb[12].mxu0 %vm486_vm1, %v451_v40 }
  0x60   : > { %2815 = vmatprep.mubr.msk.bf16.mxu0 %vm3266_vm0, %v3265_v0 }
 0x118   : > { %v527_v42 = vpop.f32.mrb[0].mxu0  ;;  %v573_v43 = vpop.f32.mrb[0].mxu1 }
 0x119   : > { %v855_v44 = vmul.f32 0.125, %v527_v42  ;;  %v856_v45 = vmul.f32 0.125, %v573_v43  ;;  %v2775_v46 = vpop.f32.mrb[1].mxu1  ;;  %v2769_v47 = vpop.f32.mrb[1].mxu0 }
 0x11a   : > { %v576_v48 = vpop.f32.mrb[2].mxu1  ;;  %v530_v49 = vpop.f32.mrb[2].mxu0 }
 0x11b   : > { %v2776_v50 = vpop.f32.mrb[3].mxu1  ;;  %v867_v51 = vsel %vm863_vm2, -1e+09, %v856_v45  ;;  %v866_v52 = vsel %vm863_vm2, -1e+09, %v855_v44  ;;  %v2770_v53 = vpop.f32.mrb[3].mxu0 }
 0x11c   : > { %v878_v54 = vsel %vm874_vm3, %v867_v51, -inf  ;;  %v875_v55 = vsel %vm874_vm3, %v866_v52, -inf }
 0x11d   : > { %879 = vmax.xlane.f32.xlu0 %v878_v54  ;;  %876 = vmax.xlane.f32.xlu1 %v875_v55 }
 0x120   : > { %v665_v56 = vpop.f32.mrb[4].mxu1  ;;  %v619_v57 = vpop.f32.mrb[4].mxu0 }
 0x121   : > { %v858_v58 = vmul.f32 0.125, %v665_v56  ;;  %v2787_v59 = vpop.f32.mrb[5].mxu1  ;;  %v857_v60 = vmul.f32 0.125, %v619_v57  ;;  %v2781_v61 = vpop.f32.mrb[5].mxu0 }
 0x122   : > { %v668_v62 = vpop.f32.mrb[6].mxu1  ;;  %v622_v63 = vpop.f32.mrb[6].mxu0 }
 0x123   : > { %v2788_v1 = vpop.f32.mrb[7].mxu1  ;;  %v869_v2 = vsel %vm863_vm2, -1e+09, %v858_v58  ;;  %v868_v3 = vsel %vm863_vm2, -1e+09, %v857_v60  ;;  %v2782_v4 = vpop.f32.mrb[7].mxu0 }
 0x124   : > { %v884_v5 = vsel %vm874_vm3, %v869_v2, -inf  ;;  %v881_v6 = vsel %vm874_vm3, %v868_v3, -inf }
 0x125   : > { %885 = vmax.xlane.f32.xlu0 %v884_v5  ;;  %v469_v5 = vld [vmem:[%s3536_s29] sm:$0xff] }
 0x128   : > { %v757_v7 = vpop.f32.mrb[8].mxu1 }
 0x129   : > { %v860_v8 = vmul.f32 0.125, %v757_v7  ;;  %882 = vmax.xlane.f32.xlu0 %v881_v6  ;;  %v2799_v9 = vpop.f32.mrb[9].mxu1  ;;  %v477_v6 = vpack.c.bf16 %v469_v5, %v469_v5  ;;  %v2973_v5 = vld [vmem:[#allocation2 + $0xa8] ss:$16 sps:$4 sm:$0xff]  }
 0x12a   : > { %v760_v10 = vpop.f32.mrb[10].mxu1  ;;  %v711_v21 = vpop.f32.mrb[8].mxu0 }
 0x12b   : > { %v871_v11 = vsel %vm863_vm2, -1e+09, %v860_v8  ;;  %v2800_v12 = vpop.f32.mrb[11].mxu1  ;;  %v859_v22 = vmul.f32 0.125, %v711_v21  ;;  %v2793_v23 = vpop.f32.mrb[9].mxu0  ;;  %v984_v7 = vsel %vm982_vm4, %v477_v6, 0 }
 0x12c   : > { %v890_v13 = vsel %vm874_vm3, %v871_v11, -inf  ;;  %v714_v24 = vpop.f32.mrb[10].mxu0  ;;  %2814 = vmatpush3.bf16.msra.mxu0 %v984_v7  ;;  %v472_v12 = vld [vmem:[%s3536_s29 + $0x18] sm:$0xff] }
 0x12d   : > { %891 = vmax.xlane.f32.xlu1 %v890_v13  ;;  %v3502_v25 = vsel %vm863_vm2, -1e+09, %v859_v22  ;;  %v2794_v26 = vpop.f32.mrb[11].mxu0  ;;  %2825 = vmatprep.subr.bf16.mxu0 %v3265_v0  ;;  %v2981_v6 = vld [vmem:[#allocation2 + $0xcc] ss:$16 sps:$4 sm:$0xff]  }
 0x12e   : > { %v887_v49 = vsel %vm874_vm3, %v3502_v25, -inf  ;;  %v471_v26 = vld [vmem:[%s3536_s29 + $0x10] sm:$0xff]  ;;  %v2979_v7 = vld [vmem:[#allocation2 + $0xc8] ss:$16 sps:$4 sm:$0xff]  }
 0x130   : > { %v849_v14 = vpop.f32.mrb[12].mxu1 }
 0x131   : > { %v862_v15 = vmul.f32 0.125, %v849_v14  ;;  %v2811_v16 = vpop.f32.mrb[13].mxu1 }
 0x132   : > { %v852_v17 = vpop.f32.mrb[14].mxu1  ;;  %v803_v27 = vpop.f32.mrb[12].mxu0 }
 0x133   : > { %v873_v18 = vsel %vm863_vm2, -1e+09, %v862_v15  ;;  %v2812_v19 = vpop.f32.mrb[15].mxu1  ;;  %v861_v28 = vmul.f32 0.125, %v803_v27  ;;  %v2805_v29 = vpop.f32.mrb[13].mxu0  ;;  %v480_v15 = vpack.c.bf16 %v472_v12, %v472_v12 }
 0x134   : > { %v896_v20 = vsel %vm874_vm3, %v873_v18, -inf  ;;  %v806_v30 = vpop.f32.mrb[14].mxu0  ;;  %v2999_v12 = vld [vmem:[#allocation2 + $0x12c] ss:$16 sps:$4 sm:$0xff]  }
 0x135   : > { %897 = vmax.xlane.f32.xlu1 %v896_v20  ;;  %v3505_v31 = vsel %vm863_vm2, -1e+09, %v861_v28  ;;  %v2806_v32 = vpop.f32.mrb[15].mxu0  ;;  %v1122_v22 = vsel %vm982_vm4, %v480_v15, 0  ;;  %v3005_v15 = vld [vmem:[#allocation2 + $0x14c] ss:$16 sps:$4 sm:$0xff]  }
 0x136   : > { %v893_v57 = vsel %vm874_vm3, %v3505_v31, -inf }
 0x1aa   : > { %v880_v33 = vpop.xlane.xlu0 %879  ;;  %v877_v34 = vpop.xlane.xlu1 %876 }
 0x1ab   : > { %v900_v35 = vsub.f32 %v867_v51, %v880_v33  ;;  %v899_v37 = vsub.f32 %v866_v52, %v877_v34 }
 0x1ad   : > { %v909_v36 = vmul.f32 1.442695, %v900_v35  ;;  %v907_v38 = vmul.f32 1.442695, %v899_v37 }
 0x1af   : > { %3132 = vpow2.f32 %v909_v36 }
 0x1b0   : > { %3134 = vpow2.f32 %v907_v38 }
 0x1b2   : > { %v886_v39 = vpop.xlane.xlu0 %885 }
 0x1b3   : > { %v902_v40 = vsub.f32 %v869_v2, %v886_v39  ;;  %v470_v2 = vld [vmem:[%s3536_s29 + $0x8] sm:$0xff] }
 0x1b5   : > { %v913_v42 = vmul.f32 1.442695, %v902_v40 }
 0x1b6   : > { %v883_v43 = vpop.xlane.xlu0 %882 }
 0x1b7   : > { %3136 = vpow2.f32 %v913_v42  ;;  %v901_v44 = vsub.f32 %v868_v3, %v883_v43  ;;  %v478_v3 = vpack.c.bf16 %v470_v2, %v470_v2  ;;  %v476_v43 = vld [vmem:[%s3536_s29 + $0x38] sm:$0xff] }
 0x1b8   : > { %v2969_v2 = vld [vmem:[#allocation2 + $0x8c] ss:$16 sps:$4 sm:$0xff]  }
 0x1b9   : > { %v3133_v45 = vpop.eup %3132  ;;  %v911_v46 = vmul.f32 1.442695, %v901_v44  ;;  %v1030_v4 = vsel %vm982_vm4, %v478_v3, 0  ;;  %v2967_v3 = vld [vmem:[#allocation2 + $0x88] ss:$16 sps:$4 sm:$0xff]  }
 0x1ba   : > { %v892_v41 = vpop.xlane.xlu1 %891  ;;  %v926_v47 = vsel %vm874_vm3, %v3133_v45, 0.0  ;;  %v3510_v51 = vpop.eup %3134  ;;  %2820 = vmatpush3.bf16.msra.mxu1 %v1030_v4  ;;  %v2975_v4 = vld [vmem:[#allocation2 + $0xac] ss:$16 sps:$4 sm:$0xff]  }
 0x1bb   : > { %3138 = vpow2.f32 %v911_v46  ;;  %v904_v48 = vsub.f32 %v871_v11, %v892_v41  ;;  %927 = vadd.xlane.f32.xlu0 %v926_v47  ;;  %v923_v55 = vsel %vm874_vm3, %v3510_v51, 0.0  ;;  %2831 = vmatprep.subr.bf16.mxu1 %v3265_v0 }
 0x1bd   : > { %v917_v50 = vmul.f32 1.442695, %v904_v48 }
 0x1bf   : > { %3140 = vpow2.f32 %v917_v50  ;;  %888 = vmax.xlane.f32.xlu0 %v887_v49 }
 0x1c1   : > { %v3512_v52 = vpop.eup %3136 }
 0x1c2   : > { %v898_v53 = vpop.xlane.xlu1 %897  ;;  %v932_v54 = vsel %vm874_vm3, %v3512_v52, 0.0 }
 0x1c3   : > { %v906_v56 = vsub.f32 %v873_v18, %v898_v53  ;;  %933 = vadd.xlane.f32.xlu1 %v932_v54  ;;  %924 = vadd.xlane.f32.xlu0 %v923_v55  ;;  %v473_v54 = vld [vmem:[%s3536_s29 + $0x20] sm:$0xff] }
 0x1c4   : > { %v481_v55 = vpack.c.bf16 %v473_v54, %v473_v54  ;;  %v3002_v54 = vld [vmem:[#allocation2 + $0x144] ss:$16 sps:$4 sm:$0xff]  }
 0x1c5   : > { %v3520_v58 = vpop.eup %3138  ;;  %v921_v59 = vmul.f32 1.442695, %v906_v56 }
 0x1c6   : > { %v929_v60 = vsel %vm874_vm3, %v3520_v58, 0.0  ;;  %v1168_v56 = vsel %vm982_vm4, %v481_v55, 0  ;;  %v3000_v55 = vld [vmem:[#allocation2 + $0x140] ss:$16 sps:$4 sm:$0xff]  }
 0x1c7   : > { %3142 = vpow2.f32 %v921_v59  ;;  %930 = vadd.xlane.f32.xlu0 %v929_v60  ;;  %894 = vmax.xlane.f32.xlu1 %v893_v57  ;;  %v2943_v57 = vld [vmem:[#allocation2 + $0x8] ss:$16 sps:$4 sm:$0xff]   ;;  %v2951_v59 = vld [vmem:[#allocation2 + $0x2c] ss:$16 sps:$4 sm:$0xff]  }
 0x1c8   : > { %v2949_v60 = vld [vmem:[#allocation2 + $0x28] ss:$16 sps:$4 sm:$0xff]  }
 0x1c9   : > { %v3524_v61 = vpop.eup %3140 }
 0x1ca   : > { %v938_v62 = vsel %vm874_vm3, %v3524_v61, 0.0 }
 0x1cb   : > { %939 = vadd.xlane.f32.xlu1 %v938_v62  ;;  %v2955_v62 = vld [vmem:[#allocation2 + $0x48] ss:$16 sps:$4 sm:$0xff]  }
 0x1d1   : > { %v3528_v63 = vpop.eup %3142 }
 0x1d2   : > { %v944_v1 = vsel %vm874_vm3, %v3528_v63, 0.0 }
 0x1d3   : > { %945 = vadd.xlane.f32.xlu1 %v944_v1  ;;  %v2961_v1 = vld [vmem:[#allocation2 + $0x68] ss:$16 sps:$4 sm:$0xff]  }
 0x248   : > { %v928_v8 = vpop.xlane.xlu0 %927 }
 0x249   : > { %3144 = vrcp.f32 %v928_v8  ;;  %v2987_v8 = vld [vmem:[#allocation2 + $0xec] ss:$16 sps:$4 sm:$0xff]  }
 0x24c   : > { %v889_v9 = vpop.xlane.xlu0 %888 }
 0x24d   : > { %v903_v10 = vsub.f32 %v3502_v25, %v889_v9  ;;  %v474_v25 = vld [vmem:[%s3536_s29 + $0x28] sm:$0xff] }
 0x24e   : > { %v482_v28 = vpack.c.bf16 %v474_v25, %v474_v25  ;;  %v2985_v9 = vld [vmem:[#allocation2 + $0xe8] ss:$16 sps:$4 sm:$0xff]  }
 0x24f   : > { %v915_v11 = vmul.f32 1.442695, %v903_v10  ;;  %v2993_v10 = vld [vmem:[#allocation2 + $0x10c] ss:$16 sps:$4 sm:$0xff]  }
 0x250   : > { %v934_v13 = vpop.xlane.xlu1 %933  ;;  %v925_v14 = vpop.xlane.xlu0 %924  ;;  %v1214_v37 = vsel %vm982_vm4, %v482_v28, 0  ;;  %v2942_v28 = vld [vmem:[#allocation2 + $0x4] ss:$16 sps:$4 sm:$0xff]  }
 0x251   : > { %3146 = vpow2.f32 %v915_v11  ;;  %v2991_v11 = vld [vmem:[#allocation2 + $0x108] ss:$16 sps:$4 sm:$0xff]  }
 0x252   : > { %3148 = vrcp.f32 %v934_v13 }
 0x253   : > { %v3145_v16 = vpop.eup %3144  ;;  %3150 = vrcp.f32 %v925_v14  ;;  %v2997_v14 = vld [vmem:[#allocation2 + $0x128] ss:$16 sps:$4 sm:$0xff]  }
 0x254   : > { %v956_v17 = vmul.f32 %v3145_v16, %v3133_v45  ;;  %v931_v18 = vpop.xlane.xlu0 %930  ;;  %v895_v19 = vpop.xlane.xlu1 %894  ;;  %v484_v45 = vpack.c.bf16 %v476_v43, %v476_v43  ;;  %v3003_v16 = vld [vmem:[#allocation2 + $0x148] ss:$16 sps:$4 sm:$0xff]   ;;  %v2966_v43 = vld [vmem:[#allocation2 + $0x84] ss:$16 sps:$4 sm:$0xff]  }
 0x255   : > { %3152 = vrcp.f32 %v931_v18  ;;  %v905_v20 = vsub.f32 %v3505_v31, %v895_v19  ;;  %v479_v31 = vpack.c.bf16 %v471_v26, %v471_v26  ;;  %v475_v18 = vld [vmem:[%s3536_s29 + $0x30] sm:$0xff] }
 0x256   : > { %964 = vst.msk [vmem:[%s3550_s16 + $0x8] sm:$0xff] %vm874_vm3, %v956_v17  ;;  %v972_v21 = vpack.c.bf16 %v956_v17, %v956_v17  ;;  %v1306_v49 = vsel %vm982_vm4, %v484_v45, 0  ;;  %v3011_v17 = vld [vmem:[#allocation2 + $0x16c] ss:$16 sps:$4 sm:$0xff]   ;;  %v2972_v45 = vld [vmem:[#allocation2 + $0xa4] ss:$16 sps:$4 sm:$0xff]  }
 0x257   : > { %v919_v23 = vmul.f32 1.442695, %v905_v20  ;;  %v1076_v42 = vsel %vm982_vm4, %v479_v31, 0  ;;  %v3009_v20 = vld [vmem:[#allocation2 + $0x168] ss:$16 sps:$4 sm:$0xff]  }
 0x258   : > { %2822 = vmatmul.mubr.msk.bf16.vlgmr.msra.gmra.mrb[16].mxu1 %vm874_vm3, %v972_v21  ;;  %v940_v24 = vpop.xlane.xlu1 %939  ;;  %v483_v21 = vpack.c.bf16 %v475_v18, %v475_v18  ;;  %v3030_v18 = vld [vmem:[#allocation2 + $0x1e0] ss:$16 sps:$4 sm:$0xff]  }
 0x259   : > { %3154 = vpow2.f32 %v919_v23  ;;  %2832 = vmatpush3.bf16.msra.mxu1 %v1122_v22  ;;  %2833 = vmatprep.mubr.msk.bf16.mxu1 %vm3266_vm0, %v3265_v0  ;;  %v3017_v22 = vld [vmem:[#allocation2 + $0x18c] ss:$16 sps:$4 sm:$0xff]  }
 0x25a   : > { %3156 = vrcp.f32 %v940_v24  ;;  %2843 = vmatprep.subr.bf16.mxu1 %v3265_v0  ;;  %v1260_v26 = vsel %vm982_vm4, %v483_v21, 0 }
 0x25b   : > { %v3561_v27 = vpop.eup %3146 }
 0x25c   : > { %v3149_v29 = vpop.eup %3148  ;;  %v935_v30 = vsel %vm874_vm3, %v3561_v27, 0.0 }
 0x25d   : > { %v3151_v32 = vpop.eup %3150  ;;  %v958_v33 = vmul.f32 %v3149_v29, %v3512_v52  ;;  %936 = vadd.xlane.f32.xlu0 %v935_v30  ;;  %v3015_v29 = vld [vmem:[#allocation2 + $0x188] ss:$16 sps:$4 sm:$0xff]   ;;  %v3023_v30 = vld [vmem:[#allocation2 + $0x1ac] ss:$16 sps:$4 sm:$0xff]  }
 0x25e   : > { %v955_v34 = vmul.f32 %v3151_v32, %v3510_v51  ;;  %v3029_v32 = vld [vmem:[#allocation2 + $0x1cc] ss:$16 sps:$4 sm:$0xff]  }
 0x25f   : > { %v3153_v35 = vpop.eup %3152  ;;  %966 = vst.msk [vmem:[%s3550_s16 + $0x18] sm:$0xff] %vm874_vm3, %v958_v33  ;;  %v974_v36 = vpack.c.bf16 %v958_v33, %v958_v33 }
 0x260   : > { %963 = vst.msk [vmem:[%s3550_s16] sm:$0xff] %vm874_vm3, %v955_v34  ;;  %v957_v38 = vmul.f32 %v3153_v35, %v3520_v58  ;;  %v971_v39 = vpack.c.bf16 %v955_v34, %v955_v34  ;;  %v946_v40 = vpop.xlane.xlu1 %945  ;;  %v2945_v58 = vld [vmem:[#allocation2 + $0xc] ss:$16 sps:$4 sm:$0xff]   ;;  %v2940_v34 = vld [vmem:[#allocation2] ss:$16 sps:$4 sm:$0xff]  }
 0x261   : > { %2834 = vmatmul.mubr.msk.bf16.vlgmr.msra.gmra.mrb[20].mxu1 %vm874_vm3, %v974_v36  ;;  %3158 = vrcp.f32 %v946_v40  ;;  %v2948_v36 = vld [vmem:[#allocation2 + $0x24] ss:$16 sps:$4 sm:$0xff]  }
 0x262   : > { %965 = vst.msk [vmem:[%s3550_s16 + $0x10] sm:$0xff] %vm874_vm3, %v957_v38  ;;  %2816 = vmatmul.mubr.msk.bf16.vlgmr.msra.gmra.mrb[16].mxu0 %vm874_vm3, %v971_v39  ;;  %2844 = vmatpush3.bf16.msra.mxu1 %v1214_v37  ;;  %v973_v50 = vpack.c.bf16 %v957_v38, %v957_v38  ;;  %v3027_v37 = vld [vmem:[#allocation2 + $0x1c8] ss:$16 sps:$4 sm:$0xff]   ;;  %v2954_v38 = vld [vmem:[#allocation2 + $0x44] ss:$16 sps:$4 sm:$0xff]  }
 0x263   : > { %v3579_v44 = vpop.eup %3154  ;;  %2826 = vmatpush3.bf16.msra.mxu0 %v1076_v42  ;;  %2827 = vmatprep.mubr.msk.bf16.mxu0 %vm3266_vm0, %v3265_v0  ;;  %v2952_v39 = vld [vmem:[#allocation2 + $0x40] ss:$16 sps:$4 sm:$0xff]   ;;  %v2960_v40 = vld [vmem:[#allocation2 + $0x64] ss:$16 sps:$4 sm:$0xff]  }
 0x264   : > { %v3157_v46 = vpop.eup %3156  ;;  %v941_v41 = vsel %vm874_vm3, %v3579_v44, 0.0  ;;  %2845 = vmatprep.mubr.msk.bf16.mxu1 %vm3266_vm0, %v3265_v0  ;;  %2855 = vmatprep.subr.bf16.mxu1 %v3265_v0  ;;  %v2958_v42 = vld [vmem:[#allocation2 + $0x60] ss:$16 sps:$4 sm:$0xff]  }
 0x265   : > { %v960_v47 = vmul.f32 %v3157_v46, %v3524_v61  ;;  %942 = vadd.xlane.f32.xlu1 %v941_v41  ;;  %2837 = vmatprep.subr.bf16.mxu0 %v3265_v0  ;;  %v2957_v61 = vld [vmem:[#allocation2 + $0x4c] ss:$16 sps:$4 sm:$0xff]   ;;  %v2970_v46 = vld [vmem:[#allocation2 + $0xa0] ss:$16 sps:$4 sm:$0xff]   ;;  %v2978_v41 = vld [vmem:[#allocation2 + $0xc4] ss:$16 sps:$4 sm:$0xff]  }
 0x267   : > { %968 = vst.msk [vmem:[%s3550_s16 + $0x28] sm:$0xff] %vm874_vm3, %v960_v47  ;;  %v976_v48 = vpack.c.bf16 %v960_v47, %v960_v47  ;;  %v2976_v47 = vld [vmem:[#allocation2 + $0xc0] ss:$16 sps:$4 sm:$0xff]  }
 0x269   : > { %2846 = vmatmul.mubr.msk.bf16.vlgmr.msra.gmra.mrb[24].mxu1 %vm874_vm3, %v976_v48  ;;  %v2984_v48 = vld [vmem:[#allocation2 + $0xe4] ss:$16 sps:$4 sm:$0xff]  }
 0x26a   : > { %2828 = vmatmul.mubr.msk.bf16.vlgmr.msra.gmra.mrb[20].mxu0 %vm874_vm3, %v973_v50  ;;  %2856 = vmatpush3.bf16.msra.mxu1 %v1306_v49  ;;  %v2982_v49 = vld [vmem:[#allocation2 + $0xe0] ss:$16 sps:$4 sm:$0xff]   ;;  %v2990_v50 = vld [vmem:[#allocation2 + $0x104] ss:$16 sps:$4 sm:$0xff]  }
 0x26b   : > { %v3159_v51 = vpop.eup %3158  ;;  %2857 = vmatprep.mubr.msk.bf16.mxu1 %vm3266_vm0, %v3265_v0  ;;  %2839 = vmatprep.mubr.msk.bf16.mxu0 %vm3266_vm0, %v3265_v0 }
 0x26c   : > { %v962_v52 = vmul.f32 %v3159_v51, %v3528_v63  ;;  %2838 = vmatpush3.bf16.msra.mxu0 %v1168_v56  ;;  %2226 = vmatprep.subr.bf16.mxu1 %v2945_v58  ;;  %v2963_v63 = vld [vmem:[#allocation2 + $0x6c] ss:$16 sps:$4 sm:$0xff]   ;;  %v2988_v51 = vld [vmem:[#allocation2 + $0x100] ss:$16 sps:$4 sm:$0xff]   ;;  %v3008_v56 = vld [vmem:[#allocation2 + $0x164] ss:$16 sps:$4 sm:$0xff]  }
 0x26d   : > { %2849 = vmatprep.subr.bf16.mxu0 %v3265_v0 }
 0x26e   : > { %970 = vst.msk [vmem:[%s3550_s16 + $0x38] sm:$0xff] %vm874_vm3, %v962_v52  ;;  %v978_v53 = vpack.c.bf16 %v962_v52, %v962_v52  ;;  %v2996_v52 = vld [vmem:[#allocation2 + $0x124] ss:$16 sps:$4 sm:$0xff]  }
 0x271   : > { %2858 = vmatmul.mubr.msk.bf16.vlgmr.msra.gmra.mrb[28].mxu1 %vm874_vm3, %v978_v53  ;;  %v2994_v53 = vld [vmem:[#allocation2 + $0x120] ss:$16 sps:$4 sm:$0xff]  }
 0x272   : > { %2227 = vmatpush1.bf16.msra.mxu1 %v2943_v57  ;;  %v3035_v57 = vld [vmem:[#allocation2 + $0x1ec] ss:$16 sps:$4 sm:$0xff]  }
 0x273   : > { %2228 = vmatprep.subr.bf16.mxu1 %v2951_v59  ;;  %v3006_v59 = vld [vmem:[#allocation2 + $0x160] ss:$16 sps:$4 sm:$0xff]  }
 0x276   : > { %2229 = vmatpush1.bf16.msra.mxu1 %v2949_v60  ;;  %v3033_v60 = vld [vmem:[#allocation2 + $0x1e8] ss:$16 sps:$4 sm:$0xff]  }
 0x277   : > { %2230 = vmatprep.subr.bf16.mxu1 %v2957_v61 }
 0x27a   : > { %2231 = vmatpush1.bf16.msra.mxu1 %v2955_v62  ;;  %v3014_v62 = vld [vmem:[#allocation2 + $0x184] ss:$16 sps:$4 sm:$0xff]  }
 0x27b   : > { %2232 = vmatprep.subr.bf16.mxu1 %v2963_v63 }
 0x27e   : > { %2233 = vmatpush1.bf16.msra.mxu1 %v2961_v1 }
 0x27f   : > { %2234 = vmatprep.subr.bf16.mxu1 %v2969_v2  ;;  %v3041_v2 = vld [vmem:[#allocation2 + $0x20c] ss:$16 sps:$4 sm:$0xff]  }
 0x282   : > { %2235 = vmatpush1.bf16.msra.mxu1 %v2967_v3  ;;  %v3012_v3 = vld [vmem:[#allocation2 + $0x180] ss:$16 sps:$4 sm:$0xff]  }
 0x283   : > { %2236 = vmatprep.subr.bf16.mxu1 %v2975_v4  ;;  %v3020_v4 = vld [vmem:[#allocation2 + $0x1a4] ss:$16 sps:$4 sm:$0xff]  }
 0x286   : > { %2237 = vmatpush1.bf16.msra.mxu1 %v2973_v5  ;;  %v3018_v5 = vld [vmem:[#allocation2 + $0x1a0] ss:$16 sps:$4 sm:$0xff]  }
 0x287   : > { %2238 = vmatprep.subr.bf16.mxu1 %v2981_v6 }
 0x28a   : > { %2239 = vmatpush1.bf16.msra.mxu1 %v2979_v7  ;;  %v3026_v7 = vld [vmem:[#allocation2 + $0x1c4] ss:$16 sps:$4 sm:$0xff]  }
 0x28b   : > { %2240 = vmatprep.subr.bf16.mxu1 %v2987_v8 }
 0x28e   : > { %2241 = vmatpush1.bf16.msra.mxu1 %v2985_v9 }
 0x28f   : > { %2242 = vmatprep.subr.bf16.mxu1 %v2993_v10 }
 0x292   : > { %2243 = vmatpush1.bf16.msra.mxu1 %v2991_v11 }
 0x293   : > { %2244 = vmatprep.subr.bf16.mxu1 %v2999_v12 }
 0x296   : > { %2245 = vmatpush1.bf16.msra.mxu1 %v2997_v14 }
 0x297   : > { %2246 = vmatprep.subr.bf16.mxu1 %v3005_v15  ;;  %v3024_v15 = vld [vmem:[#allocation2 + $0x1c0] ss:$16 sps:$4 sm:$0xff]  }
 0x29a   : > { %2247 = vmatpush1.bf16.msra.mxu1 %v3003_v16 }
 0x29b   : > { %2248 = vmatprep.subr.bf16.mxu1 %v3011_v17  ;;  %v3032_v17 = vld [vmem:[#allocation2 + $0x1e4] ss:$16 sps:$4 sm:$0xff]  }
 0x29e   : > { %2249 = vmatpush1.bf16.msra.mxu1 %v3009_v20  ;;  %v3038_v20 = vld [vmem:[#allocation2 + $0x204] ss:$16 sps:$4 sm:$0xff]  }
 0x29f   : > { %2250 = vmatprep.subr.bf16.mxu1 %v3017_v22 }
 0x2a2   : > { %2251 = vmatpush1.bf16.msra.mxu1 %v3015_v29 }
 0x2a3   : > { %2252 = vmatprep.subr.bf16.mxu1 %v3023_v30 }
 0x2ea   : > { %v937_v13 = vpop.xlane.xlu0 %936 }
 0x2eb   : > { %3160 = vrcp.f32 %v937_v13 }
 0x2f2   : > { %v943_v19 = vpop.xlane.xlu1 %942 }
 0x2f3   : > { %3162 = vrcp.f32 %v943_v19 }
 0x2f5   : > { %v3161_v23 = vpop.eup %3160 }
 0x2f6   : > { %v959_v24 = vmul.f32 %v3161_v23, %v3561_v27  ;;  %v3021_v27 = vld [vmem:[#allocation2 + $0x1a8] ss:$16 sps:$4 sm:$0xff]  }
 0x2f7   : > { %2253 = vmatpush1.bf16.msra.mxu1 %v3021_v27 }
 0x2f8   : > { %967 = vst.msk [vmem:[%s3550_s16 + $0x20] sm:$0xff] %vm874_vm3, %v959_v24  ;;  %v975_v25 = vpack.c.bf16 %v959_v24, %v959_v24  ;;  %2254 = vmatprep.subr.bf16.mxu1 %v3029_v32 }
 0x2fa   : > { %2840 = vmatmul.mubr.msk.bf16.vlgmr.msra.gmra.mrb[24].mxu0 %vm874_vm3, %v975_v25 }
 0x2fb   : > { %2850 = vmatpush3.bf16.msra.mxu0 %v1260_v26  ;;  %2851 = vmatprep.mubr.msk.bf16.mxu0 %vm3266_vm0, %v3265_v0  ;;  %v2946_v0 = vld [vmem:[#allocation2 + $0x20] ss:$16 sps:$4 sm:$0xff]  }
 0x2fc   : > { %2144 = vmatprep.subr.bf16.mxu0 %v2942_v28  ;;  %2255 = vmatpush1.bf16.msra.mxu1 %v3027_v37 }
 0x2fd   : > { %v3163_v31 = vpop.eup %3162  ;;  %2256 = vmatprep.subr.bf16.mxu1 %v3035_v57  ;;  %v3068_v57 = vld [vmem:[#allocation2 + $0x2a4] ss:$16 sps:$4 sm:$0xff]  }
 0x2fe   : > { %v961_v33 = vmul.f32 %v3163_v31, %v3579_v44  ;;  %v2964_v44 = vld [vmem:[#allocation2 + $0x80] ss:$16 sps:$4 sm:$0xff]  }
 0x300   : > { %969 = vst.msk [vmem:[%s3550_s16 + $0x30] sm:$0xff] %vm874_vm3, %v961_v33  ;;  %v977_v35 = vpack.c.bf16 %v961_v33, %v961_v33  ;;  %2257 = vmatpush1.bf16.msra.mxu1 %v3033_v60  ;;  %v3069_v60 = vld [vmem:[#allocation2 + $0x2a8] ss:$16 sps:$4 sm:$0xff]   ;;  %s3198_s16 = sshll.u32 %s3268_s13, 4  ;;  %s3199_s16 = int_to_ptr.vmem [resolvable:$false] %s3198_s16 }
 0x301   : > { %2267 = vmatprep.subr.bf16.mxu1 %v3041_v2  ;;  %v3080_v2 = vld [vmem:[#allocation2 + $0x2e4] ss:$16 sps:$4 sm:$0xff]   ;;  %p3201_p2 = scmp.lt.s32.totalorder %s3658_s27, %s3199_s16 }
 0x302   : > { %2852 = vmatmul.mubr.msk.bf16.vlgmr.msra.gmra.mrb[28].mxu0 %vm874_vm3, %v977_v35 }
 0x303   : > { %2145 = vmatpush1.bf16.msra.mxu0 %v2940_v34 }
 0x304   : > { %2146 = vmatprep.subr.bf16.mxu0 %v2948_v36 }
 0x307   : > { %2147 = vmatpush1.bf16.msra.mxu0 %v2946_v0 }
 0x308   : > { %2148 = vmatprep.subr.bf16.mxu0 %v2954_v38 }
 0x30b   : > { %2149 = vmatpush1.bf16.msra.mxu0 %v2952_v39  ;;  %v3036_v39 = vld [vmem:[#allocation2 + $0x200] ss:$16 sps:$4 sm:$0xff]  }
 0x30c   : > { %2150 = vmatprep.subr.bf16.mxu0 %v2960_v40  ;;  %v3039_v40 = vld [vmem:[#allocation2 + $0x208] ss:$16 sps:$4 sm:$0xff]  }
 0x30f   : > { %2151 = vmatpush1.bf16.msra.mxu0 %v2958_v42  ;;  %v3044_v42 = vld [vmem:[#allocation2 + $0x224] ss:$16 sps:$4 sm:$0xff]  }
 0x310   : > { %2152 = vmatprep.subr.bf16.mxu0 %v2966_v43  ;;  %v3047_v43 = vld [vmem:[#allocation2 + $0x22c] ss:$16 sps:$4 sm:$0xff]  }
 0x313   : > { %2153 = vmatpush1.bf16.msra.mxu0 %v2964_v44  ;;  %v3042_v44 = vld [vmem:[#allocation2 + $0x220] ss:$16 sps:$4 sm:$0xff]  }
 0x314   : > { %2154 = vmatprep.subr.bf16.mxu0 %v2972_v45  ;;  %v3045_v45 = vld [vmem:[#allocation2 + $0x228] ss:$16 sps:$4 sm:$0xff]  }
 0x317   : > { %2155 = vmatpush1.bf16.msra.mxu0 %v2970_v46  ;;  %v3050_v46 = vld [vmem:[#allocation2 + $0x244] ss:$16 sps:$4 sm:$0xff]  }
 0x318   : > { %2156 = vmatprep.subr.bf16.mxu0 %v2978_v41  ;;  %v3053_v41 = vld [vmem:[#allocation2 + $0x24c] ss:$16 sps:$4 sm:$0xff]  }
 0x31b   : > { %2157 = vmatpush1.bf16.msra.mxu0 %v2976_v47  ;;  %v3048_v47 = vld [vmem:[#allocation2 + $0x240] ss:$16 sps:$4 sm:$0xff]  }
 0x31c   : > { %2158 = vmatprep.subr.bf16.mxu0 %v2984_v48  ;;  %v3051_v48 = vld [vmem:[#allocation2 + $0x248] ss:$16 sps:$4 sm:$0xff]  }
 0x31f   : > { %2159 = vmatpush1.bf16.msra.mxu0 %v2982_v49  ;;  %v3056_v49 = vld [vmem:[#allocation2 + $0x264] ss:$16 sps:$4 sm:$0xff]  }
 0x320   : > { %2160 = vmatprep.subr.bf16.mxu0 %v2990_v50  ;;  %v3059_v50 = vld [vmem:[#allocation2 + $0x26c] ss:$16 sps:$4 sm:$0xff]  }
 0x323   : > { %2161 = vmatpush1.bf16.msra.mxu0 %v2988_v51  ;;  %v3054_v51 = vld [vmem:[#allocation2 + $0x260] ss:$16 sps:$4 sm:$0xff]  }
 0x324   : > { %2162 = vmatprep.subr.bf16.mxu0 %v2996_v52  ;;  %v3057_v52 = vld [vmem:[#allocation2 + $0x268] ss:$16 sps:$4 sm:$0xff]  }
 0x327   : > { %2163 = vmatpush1.bf16.msra.mxu0 %v2994_v53  ;;  %v3062_v53 = vld [vmem:[#allocation2 + $0x284] ss:$16 sps:$4 sm:$0xff]  }
 0x328   : > { %2164 = vmatprep.subr.bf16.mxu0 %v3002_v54  ;;  %v3065_v54 = vld [vmem:[#allocation2 + $0x28c] ss:$16 sps:$4 sm:$0xff]  }
 0x32b   : > { %v1066_v58 = vpop.f32.mrb[16].mxu1  ;;  %2165 = vmatpush1.bf16.msra.mxu0 %v3000_v55  ;;  %v3060_v55 = vld [vmem:[#allocation2 + $0x280] ss:$16 sps:$4 sm:$0xff]  }
 0x32c   : > { %v2823_v61 = vpop.f32.mrb[17].mxu1  ;;  %2166 = vmatprep.subr.bf16.mxu0 %v3008_v56  ;;  %v3063_v56 = vld [vmem:[#allocation2 + $0x288] ss:$16 sps:$4 sm:$0xff]  }
 0x32d   : > { %v1069_v63 = vpop.f32.mrb[18].mxu1  ;;  %v3074_v61 = vld [vmem:[#allocation2 + $0x2c4] ss:$16 sps:$4 sm:$0xff]  }
 0x32e   : > { %v2824_v1 = vpop.f32.mrb[19].mxu1  ;;  %v3072_v63 = vld [vmem:[#allocation2 + $0x2c0] ss:$16 sps:$4 sm:$0xff]  }
 0x32f   : > { %2167 = vmatpush1.bf16.msra.mxu0 %v3006_v59  ;;  %v3066_v59 = vld [vmem:[#allocation2 + $0x2a0] ss:$16 sps:$4 sm:$0xff]   ;;  %v3075_v1 = vld [vmem:[#allocation2 + $0x2c8] ss:$16 sps:$4 sm:$0xff]  }
 0x330   : > { %2168 = vmatprep.subr.bf16.mxu0 %v3014_v62  ;;  %v3077_v62 = vld [vmem:[#allocation2 + $0x2cc] ss:$16 sps:$4 sm:$0xff]  }
 0x333   : > { %2169 = vmatpush1.bf16.msra.mxu0 %v3012_v3  ;;  %v3083_v3 = vld [vmem:[#allocation2 + $0x2ec] ss:$16 sps:$4 sm:$0xff]  }
 0x334   : > { %v1158_v6 = vpop.f32.mrb[20].mxu1  ;;  %2170 = vmatprep.subr.bf16.mxu0 %v3020_v4  ;;  %v3078_v4 = vld [vmem:[#allocation2 + $0x2e0] ss:$16 sps:$4 sm:$0xff]  }
 0x335   : > { %v1020_v8 = vpop.f32.mrb[16].mxu0  ;;  %v2930_v9 = vpack.i.bf16 %v1066_v58, %v1158_v6  ;;  %v2835_v10 = vpop.f32.mrb[21].mxu1  ;;  %v3071_v58 = vld [vmem:[#allocation2 + $0x2ac] ss:$16 sps:$4 sm:$0xff]   ;;  %v3086_v6 = vld [vmem:[#allocation2 + $0x304] ss:$16 sps:$4 sm:$0xff]  }
 0x336   : > { %v2817_v11 = vpop.f32.mrb[17].mxu0  ;;  %v1161_v12 = vpop.f32.mrb[22].mxu1  ;;  %v3087_v10 = vld [vmem:[#allocation2 + $0x308] ss:$16 sps:$4 sm:$0xff]  }
 0x337   : > { %v1023_v13 = vpop.f32.mrb[18].mxu0  ;;  %v2836_v14 = vpop.f32.mrb[23].mxu1  ;;  %2931 = vrot.lane.b32.xlu0 %v2930_v9, %s3267_s17  ;;  %2171 = vmatpush1.bf16.msra.mxu0 %v3018_v5  ;;  %v3081_v5 = vld [vmem:[#allocation2 + $0x2e8] ss:$16 sps:$4 sm:$0xff]   ;;  %v3084_v9 = vld [vmem:[#allocation2 + $0x300] ss:$16 sps:$4 sm:$0xff]  }
 0x338   : > { %v2818_v16 = vpop.f32.mrb[19].mxu0  ;;  %2172 = vmatprep.subr.bf16.mxu0 %v3026_v7  ;;  %v3089_v7 = vld [vmem:[#allocation2 + $0x30c] ss:$16 sps:$4 sm:$0xff]   ;;  %v3092_v12 = vld [vmem:[#allocation2 + $0x324] ss:$16 sps:$4 sm:$0xff]  }
 0x339   : > { %v3095_v13 = vld [vmem:[#allocation2 + $0x32c] ss:$16 sps:$4 sm:$0xff]  }
 0x33b   : > { %2173 = vmatpush1.bf16.msra.mxu0 %v3024_v15 }
 0x33c   : > { %v1250_v19 = vpop.f32.mrb[24].mxu1  ;;  %2174 = vmatprep.subr.bf16.mxu0 %v3032_v17  ;;  %v3090_v17 = vld [vmem:[#allocation2 + $0x320] ss:$16 sps:$4 sm:$0xff]  }
 0x33d   : > { %v1112_v21 = vpop.f32.mrb[20].mxu0  ;;  %v2847_v22 = vpop.f32.mrb[25].mxu1 }
 0x33e   : > { %v2829_v23 = vpop.f32.mrb[21].mxu0  ;;  %v1253_v24 = vpop.f32.mrb[26].mxu1 }
 0x33f   : > { %v1115_v25 = vpop.f32.mrb[22].mxu0  ;;  %v2848_v26 = vpop.f32.mrb[27].mxu1  ;;  %2175 = vmatpush1.bf16.msra.mxu0 %v3030_v18  ;;  %v3093_v18 = vld [vmem:[#allocation2 + $0x328] ss:$16 sps:$4 sm:$0xff]   ;;  %v3096_v23 = vld [vmem:[#allocation2 + $0x340] ss:$16 sps:$4 sm:$0xff]  }
 0x340   : > { %v2830_v28 = vpop.f32.mrb[23].mxu0  ;;  %2185 = vmatprep.subr.bf16.mxu0 %v3038_v20  ;;  %v3101_v20 = vld [vmem:[#allocation2 + $0x34c] ss:$16 sps:$4 sm:$0xff]   ;;  %v3099_v24 = vld [vmem:[#allocation2 + $0x348] ss:$16 sps:$4 sm:$0xff]  }
 0x344   : > { %v1342_v29 = vpop.f32.mrb[28].mxu1 }
 0x345   : > { %v2935_v30 = vpack.i.bf16 %v1250_v19, %v1342_v29  ;;  %v2859_v27 = vpop.f32.mrb[29].mxu1  ;;  %v3098_v19 = vld [vmem:[#allocation2 + $0x344] ss:$16 sps:$4 sm:$0xff]  }
 0x346   : > { %v1345_v31 = vpop.f32.mrb[30].mxu1  ;;  %v3107_v27 = vld [vmem:[#allocation2 + $0x36c] ss:$16 sps:$4 sm:$0xff]  }
 0x347   : > { %2936 = vrot.lane.b32.xlu1 %v2935_v30, %s3267_s17  ;;  %v2860_v32 = vpop.f32.mrb[31].mxu1  ;;  %v3104_v30 = vld [vmem:[#allocation2 + $0x364] ss:$16 sps:$4 sm:$0xff]   ;;  %s3656_s17 = scalar_lea.hbm %s3727_s9, %s2732_s23 }
 0x348   : > { %v3102_v32 = vld [vmem:[#allocation2 + $0x360] ss:$16 sps:$4 sm:$0xff]  }
 0x3a9   : > { %v2932_v33 = vpop.permute.xlu0 %2931 }
 0x3aa   : > { %v2934_v34 = vunpack.i.h.bf16 %v2932_v33  ;;  %v2933_v35 = vunpack.i.l.bf16 %v2932_v33  ;;  %v3105_v33 = vld [vmem:[#allocation2 + $0x368] ss:$16 sps:$4 sm:$0xff]  }
 0x3ac   : > { %v1364_v36 = vsel %vm486_vm1, %v1020_v8, %v2934_v34  ;;  %v1365_v37 = vsel %vm486_vm1, %v1112_v21, %v2933_v35  ;;  %v3110_v34 = vld [vmem:[#allocation2 + $0x384] ss:$16 sps:$4 sm:$0xff]   ;;  %v3113_v35 = vld [vmem:[#allocation2 + $0x38c] ss:$16 sps:$4 sm:$0xff]  }
 0x3ad   : > { %v1368_v0 = vpack.c.bf16 %v1364_v36, %v1364_v36  ;;  %v1369_v38 = vpack.c.bf16 %v1365_v37, %v1365_v37  ;;  %v3108_v36 = vld [vmem:[#allocation2 + $0x380] ss:$16 sps:$4 sm:$0xff]   ;;  %v3111_v37 = vld [vmem:[#allocation2 + $0x388] ss:$16 sps:$4 sm:$0xff]  }
 0x3af   : > { %2176 = vmatprep.mubr.bf16.mxu0 %v1369_v38  ;;  %2258 = vmatprep.mubr.bf16.mxu1 %v1369_v38  ;;  %v3119_v38 = vld [vmem:[#allocation2 + $0x3ac] ss:$16 sps:$4 sm:$0xff]  }
 0x3b0   : > { %2177 = vmatmul.mubr.bf16.vlgmr.msra.gmra.mrb[32].mxu0 %v1368_v0  ;;  %2259 = vmatmul.mubr.bf16.vlgmr.msra.gmra.mrb[32].mxu1 %v1368_v0  ;;  %v3116_v0 = vld [vmem:[#allocation2 + $0x3a4] ss:$16 sps:$4 sm:$0xff]  }
 0x3b1   : > { %2186 = vmatpush1.bf16.msra.mxu0 %v3036_v39  ;;  %2268 = vmatpush1.bf16.msra.mxu1 %v3039_v40  ;;  %v3114_v39 = vld [vmem:[#allocation2 + $0x3a0] ss:$16 sps:$4 sm:$0xff]   ;;  %v3117_v40 = vld [vmem:[#allocation2 + $0x3a8] ss:$16 sps:$4 sm:$0xff]  }
 0x3b2   : > { %2187 = vmatprep.subr.bf16.mxu0 %v3044_v42  ;;  %2269 = vmatprep.subr.bf16.mxu1 %v3047_v43  ;;  %v3122_v42 = vld [vmem:[#allocation2 + $0x3c4] ss:$16 sps:$4 sm:$0xff]   ;;  %v3125_v43 = vld [vmem:[#allocation2 + $0x3cc] ss:$16 sps:$4 sm:$0xff]  }
 0x3b5   : > { %2188 = vmatpush1.bf16.msra.mxu0 %v3042_v44  ;;  %2270 = vmatpush1.bf16.msra.mxu1 %v3045_v45  ;;  %v3120_v44 = vld [vmem:[#allocation2 + $0x3c0] ss:$16 sps:$4 sm:$0xff]   ;;  %v3123_v45 = vld [vmem:[#allocation2 + $0x3c8] ss:$16 sps:$4 sm:$0xff]  }
 0x3b6   : > { %2189 = vmatprep.subr.bf16.mxu0 %v3050_v46  ;;  %2271 = vmatprep.subr.bf16.mxu1 %v3053_v41  ;;  %v3128_v46 = vld [vmem:[#allocation2 + $0x3e4] ss:$16 sps:$4 sm:$0xff]   ;;  %v3131_v41 = vld [vmem:[#allocation2 + $0x3ec] ss:$16 sps:$4 sm:$0xff]  }
 0x3b9   : > { %2190 = vmatpush1.bf16.msra.mxu0 %v3048_v47  ;;  %2272 = vmatpush1.bf16.msra.mxu1 %v3051_v48  ;;  %v3622_v16 = vpop.permute.xlu1 %2936  ;;  %v3126_v48 = vld [vmem:[#allocation2 + $0x3e0] ss:$16 sps:$4 sm:$0xff]  }
 0x3ba   : > { %2191 = vmatprep.subr.bf16.mxu0 %v3056_v49  ;;  %2273 = vmatprep.subr.bf16.mxu1 %v3059_v50  ;;  %v2938_v21 = vunpack.i.l.bf16 %v3622_v16  ;;  %v2939_v47 = vunpack.i.h.bf16 %v3622_v16  ;;  %v3129_v49 = vld [vmem:[#allocation2 + $0x3e8] ss:$16 sps:$4 sm:$0xff]  }
 0x3bd   : > { %2192 = vmatpush1.bf16.msra.mxu0 %v3054_v51  ;;  %2274 = vmatpush1.bf16.msra.mxu1 %v3057_v52  ;;  %v1500_v52 = vld [vmem:[%s430_s28] sm:$0xff] }
 0x3be   : > { %2193 = vmatprep.subr.bf16.mxu0 %v3062_v53  ;;  %2275 = vmatprep.subr.bf16.mxu1 %v3065_v54  ;;  %v1501_v53 = vld [vmem:[%s430_s28 + $0x8] sm:$0xff] }
 0x3c1   : > { %2194 = vmatpush1.bf16.msra.mxu0 %v3060_v55  ;;  %2276 = vmatpush1.bf16.msra.mxu1 %v3063_v56 }
 0x3c2   : > { %2195 = vmatprep.subr.bf16.mxu0 %v3068_v57  ;;  %2277 = vmatprep.subr.bf16.mxu1 %v3071_v58  ;;  %v1502_v57 = vld [vmem:[%s430_s28 + $0x10] sm:$0xff] }
 0x3c5   : > { %2196 = vmatpush1.bf16.msra.mxu0 %v3066_v59  ;;  %2278 = vmatpush1.bf16.msra.mxu1 %v3069_v60 }
 0x3c6   : > { %2197 = vmatprep.subr.bf16.mxu0 %v3074_v61  ;;  %2279 = vmatprep.subr.bf16.mxu1 %v3077_v62 }
 0x3c9   : > { %2198 = vmatpush1.bf16.msra.mxu0 %v3072_v63  ;;  %2280 = vmatpush1.bf16.msra.mxu1 %v3075_v1  ;;  %v1503_v63 = vld [vmem:[%s430_s28 + $0x18] sm:$0xff]  ;;  %s3200_s28 = scalar_lea.vmem %s3199_s16, 2048 }
 0x3ca   : > { %2199 = vmatprep.subr.bf16.mxu0 %v3080_v2  ;;  %2281 = vmatprep.subr.bf16.mxu1 %v3083_v3  ;;  %p3202_p3 = scmp.lt.s32.totalorder %s3200_s28, %s3194_s26 }
 0x3cc   : > { %p3203_p4 = por %p3202_p3, %p3201_p2 }
 0x3cd   : > { %2200 = vmatpush1.bf16.msra.mxu0 %v3078_v4  ;;  %2282 = vmatpush1.bf16.msra.mxu1 %v3081_v5  ;;  %v3620_v8 = vpop.f32.mrb[24].mxu0 }
 0x3ce   : > { %v2841_v11 = vpop.f32.mrb[25].mxu0  ;;  %2201 = vmatprep.subr.bf16.mxu0 %v3086_v6  ;;  %2283 = vmatprep.subr.bf16.mxu1 %v3089_v7  ;;  %v1366_v50 = vsel %vm486_vm1, %v3620_v8, %v2939_v47  ;;  %p3204_p7 = pnand %p3203_p4, %p3197_p12 }
 0x3cf   : > { %v1207_v14 = vpop.f32.mrb[26].mxu0  ;;  %v1370_v51 = vpack.c.bf16 %v1366_v50, %v1366_v50 }
 0x3d0   : > { %v2842_v15 = vpop.f32.mrb[27].mxu0 }
 0x3d1   : > { %2202 = vmatpush1.bf16.msra.mxu0 %v3084_v9  ;;  %2284 = vmatpush1.bf16.msra.mxu1 %v3087_v10 }
 0x3d2   : > { %2203 = vmatprep.subr.bf16.mxu0 %v3092_v12  ;;  %2285 = vmatprep.subr.bf16.mxu1 %v3095_v13 }
 0x3d5   : > { %2204 = vmatpush1.bf16.msra.mxu0 %v3090_v17  ;;  %2286 = vmatpush1.bf16.msra.mxu1 %v3093_v18  ;;  %v1296_v22 = vpop.f32.mrb[28].mxu0 }
 0x3d6   : > { %v1367_v25 = vsel %vm486_vm1, %v1296_v22, %v2938_v21  ;;  %v2853_v26 = vpop.f32.mrb[29].mxu0  ;;  %2205 = vmatprep.subr.bf16.mxu0 %v3098_v19  ;;  %2287 = vmatprep.subr.bf16.mxu1 %v3101_v20 }
 0x3d7   : > { %v1371_v28 = vpack.c.bf16 %v1367_v25, %v1367_v25  ;;  %v1299_v29 = vpop.f32.mrb[30].mxu0 }
 0x3d8   : > { %v2854_v31 = vpop.f32.mrb[31].mxu0 }
 0x3d9   : > { %2206 = vmatpush1.bf16.msra.mxu0 %v3096_v23  ;;  %2288 = vmatpush1.bf16.msra.mxu1 %v3099_v24 }
 0x3da   : > { %2217 = vmatprep.mubr.bf16.mxu0 %v1371_v28  ;;  %2299 = vmatprep.mubr.bf16.mxu1 %v1371_v28 }
 0x3db   : > { %2207 = vmatprep.subr.bf16.mxu0 %v3104_v30  ;;  %2289 = vmatprep.subr.bf16.mxu1 %v3107_v27 }
 0x3dd   : > { %2208 = vmatpush1.bf16.msra.mxu0 %v3102_v32  ;;  %2290 = vmatpush1.bf16.msra.mxu1 %v3105_v33 }
 0x3de   : > { %2209 = vmatprep.subr.bf16.mxu0 %v3110_v34  ;;  %2291 = vmatprep.subr.bf16.mxu1 %v3113_v35 }
 0x3e1   : > { %2210 = vmatpush1.bf16.msra.mxu0 %v3108_v36  ;;  %2292 = vmatpush1.bf16.msra.mxu1 %v3111_v37 }
 0x3e2   : > { %2211 = vmatprep.subr.bf16.mxu0 %v3116_v0  ;;  %2293 = vmatprep.subr.bf16.mxu1 %v3119_v38 }
 0x3e5   : > { %2212 = vmatpush1.bf16.msra.mxu0 %v3114_v39  ;;  %2294 = vmatpush1.bf16.msra.mxu1 %v3117_v40 }
 0x3e6   : > { %2213 = vmatprep.subr.bf16.mxu0 %v3122_v42  ;;  %2295 = vmatprep.subr.bf16.mxu1 %v3125_v43 }
 0x3e9   : > { %2214 = vmatpush1.bf16.msra.mxu0 %v3120_v44  ;;  %2296 = vmatpush1.bf16.msra.mxu1 %v3123_v45 }
 0x3ea   : > { %2215 = vmatprep.subr.bf16.mxu0 %v3128_v46  ;;  %2297 = vmatprep.subr.bf16.mxu1 %v3131_v41 }
 0x3ed   : > { %2216 = vmatpush1.bf16.msra.mxu0 %v3126_v48  ;;  %2298 = vmatpush1.bf16.msra.mxu1 %v3129_v49 }
 0x3f0   : > { %2218 = vmatmul.mubr.bf16.vlgmr.msra.gmra.mrb[32].mxu0 %v1370_v51  ;;  %2300 = vmatmul.mubr.bf16.vlgmr.msra.gmra.mrb[32].mxu1 %v1370_v51 }
 0x4c3   : > { %v2219_v54 = vpop.f32.mrb[32].mxu0  ;;  %v2301_v55 = vpop.f32.mrb[32].mxu1 }
 0x4c4   : > { %v2861_v56 = vadd.f32 %v2219_v54, %v1500_v52  ;;  %v2221_v58 = vpop.f32.mrb[33].mxu0  ;;  %v2303_v59 = vpop.f32.mrb[33].mxu1  ;;  %v2863_v3 = vadd.f32 %v2301_v55, %v1502_v57 }
 0x4c5   : > { %v2862_v60 = vadd.f32 %v2221_v58, %v1501_v53  ;;  %v2223_v61 = vpop.f32.mrb[34].mxu0  ;;  %v2305_v62 = vpop.f32.mrb[34].mxu1  ;;  %v2864_v5 = vadd.f32 %v2303_v59, %v1503_v63 }
 0x4c6   : > { %v2224_v1 = vpop.f32.mrb[35].mxu0  ;;  %v2306_v2 = vpop.f32.mrb[35].mxu1 }
 0x4c7   : > { %v2310_v4 = vadd.f32 %v2862_v60, %v2861_v56 }
 0x4c9   : > { %v2311_v6 = vadd.f32 %v2863_v3, %v2310_v4 }
 0x4cb   : > { %v2312_v7 = vadd.f32 %v2864_v5, %v2311_v6 }
 0x4cd   : > { %2313 = vadd.xlane.f32.xlu1 %v2312_v7 }
 0x55a   : > { %v2314_v8 = vpop.xlane.xlu1 %2313 }
 0x55b   : > { %v2316_v9 = vmul.f32 0.001953125, %v2314_v8 }
 0x55d   : > { %v3635_v10 = vsub.f32 %v2861_v56, %v2316_v9  ;;  %v3637_v11 = vsub.f32 %v2862_v60, %v2316_v9  ;;  %v3639_v12 = vsub.f32 %v2863_v3, %v2316_v9  ;;  %v3641_v13 = vsub.f32 %v2864_v5, %v2316_v9 }
 0x55f   : > { %v2321_v14 = vmul.f32 %v3635_v10, %v3635_v10  ;;  %v2322_v15 = vmul.f32 %v3637_v11, %v3637_v11  ;;  %v2323_v16 = vmul.f32 %v3639_v12, %v3639_v12  ;;  %v2324_v18 = vmul.f32 %v3641_v13, %v3641_v13 }
 0x561   : > { %v2325_v17 = vadd.f32 %v2322_v15, %v2321_v14 }
 0x563   : > { %v2326_v19 = vadd.f32 %v2325_v17, %v2323_v16 }
 0x565   : > { %v2327_v20 = vadd.f32 %v2326_v19, %v2324_v18 }
 0x567   : > { %2328 = vadd.xlane.f32.xlu0 %v2327_v20 }
 0x568   : > { %3207 = shalt.err (!%p3204_p7)
}
 0x569   : > { %s3208_s21 = scalar_lea.hbm %s3656_s17, 1024  ;;  %s3212_s14 = scalar_lea.hbm %s3727_s9, 2048 }
 0x56a   : > { %p3209_p8 = scmp.ne.s32.totalorder %s3656_s17, %s3208_s21  ;;  %p3213_p1 = scmp.lt.u32.totalorder %s3656_s17, %s3727_s9 }
 0x56b   : > { %p3214_p0 = scmp.lt.u32.totalorder %s3212_s14, %s3208_s21  ;;  %p3216_p6 = scmp.lt.u32.totalorder %s3208_s21, %s3656_s17 }
 0x56c   : > { %p3210_p11 = pnand %p3209_p8, %p3738_p9 }
 0x56d   : > { %p3215_p5 = por %p3214_p0, %p3213_p1 }
 0x56e   : > { %p3211_p13 = pneg %p3210_p11 }
 0x56f   : > { %p3217_p10 = por %p3216_p6, %p3215_p5 }
 0x571   : > { %p3218_p12 = pnand %p3217_p10, %p3211_p13 }
 0x573   : > { %3221 = shalt.err (!%p3218_p12)
}
 0x574   : > { %s3269_s26 = smov 128   ;;  %s3270_s28 = smov 8   ;;  %v2338_v23 = vlaneseq  ;;  %v2308_v27 = vld [vmem:[%s3724_s6] sm:$0xf] }
 0x575   : > { %2877 = dma.vmem_to_hbm [thread:$0]  (%p3738_p9), %s3658_s27, 1024, %s3656_s17, %s3662_s25, %s3269_s26, %s3269_s26, %s3270_s28  }
 0x576   : > { %v2339_v25 = vshrl.u32 %v2338_v23, 7  ;;  %v2309_v31 = vld [vmem:[%s3725_s7] sm:$0xf]  ;;  %s435_s17 = scalar_lea.vmem %s3726_s8, %s2730_s22 }
 0x578   : > { %v2340_v26 = vsub.s32 0, %v2339_v25  ;;  %v2344_v28 = vsub.s32 1, %v2339_v25  ;;  %v2348_v29 = vsub.s32 2, %v2339_v25  ;;  %v2352_v30 = vsub.s32 3, %v2339_v25 }
 0x57a   : > { %v2341_v32 = vrot.slane %v2308_v27, %v2340_v26  ;;  %v2345_v33 = vrot.slane %v2308_v27, %v2344_v28  ;;  %v2349_v34 = vrot.slane %v2308_v27, %v2348_v29  ;;  %v2353_v35 = vrot.slane %v2308_v27, %v2352_v30 }
 0x57b   : > { %v2366_v37 = vrot.slane %v2309_v31, %v2340_v26  ;;  %v2370_v0 = vrot.slane %v2309_v31, %v2344_v28  ;;  %v2374_v38 = vrot.slane %v2309_v31, %v2348_v29  ;;  %v2378_v39 = vrot.slane %v2309_v31, %v2352_v30 }
 0x5f4   : > { %v2329_v21 = vpop.xlane.xlu0 %2328 }
 0x5f5   : > { %v2330_v22 = vmul.f32 0.001953125, %v2329_v21 }
 0x5f7   : > { %v2331_v24 = vadd.f32 1e-05, %v2330_v22 }
 0x5f9   : > { %3164 = vrsqrt.f32 %v2331_v24 }
 0x603   : > { %v3165_v36 = vpop.eup %3164 }
 0x604   : > { %v2333_v40 = vmul.f32 %v3165_v36, %v3635_v10  ;;  %v2334_v42 = vmul.f32 %v3165_v36, %v3637_v11  ;;  %v2335_v43 = vmul.f32 %v3165_v36, %v3639_v12  ;;  %v2336_v44 = vmul.f32 %v3165_v36, %v3641_v13 }
 0x606   : > { %v2358_v45 = vmul.f32 %v2341_v32, %v2333_v40  ;;  %v2359_v46 = vmul.f32 %v2345_v33, %v2334_v42  ;;  %v2360_v41 = vmul.f32 %v2349_v34, %v2335_v43  ;;  %v2361_v47 = vmul.f32 %v2353_v35, %v2336_v44 }
 0x608   : > { %v2383_v48 = vadd.f32 %v2366_v37, %v2358_v45  ;;  %v2384_v49 = vadd.f32 %v2370_v0, %v2359_v46  ;;  %v2385_v50 = vadd.f32 %v2374_v38, %v2360_v41  ;;  %v2386_v51 = vadd.f32 %v2378_v39, %v2361_v47 }
 0x60a   : > { %2387 = vst [vmem:[%s435_s17] sm:$0xff] %v2383_v48  ;;  %2388 = vst [vmem:[%s435_s17 + $0x8] sm:$0xff] %v2384_v49 }
 0x60b   : > { %2389 = vst [vmem:[%s435_s17 + $0x10] sm:$0xff] %v2385_v50  ;;  %2390 = vst [vmem:[%s435_s17 + $0x18] sm:$0xff] %v2386_v51 }
 0x60c PF: > { %p2889_p9 = scmp.ge.s32.totalorder %s3260_s12, 2  ;;  %s2436_s25 = sand.u32 1, %s3248_s30  }
 0x60d   : > { %p3739_p2 = scmp.ne.s32.totalorder %s3732_s20, 0  ;;  %s2437_s24 = scalar_lea.sflag [#allocation4], %s2436_s25 }
 0x60f   : > { %p2884_p3 = pnand %p2889_p9, %p3739_p2 }
 0x611   : > { %3243 = dma.done.wait (!%p2884_p3), %s2437_s24, 1024  }
 0x612   : > { %3245 = vsyncadd (!%p2884_p3), %s2437_s24, 4294966272  ;;  %p21_p4 = scmp.ge.s32.totalorder %s3346_s15, 4   ;;  %s3740_s30 = smov %s3252_s10 }
 0x613   : > { %s3741_s10 = smov %s3256_s11  ;;  %s3742_s11 = smov %s3357_s18 }
 0x614   : > { %s3743_s12 = smov %s3346_s15  ;;  %23 = sbr.rel (!%p21_p4) target bundleno = 4 (0x4), region = 116 }
 0x61b   :  { %2442 = vsyncpa [#allocation3], 1 }
 0x61c   :  { %2444 = vsyncpa [#allocation3 + $0x1], 1 }
 0x61d   :  { %2445 = vsyncpa [#allocation4], 1 }
 0x61e   :  { %2447 = vsyncpa [#allocation4 + $0x1], 1 }

// kernel: decoder_layer.11
= control target key start
LH: loop header
LB: loop body
LE: loop exit
PB: predicated region body
PF: predicated region fallthrough
CT: control target
= control target key end

     0   :  { %s12940_s0 = inlined_call_operand.vmem [shape: f32[16,512], index: 0, kind: input, shape index: {}]   ;;  %s12941_s1 = inlined_call_operand.vmem [shape: bf16[512,2048], index: 1, kind: input, shape index: {}]   ;;  %s12942_s2 = inlined_call_operand.vmem [shape: bf16[2048,512], index: 2, kind: input, shape index: {}]   ;;  %s12943_s3 = inlined_call_operand.vmem [shape: f32[1,512], index: 3, kind: input, shape index: {}]   ;;  %s12944_s4 = inlined_call_operand.vmem [shape: f32[1,512], index: 4, kind: input, shape index: {}]   ;;  %s12945_s5 = inlined_call_operand.hbm [shape: f32[16,512], index: 5, kind: output, shape index: {}]  }
   0x1   :  { %v33_v0 = vld [vmem:[%s12941_s1] sm:$0xff]  ;;  %v34_v2 = vld [vmem:[%s12941_s1 + $0x8] sm:$0xff] }
   0x2   :  { %v41_v1 = vld [vmem:[%s12941_s1 + $0x40] sm:$0xff]  ;;  %v42_v4 = vld [vmem:[%s12941_s1 + $0x48] sm:$0xff] }
   0x3   :  { %v7739_v3 = vcombine.high %v33_v0, %v41_v1  ;;  %v7738_v5 = vcombine.low %v33_v0, %v41_v1  ;;  %v49_v6 = vld [vmem:[%s12941_s1 + $0x80] sm:$0xff]  ;;  %v7741_v8 = vcombine.high %v34_v2, %v42_v4  ;;  %v7740_v9 = vcombine.low %v34_v2, %v42_v4  ;;  %v50_v11 = vld [vmem:[%s12941_s1 + $0x88] sm:$0xff] }
   0x4   :  { %v57_v7 = vld [vmem:[%s12941_s1 + $0xc0] sm:$0xff]  ;;  %v58_v12 = vld [vmem:[%s12941_s1 + $0xc8] sm:$0xff] }
   0x5   :  { %v7755_v10 = vcombine.high %v49_v6, %v57_v7  ;;  %v65_v13 = vld [vmem:[%s12941_s1 + $0x100] sm:$0xff]  ;;  %3105 = vmatprep.subr.bf16.mxu0 %v7739_v3  ;;  %v7757_v14 = vcombine.high %v50_v11, %v58_v12  ;;  %v66_v16 = vld [vmem:[%s12941_s1 + $0x108] sm:$0xff]  ;;  %3191 = vmatprep.subr.bf16.mxu1 %v7741_v8  ;;  %v7754_v18 = vcombine.low %v49_v6, %v57_v7 }
   0x6   :  { %v73_v15 = vld [vmem:[%s12941_s1 + $0x140] sm:$0xff]  ;;  %v74_v17 = vld [vmem:[%s12941_s1 + $0x148] sm:$0xff]  ;;  %3106 = vmatpush1.bf16.msra.mxu0 %v7738_v5  ;;  %3192 = vmatpush1.bf16.msra.mxu1 %v7740_v9  ;;  %v7756_v19 = vcombine.low %v50_v11, %v58_v12 }
   0x7   :  { %3107 = vmatprep.subr.bf16.mxu0 %v7755_v10  ;;  %v7771_v20 = vcombine.high %v65_v13, %v73_v15  ;;  %3193 = vmatprep.subr.bf16.mxu1 %v7757_v14  ;;  %v7773_v21 = vcombine.high %v66_v16, %v74_v17  ;;  %v81_v22 = vld [vmem:[%s12941_s1 + $0x180] sm:$0xff]  ;;  %v82_v24 = vld [vmem:[%s12941_s1 + $0x188] sm:$0xff]  ;;  %v7770_v26 = vcombine.low %v65_v13, %v73_v15 }
   0x8   :  { %v89_v23 = vld [vmem:[%s12941_s1 + $0x1c0] sm:$0xff]  ;;  %v90_v25 = vld [vmem:[%s12941_s1 + $0x1c8] sm:$0xff]  ;;  %v7772_v27 = vcombine.low %v66_v16, %v74_v17 }
   0x9   :  { %v7787_v28 = vcombine.high %v81_v22, %v89_v23  ;;  %v7789_v29 = vcombine.high %v82_v24, %v90_v25  ;;  %v97_v30 = vld [vmem:[%s12941_s1 + $0x200] sm:$0xff]  ;;  %v98_v32 = vld [vmem:[%s12941_s1 + $0x208] sm:$0xff]  ;;  %v7786_v34 = vcombine.low %v81_v22, %v89_v23  ;;  %v7788_v35 = vcombine.low %v82_v24, %v90_v25 }
   0xa   :  { %3108 = vmatpush1.bf16.msra.mxu0 %v7754_v18  ;;  %3194 = vmatpush1.bf16.msra.mxu1 %v7756_v19  ;;  %v105_v31 = vld [vmem:[%s12941_s1 + $0x240] sm:$0xff]  ;;  %v106_v33 = vld [vmem:[%s12941_s1 + $0x248] sm:$0xff] }
   0xb   :  { %3109 = vmatprep.subr.bf16.mxu0 %v7771_v20  ;;  %3195 = vmatprep.subr.bf16.mxu1 %v7773_v21  ;;  %v7803_v36 = vcombine.high %v97_v30, %v105_v31  ;;  %v7805_v37 = vcombine.high %v98_v32, %v106_v33  ;;  %v113_v38 = vld [vmem:[%s12941_s1 + $0x280] sm:$0xff]  ;;  %v114_v40 = vld [vmem:[%s12941_s1 + $0x288] sm:$0xff]  ;;  %v7802_v42 = vcombine.low %v97_v30, %v105_v31 }
   0xc   :  { %v121_v39 = vld [vmem:[%s12941_s1 + $0x2c0] sm:$0xff]  ;;  %v122_v41 = vld [vmem:[%s12941_s1 + $0x2c8] sm:$0xff]  ;;  %v7804_v43 = vcombine.low %v98_v32, %v106_v33 }
   0xd   :  { %v7819_v44 = vcombine.high %v113_v38, %v121_v39  ;;  %v7821_v45 = vcombine.high %v114_v40, %v122_v41  ;;  %v129_v46 = vld [vmem:[%s12941_s1 + $0x300] sm:$0xff]  ;;  %v130_v48 = vld [vmem:[%s12941_s1 + $0x308] sm:$0xff]  ;;  %v7818_v50 = vcombine.low %v113_v38, %v121_v39  ;;  %v7820_v51 = vcombine.low %v114_v40, %v122_v41 }
   0xe   :  { %3110 = vmatpush1.bf16.msra.mxu0 %v7770_v26  ;;  %3196 = vmatpush1.bf16.msra.mxu1 %v7772_v27  ;;  %v137_v47 = vld [vmem:[%s12941_s1 + $0x340] sm:$0xff]  ;;  %v138_v49 = vld [vmem:[%s12941_s1 + $0x348] sm:$0xff] }
   0xf   :  { %3111 = vmatprep.subr.bf16.mxu0 %v7787_v28  ;;  %3197 = vmatprep.subr.bf16.mxu1 %v7789_v29  ;;  %v7835_v52 = vcombine.high %v129_v46, %v137_v47  ;;  %v22_v53 = vld [vmem:[%s12940_s0 + $0x8] sm:$0xff]  ;;  %v7837_v55 = vcombine.high %v130_v48, %v138_v49  ;;  %v145_v56 = vld [vmem:[%s12941_s1 + $0x380] sm:$0xff]  ;;  %v7834_v61 = vcombine.low %v129_v46, %v137_v47 }
  0x10   :  { %v26_v54 = vld [vmem:[%s12940_s0 + $0x28] sm:$0xff]  ;;  %v153_v57 = vld [vmem:[%s12941_s1 + $0x3c0] sm:$0xff]  ;;  %v7836_v62 = vcombine.low %v130_v48, %v138_v49 }
  0x11   :  { %v9794_v58 = vpack.c.bf16 %v26_v54, %v22_v53  ;;  %v146_v59 = vld [vmem:[%s12941_s1 + $0x388] sm:$0xff]  ;;  %v7851_v63 = vcombine.high %v145_v56, %v153_v57  ;;  %v161_v1 = vld [vmem:[%s12941_s1 + $0x400] sm:$0xff]  ;;  %v7850_v5 = vcombine.low %v145_v56, %v153_v57 }
  0x12   :  { %3112 = vmatpush1.bf16.msra.mxu0 %v7786_v34  ;;  %3198 = vmatpush1.bf16.msra.mxu1 %v7788_v35  ;;  %v154_v60 = vld [vmem:[%s12941_s1 + $0x3c8] sm:$0xff]  ;;  %v169_v2 = vld [vmem:[%s12941_s1 + $0x440] sm:$0xff] }
  0x13   :  { %3113 = vmatprep.subr.bf16.mxu0 %v7803_v36  ;;  %3199 = vmatprep.subr.bf16.mxu1 %v7805_v37  ;;  %v7853_v0 = vcombine.high %v146_v59, %v154_v60  ;;  %v162_v3 = vld [vmem:[%s12941_s1 + $0x408] sm:$0xff]  ;;  %v7852_v6 = vcombine.low %v146_v59, %v154_v60  ;;  %v7867_v7 = vcombine.high %v161_v1, %v169_v2  ;;  %v177_v9 = vld [vmem:[%s12941_s1 + $0x480] sm:$0xff] }
  0x14   :  { %3137 = vmatprep.mubr.bf16.mxu0 %v9794_v58  ;;  %3223 = vmatprep.mubr.bf16.mxu1 %v9794_v58  ;;  %v170_v4 = vld [vmem:[%s12941_s1 + $0x448] sm:$0xff]  ;;  %v185_v10 = vld [vmem:[%s12941_s1 + $0x4c0] sm:$0xff]  ;;  %v7866_v13 = vcombine.low %v161_v1, %v169_v2 }
  0x15   :  { %v7869_v8 = vcombine.high %v162_v3, %v170_v4  ;;  %v178_v11 = vld [vmem:[%s12941_s1 + $0x488] sm:$0xff]  ;;  %v7868_v14 = vcombine.low %v162_v3, %v170_v4  ;;  %v7883_v15 = vcombine.high %v177_v9, %v185_v10  ;;  %v193_v17 = vld [vmem:[%s12941_s1 + $0x500] sm:$0xff]  ;;  %v7882_v21 = vcombine.low %v177_v9, %v185_v10 }
  0x16   :  { %3114 = vmatpush1.bf16.msra.mxu0 %v7802_v42  ;;  %3200 = vmatpush1.bf16.msra.mxu1 %v7804_v43  ;;  %v186_v12 = vld [vmem:[%s12941_s1 + $0x4c8] sm:$0xff]  ;;  %v201_v18 = vld [vmem:[%s12941_s1 + $0x540] sm:$0xff] }
  0x17   :  { %3115 = vmatprep.subr.bf16.mxu0 %v7819_v44  ;;  %3201 = vmatprep.subr.bf16.mxu1 %v7821_v45  ;;  %v7885_v16 = vcombine.high %v178_v11, %v186_v12  ;;  %v194_v19 = vld [vmem:[%s12941_s1 + $0x508] sm:$0xff]  ;;  %v7884_v22 = vcombine.low %v178_v11, %v186_v12  ;;  %v7899_v23 = vcombine.high %v193_v17, %v201_v18  ;;  %v209_v25 = vld [vmem:[%s12941_s1 + $0x580] sm:$0xff] }
  0x18   :  { %v202_v20 = vld [vmem:[%s12941_s1 + $0x548] sm:$0xff]  ;;  %v217_v26 = vld [vmem:[%s12941_s1 + $0x5c0] sm:$0xff]  ;;  %v7898_v29 = vcombine.low %v193_v17, %v201_v18  ;;  %v24_v17 = vld [vmem:[%s12940_s0 + $0x18] sm:$0xff] }
  0x19   :  { %v7901_v24 = vcombine.high %v194_v19, %v202_v20  ;;  %v210_v27 = vld [vmem:[%s12941_s1 + $0x588] sm:$0xff]  ;;  %v7900_v30 = vcombine.low %v194_v19, %v202_v20  ;;  %v7915_v31 = vcombine.high %v209_v25, %v217_v26  ;;  %v225_v33 = vld [vmem:[%s12941_s1 + $0x600] sm:$0xff]  ;;  %v7914_v37 = vcombine.low %v209_v25, %v217_v26  ;;  %v28_v18 = vld [vmem:[%s12940_s0 + $0x38] sm:$0xff] }
  0x1a   :  { %3116 = vmatpush1.bf16.msra.mxu0 %v7818_v50  ;;  %3202 = vmatpush1.bf16.msra.mxu1 %v7820_v51  ;;  %v218_v28 = vld [vmem:[%s12941_s1 + $0x5c8] sm:$0xff]  ;;  %v233_v34 = vld [vmem:[%s12941_s1 + $0x640] sm:$0xff]  ;;  %v9944_v25 = vpack.c.bf16 %v28_v18, %v24_v17 }
  0x1b   :  { %3117 = vmatprep.subr.bf16.mxu0 %v7835_v52  ;;  %3203 = vmatprep.subr.bf16.mxu1 %v7837_v55  ;;  %v7917_v32 = vcombine.high %v210_v27, %v218_v28  ;;  %v226_v35 = vld [vmem:[%s12941_s1 + $0x608] sm:$0xff]  ;;  %v7916_v38 = vcombine.low %v210_v27, %v218_v28  ;;  %v7931_v39 = vcombine.high %v225_v33, %v233_v34  ;;  %v241_v41 = vld [vmem:[%s12941_s1 + $0x680] sm:$0xff] }
  0x1c   :  { %v234_v36 = vld [vmem:[%s12941_s1 + $0x648] sm:$0xff]  ;;  %v249_v42 = vld [vmem:[%s12941_s1 + $0x6c0] sm:$0xff]  ;;  %v7930_v45 = vcombine.low %v225_v33, %v233_v34 }
  0x1d   :  { %v7933_v40 = vcombine.high %v226_v35, %v234_v36  ;;  %v242_v43 = vld [vmem:[%s12941_s1 + $0x688] sm:$0xff]  ;;  %v7932_v46 = vcombine.low %v226_v35, %v234_v36  ;;  %v7947_v47 = vcombine.high %v241_v41, %v249_v42  ;;  %v257_v49 = vld [vmem:[%s12941_s1 + $0x700] sm:$0xff]  ;;  %v7946_v53 = vcombine.low %v241_v41, %v249_v42 }
  0x1e   :  { %3118 = vmatpush1.bf16.msra.mxu0 %v7834_v61  ;;  %3204 = vmatpush1.bf16.msra.mxu1 %v7836_v62  ;;  %v250_v44 = vld [vmem:[%s12941_s1 + $0x6c8] sm:$0xff]  ;;  %v265_v50 = vld [vmem:[%s12941_s1 + $0x740] sm:$0xff] }
  0x1f   :  { %3119 = vmatprep.subr.bf16.mxu0 %v7851_v63  ;;  %3205 = vmatprep.subr.bf16.mxu1 %v7853_v0  ;;  %v7949_v48 = vcombine.high %v242_v43, %v250_v44  ;;  %v258_v51 = vld [vmem:[%s12941_s1 + $0x708] sm:$0xff]  ;;  %v7948_v54 = vcombine.low %v242_v43, %v250_v44  ;;  %v7963_v55 = vcombine.high %v257_v49, %v265_v50  ;;  %v273_v57 = vld [vmem:[%s12941_s1 + $0x780] sm:$0xff] }
  0x20   :  { %v266_v52 = vld [vmem:[%s12941_s1 + $0x748] sm:$0xff]  ;;  %v281_v59 = vld [vmem:[%s12941_s1 + $0x7c0] sm:$0xff]  ;;  %v7962_v62 = vcombine.low %v257_v49, %v265_v50 }
  0x21   :  { %v7965_v56 = vcombine.high %v258_v51, %v266_v52  ;;  %v274_v60 = vld [vmem:[%s12941_s1 + $0x788] sm:$0xff]  ;;  %v7964_v63 = vcombine.low %v258_v51, %v266_v52  ;;  %v7979_v0 = vcombine.high %v273_v57, %v281_v59  ;;  %v289_v2 = vld [vmem:[%s12941_s1 + $0x800] sm:$0xff] }
  0x22   :  { %3120 = vmatpush1.bf16.msra.mxu0 %v7850_v5  ;;  %3206 = vmatpush1.bf16.msra.mxu1 %v7852_v6  ;;  %v282_v61 = vld [vmem:[%s12941_s1 + $0x7c8] sm:$0xff]  ;;  %v297_v3 = vld [vmem:[%s12941_s1 + $0x840] sm:$0xff]  ;;  %v7978_v6 = vcombine.low %v273_v57, %v281_v59 }
  0x23   :  { %3121 = vmatprep.subr.bf16.mxu0 %v7867_v7  ;;  %3207 = vmatprep.subr.bf16.mxu1 %v7869_v8  ;;  %v7981_v1 = vcombine.high %v274_v60, %v282_v61  ;;  %v290_v4 = vld [vmem:[%s12941_s1 + $0x808] sm:$0xff]  ;;  %v21_v7 = vld [vmem:[%s12940_s0] sm:$0xff]  ;;  %v7980_v9 = vcombine.low %v274_v60, %v282_v61  ;;  %v7995_v10 = vcombine.high %v289_v2, %v297_v3 }
  0x24   :  { %v298_v5 = vld [vmem:[%s12941_s1 + $0x848] sm:$0xff]  ;;  %v25_v8 = vld [vmem:[%s12940_s0 + $0x20] sm:$0xff]  ;;  %v7994_v19 = vcombine.low %v289_v2, %v297_v3 }
  0x25   :  { %v7997_v11 = vcombine.high %v290_v4, %v298_v5  ;;  %v305_v12 = vld [vmem:[%s12941_s1 + $0x880] sm:$0xff]  ;;  %v7996_v20 = vcombine.low %v290_v4, %v298_v5  ;;  %v322_v26 = vld [vmem:[%s12941_s1 + $0x908] sm:$0xff] }
  0x26   :  { %3122 = vmatpush1.bf16.msra.mxu0 %v7866_v13  ;;  %3208 = vmatpush1.bf16.msra.mxu1 %v7868_v14  ;;  %v313_v13 = vld [vmem:[%s12941_s1 + $0x8c0] sm:$0xff]  ;;  %v306_v14 = vld [vmem:[%s12941_s1 + $0x888] sm:$0xff] }
  0x27   :  { %3123 = vmatprep.subr.bf16.mxu0 %v7883_v15  ;;  %3209 = vmatprep.subr.bf16.mxu1 %v7885_v16  ;;  %v9927_v15 = vpack.c.bf16 %v25_v8, %v21_v7  ;;  %v314_v16 = vld [vmem:[%s12941_s1 + $0x8c8] sm:$0xff]  ;;  %v8010_v28 = vcombine.low %v305_v12, %v313_v13  ;;  %v417_v8 = vld [vmem:[%s12941_s1 + $0xc00] sm:$0xff] }
  0x28   :  { %v330_v27 = vld [vmem:[%s12941_s1 + $0x948] sm:$0xff]  ;;  %v433_v17 = vld [vmem:[%s12941_s1 + $0xc80] sm:$0xff] }
  0x29   :  { %v338_v33 = vld [vmem:[%s12941_s1 + $0x988] sm:$0xff]  ;;  %v8029_v34 = vcombine.high %v322_v26, %v330_v27  ;;  %v441_v18 = vld [vmem:[%s12941_s1 + $0xcc0] sm:$0xff] }
  0x2a   :  { %3124 = vmatpush1.bf16.msra.mxu0 %v7882_v21  ;;  %3210 = vmatpush1.bf16.msra.mxu1 %v7884_v22  ;;  %v8011_v21 = vcombine.high %v305_v12, %v313_v13  ;;  %v8013_v22 = vcombine.high %v306_v14, %v314_v16  ;;  %v346_v35 = vld [vmem:[%s12941_s1 + $0x9c8] sm:$0xff] }
  0x2b   :  { %3125 = vmatprep.subr.bf16.mxu0 %v7899_v23  ;;  %3211 = vmatprep.subr.bf16.mxu1 %v7901_v24  ;;  %v321_v23 = vld [vmem:[%s12941_s1 + $0x900] sm:$0xff]  ;;  %v354_v41 = vld [vmem:[%s12941_s1 + $0xa08] sm:$0xff]  ;;  %v8045_v42 = vcombine.high %v338_v33, %v346_v35 }
  0x2c   :  { %v329_v24 = vld [vmem:[%s12941_s1 + $0x940] sm:$0xff]  ;;  %v362_v43 = vld [vmem:[%s12941_s1 + $0xa48] sm:$0xff] }
  0x2d   :  { %v8026_v36 = vcombine.low %v321_v23, %v329_v24  ;;  %v370_v49 = vld [vmem:[%s12941_s1 + $0xa88] sm:$0xff]  ;;  %v8061_v50 = vcombine.high %v354_v41, %v362_v43 }
  0x2e   :  { %3126 = vmatpush1.bf16.msra.mxu0 %v7898_v29  ;;  %3212 = vmatpush1.bf16.msra.mxu1 %v7900_v30  ;;  %v8012_v29 = vcombine.low %v306_v14, %v314_v16  ;;  %v8027_v30 = vcombine.high %v321_v23, %v329_v24  ;;  %v378_v51 = vld [vmem:[%s12941_s1 + $0xac8] sm:$0xff]  ;;  %v8139_v24 = vcombine.high %v433_v17, %v441_v18 }
  0x2f   :  { %3127 = vmatprep.subr.bf16.mxu0 %v7915_v31  ;;  %3213 = vmatprep.subr.bf16.mxu1 %v7917_v32  ;;  %v337_v31 = vld [vmem:[%s12941_s1 + $0x980] sm:$0xff]  ;;  %v386_v57 = vld [vmem:[%s12941_s1 + $0xb08] sm:$0xff]  ;;  %v8077_v59 = vcombine.high %v370_v49, %v378_v51 }
  0x30   :  { %v345_v32 = vld [vmem:[%s12941_s1 + $0x9c0] sm:$0xff]  ;;  %v394_v60 = vld [vmem:[%s12941_s1 + $0xb48] sm:$0xff] }
  0x31   :  { %v8042_v44 = vcombine.low %v337_v31, %v345_v32  ;;  %v402_v2 = vld [vmem:[%s12941_s1 + $0xb88] sm:$0xff]  ;;  %v8093_v3 = vcombine.high %v386_v57, %v394_v60 }
  0x32   :  { %3128 = vmatpush1.bf16.msra.mxu0 %v7914_v37  ;;  %3214 = vmatpush1.bf16.msra.mxu1 %v7916_v38  ;;  %v8028_v37 = vcombine.low %v322_v26, %v330_v27  ;;  %v8043_v38 = vcombine.high %v337_v31, %v345_v32  ;;  %v410_v4 = vld [vmem:[%s12941_s1 + $0xbc8] sm:$0xff]  ;;  %v449_v26 = vld [vmem:[%s12941_s1 + $0xd00] sm:$0xff]  ;;  %v8138_v31 = vcombine.low %v433_v17, %v441_v18  ;;  %v27_v17 = vld [vmem:[%s12940_s0 + $0x30] sm:$0xff] }
  0x33   :  { %3129 = vmatprep.subr.bf16.mxu0 %v7931_v39  ;;  %3215 = vmatprep.subr.bf16.mxu1 %v7933_v40  ;;  %v353_v39 = vld [vmem:[%s12941_s1 + $0xa00] sm:$0xff]  ;;  %v426_v12 = vld [vmem:[%s12941_s1 + $0xc48] sm:$0xff]  ;;  %v8108_v14 = vcombine.low %v402_v2, %v410_v4  ;;  %v44_v18 = vld [vmem:[%s12941_s1 + $0x58] sm:$0xff] }
  0x34   :  { %v361_v40 = vld [vmem:[%s12941_s1 + $0xa40] sm:$0xff] }
  0x35   :  { %v8058_v52 = vcombine.low %v353_v39, %v361_v40  ;;  %v457_v27 = vld [vmem:[%s12941_s1 + $0xd40] sm:$0xff] }
  0x36   :  { %3130 = vmatpush1.bf16.msra.mxu0 %v7930_v45  ;;  %3216 = vmatpush1.bf16.msra.mxu1 %v7932_v46  ;;  %v8044_v45 = vcombine.low %v338_v33, %v346_v35  ;;  %v8059_v46 = vcombine.high %v353_v39, %v361_v40  ;;  %v8155_v33 = vcombine.high %v449_v26, %v457_v27  ;;  %v473_v35 = vld [vmem:[%s12941_s1 + $0xdc0] sm:$0xff] }
  0x37   :  { %3131 = vmatprep.subr.bf16.mxu0 %v7947_v47  ;;  %3217 = vmatprep.subr.bf16.mxu1 %v7949_v48  ;;  %v369_v47 = vld [vmem:[%s12941_s1 + $0xa80] sm:$0xff]  ;;  %v8154_v39 = vcombine.low %v449_v26, %v457_v27  ;;  %v60_v27 = vld [vmem:[%s12941_s1 + $0xd8] sm:$0xff] }
  0x38   :  { %v377_v48 = vld [vmem:[%s12941_s1 + $0xac0] sm:$0xff] }
  0x39   :  { %v8074_v61 = vcombine.low %v369_v47, %v377_v48 }
  0x3a   :  { %3132 = vmatpush1.bf16.msra.mxu0 %v7946_v53  ;;  %3218 = vmatpush1.bf16.msra.mxu1 %v7948_v54  ;;  %v8060_v53 = vcombine.low %v354_v41, %v362_v43  ;;  %v8075_v54 = vcombine.high %v369_v47, %v377_v48  ;;  %v489_v43 = vld [vmem:[%s12941_s1 + $0xe40] sm:$0xff] }
  0x3b   :  { %3133 = vmatprep.subr.bf16.mxu0 %v7963_v55  ;;  %3219 = vmatprep.subr.bf16.mxu1 %v7965_v56  ;;  %v385_v55 = vld [vmem:[%s12941_s1 + $0xb00] sm:$0xff] }
  0x3c   :  { %v393_v56 = vld [vmem:[%s12941_s1 + $0xb40] sm:$0xff] }
  0x3d   :  { %v8090_v5 = vcombine.low %v385_v55, %v393_v56 }
  0x3e   :  { %3134 = vmatpush1.bf16.msra.mxu0 %v7962_v62  ;;  %3220 = vmatpush1.bf16.msra.mxu1 %v7964_v63  ;;  %v8076_v62 = vcombine.low %v370_v49, %v378_v51  ;;  %v8091_v63 = vcombine.high %v385_v55, %v393_v56  ;;  %v505_v51 = vld [vmem:[%s12941_s1 + $0xec0] sm:$0xff] }
  0x3f   :  { %3135 = vmatprep.subr.bf16.mxu0 %v7979_v0  ;;  %3221 = vmatprep.subr.bf16.mxu1 %v7981_v1  ;;  %v401_v0 = vld [vmem:[%s12941_s1 + $0xb80] sm:$0xff] }
  0x40   :  { %v409_v1 = vld [vmem:[%s12941_s1 + $0xbc0] sm:$0xff] }
  0x41   :  { %v8107_v7 = vcombine.high %v401_v0, %v409_v1  ;;  %v8106_v13 = vcombine.low %v401_v0, %v409_v1 }
  0x42   :  { %3136 = vmatpush1.bf16.msra.mxu0 %v7978_v6  ;;  %3222 = vmatpush1.bf16.msra.mxu1 %v7980_v9  ;;  %v8092_v6 = vcombine.low %v386_v57, %v394_v60  ;;  %v425_v9 = vld [vmem:[%s12941_s1 + $0xc40] sm:$0xff] }
  0x43   :  { %3148 = vmatprep.subr.bf16.mxu0 %v7995_v10  ;;  %3234 = vmatprep.subr.bf16.mxu1 %v7997_v11  ;;  %v418_v10 = vld [vmem:[%s12941_s1 + $0xc08] sm:$0xff]  ;;  %v8109_v11 = vcombine.high %v402_v2, %v410_v4  ;;  %v8123_v16 = vcombine.high %v417_v8, %v425_v9  ;;  %v521_v60 = vld [vmem:[%s12941_s1 + $0xf40] sm:$0xff] }
  0x44   :  { %v8124_v23 = vcombine.low %v418_v10, %v426_v12  ;;  %v537_v4 = vld [vmem:[%s12941_s1 + $0xfc0] sm:$0xff] }
  0x45   :  { %3138 = vmatmul.mubr.bf16.vlgmr.msra.gmra.mrb[0].mxu0 %v9927_v15  ;;  %3224 = vmatmul.mubr.bf16.vlgmr.msra.gmra.mrb[0].mxu1 %v9927_v15 }
  0x46   :  { %3149 = vmatpush1.bf16.msra.mxu0 %v7994_v19  ;;  %3235 = vmatpush1.bf16.msra.mxu1 %v7996_v20  ;;  %v434_v19 = vld [vmem:[%s12941_s1 + $0xc88] sm:$0xff]  ;;  %v8125_v20 = vcombine.high %v418_v10, %v426_v12  ;;  %v43_v12 = vld [vmem:[%s12941_s1 + $0x50] sm:$0xff] }
  0x47   :  { %3150 = vmatprep.subr.bf16.mxu0 %v8011_v21  ;;  %3236 = vmatprep.subr.bf16.mxu1 %v8013_v22  ;;  %v442_v21 = vld [vmem:[%s12941_s1 + $0xcc8] sm:$0xff]  ;;  %v8122_v22 = vcombine.low %v417_v8, %v425_v9 }
  0x48   :  { %3180 = vmatprep.mubr.bf16.mxu0 %v9944_v25  ;;  %3266 = vmatprep.mubr.bf16.mxu1 %v9944_v25  ;;  %v8140_v32 = vcombine.low %v434_v19, %v442_v21 }
  0x4a   :  { %3151 = vmatpush1.bf16.msra.mxu0 %v8010_v28  ;;  %3237 = vmatpush1.bf16.msra.mxu1 %v8012_v29  ;;  %v450_v28 = vld [vmem:[%s12941_s1 + $0xd08] sm:$0xff]  ;;  %v8141_v29 = vcombine.high %v434_v19, %v442_v21 }
  0x4b   :  { %3152 = vmatprep.subr.bf16.mxu0 %v8027_v30  ;;  %3238 = vmatprep.subr.bf16.mxu1 %v8029_v34  ;;  %v458_v30 = vld [vmem:[%s12941_s1 + $0xd48] sm:$0xff]  ;;  %v465_v34 = vld [vmem:[%s12941_s1 + $0xd80] sm:$0xff] }
  0x4c   :  { %v8156_v40 = vcombine.low %v450_v28, %v458_v30  ;;  %v8171_v41 = vcombine.high %v465_v34, %v473_v35  ;;  %v8170_v47 = vcombine.low %v465_v34, %v473_v35  ;;  %v68_v34 = vld [vmem:[%s12941_s1 + $0x118] sm:$0xff] }
  0x4e   :  { %3153 = vmatpush1.bf16.msra.mxu0 %v8026_v36  ;;  %3239 = vmatpush1.bf16.msra.mxu1 %v8028_v37  ;;  %v466_v36 = vld [vmem:[%s12941_s1 + $0xd88] sm:$0xff]  ;;  %v8157_v37 = vcombine.high %v450_v28, %v458_v30 }
  0x4f   :  { %3154 = vmatprep.subr.bf16.mxu0 %v8043_v38  ;;  %3240 = vmatprep.subr.bf16.mxu1 %v8045_v42  ;;  %v474_v38 = vld [vmem:[%s12941_s1 + $0xdc8] sm:$0xff]  ;;  %v481_v42 = vld [vmem:[%s12941_s1 + $0xe00] sm:$0xff] }
  0x50   :  { %v8172_v48 = vcombine.low %v466_v36, %v474_v38  ;;  %v8187_v49 = vcombine.high %v481_v42, %v489_v43  ;;  %v8186_v55 = vcombine.low %v481_v42, %v489_v43  ;;  %v84_v42 = vld [vmem:[%s12941_s1 + $0x198] sm:$0xff] }
  0x52   :  { %3155 = vmatpush1.bf16.msra.mxu0 %v8042_v44  ;;  %3241 = vmatpush1.bf16.msra.mxu1 %v8044_v45  ;;  %v482_v44 = vld [vmem:[%s12941_s1 + $0xe08] sm:$0xff]  ;;  %v8173_v45 = vcombine.high %v466_v36, %v474_v38  ;;  %v76_v36 = vld [vmem:[%s12941_s1 + $0x158] sm:$0xff] }
  0x53   :  { %3156 = vmatprep.subr.bf16.mxu0 %v8059_v46  ;;  %3242 = vmatprep.subr.bf16.mxu1 %v8061_v50  ;;  %v490_v46 = vld [vmem:[%s12941_s1 + $0xe48] sm:$0xff]  ;;  %v497_v50 = vld [vmem:[%s12941_s1 + $0xe80] sm:$0xff]  ;;  %v7777_v43 = vcombine.high %v68_v34, %v76_v36 }
  0x54   :  { %v8188_v56 = vcombine.low %v482_v44, %v490_v46  ;;  %v8203_v57 = vcombine.high %v497_v50, %v505_v51  ;;  %v8202_v0 = vcombine.low %v497_v50, %v505_v51  ;;  %v100_v50 = vld [vmem:[%s12941_s1 + $0x218] sm:$0xff] }
  0x56   :  { %3157 = vmatpush1.bf16.msra.mxu0 %v8058_v52  ;;  %3243 = vmatpush1.bf16.msra.mxu1 %v8060_v53  ;;  %v498_v52 = vld [vmem:[%s12941_s1 + $0xe88] sm:$0xff]  ;;  %v8189_v53 = vcombine.high %v482_v44, %v490_v46  ;;  %v92_v44 = vld [vmem:[%s12941_s1 + $0x1d8] sm:$0xff]  ;;  %v7776_v46 = vcombine.low %v68_v34, %v76_v36  ;;  %v195_v36 = vld [vmem:[%s12941_s1 + $0x510] sm:$0xff] }
  0x57   :  { %3158 = vmatprep.subr.bf16.mxu0 %v8075_v54  ;;  %3244 = vmatprep.subr.bf16.mxu1 %v8077_v59  ;;  %v506_v54 = vld [vmem:[%s12941_s1 + $0xec8] sm:$0xff]  ;;  %v513_v59 = vld [vmem:[%s12941_s1 + $0xf00] sm:$0xff]  ;;  %v7793_v51 = vcombine.high %v84_v42, %v92_v44 }
  0x58   :  { %v8204_v1 = vcombine.low %v498_v52, %v506_v54  ;;  %v8219_v2 = vcombine.high %v513_v59, %v521_v60  ;;  %v8218_v8 = vcombine.low %v513_v59, %v521_v60  ;;  %v116_v59 = vld [vmem:[%s12941_s1 + $0x298] sm:$0xff] }
  0x5a   :  { %3159 = vmatpush1.bf16.msra.mxu0 %v8074_v61  ;;  %3245 = vmatpush1.bf16.msra.mxu1 %v8076_v62  ;;  %v514_v61 = vld [vmem:[%s12941_s1 + $0xf08] sm:$0xff]  ;;  %v8205_v62 = vcombine.high %v498_v52, %v506_v54  ;;  %v108_v52 = vld [vmem:[%s12941_s1 + $0x258] sm:$0xff]  ;;  %v7792_v54 = vcombine.low %v84_v42, %v92_v44  ;;  %v211_v44 = vld [vmem:[%s12941_s1 + $0x590] sm:$0xff] }
  0x5b   :  { %3160 = vmatprep.subr.bf16.mxu0 %v8091_v63  ;;  %3246 = vmatprep.subr.bf16.mxu1 %v8093_v3  ;;  %v522_v63 = vld [vmem:[%s12941_s1 + $0xf48] sm:$0xff]  ;;  %v529_v3 = vld [vmem:[%s12941_s1 + $0xf80] sm:$0xff]  ;;  %v7809_v60 = vcombine.high %v100_v50, %v108_v52 }
  0x5c   :  { %v8220_v9 = vcombine.low %v514_v61, %v522_v63  ;;  %v8235_v10 = vcombine.high %v529_v3, %v537_v4  ;;  %v8234_v19 = vcombine.low %v529_v3, %v537_v4  ;;  %v132_v3 = vld [vmem:[%s12941_s1 + $0x318] sm:$0xff] }
  0x5e   :  { %3161 = vmatpush1.bf16.msra.mxu0 %v8090_v5  ;;  %3247 = vmatpush1.bf16.msra.mxu1 %v8092_v6  ;;  %v530_v5 = vld [vmem:[%s12941_s1 + $0xf88] sm:$0xff]  ;;  %v8221_v6 = vcombine.high %v514_v61, %v522_v63  ;;  %v124_v61 = vld [vmem:[%s12941_s1 + $0x2d8] sm:$0xff]  ;;  %v7808_v63 = vcombine.low %v100_v50, %v108_v52  ;;  %v227_v52 = vld [vmem:[%s12941_s1 + $0x610] sm:$0xff] }
  0x5f   :  { %3162 = vmatprep.subr.bf16.mxu0 %v8107_v7  ;;  %3248 = vmatprep.subr.bf16.mxu1 %v8109_v11  ;;  %v538_v7 = vld [vmem:[%s12941_s1 + $0xfc8] sm:$0xff]  ;;  %v35_v11 = vld [vmem:[%s12941_s1 + $0x10] sm:$0xff]  ;;  %v7825_v4 = vcombine.high %v116_v59, %v124_v61 }
  0x60   :  { %v7743_v21 = vcombine.high %v35_v11, %v43_v12 }
  0x62   :  { %3163 = vmatpush1.bf16.msra.mxu0 %v8106_v13  ;;  %3249 = vmatpush1.bf16.msra.mxu1 %v8108_v14  ;;  %v36_v13 = vld [vmem:[%s12941_s1 + $0x18] sm:$0xff]  ;;  %v8237_v14 = vcombine.high %v530_v5, %v538_v7 }
  0x63   :  { %3164 = vmatprep.subr.bf16.mxu0 %v8123_v16  ;;  %3250 = vmatprep.subr.bf16.mxu1 %v8125_v20  ;;  %v23_v16 = vld [vmem:[%s12940_s0 + $0x10] sm:$0xff]  ;;  %v8236_v20 = vcombine.low %v530_v5, %v538_v7  ;;  %v7745_v26 = vcombine.high %v36_v13, %v44_v18  ;;  %v7744_v30 = vcombine.low %v36_v13, %v44_v18  ;;  %v140_v5 = vld [vmem:[%s12941_s1 + $0x358] sm:$0xff] }
  0x64   :  { %v10142_v28 = vpack.c.bf16 %v27_v17, %v23_v16  ;;  %v7824_v7 = vcombine.low %v116_v59, %v124_v61  ;;  %v156_v13 = vld [vmem:[%s12941_s1 + $0x3d8] sm:$0xff]  ;;  %v7840_v16 = vcombine.low %v132_v3, %v140_v5  ;;  %v163_v18 = vld [vmem:[%s12941_s1 + $0x410] sm:$0xff] }
  0x65   :  { %v243_v61 = vld [vmem:[%s12941_s1 + $0x690] sm:$0xff] }
  0x66   :  { %3165 = vmatpush1.bf16.msra.mxu0 %v8122_v22  ;;  %3251 = vmatpush1.bf16.msra.mxu1 %v8124_v23  ;;  %v51_v22 = vld [vmem:[%s12941_s1 + $0x90] sm:$0xff] }
  0x67   :  { %3166 = vmatprep.subr.bf16.mxu0 %v8139_v24  ;;  %3252 = vmatprep.subr.bf16.mxu1 %v8141_v29  ;;  %v59_v23 = vld [vmem:[%s12941_s1 + $0xd0] sm:$0xff]  ;;  %v52_v24 = vld [vmem:[%s12941_s1 + $0x98] sm:$0xff]  ;;  %v7742_v29 = vcombine.low %v35_v11, %v43_v12  ;;  %v7841_v12 = vcombine.high %v132_v3, %v140_v5 }
  0x68   :  { %v7761_v35 = vcombine.high %v52_v24, %v60_v27  ;;  %v7760_v38 = vcombine.low %v52_v24, %v60_v27  ;;  %v148_v11 = vld [vmem:[%s12941_s1 + $0x398] sm:$0xff]  ;;  %v179_v27 = vld [vmem:[%s12941_s1 + $0x490] sm:$0xff] }
  0x69   :  { %v7856_v24 = vcombine.low %v148_v11, %v156_v13  ;;  %v259_v5 = vld [vmem:[%s12941_s1 + $0x710] sm:$0xff] }
  0x6a   :  { %3167 = vmatpush1.bf16.msra.mxu0 %v8138_v31  ;;  %3253 = vmatpush1.bf16.msra.mxu1 %v8140_v32  ;;  %v7759_v31 = vcombine.high %v51_v22, %v59_v23  ;;  %v67_v32 = vld [vmem:[%s12941_s1 + $0x110] sm:$0xff] }
  0x6b   :  { %3168 = vmatprep.subr.bf16.mxu0 %v8155_v33  ;;  %3254 = vmatprep.subr.bf16.mxu1 %v8157_v37  ;;  %v75_v33 = vld [vmem:[%s12941_s1 + $0x150] sm:$0xff]  ;;  %v7758_v37 = vcombine.low %v51_v22, %v59_v23  ;;  %v172_v22 = vld [vmem:[%s12941_s1 + $0x458] sm:$0xff] }
  0x6e   :  { %3169 = vmatpush1.bf16.msra.mxu0 %v8154_v39  ;;  %3255 = vmatpush1.bf16.msra.mxu1 %v8156_v40  ;;  %v7775_v39 = vcombine.high %v67_v32, %v75_v33  ;;  %v83_v40 = vld [vmem:[%s12941_s1 + $0x190] sm:$0xff] }
  0x6f   :  { %3170 = vmatprep.subr.bf16.mxu0 %v8171_v41  ;;  %3256 = vmatprep.subr.bf16.mxu1 %v8173_v45  ;;  %v91_v41 = vld [vmem:[%s12941_s1 + $0x1d0] sm:$0xff]  ;;  %v7774_v45 = vcombine.low %v67_v32, %v75_v33  ;;  %v188_v32 = vld [vmem:[%s12941_s1 + $0x4d8] sm:$0xff] }
  0x72   :  { %3171 = vmatpush1.bf16.msra.mxu0 %v8170_v47  ;;  %3257 = vmatpush1.bf16.msra.mxu1 %v8172_v48  ;;  %v7791_v47 = vcombine.high %v83_v40, %v91_v41  ;;  %v99_v48 = vld [vmem:[%s12941_s1 + $0x210] sm:$0xff] }
  0x73   :  { %3172 = vmatprep.subr.bf16.mxu0 %v8187_v49  ;;  %3258 = vmatprep.subr.bf16.mxu1 %v8189_v53  ;;  %v107_v49 = vld [vmem:[%s12941_s1 + $0x250] sm:$0xff]  ;;  %v7790_v53 = vcombine.low %v83_v40, %v91_v41  ;;  %v204_v40 = vld [vmem:[%s12941_s1 + $0x558] sm:$0xff] }
  0x76   :  { %3173 = vmatpush1.bf16.msra.mxu0 %v8186_v55  ;;  %3259 = vmatpush1.bf16.msra.mxu1 %v8188_v56  ;;  %v7807_v55 = vcombine.high %v99_v48, %v107_v49  ;;  %v115_v56 = vld [vmem:[%s12941_s1 + $0x290] sm:$0xff] }
  0x77   :  { %3174 = vmatprep.subr.bf16.mxu0 %v8203_v57  ;;  %3260 = vmatprep.subr.bf16.mxu1 %v8205_v62  ;;  %v123_v57 = vld [vmem:[%s12941_s1 + $0x2d0] sm:$0xff]  ;;  %v7806_v62 = vcombine.low %v99_v48, %v107_v49  ;;  %v220_v48 = vld [vmem:[%s12941_s1 + $0x5d8] sm:$0xff] }
  0x7a   :  { %3175 = vmatpush1.bf16.msra.mxu0 %v8202_v0  ;;  %3261 = vmatpush1.bf16.msra.mxu1 %v8204_v1  ;;  %v7823_v0 = vcombine.high %v115_v56, %v123_v57  ;;  %v131_v1 = vld [vmem:[%s12941_s1 + $0x310] sm:$0xff] }
  0x7b   :  { %3176 = vmatprep.subr.bf16.mxu0 %v8219_v2  ;;  %3262 = vmatprep.subr.bf16.mxu1 %v8221_v6  ;;  %v139_v2 = vld [vmem:[%s12941_s1 + $0x350] sm:$0xff]  ;;  %v7822_v6 = vcombine.low %v115_v56, %v123_v57  ;;  %v236_v56 = vld [vmem:[%s12941_s1 + $0x658] sm:$0xff] }
  0x7e   :  { %3177 = vmatpush1.bf16.msra.mxu0 %v8218_v8  ;;  %3263 = vmatpush1.bf16.msra.mxu1 %v8220_v9  ;;  %v7839_v8 = vcombine.high %v131_v1, %v139_v2  ;;  %v147_v9 = vld [vmem:[%s12941_s1 + $0x390] sm:$0xff] }
  0x7f   :  { %3178 = vmatprep.subr.bf16.mxu0 %v8235_v10  ;;  %3264 = vmatprep.subr.bf16.mxu1 %v8237_v14  ;;  %v155_v10 = vld [vmem:[%s12941_s1 + $0x3d0] sm:$0xff]  ;;  %v7838_v14 = vcombine.low %v131_v1, %v139_v2  ;;  %v252_v1 = vld [vmem:[%s12941_s1 + $0x6d8] sm:$0xff] }
  0x80   :  { %v7855_v17 = vcombine.high %v147_v9, %v155_v10  ;;  %v7854_v23 = vcombine.low %v147_v9, %v155_v10  ;;  %v268_v9 = vld [vmem:[%s12941_s1 + $0x758] sm:$0xff] }
  0x82   :  { %3179 = vmatpush1.bf16.msra.mxu0 %v8234_v19  ;;  %3265 = vmatpush1.bf16.msra.mxu1 %v8236_v20  ;;  %v171_v19 = vld [vmem:[%s12941_s1 + $0x450] sm:$0xff]  ;;  %v164_v20 = vld [vmem:[%s12941_s1 + $0x418] sm:$0xff] }
  0x83   :  { %3277 = vmatprep.subr.bf16.mxu0 %v7743_v21  ;;  %3363 = vmatprep.subr.bf16.mxu1 %v7745_v26  ;;  %v7857_v21 = vcombine.high %v148_v11, %v156_v13  ;;  %v7871_v26 = vcombine.high %v163_v18, %v171_v19  ;;  %v7870_v33 = vcombine.low %v163_v18, %v171_v19  ;;  %v275_v13 = vld [vmem:[%s12941_s1 + $0x790] sm:$0xff]  ;;  %v284_v18 = vld [vmem:[%s12941_s1 + $0x7d8] sm:$0xff] }
  0x84   :  { %v7872_v34 = vcombine.low %v164_v20, %v172_v22 }
  0x85   :  { %3181 = vmatmul.mubr.bf16.vlgmr.msra.gmra.mrb[0].mxu0 %v10142_v28  ;;  %3267 = vmatmul.mubr.bf16.vlgmr.msra.gmra.mrb[0].mxu1 %v10142_v28 }
  0x86   :  { %3278 = vmatpush1.bf16.msra.mxu0 %v7742_v29  ;;  %3364 = vmatpush1.bf16.msra.mxu1 %v7744_v30  ;;  %v187_v29 = vld [vmem:[%s12941_s1 + $0x4d0] sm:$0xff]  ;;  %v180_v30 = vld [vmem:[%s12941_s1 + $0x498] sm:$0xff] }
  0x87   :  { %3279 = vmatprep.subr.bf16.mxu0 %v7759_v31  ;;  %3365 = vmatprep.subr.bf16.mxu1 %v7761_v35  ;;  %v7873_v31 = vcombine.high %v164_v20, %v172_v22  ;;  %v7887_v35 = vcombine.high %v179_v27, %v187_v29  ;;  %v7886_v41 = vcombine.low %v179_v27, %v187_v29  ;;  %v291_v22 = vld [vmem:[%s12941_s1 + $0x810] sm:$0xff]  ;;  %v300_v27 = vld [vmem:[%s12941_s1 + $0x858] sm:$0xff] }
  0x88   :  { %3309 = vmatprep.mubr.bf16.mxu0 %v9794_v58  ;;  %3395 = vmatprep.mubr.bf16.mxu1 %v9794_v58  ;;  %v7888_v42 = vcombine.low %v180_v30, %v188_v32 }
  0x8a   :  { %3280 = vmatpush1.bf16.msra.mxu0 %v7758_v37  ;;  %3366 = vmatpush1.bf16.msra.mxu1 %v7760_v38  ;;  %v203_v37 = vld [vmem:[%s12941_s1 + $0x550] sm:$0xff]  ;;  %v196_v38 = vld [vmem:[%s12941_s1 + $0x518] sm:$0xff] }
  0x8b   :  { %3281 = vmatprep.subr.bf16.mxu0 %v7775_v39  ;;  %3367 = vmatprep.subr.bf16.mxu1 %v7777_v43  ;;  %v7889_v39 = vcombine.high %v180_v30, %v188_v32  ;;  %v7903_v43 = vcombine.high %v195_v36, %v203_v37  ;;  %v7902_v49 = vcombine.low %v195_v36, %v203_v37  ;;  %v307_v32 = vld [vmem:[%s12941_s1 + $0x890] sm:$0xff]  ;;  %v316_v36 = vld [vmem:[%s12941_s1 + $0x8d8] sm:$0xff] }
  0x8c   :  { %v7904_v50 = vcombine.low %v196_v38, %v204_v40 }
  0x8e   :  { %3282 = vmatpush1.bf16.msra.mxu0 %v7774_v45  ;;  %3368 = vmatpush1.bf16.msra.mxu1 %v7776_v46  ;;  %v219_v45 = vld [vmem:[%s12941_s1 + $0x5d0] sm:$0xff]  ;;  %v212_v46 = vld [vmem:[%s12941_s1 + $0x598] sm:$0xff] }
  0x8f   :  { %3283 = vmatprep.subr.bf16.mxu0 %v7791_v47  ;;  %3369 = vmatprep.subr.bf16.mxu1 %v7793_v51  ;;  %v7905_v47 = vcombine.high %v196_v38, %v204_v40  ;;  %v7919_v51 = vcombine.high %v211_v44, %v219_v45  ;;  %v7918_v57 = vcombine.low %v211_v44, %v219_v45  ;;  %v323_v40 = vld [vmem:[%s12941_s1 + $0x910] sm:$0xff]  ;;  %v332_v44 = vld [vmem:[%s12941_s1 + $0x958] sm:$0xff] }
  0x90   :  { %v7920_v59 = vcombine.low %v212_v46, %v220_v48 }
  0x92   :  { %3284 = vmatpush1.bf16.msra.mxu0 %v7790_v53  ;;  %3370 = vmatpush1.bf16.msra.mxu1 %v7792_v54  ;;  %v235_v53 = vld [vmem:[%s12941_s1 + $0x650] sm:$0xff]  ;;  %v228_v54 = vld [vmem:[%s12941_s1 + $0x618] sm:$0xff] }
  0x93   :  { %3285 = vmatprep.subr.bf16.mxu0 %v7807_v55  ;;  %3371 = vmatprep.subr.bf16.mxu1 %v7809_v60  ;;  %v7921_v55 = vcombine.high %v212_v46, %v220_v48  ;;  %v7935_v60 = vcombine.high %v227_v52, %v235_v53  ;;  %v7934_v2 = vcombine.low %v227_v52, %v235_v53  ;;  %v339_v48 = vld [vmem:[%s12941_s1 + $0x990] sm:$0xff]  ;;  %v348_v52 = vld [vmem:[%s12941_s1 + $0x9d8] sm:$0xff] }
  0x94   :  { %v7936_v3 = vcombine.low %v228_v54, %v236_v56 }
  0x96   :  { %3286 = vmatpush1.bf16.msra.mxu0 %v7806_v62  ;;  %3372 = vmatpush1.bf16.msra.mxu1 %v7808_v63  ;;  %v251_v62 = vld [vmem:[%s12941_s1 + $0x6d0] sm:$0xff]  ;;  %v244_v63 = vld [vmem:[%s12941_s1 + $0x698] sm:$0xff] }
  0x97   :  { %3287 = vmatprep.subr.bf16.mxu0 %v7823_v0  ;;  %3373 = vmatprep.subr.bf16.mxu1 %v7825_v4  ;;  %v7937_v0 = vcombine.high %v228_v54, %v236_v56  ;;  %v7951_v4 = vcombine.high %v243_v61, %v251_v62  ;;  %v7950_v10 = vcombine.low %v243_v61, %v251_v62  ;;  %v355_v56 = vld [vmem:[%s12941_s1 + $0xa10] sm:$0xff]  ;;  %v364_v61 = vld [vmem:[%s12941_s1 + $0xa58] sm:$0xff] }
  0x98   :  { %v7952_v11 = vcombine.low %v244_v63, %v252_v1 }
  0x9a   :  { %3288 = vmatpush1.bf16.msra.mxu0 %v7822_v6  ;;  %3374 = vmatpush1.bf16.msra.mxu1 %v7824_v7  ;;  %v267_v6 = vld [vmem:[%s12941_s1 + $0x750] sm:$0xff]  ;;  %v260_v7 = vld [vmem:[%s12941_s1 + $0x718] sm:$0xff] }
  0x9b   :  { %3289 = vmatprep.subr.bf16.mxu0 %v7839_v8  ;;  %3375 = vmatprep.subr.bf16.mxu1 %v7841_v12  ;;  %v7953_v8 = vcombine.high %v244_v63, %v252_v1  ;;  %v7967_v12 = vcombine.high %v259_v5, %v267_v6  ;;  %v7966_v19 = vcombine.low %v259_v5, %v267_v6  ;;  %v371_v1 = vld [vmem:[%s12941_s1 + $0xa90] sm:$0xff]  ;;  %v380_v5 = vld [vmem:[%s12941_s1 + $0xad8] sm:$0xff] }
  0x9c   :  { %v7968_v20 = vcombine.low %v260_v7, %v268_v9 }
  0x9e   :  { %3290 = vmatpush1.bf16.msra.mxu0 %v7838_v14  ;;  %3376 = vmatpush1.bf16.msra.mxu1 %v7840_v16  ;;  %v283_v14 = vld [vmem:[%s12941_s1 + $0x7d0] sm:$0xff]  ;;  %v276_v16 = vld [vmem:[%s12941_s1 + $0x798] sm:$0xff] }
  0x9f   :  { %3291 = vmatprep.subr.bf16.mxu0 %v7855_v17  ;;  %3377 = vmatprep.subr.bf16.mxu1 %v7857_v21  ;;  %v7969_v17 = vcombine.high %v260_v7, %v268_v9  ;;  %v7983_v21 = vcombine.high %v275_v13, %v283_v14  ;;  %v7982_v29 = vcombine.low %v275_v13, %v283_v14  ;;  %v387_v9 = vld [vmem:[%s12941_s1 + $0xb10] sm:$0xff]  ;;  %v396_v13 = vld [vmem:[%s12941_s1 + $0xb58] sm:$0xff] }
  0xa0   :  { %v7984_v30 = vcombine.low %v276_v16, %v284_v18 }
  0xa2   :  { %3292 = vmatpush1.bf16.msra.mxu0 %v7854_v23  ;;  %3378 = vmatpush1.bf16.msra.mxu1 %v7856_v24  ;;  %v299_v23 = vld [vmem:[%s12941_s1 + $0x850] sm:$0xff]  ;;  %v292_v24 = vld [vmem:[%s12941_s1 + $0x818] sm:$0xff] }
  0xa3   :  { %3293 = vmatprep.subr.bf16.mxu0 %v7871_v26  ;;  %3379 = vmatprep.subr.bf16.mxu1 %v7873_v31  ;;  %v7985_v26 = vcombine.high %v276_v16, %v284_v18  ;;  %v7999_v31 = vcombine.high %v291_v22, %v299_v23  ;;  %v7998_v37 = vcombine.low %v291_v22, %v299_v23  ;;  %v403_v18 = vld [vmem:[%s12941_s1 + $0xb90] sm:$0xff]  ;;  %v412_v22 = vld [vmem:[%s12941_s1 + $0xbd8] sm:$0xff] }
  0xa4   :  { %v8000_v38 = vcombine.low %v292_v24, %v300_v27 }
  0xa6   :  { %3294 = vmatpush1.bf16.msra.mxu0 %v7870_v33  ;;  %3380 = vmatpush1.bf16.msra.mxu1 %v7872_v34  ;;  %v315_v33 = vld [vmem:[%s12941_s1 + $0x8d0] sm:$0xff]  ;;  %v308_v34 = vld [vmem:[%s12941_s1 + $0x898] sm:$0xff] }
  0xa7   :  { %3295 = vmatprep.subr.bf16.mxu0 %v7887_v35  ;;  %3381 = vmatprep.subr.bf16.mxu1 %v7889_v39  ;;  %v8001_v35 = vcombine.high %v292_v24, %v300_v27  ;;  %v8015_v39 = vcombine.high %v307_v32, %v315_v33  ;;  %v8014_v45 = vcombine.low %v307_v32, %v315_v33  ;;  %v419_v27 = vld [vmem:[%s12941_s1 + $0xc10] sm:$0xff]  ;;  %v428_v32 = vld [vmem:[%s12941_s1 + $0xc58] sm:$0xff] }
  0xa8   :  { %v8016_v46 = vcombine.low %v308_v34, %v316_v36 }
  0xaa   :  { %3296 = vmatpush1.bf16.msra.mxu0 %v7886_v41  ;;  %3382 = vmatpush1.bf16.msra.mxu1 %v7888_v42  ;;  %v331_v41 = vld [vmem:[%s12941_s1 + $0x950] sm:$0xff]  ;;  %v324_v42 = vld [vmem:[%s12941_s1 + $0x918] sm:$0xff] }
  0xab   :  { %3297 = vmatprep.subr.bf16.mxu0 %v7903_v43  ;;  %3383 = vmatprep.subr.bf16.mxu1 %v7905_v47  ;;  %v8017_v43 = vcombine.high %v308_v34, %v316_v36  ;;  %v8031_v47 = vcombine.high %v323_v40, %v331_v41  ;;  %v8030_v53 = vcombine.low %v323_v40, %v331_v41  ;;  %v435_v36 = vld [vmem:[%s12941_s1 + $0xc90] sm:$0xff]  ;;  %v444_v40 = vld [vmem:[%s12941_s1 + $0xcd8] sm:$0xff] }
  0xac   :  { %v8032_v54 = vcombine.low %v324_v42, %v332_v44 }
  0xae   :  { %3298 = vmatpush1.bf16.msra.mxu0 %v7902_v49  ;;  %3384 = vmatpush1.bf16.msra.mxu1 %v7904_v50  ;;  %v347_v49 = vld [vmem:[%s12941_s1 + $0x9d0] sm:$0xff]  ;;  %v340_v50 = vld [vmem:[%s12941_s1 + $0x998] sm:$0xff] }
  0xaf   :  { %3299 = vmatprep.subr.bf16.mxu0 %v7919_v51  ;;  %3385 = vmatprep.subr.bf16.mxu1 %v7921_v55  ;;  %v8033_v51 = vcombine.high %v324_v42, %v332_v44  ;;  %v8047_v55 = vcombine.high %v339_v48, %v347_v49  ;;  %v8046_v62 = vcombine.low %v339_v48, %v347_v49  ;;  %v451_v44 = vld [vmem:[%s12941_s1 + $0xd10] sm:$0xff]  ;;  %v460_v48 = vld [vmem:[%s12941_s1 + $0xd58] sm:$0xff] }
  0xb0   :  { %v8048_v63 = vcombine.low %v340_v50, %v348_v52 }
  0xb2   :  { %3300 = vmatpush1.bf16.msra.mxu0 %v7918_v57  ;;  %3386 = vmatpush1.bf16.msra.mxu1 %v7920_v59  ;;  %v363_v57 = vld [vmem:[%s12941_s1 + $0xa50] sm:$0xff]  ;;  %v356_v59 = vld [vmem:[%s12941_s1 + $0xa18] sm:$0xff] }
  0xb3   :  { %3301 = vmatprep.subr.bf16.mxu0 %v7935_v60  ;;  %3387 = vmatprep.subr.bf16.mxu1 %v7937_v0  ;;  %v8049_v60 = vcombine.high %v340_v50, %v348_v52  ;;  %v8063_v0 = vcombine.high %v355_v56, %v363_v57  ;;  %v8062_v6 = vcombine.low %v355_v56, %v363_v57  ;;  %v467_v52 = vld [vmem:[%s12941_s1 + $0xd90] sm:$0xff]  ;;  %v476_v56 = vld [vmem:[%s12941_s1 + $0xdd8] sm:$0xff] }
  0xb4   :  { %v8064_v7 = vcombine.low %v356_v59, %v364_v61 }
  0xb6   :  { %3302 = vmatpush1.bf16.msra.mxu0 %v7934_v2  ;;  %3388 = vmatpush1.bf16.msra.mxu1 %v7936_v3  ;;  %v379_v2 = vld [vmem:[%s12941_s1 + $0xad0] sm:$0xff]  ;;  %v372_v3 = vld [vmem:[%s12941_s1 + $0xa98] sm:$0xff] }
  0xb7   :  { %3303 = vmatprep.subr.bf16.mxu0 %v7951_v4  ;;  %3389 = vmatprep.subr.bf16.mxu1 %v7953_v8  ;;  %v8065_v4 = vcombine.high %v356_v59, %v364_v61  ;;  %v8079_v8 = vcombine.high %v371_v1, %v379_v2  ;;  %v8078_v14 = vcombine.low %v371_v1, %v379_v2  ;;  %v483_v61 = vld [vmem:[%s12941_s1 + $0xe10] sm:$0xff]  ;;  %v492_v1 = vld [vmem:[%s12941_s1 + $0xe58] sm:$0xff] }
  0xb8   :  { %v8080_v16 = vcombine.low %v372_v3, %v380_v5 }
  0xba   :  { %3304 = vmatpush1.bf16.msra.mxu0 %v7950_v10  ;;  %3390 = vmatpush1.bf16.msra.mxu1 %v7952_v11  ;;  %v395_v10 = vld [vmem:[%s12941_s1 + $0xb50] sm:$0xff]  ;;  %v388_v11 = vld [vmem:[%s12941_s1 + $0xb18] sm:$0xff] }
  0xbb   :  { %3305 = vmatprep.subr.bf16.mxu0 %v7967_v12  ;;  %3391 = vmatprep.subr.bf16.mxu1 %v7969_v17  ;;  %v8081_v12 = vcombine.high %v372_v3, %v380_v5  ;;  %v8095_v17 = vcombine.high %v387_v9, %v395_v10  ;;  %v8094_v23 = vcombine.low %v387_v9, %v395_v10  ;;  %v499_v5 = vld [vmem:[%s12941_s1 + $0xe90] sm:$0xff]  ;;  %v508_v9 = vld [vmem:[%s12941_s1 + $0xed8] sm:$0xff] }
  0xbc   :  { %v8096_v24 = vcombine.low %v388_v11, %v396_v13 }
  0xbe   :  { %3306 = vmatpush1.bf16.msra.mxu0 %v7966_v19  ;;  %3392 = vmatpush1.bf16.msra.mxu1 %v7968_v20  ;;  %v411_v19 = vld [vmem:[%s12941_s1 + $0xbd0] sm:$0xff]  ;;  %v404_v20 = vld [vmem:[%s12941_s1 + $0xb98] sm:$0xff] }
  0xbf   :  { %3307 = vmatprep.subr.bf16.mxu0 %v7983_v21  ;;  %3393 = vmatprep.subr.bf16.mxu1 %v7985_v26  ;;  %v8097_v21 = vcombine.high %v388_v11, %v396_v13  ;;  %v8111_v26 = vcombine.high %v403_v18, %v411_v19  ;;  %v8110_v33 = vcombine.low %v403_v18, %v411_v19  ;;  %v515_v13 = vld [vmem:[%s12941_s1 + $0xf10] sm:$0xff]  ;;  %v524_v18 = vld [vmem:[%s12941_s1 + $0xf58] sm:$0xff] }
  0xc0   :  { %v8112_v34 = vcombine.low %v404_v20, %v412_v22 }
  0xc2   :  { %3308 = vmatpush1.bf16.msra.mxu0 %v7982_v29  ;;  %3394 = vmatpush1.bf16.msra.mxu1 %v7984_v30  ;;  %v427_v29 = vld [vmem:[%s12941_s1 + $0xc50] sm:$0xff]  ;;  %v420_v30 = vld [vmem:[%s12941_s1 + $0xc18] sm:$0xff] }
  0xc3   :  { %3320 = vmatprep.subr.bf16.mxu0 %v7999_v31  ;;  %3406 = vmatprep.subr.bf16.mxu1 %v8001_v35  ;;  %v8113_v31 = vcombine.high %v404_v20, %v412_v22  ;;  %v8127_v35 = vcombine.high %v419_v27, %v427_v29  ;;  %v8126_v41 = vcombine.low %v419_v27, %v427_v29  ;;  %v531_v22 = vld [vmem:[%s12941_s1 + $0xf90] sm:$0xff]  ;;  %v540_v27 = vld [vmem:[%s12941_s1 + $0xfd8] sm:$0xff] }
  0xc4   :  { %v8128_v42 = vcombine.low %v420_v30, %v428_v32 }
  0xc5   :  { %3310 = vmatmul.mubr.bf16.vlgmr.msra.gmra.mrb[4].mxu0 %v9927_v15  ;;  %3396 = vmatmul.mubr.bf16.vlgmr.msra.gmra.mrb[4].mxu1 %v9927_v15 }
  0xc6   :  { %3321 = vmatpush1.bf16.msra.mxu0 %v7998_v37  ;;  %3407 = vmatpush1.bf16.msra.mxu1 %v8000_v38  ;;  %v443_v37 = vld [vmem:[%s12941_s1 + $0xcd0] sm:$0xff]  ;;  %v436_v38 = vld [vmem:[%s12941_s1 + $0xc98] sm:$0xff] }
  0xc7   :  { %3322 = vmatprep.subr.bf16.mxu0 %v8015_v39  ;;  %3408 = vmatprep.subr.bf16.mxu1 %v8017_v43  ;;  %v8129_v39 = vcombine.high %v420_v30, %v428_v32  ;;  %v8143_v43 = vcombine.high %v435_v36, %v443_v37  ;;  %v8142_v49 = vcombine.low %v435_v36, %v443_v37  ;;  %v37_v32 = vld [vmem:[%s12941_s1 + $0x20] sm:$0xff]  ;;  %v46_v36 = vld [vmem:[%s12941_s1 + $0x68] sm:$0xff] }
  0xc8   :  { %3352 = vmatprep.mubr.bf16.mxu0 %v9944_v25  ;;  %3438 = vmatprep.mubr.bf16.mxu1 %v9944_v25  ;;  %v8144_v50 = vcombine.low %v436_v38, %v444_v40 }
  0xca   :  { %3323 = vmatpush1.bf16.msra.mxu0 %v8014_v45  ;;  %3409 = vmatpush1.bf16.msra.mxu1 %v8016_v46  ;;  %v459_v45 = vld [vmem:[%s12941_s1 + $0xd50] sm:$0xff]  ;;  %v452_v46 = vld [vmem:[%s12941_s1 + $0xd18] sm:$0xff] }
  0xcb   :  { %3324 = vmatprep.subr.bf16.mxu0 %v8031_v47  ;;  %3410 = vmatprep.subr.bf16.mxu1 %v8033_v51  ;;  %v8145_v47 = vcombine.high %v436_v38, %v444_v40  ;;  %v8159_v51 = vcombine.high %v451_v44, %v459_v45  ;;  %v8158_v57 = vcombine.low %v451_v44, %v459_v45  ;;  %v53_v40 = vld [vmem:[%s12941_s1 + $0xa0] sm:$0xff]  ;;  %v62_v44 = vld [vmem:[%s12941_s1 + $0xe8] sm:$0xff] }
  0xcc   :  { %v8160_v59 = vcombine.low %v452_v46, %v460_v48 }
  0xce   :  { %3325 = vmatpush1.bf16.msra.mxu0 %v8030_v53  ;;  %3411 = vmatpush1.bf16.msra.mxu1 %v8032_v54  ;;  %v475_v53 = vld [vmem:[%s12941_s1 + $0xdd0] sm:$0xff]  ;;  %v468_v54 = vld [vmem:[%s12941_s1 + $0xd98] sm:$0xff] }
  0xcf   :  { %3326 = vmatprep.subr.bf16.mxu0 %v8047_v55  ;;  %3412 = vmatprep.subr.bf16.mxu1 %v8049_v60  ;;  %v8161_v55 = vcombine.high %v452_v46, %v460_v48  ;;  %v8175_v60 = vcombine.high %v467_v52, %v475_v53  ;;  %v8174_v2 = vcombine.low %v467_v52, %v475_v53  ;;  %v69_v48 = vld [vmem:[%s12941_s1 + $0x120] sm:$0xff]  ;;  %v78_v52 = vld [vmem:[%s12941_s1 + $0x168] sm:$0xff] }
  0xd0   :  { %v8176_v3 = vcombine.low %v468_v54, %v476_v56 }
  0xd2   :  { %3327 = vmatpush1.bf16.msra.mxu0 %v8046_v62  ;;  %3413 = vmatpush1.bf16.msra.mxu1 %v8048_v63  ;;  %v491_v62 = vld [vmem:[%s12941_s1 + $0xe50] sm:$0xff]  ;;  %v484_v63 = vld [vmem:[%s12941_s1 + $0xe18] sm:$0xff] }
  0xd3   :  { %3328 = vmatprep.subr.bf16.mxu0 %v8063_v0  ;;  %3414 = vmatprep.subr.bf16.mxu1 %v8065_v4  ;;  %v8177_v0 = vcombine.high %v468_v54, %v476_v56  ;;  %v8191_v4 = vcombine.high %v483_v61, %v491_v62  ;;  %v8190_v10 = vcombine.low %v483_v61, %v491_v62  ;;  %v85_v56 = vld [vmem:[%s12941_s1 + $0x1a0] sm:$0xff]  ;;  %v94_v61 = vld [vmem:[%s12941_s1 + $0x1e8] sm:$0xff] }
  0xd4   :  { %v8192_v11 = vcombine.low %v484_v63, %v492_v1 }
  0xd6   :  { %3329 = vmatpush1.bf16.msra.mxu0 %v8062_v6  ;;  %3415 = vmatpush1.bf16.msra.mxu1 %v8064_v7  ;;  %v507_v6 = vld [vmem:[%s12941_s1 + $0xed0] sm:$0xff]  ;;  %v500_v7 = vld [vmem:[%s12941_s1 + $0xe98] sm:$0xff] }
  0xd7   :  { %3330 = vmatprep.subr.bf16.mxu0 %v8079_v8  ;;  %3416 = vmatprep.subr.bf16.mxu1 %v8081_v12  ;;  %v8193_v8 = vcombine.high %v484_v63, %v492_v1  ;;  %v8207_v12 = vcombine.high %v499_v5, %v507_v6  ;;  %v8206_v19 = vcombine.low %v499_v5, %v507_v6  ;;  %v101_v1 = vld [vmem:[%s12941_s1 + $0x220] sm:$0xff]  ;;  %v110_v5 = vld [vmem:[%s12941_s1 + $0x268] sm:$0xff] }
  0xd8   :  { %v8208_v20 = vcombine.low %v500_v7, %v508_v9 }
  0xda   :  { %3331 = vmatpush1.bf16.msra.mxu0 %v8078_v14  ;;  %3417 = vmatpush1.bf16.msra.mxu1 %v8080_v16  ;;  %v523_v14 = vld [vmem:[%s12941_s1 + $0xf50] sm:$0xff]  ;;  %v516_v16 = vld [vmem:[%s12941_s1 + $0xf18] sm:$0xff] }
  0xdb   :  { %3332 = vmatprep.subr.bf16.mxu0 %v8095_v17  ;;  %3418 = vmatprep.subr.bf16.mxu1 %v8097_v21  ;;  %v8209_v17 = vcombine.high %v500_v7, %v508_v9  ;;  %v8223_v21 = vcombine.high %v515_v13, %v523_v14  ;;  %v8222_v29 = vcombine.low %v515_v13, %v523_v14  ;;  %v117_v9 = vld [vmem:[%s12941_s1 + $0x2a0] sm:$0xff]  ;;  %v126_v13 = vld [vmem:[%s12941_s1 + $0x2e8] sm:$0xff] }
  0xdc   :  { %v8224_v30 = vcombine.low %v516_v16, %v524_v18 }
  0xde   :  { %3333 = vmatpush1.bf16.msra.mxu0 %v8094_v23  ;;  %3419 = vmatpush1.bf16.msra.mxu1 %v8096_v24  ;;  %v539_v23 = vld [vmem:[%s12941_s1 + $0xfd0] sm:$0xff]  ;;  %v532_v24 = vld [vmem:[%s12941_s1 + $0xf98] sm:$0xff] }
  0xdf   :  { %3334 = vmatprep.subr.bf16.mxu0 %v8111_v26  ;;  %3420 = vmatprep.subr.bf16.mxu1 %v8113_v31  ;;  %v8225_v26 = vcombine.high %v516_v16, %v524_v18  ;;  %v8239_v31 = vcombine.high %v531_v22, %v539_v23  ;;  %v8238_v37 = vcombine.low %v531_v22, %v539_v23  ;;  %v133_v18 = vld [vmem:[%s12941_s1 + $0x320] sm:$0xff]  ;;  %v142_v22 = vld [vmem:[%s12941_s1 + $0x368] sm:$0xff] }
  0xe0   :  { %v8240_v38 = vcombine.low %v532_v24, %v540_v27 }
  0xe2   :  { %3335 = vmatpush1.bf16.msra.mxu0 %v8110_v33  ;;  %3421 = vmatpush1.bf16.msra.mxu1 %v8112_v34  ;;  %v45_v33 = vld [vmem:[%s12941_s1 + $0x60] sm:$0xff]  ;;  %v38_v34 = vld [vmem:[%s12941_s1 + $0x28] sm:$0xff] }
  0xe3   :  { %3336 = vmatprep.subr.bf16.mxu0 %v8127_v35  ;;  %3422 = vmatprep.subr.bf16.mxu1 %v8129_v39  ;;  %v8241_v35 = vcombine.high %v532_v24, %v540_v27  ;;  %v7747_v39 = vcombine.high %v37_v32, %v45_v33  ;;  %v7746_v45 = vcombine.low %v37_v32, %v45_v33  ;;  %v149_v27 = vld [vmem:[%s12941_s1 + $0x3a0] sm:$0xff]  ;;  %v158_v32 = vld [vmem:[%s12941_s1 + $0x3e8] sm:$0xff] }
  0xe4   :  { %v7748_v46 = vcombine.low %v38_v34, %v46_v36 }
  0xe6   :  { %3337 = vmatpush1.bf16.msra.mxu0 %v8126_v41  ;;  %3423 = vmatpush1.bf16.msra.mxu1 %v8128_v42  ;;  %v61_v41 = vld [vmem:[%s12941_s1 + $0xe0] sm:$0xff]  ;;  %v54_v42 = vld [vmem:[%s12941_s1 + $0xa8] sm:$0xff] }
  0xe7   :  { %3338 = vmatprep.subr.bf16.mxu0 %v8143_v43  ;;  %3424 = vmatprep.subr.bf16.mxu1 %v8145_v47  ;;  %v7749_v43 = vcombine.high %v38_v34, %v46_v36  ;;  %v7763_v47 = vcombine.high %v53_v40, %v61_v41  ;;  %v7762_v53 = vcombine.low %v53_v40, %v61_v41  ;;  %v165_v36 = vld [vmem:[%s12941_s1 + $0x420] sm:$0xff]  ;;  %v174_v40 = vld [vmem:[%s12941_s1 + $0x468] sm:$0xff] }
  0xe8   :  { %v7764_v54 = vcombine.low %v54_v42, %v62_v44 }
  0xea   :  { %3339 = vmatpush1.bf16.msra.mxu0 %v8142_v49  ;;  %3425 = vmatpush1.bf16.msra.mxu1 %v8144_v50  ;;  %v77_v49 = vld [vmem:[%s12941_s1 + $0x160] sm:$0xff]  ;;  %v70_v50 = vld [vmem:[%s12941_s1 + $0x128] sm:$0xff] }
  0xeb   :  { %3340 = vmatprep.subr.bf16.mxu0 %v8159_v51  ;;  %3426 = vmatprep.subr.bf16.mxu1 %v8161_v55  ;;  %v7765_v51 = vcombine.high %v54_v42, %v62_v44  ;;  %v7779_v55 = vcombine.high %v69_v48, %v77_v49  ;;  %v7778_v62 = vcombine.low %v69_v48, %v77_v49  ;;  %v181_v44 = vld [vmem:[%s12941_s1 + $0x4a0] sm:$0xff]  ;;  %v190_v48 = vld [vmem:[%s12941_s1 + $0x4e8] sm:$0xff] }
  0xec   :  { %v7780_v63 = vcombine.low %v70_v50, %v78_v52 }
  0xee   :  { %3341 = vmatpush1.bf16.msra.mxu0 %v8158_v57  ;;  %3427 = vmatpush1.bf16.msra.mxu1 %v8160_v59  ;;  %v93_v57 = vld [vmem:[%s12941_s1 + $0x1e0] sm:$0xff]  ;;  %v86_v59 = vld [vmem:[%s12941_s1 + $0x1a8] sm:$0xff] }
  0xef   :  { %3342 = vmatprep.subr.bf16.mxu0 %v8175_v60  ;;  %3428 = vmatprep.subr.bf16.mxu1 %v8177_v0  ;;  %v7781_v60 = vcombine.high %v70_v50, %v78_v52  ;;  %v7795_v0 = vcombine.high %v85_v56, %v93_v57  ;;  %v7794_v6 = vcombine.low %v85_v56, %v93_v57  ;;  %v197_v52 = vld [vmem:[%s12941_s1 + $0x520] sm:$0xff]  ;;  %v206_v56 = vld [vmem:[%s12941_s1 + $0x568] sm:$0xff] }
  0xf0   :  { %v7796_v7 = vcombine.low %v86_v59, %v94_v61 }
  0xf2   :  { %3343 = vmatpush1.bf16.msra.mxu0 %v8174_v2  ;;  %3429 = vmatpush1.bf16.msra.mxu1 %v8176_v3  ;;  %v109_v2 = vld [vmem:[%s12941_s1 + $0x260] sm:$0xff]  ;;  %v102_v3 = vld [vmem:[%s12941_s1 + $0x228] sm:$0xff] }
  0xf3   :  { %3344 = vmatprep.subr.bf16.mxu0 %v8191_v4  ;;  %3430 = vmatprep.subr.bf16.mxu1 %v8193_v8  ;;  %v7797_v4 = vcombine.high %v86_v59, %v94_v61  ;;  %v7811_v8 = vcombine.high %v101_v1, %v109_v2  ;;  %v7810_v14 = vcombine.low %v101_v1, %v109_v2  ;;  %v213_v61 = vld [vmem:[%s12941_s1 + $0x5a0] sm:$0xff]  ;;  %v222_v1 = vld [vmem:[%s12941_s1 + $0x5e8] sm:$0xff] }
  0xf4   :  { %v7812_v16 = vcombine.low %v102_v3, %v110_v5 }
  0xf6   :  { %3345 = vmatpush1.bf16.msra.mxu0 %v8190_v10  ;;  %3431 = vmatpush1.bf16.msra.mxu1 %v8192_v11  ;;  %v125_v10 = vld [vmem:[%s12941_s1 + $0x2e0] sm:$0xff]  ;;  %v118_v11 = vld [vmem:[%s12941_s1 + $0x2a8] sm:$0xff] }
  0xf7   :  { %3346 = vmatprep.subr.bf16.mxu0 %v8207_v12  ;;  %3432 = vmatprep.subr.bf16.mxu1 %v8209_v17  ;;  %v7813_v12 = vcombine.high %v102_v3, %v110_v5  ;;  %v7827_v17 = vcombine.high %v117_v9, %v125_v10  ;;  %v7826_v23 = vcombine.low %v117_v9, %v125_v10  ;;  %v229_v5 = vld [vmem:[%s12941_s1 + $0x620] sm:$0xff]  ;;  %v238_v9 = vld [vmem:[%s12941_s1 + $0x668] sm:$0xff] }
  0xf8   :  { %v7828_v24 = vcombine.low %v118_v11, %v126_v13 }
  0xfa   :  { %3347 = vmatpush1.bf16.msra.mxu0 %v8206_v19  ;;  %3433 = vmatpush1.bf16.msra.mxu1 %v8208_v20  ;;  %v141_v19 = vld [vmem:[%s12941_s1 + $0x360] sm:$0xff]  ;;  %v134_v20 = vld [vmem:[%s12941_s1 + $0x328] sm:$0xff] }
  0xfb   :  { %3348 = vmatprep.subr.bf16.mxu0 %v8223_v21  ;;  %3434 = vmatprep.subr.bf16.mxu1 %v8225_v26  ;;  %v7829_v21 = vcombine.high %v118_v11, %v126_v13  ;;  %v7843_v26 = vcombine.high %v133_v18, %v141_v19  ;;  %v7842_v33 = vcombine.low %v133_v18, %v141_v19  ;;  %v245_v13 = vld [vmem:[%s12941_s1 + $0x6a0] sm:$0xff]  ;;  %v254_v18 = vld [vmem:[%s12941_s1 + $0x6e8] sm:$0xff] }
  0xfc   :  { %v7844_v34 = vcombine.low %v134_v20, %v142_v22 }
  0xfe   :  { %3349 = vmatpush1.bf16.msra.mxu0 %v8222_v29  ;;  %3435 = vmatpush1.bf16.msra.mxu1 %v8224_v30  ;;  %v157_v29 = vld [vmem:[%s12941_s1 + $0x3e0] sm:$0xff]  ;;  %v150_v30 = vld [vmem:[%s12941_s1 + $0x3a8] sm:$0xff] }
  0xff   :  { %3350 = vmatprep.subr.bf16.mxu0 %v8239_v31  ;;  %3436 = vmatprep.subr.bf16.mxu1 %v8241_v35  ;;  %v7845_v31 = vcombine.high %v134_v20, %v142_v22  ;;  %v7859_v35 = vcombine.high %v149_v27, %v157_v29  ;;  %v7858_v41 = vcombine.low %v149_v27, %v157_v29  ;;  %v261_v22 = vld [vmem:[%s12941_s1 + $0x720] sm:$0xff]  ;;  %v270_v27 = vld [vmem:[%s12941_s1 + $0x768] sm:$0xff] }
 0x100   :  { %v7860_v42 = vcombine.low %v150_v30, %v158_v32 }
 0x102   :  { %3351 = vmatpush1.bf16.msra.mxu0 %v8238_v37  ;;  %3437 = vmatpush1.bf16.msra.mxu1 %v8240_v38  ;;  %v173_v37 = vld [vmem:[%s12941_s1 + $0x460] sm:$0xff]  ;;  %v166_v38 = vld [vmem:[%s12941_s1 + $0x428] sm:$0xff] }
 0x103   :  { %3449 = vmatprep.subr.bf16.mxu0 %v7747_v39  ;;  %3535 = vmatprep.subr.bf16.mxu1 %v7749_v43  ;;  %v7861_v39 = vcombine.high %v150_v30, %v158_v32  ;;  %v7875_v43 = vcombine.high %v165_v36, %v173_v37  ;;  %v7874_v49 = vcombine.low %v165_v36, %v173_v37  ;;  %v277_v32 = vld [vmem:[%s12941_s1 + $0x7a0] sm:$0xff]  ;;  %v286_v36 = vld [vmem:[%s12941_s1 + $0x7e8] sm:$0xff] }
 0x104   :  { %v7876_v50 = vcombine.low %v166_v38, %v174_v40 }
 0x105   :  { %3353 = vmatmul.mubr.bf16.vlgmr.msra.gmra.mrb[4].mxu0 %v10142_v28  ;;  %3439 = vmatmul.mubr.bf16.vlgmr.msra.gmra.mrb[4].mxu1 %v10142_v28 }
 0x106   :  { %3450 = vmatpush1.bf16.msra.mxu0 %v7746_v45  ;;  %3536 = vmatpush1.bf16.msra.mxu1 %v7748_v46  ;;  %v189_v45 = vld [vmem:[%s12941_s1 + $0x4e0] sm:$0xff]  ;;  %v182_v46 = vld [vmem:[%s12941_s1 + $0x4a8] sm:$0xff] }
 0x107   :  { %3451 = vmatprep.subr.bf16.mxu0 %v7763_v47  ;;  %3537 = vmatprep.subr.bf16.mxu1 %v7765_v51  ;;  %v7877_v47 = vcombine.high %v166_v38, %v174_v40  ;;  %v7891_v51 = vcombine.high %v181_v44, %v189_v45  ;;  %v7890_v57 = vcombine.low %v181_v44, %v189_v45  ;;  %v293_v40 = vld [vmem:[%s12941_s1 + $0x820] sm:$0xff]  ;;  %v302_v44 = vld [vmem:[%s12941_s1 + $0x868] sm:$0xff] }
 0x108   :  { %3481 = vmatprep.mubr.bf16.mxu0 %v9794_v58  ;;  %3567 = vmatprep.mubr.bf16.mxu1 %v9794_v58  ;;  %v7892_v59 = vcombine.low %v182_v46, %v190_v48 }
 0x10a   :  { %3452 = vmatpush1.bf16.msra.mxu0 %v7762_v53  ;;  %3538 = vmatpush1.bf16.msra.mxu1 %v7764_v54  ;;  %v205_v53 = vld [vmem:[%s12941_s1 + $0x560] sm:$0xff]  ;;  %v198_v54 = vld [vmem:[%s12941_s1 + $0x528] sm:$0xff] }
 0x10b   :  { %3453 = vmatprep.subr.bf16.mxu0 %v7779_v55  ;;  %3539 = vmatprep.subr.bf16.mxu1 %v7781_v60  ;;  %v7893_v55 = vcombine.high %v182_v46, %v190_v48  ;;  %v7907_v60 = vcombine.high %v197_v52, %v205_v53  ;;  %v7906_v2 = vcombine.low %v197_v52, %v205_v53  ;;  %v309_v48 = vld [vmem:[%s12941_s1 + $0x8a0] sm:$0xff]  ;;  %v318_v52 = vld [vmem:[%s12941_s1 + $0x8e8] sm:$0xff] }
 0x10c   :  { %v7908_v3 = vcombine.low %v198_v54, %v206_v56 }
 0x10e   :  { %3454 = vmatpush1.bf16.msra.mxu0 %v7778_v62  ;;  %3540 = vmatpush1.bf16.msra.mxu1 %v7780_v63  ;;  %v221_v62 = vld [vmem:[%s12941_s1 + $0x5e0] sm:$0xff]  ;;  %v214_v63 = vld [vmem:[%s12941_s1 + $0x5a8] sm:$0xff] }
 0x10f   :  { %3455 = vmatprep.subr.bf16.mxu0 %v7795_v0  ;;  %3541 = vmatprep.subr.bf16.mxu1 %v7797_v4  ;;  %v7909_v0 = vcombine.high %v198_v54, %v206_v56  ;;  %v7923_v4 = vcombine.high %v213_v61, %v221_v62  ;;  %v7922_v10 = vcombine.low %v213_v61, %v221_v62  ;;  %v325_v56 = vld [vmem:[%s12941_s1 + $0x920] sm:$0xff]  ;;  %v334_v61 = vld [vmem:[%s12941_s1 + $0x968] sm:$0xff] }
 0x110   :  { %v7924_v11 = vcombine.low %v214_v63, %v222_v1 }
 0x112   :  { %3456 = vmatpush1.bf16.msra.mxu0 %v7794_v6  ;;  %3542 = vmatpush1.bf16.msra.mxu1 %v7796_v7  ;;  %v237_v6 = vld [vmem:[%s12941_s1 + $0x660] sm:$0xff]  ;;  %v230_v7 = vld [vmem:[%s12941_s1 + $0x628] sm:$0xff] }
 0x113   :  { %3457 = vmatprep.subr.bf16.mxu0 %v7811_v8  ;;  %3543 = vmatprep.subr.bf16.mxu1 %v7813_v12  ;;  %v7925_v8 = vcombine.high %v214_v63, %v222_v1  ;;  %v7939_v12 = vcombine.high %v229_v5, %v237_v6  ;;  %v7938_v19 = vcombine.low %v229_v5, %v237_v6 }
 0x114   :  { %v7940_v20 = vcombine.low %v230_v7, %v238_v9 }
 0x116   :  { %3458 = vmatpush1.bf16.msra.mxu0 %v7810_v14  ;;  %3544 = vmatpush1.bf16.msra.mxu1 %v7812_v16  ;;  %v253_v14 = vld [vmem:[%s12941_s1 + $0x6e0] sm:$0xff]  ;;  %v246_v16 = vld [vmem:[%s12941_s1 + $0x6a8] sm:$0xff] }
 0x117   :  { %3459 = vmatprep.subr.bf16.mxu0 %v7827_v17  ;;  %3545 = vmatprep.subr.bf16.mxu1 %v7829_v21  ;;  %v7941_v17 = vcombine.high %v230_v7, %v238_v9  ;;  %v7955_v21 = vcombine.high %v245_v13, %v253_v14  ;;  %v7954_v29 = vcombine.low %v245_v13, %v253_v14 }
 0x118   :  { %v7956_v30 = vcombine.low %v246_v16, %v254_v18 }
 0x11a   :  { %3460 = vmatpush1.bf16.msra.mxu0 %v7826_v23  ;;  %3546 = vmatpush1.bf16.msra.mxu1 %v7828_v24  ;;  %v269_v23 = vld [vmem:[%s12941_s1 + $0x760] sm:$0xff]  ;;  %v262_v24 = vld [vmem:[%s12941_s1 + $0x728] sm:$0xff] }
 0x11b   :  { %3461 = vmatprep.subr.bf16.mxu0 %v7843_v26  ;;  %3547 = vmatprep.subr.bf16.mxu1 %v7845_v31  ;;  %v7957_v26 = vcombine.high %v246_v16, %v254_v18  ;;  %v7971_v31 = vcombine.high %v261_v22, %v269_v23  ;;  %v7970_v37 = vcombine.low %v261_v22, %v269_v23 }
 0x11c   :  { %v7972_v38 = vcombine.low %v262_v24, %v270_v27 }
 0x11e   :  { %3462 = vmatpush1.bf16.msra.mxu0 %v7842_v33  ;;  %3548 = vmatpush1.bf16.msra.mxu1 %v7844_v34  ;;  %v285_v33 = vld [vmem:[%s12941_s1 + $0x7e0] sm:$0xff]  ;;  %v278_v34 = vld [vmem:[%s12941_s1 + $0x7a8] sm:$0xff] }
 0x11f   :  { %3463 = vmatprep.subr.bf16.mxu0 %v7859_v35  ;;  %3549 = vmatprep.subr.bf16.mxu1 %v7861_v39  ;;  %v7973_v35 = vcombine.high %v262_v24, %v270_v27  ;;  %v7987_v39 = vcombine.high %v277_v32, %v285_v33  ;;  %v7986_v45 = vcombine.low %v277_v32, %v285_v33 }
 0x120   :  { %v7988_v46 = vcombine.low %v278_v34, %v286_v36 }
 0x122   :  { %3464 = vmatpush1.bf16.msra.mxu0 %v7858_v41  ;;  %3550 = vmatpush1.bf16.msra.mxu1 %v7860_v42  ;;  %v301_v41 = vld [vmem:[%s12941_s1 + $0x860] sm:$0xff]  ;;  %v294_v42 = vld [vmem:[%s12941_s1 + $0x828] sm:$0xff] }
 0x123   :  { %3465 = vmatprep.subr.bf16.mxu0 %v7875_v43  ;;  %3551 = vmatprep.subr.bf16.mxu1 %v7877_v47  ;;  %v7989_v43 = vcombine.high %v278_v34, %v286_v36  ;;  %v8003_v47 = vcombine.high %v293_v40, %v301_v41  ;;  %v8002_v53 = vcombine.low %v293_v40, %v301_v41 }
 0x124   :  { %v8004_v54 = vcombine.low %v294_v42, %v302_v44 }
 0x126   :  { %3466 = vmatpush1.bf16.msra.mxu0 %v7874_v49  ;;  %3552 = vmatpush1.bf16.msra.mxu1 %v7876_v50  ;;  %v317_v49 = vld [vmem:[%s12941_s1 + $0x8e0] sm:$0xff]  ;;  %v310_v50 = vld [vmem:[%s12941_s1 + $0x8a8] sm:$0xff] }
 0x127   :  { %3467 = vmatprep.subr.bf16.mxu0 %v7891_v51  ;;  %3553 = vmatprep.subr.bf16.mxu1 %v7893_v55  ;;  %v8005_v51 = vcombine.high %v294_v42, %v302_v44  ;;  %v8019_v55 = vcombine.high %v309_v48, %v317_v49  ;;  %v8018_v62 = vcombine.low %v309_v48, %v317_v49 }
 0x12a   :  { %3468 = vmatpush1.bf16.msra.mxu0 %v7890_v57  ;;  %3554 = vmatpush1.bf16.msra.mxu1 %v7892_v59  ;;  %v333_v57 = vld [vmem:[%s12941_s1 + $0x960] sm:$0xff]  ;;  %v326_v59 = vld [vmem:[%s12941_s1 + $0x928] sm:$0xff] }
 0x12b   :  { %3469 = vmatprep.subr.bf16.mxu0 %v7907_v60  ;;  %3555 = vmatprep.subr.bf16.mxu1 %v7909_v0  ;;  %v8021_v60 = vcombine.high %v310_v50, %v318_v52 }
 0x12e   :  { %3470 = vmatpush1.bf16.msra.mxu0 %v7906_v2  ;;  %3556 = vmatpush1.bf16.msra.mxu1 %v7908_v3 }
 0x12f   :  { %3471 = vmatprep.subr.bf16.mxu0 %v7923_v4  ;;  %3557 = vmatprep.subr.bf16.mxu1 %v7925_v8 }
 0x132   :  { %3472 = vmatpush1.bf16.msra.mxu0 %v7922_v10  ;;  %3558 = vmatpush1.bf16.msra.mxu1 %v7924_v11 }
 0x133   :  { %3473 = vmatprep.subr.bf16.mxu0 %v7939_v12  ;;  %3559 = vmatprep.subr.bf16.mxu1 %v7941_v17 }
 0x136   :  { %3474 = vmatpush1.bf16.msra.mxu0 %v7938_v19  ;;  %3560 = vmatpush1.bf16.msra.mxu1 %v7940_v20 }
 0x137   :  { %3475 = vmatprep.subr.bf16.mxu0 %v7955_v21  ;;  %3561 = vmatprep.subr.bf16.mxu1 %v7957_v26 }
 0x13a   :  { %3476 = vmatpush1.bf16.msra.mxu0 %v7954_v29  ;;  %3562 = vmatpush1.bf16.msra.mxu1 %v7956_v30 }
 0x13b   :  { %3477 = vmatprep.subr.bf16.mxu0 %v7971_v31  ;;  %3563 = vmatprep.subr.bf16.mxu1 %v7973_v35 }
 0x13e   :  { %3478 = vmatpush1.bf16.msra.mxu0 %v7970_v37  ;;  %3564 = vmatpush1.bf16.msra.mxu1 %v7972_v38 }
 0x13f   :  { %3479 = vmatprep.subr.bf16.mxu0 %v7987_v39  ;;  %3565 = vmatprep.subr.bf16.mxu1 %v7989_v43 }
 0x142   :  { %3480 = vmatpush1.bf16.msra.mxu0 %v7986_v45  ;;  %3566 = vmatpush1.bf16.msra.mxu1 %v7988_v46 }
 0x143   :  { %3492 = vmatprep.subr.bf16.mxu0 %v8003_v47  ;;  %3578 = vmatprep.subr.bf16.mxu1 %v8005_v51 }
 0x145   :  { %3482 = vmatmul.mubr.bf16.vlgmr.msra.gmra.mrb[8].mxu0 %v9927_v15  ;;  %3568 = vmatmul.mubr.bf16.vlgmr.msra.gmra.mrb[8].mxu1 %v9927_v15 }
 0x146   :  { %3493 = vmatpush1.bf16.msra.mxu0 %v8002_v53 }
 0x147   :  { %10 = vsyncpa [#allocation3], 0  ;;  %3579 = vmatpush1.bf16.msra.mxu1 %v8004_v54  ;;  %3494 = vmatprep.subr.bf16.mxu0 %v8019_v55  ;;  %v8020_v63 = vcombine.low %v310_v50, %v318_v52  ;;  %v8035_v0 = vcombine.high %v325_v56, %v333_v57  ;;  %v8037_v1 = vcombine.high %v326_v59, %v334_v61  ;;  %v341_v2 = vld [vmem:[%s12941_s1 + $0x9a0] sm:$0xff]  ;;  %v342_v4 = vld [vmem:[%s12941_s1 + $0x9a8] sm:$0xff] }
 0x148   :  { %3580 = vmatprep.subr.bf16.mxu1 %v8021_v60  ;;  %v349_v3 = vld [vmem:[%s12941_s1 + $0x9e0] sm:$0xff]  ;;  %3524 = vmatprep.mubr.bf16.mxu0 %v9944_v25  ;;  %v350_v5 = vld [vmem:[%s12941_s1 + $0x9e8] sm:$0xff]  ;;  %v8034_v6 = vcombine.low %v325_v56, %v333_v57  ;;  %v8036_v7 = vcombine.low %v326_v59, %v334_v61 }
 0x149   :  { %3610 = vmatprep.mubr.bf16.mxu1 %v9944_v25  ;;  %v8051_v8 = vcombine.high %v341_v2, %v349_v3  ;;  %v8053_v9 = vcombine.high %v342_v4, %v350_v5  ;;  %v357_v10 = vld [vmem:[%s12941_s1 + $0xa20] sm:$0xff]  ;;  %v358_v12 = vld [vmem:[%s12941_s1 + $0xa28] sm:$0xff]  ;;  %v8050_v14 = vcombine.low %v341_v2, %v349_v3  ;;  %v8052_v16 = vcombine.low %v342_v4, %v350_v5 }
 0x14a   :  { %3495 = vmatpush1.bf16.msra.mxu0 %v8018_v62  ;;  %v365_v11 = vld [vmem:[%s12941_s1 + $0xa60] sm:$0xff]  ;;  %v366_v13 = vld [vmem:[%s12941_s1 + $0xa68] sm:$0xff] }
 0x14b   :  { %3581 = vmatpush1.bf16.msra.mxu1 %v8020_v63  ;;  %3496 = vmatprep.subr.bf16.mxu0 %v8035_v0  ;;  %v8067_v17 = vcombine.high %v357_v10, %v365_v11  ;;  %v8069_v18 = vcombine.high %v358_v12, %v366_v13  ;;  %v373_v19 = vld [vmem:[%s12941_s1 + $0xaa0] sm:$0xff]  ;;  %v374_v21 = vld [vmem:[%s12941_s1 + $0xaa8] sm:$0xff]  ;;  %v8066_v23 = vcombine.low %v357_v10, %v365_v11 }
 0x14c   :  { %3582 = vmatprep.subr.bf16.mxu1 %v8037_v1  ;;  %v381_v20 = vld [vmem:[%s12941_s1 + $0xae0] sm:$0xff]  ;;  %v382_v22 = vld [vmem:[%s12941_s1 + $0xae8] sm:$0xff]  ;;  %v8068_v24 = vcombine.low %v358_v12, %v366_v13 }
 0x14d   :  { %v8083_v26 = vcombine.high %v373_v19, %v381_v20  ;;  %v8085_v27 = vcombine.high %v374_v21, %v382_v22  ;;  %v389_v29 = vld [vmem:[%s12941_s1 + $0xb20] sm:$0xff]  ;;  %v390_v31 = vld [vmem:[%s12941_s1 + $0xb28] sm:$0xff]  ;;  %v8082_v33 = vcombine.low %v373_v19, %v381_v20  ;;  %v8084_v34 = vcombine.low %v374_v21, %v382_v22 }
 0x14e   :  { %3497 = vmatpush1.bf16.msra.mxu0 %v8034_v6  ;;  %v397_v30 = vld [vmem:[%s12941_s1 + $0xb60] sm:$0xff]  ;;  %v398_v32 = vld [vmem:[%s12941_s1 + $0xb68] sm:$0xff] }
 0x14f   :  { %3583 = vmatpush1.bf16.msra.mxu1 %v8036_v7  ;;  %3498 = vmatprep.subr.bf16.mxu0 %v8051_v8  ;;  %v8099_v35 = vcombine.high %v389_v29, %v397_v30  ;;  %v405_v36 = vld [vmem:[%s12941_s1 + $0xba0] sm:$0xff]  ;;  %v8101_v38 = vcombine.high %v390_v31, %v398_v32  ;;  %v406_v40 = vld [vmem:[%s12941_s1 + $0xba8] sm:$0xff]  ;;  %v8098_v46 = vcombine.low %v389_v29, %v397_v30 }
 0x150   :  { %3584 = vmatprep.subr.bf16.mxu1 %v8053_v9  ;;  %v413_v39 = vld [vmem:[%s12941_s1 + $0xbe0] sm:$0xff]  ;;  %v414_v41 = vld [vmem:[%s12941_s1 + $0xbe8] sm:$0xff]  ;;  %v8100_v47 = vcombine.low %v390_v31, %v398_v32 }
 0x151   :  { %v8115_v52 = vcombine.high %v405_v36, %v413_v39  ;;  %v8117_v53 = vcombine.high %v406_v40, %v414_v41  ;;  %v421_v54 = vld [vmem:[%s12941_s1 + $0xc20] sm:$0xff]  ;;  %v422_v1 = vld [vmem:[%s12941_s1 + $0xc28] sm:$0xff]  ;;  %v8114_v5 = vcombine.low %v405_v36, %v413_v39  ;;  %v8116_v7 = vcombine.low %v406_v40, %v414_v41 }
 0x152   :  { %3499 = vmatpush1.bf16.msra.mxu0 %v8050_v14  ;;  %v429_v61 = vld [vmem:[%s12941_s1 + $0xc60] sm:$0xff]  ;;  %v430_v2 = vld [vmem:[%s12941_s1 + $0xc68] sm:$0xff] }
 0x153   :  { %3585 = vmatpush1.bf16.msra.mxu1 %v8052_v16  ;;  %3500 = vmatprep.subr.bf16.mxu0 %v8067_v17  ;;  %v8131_v8 = vcombine.high %v421_v54, %v429_v61  ;;  %v8133_v9 = vcombine.high %v422_v1, %v430_v2  ;;  %v437_v10 = vld [vmem:[%s12941_s1 + $0xca0] sm:$0xff]  ;;  %v438_v12 = vld [vmem:[%s12941_s1 + $0xca8] sm:$0xff]  ;;  %v8130_v14 = vcombine.low %v421_v54, %v429_v61 }
 0x154   :  { %3586 = vmatprep.subr.bf16.mxu1 %v8069_v18  ;;  %v445_v11 = vld [vmem:[%s12941_s1 + $0xce0] sm:$0xff]  ;;  %v446_v13 = vld [vmem:[%s12941_s1 + $0xce8] sm:$0xff]  ;;  %v8132_v16 = vcombine.low %v422_v1, %v430_v2 }
 0x155   :  { %v8147_v17 = vcombine.high %v437_v10, %v445_v11  ;;  %v8149_v18 = vcombine.high %v438_v12, %v446_v13  ;;  %v453_v19 = vld [vmem:[%s12941_s1 + $0xd20] sm:$0xff]  ;;  %v454_v21 = vld [vmem:[%s12941_s1 + $0xd28] sm:$0xff] }
 0x156   :  { %3501 = vmatpush1.bf16.msra.mxu0 %v8066_v23  ;;  %v461_v20 = vld [vmem:[%s12941_s1 + $0xd60] sm:$0xff]  ;;  %v462_v22 = vld [vmem:[%s12941_s1 + $0xd68] sm:$0xff]  ;;  %v8146_v23 = vcombine.low %v437_v10, %v445_v11  ;;  %v39_v10 = vld [vmem:[%s12941_s1 + $0x30] sm:$0xff] }
 0x157   :  { %3587 = vmatpush1.bf16.msra.mxu1 %v8068_v24  ;;  %3502 = vmatprep.subr.bf16.mxu0 %v8083_v26  ;;  %v8148_v24 = vcombine.low %v438_v12, %v446_v13  ;;  %v8163_v26 = vcombine.high %v453_v19, %v461_v20  ;;  %v469_v29 = vld [vmem:[%s12941_s1 + $0xda0] sm:$0xff]  ;;  %v470_v31 = vld [vmem:[%s12941_s1 + $0xda8] sm:$0xff]  ;;  %v47_v11 = vld [vmem:[%s12941_s1 + $0x70] sm:$0xff] }
 0x158   :  { %v3182_v37 = vpop.f32.mrb[0].mxu0  ;;  %3588 = vmatprep.subr.bf16.mxu1 %v8085_v27  ;;  %v3268_v42 = vpop.f32.mrb[0].mxu1  ;;  %v8165_v27 = vcombine.high %v454_v21, %v462_v22  ;;  %v477_v30 = vld [vmem:[%s12941_s1 + $0xde0] sm:$0xff]  ;;  %v478_v32 = vld [vmem:[%s12941_s1 + $0xde8] sm:$0xff]  ;;  %v40_v12 = vld [vmem:[%s12941_s1 + $0x38] sm:$0xff] }
 0x159   :  { %v3184_v43 = vpop.f32.mrb[1].mxu0  ;;  %v3270_v44 = vpop.f32.mrb[1].mxu1  ;;  %v3793_v48 = vmax.f32 %v3182_v37, 0.0  ;;  %v3795_v55 = vmax.f32 %v3268_v42, 0.0  ;;  %v8181_v36 = vcombine.high %v470_v31, %v478_v32  ;;  %v485_v37 = vld [vmem:[%s12941_s1 + $0xe20] sm:$0xff]  ;;  %v486_v39 = vld [vmem:[%s12941_s1 + $0xe28] sm:$0xff]  ;;  %v8178_v41 = vcombine.low %v469_v29, %v477_v30 }
 0x15a   :  { %v3186_v45 = vpop.f32.mrb[2].mxu0  ;;  %3503 = vmatpush1.bf16.msra.mxu0 %v8082_v33  ;;  %v3272_v50 = vpop.f32.mrb[2].mxu1  ;;  %v3794_v56 = vmax.f32 %v3184_v43, 0.0  ;;  %v3796_v62 = vmax.f32 %v3270_v44, 0.0  ;;  %v8162_v33 = vcombine.low %v453_v19, %v461_v20  ;;  %v494_v40 = vld [vmem:[%s12941_s1 + $0xe68] sm:$0xff]  ;;  %v8180_v42 = vcombine.low %v470_v31, %v478_v32  ;;  %v525_v54 = vld [vmem:[%s12941_s1 + $0xf60] sm:$0xff] }
 0x15b   :  { %v3809_v49 = vmax.f32 %v3186_v45, 0.0  ;;  %3589 = vmatpush1.bf16.msra.mxu1 %v8084_v34  ;;  %v3188_v51 = vpop.f32.mrb[3].mxu0  ;;  %3504 = vmatprep.subr.bf16.mxu0 %v8099_v35  ;;  %v3811_v57 = vmax.f32 %v3272_v50, 0.0  ;;  %v3274_v60 = vpop.f32.mrb[3].mxu1  ;;  %v8164_v34 = vcombine.low %v454_v21, %v462_v22  ;;  %v8179_v35 = vcombine.high %v469_v29, %v477_v30  ;;  %v501_v45 = vld [vmem:[%s12941_s1 + $0xea0] sm:$0xff]  ;;  %v534_v1 = vld [vmem:[%s12941_s1 + $0xfa8] sm:$0xff] }
 0x15c   :  { %v3810_v59 = vmax.f32 %v3188_v51, 0.0  ;;  %3590 = vmatprep.subr.bf16.mxu1 %v8101_v38  ;;  %v3812_v0 = vmax.f32 %v3274_v60, 0.0  ;;  %v493_v38 = vld [vmem:[%s12941_s1 + $0xe60] sm:$0xff]  ;;  %v8197_v44 = vcombine.high %v486_v39, %v494_v40  ;;  %v8196_v50 = vcombine.low %v486_v39, %v494_v40  ;;  %v542_v2 = vld [vmem:[%s12941_s1 + $0xfe8] sm:$0xff]  ;;  %v48_v13 = vld [vmem:[%s12941_s1 + $0x78] sm:$0xff] }
 0x15d   :  { %v10814_v63 = vpack.c.bf16 %v3809_v49, %v3793_v48  ;;  %v10822_v3 = vpack.c.bf16 %v3811_v57, %v3795_v55  ;;  %v8195_v43 = vcombine.high %v485_v37, %v493_v38  ;;  %v510_v48 = vld [vmem:[%s12941_s1 + $0xee8] sm:$0xff]  ;;  %v8194_v49 = vcombine.low %v485_v37, %v493_v38  ;;  %v55_v19 = vld [vmem:[%s12941_s1 + $0xb0] sm:$0xff]  ;;  %v56_v21 = vld [vmem:[%s12941_s1 + $0xb8] sm:$0xff] }
 0x15e   :  { %v10824_v4 = vpack.c.bf16 %v3810_v59, %v3794_v56  ;;  %3505 = vmatpush1.bf16.msra.mxu0 %v8098_v46  ;;  %v10826_v6 = vpack.c.bf16 %v3812_v0, %v3796_v62  ;;  %v509_v46 = vld [vmem:[%s12941_s1 + $0xee0] sm:$0xff]  ;;  %v518_v55 = vld [vmem:[%s12941_s1 + $0xf28] sm:$0xff]  ;;  %v63_v20 = vld [vmem:[%s12941_s1 + $0xf0] sm:$0xff] }
 0x15f   :  { %3591 = vmatpush1.bf16.msra.mxu1 %v8100_v47  ;;  %3506 = vmatprep.subr.bf16.mxu0 %v8115_v52  ;;  %v502_v47 = vld [vmem:[%s12941_s1 + $0xea8] sm:$0xff]  ;;  %v8211_v51 = vcombine.high %v501_v45, %v509_v46  ;;  %v8210_v57 = vcombine.low %v501_v45, %v509_v46  ;;  %v533_v62 = vld [vmem:[%s12941_s1 + $0xfa0] sm:$0xff]  ;;  %v64_v22 = vld [vmem:[%s12941_s1 + $0xf8] sm:$0xff] }
 0x160   :  { %3592 = vmatprep.subr.bf16.mxu1 %v8117_v53  ;;  %v8213_v52 = vcombine.high %v502_v47, %v510_v48  ;;  %v517_v53 = vld [vmem:[%s12941_s1 + $0xf20] sm:$0xff]  ;;  %v526_v56 = vld [vmem:[%s12941_s1 + $0xf68] sm:$0xff]  ;;  %v8212_v59 = vcombine.low %v502_v47, %v510_v48  ;;  %v71_v29 = vld [vmem:[%s12941_s1 + $0x130] sm:$0xff] }
 0x161   :  { %v8227_v60 = vcombine.high %v517_v53, %v525_v54  ;;  %v8229_v61 = vcombine.high %v518_v55, %v526_v56  ;;  %v541_v0 = vld [vmem:[%s12941_s1 + $0xfe0] sm:$0xff]  ;;  %v79_v30 = vld [vmem:[%s12941_s1 + $0x170] sm:$0xff]  ;;  %v72_v31 = vld [vmem:[%s12941_s1 + $0x138] sm:$0xff] }
 0x162   :  { %3507 = vmatpush1.bf16.msra.mxu0 %v8114_v5  ;;  %v8226_v5 = vcombine.low %v517_v53, %v525_v54  ;;  %v80_v32 = vld [vmem:[%s12941_s1 + $0x178] sm:$0xff]  ;;  %v87_v37 = vld [vmem:[%s12941_s1 + $0x1b0] sm:$0xff] }
 0x163   :  { %3593 = vmatpush1.bf16.msra.mxu1 %v8116_v7  ;;  %3508 = vmatprep.subr.bf16.mxu0 %v8131_v8  ;;  %v8228_v7 = vcombine.low %v518_v55, %v526_v56  ;;  %v8243_v8 = vcombine.high %v533_v62, %v541_v0  ;;  %v95_v38 = vld [vmem:[%s12941_s1 + $0x1f0] sm:$0xff]  ;;  %v88_v39 = vld [vmem:[%s12941_s1 + $0x1b8] sm:$0xff] }
 0x164   :  { %3594 = vmatprep.subr.bf16.mxu1 %v8133_v9  ;;  %v8245_v9 = vcombine.high %v534_v1, %v542_v2  ;;  %v96_v40 = vld [vmem:[%s12941_s1 + $0x1f8] sm:$0xff]  ;;  %v103_v45 = vld [vmem:[%s12941_s1 + $0x230] sm:$0xff]  ;;  %v7798_v48 = vcombine.low %v87_v37, %v95_v38 }
 0x165   :  { %v111_v46 = vld [vmem:[%s12941_s1 + $0x270] sm:$0xff]  ;;  %v112_v47 = vld [vmem:[%s12941_s1 + $0x278] sm:$0xff] }
 0x166   :  { %3509 = vmatpush1.bf16.msra.mxu0 %v8130_v14  ;;  %v8242_v14 = vcombine.low %v533_v62, %v541_v0  ;;  %v127_v53 = vld [vmem:[%s12941_s1 + $0x2f0] sm:$0xff]  ;;  %v120_v54 = vld [vmem:[%s12941_s1 + $0x2b8] sm:$0xff]  ;;  %v7814_v56 = vcombine.low %v103_v45, %v111_v46 }
 0x167   :  { %3595 = vmatpush1.bf16.msra.mxu1 %v8132_v16  ;;  %3510 = vmatprep.subr.bf16.mxu0 %v8147_v17  ;;  %v8244_v16 = vcombine.low %v534_v1, %v542_v2  ;;  %v7751_v17 = vcombine.high %v39_v10, %v47_v11  ;;  %v128_v55 = vld [vmem:[%s12941_s1 + $0x2f8] sm:$0xff]  ;;  %v143_v62 = vld [vmem:[%s12941_s1 + $0x370] sm:$0xff] }
 0x168   :  { %3596 = vmatprep.subr.bf16.mxu1 %v8149_v18  ;;  %v7753_v18 = vcombine.high %v40_v12, %v48_v13  ;;  %v136_v0 = vld [vmem:[%s12941_s1 + $0x338] sm:$0xff] }
 0x169   :  { %v144_v1 = vld [vmem:[%s12941_s1 + $0x378] sm:$0xff] }
 0x16a   :  { %3511 = vmatpush1.bf16.msra.mxu0 %v8146_v23  ;;  %v7750_v23 = vcombine.low %v39_v10, %v47_v11  ;;  %v159_v10 = vld [vmem:[%s12941_s1 + $0x3f0] sm:$0xff]  ;;  %v152_v11 = vld [vmem:[%s12941_s1 + $0x3b8] sm:$0xff] }
 0x16b   :  { %3597 = vmatpush1.bf16.msra.mxu1 %v8148_v24  ;;  %3512 = vmatprep.subr.bf16.mxu0 %v8163_v26  ;;  %v7752_v24 = vcombine.low %v40_v12, %v48_v13  ;;  %v7767_v26 = vcombine.high %v55_v19, %v63_v20  ;;  %v160_v12 = vld [vmem:[%s12941_s1 + $0x3f8] sm:$0xff] }
 0x16c   :  { %3598 = vmatprep.subr.bf16.mxu1 %v8165_v27  ;;  %v7769_v27 = vcombine.high %v56_v21, %v64_v22 }
 0x16e   :  { %3513 = vmatpush1.bf16.msra.mxu0 %v8162_v33  ;;  %v7766_v33 = vcombine.low %v55_v19, %v63_v20  ;;  %v175_v19 = vld [vmem:[%s12941_s1 + $0x470] sm:$0xff]  ;;  %v168_v20 = vld [vmem:[%s12941_s1 + $0x438] sm:$0xff] }
 0x16f   :  { %3599 = vmatpush1.bf16.msra.mxu1 %v8164_v34  ;;  %3514 = vmatprep.subr.bf16.mxu0 %v8179_v35  ;;  %v7768_v34 = vcombine.low %v56_v21, %v64_v22  ;;  %v7783_v35 = vcombine.high %v71_v29, %v79_v30  ;;  %v176_v21 = vld [vmem:[%s12941_s1 + $0x478] sm:$0xff] }
 0x170   :  { %3600 = vmatprep.subr.bf16.mxu1 %v8181_v36  ;;  %v7785_v36 = vcombine.high %v72_v31, %v80_v32 }
 0x172   :  { %3515 = vmatpush1.bf16.msra.mxu0 %v8178_v41  ;;  %v7782_v41 = vcombine.low %v71_v29, %v79_v30  ;;  %v191_v29 = vld [vmem:[%s12941_s1 + $0x4f0] sm:$0xff]  ;;  %v184_v30 = vld [vmem:[%s12941_s1 + $0x4b8] sm:$0xff] }
 0x173   :  { %3601 = vmatpush1.bf16.msra.mxu1 %v8180_v42  ;;  %3516 = vmatprep.subr.bf16.mxu0 %v8195_v43  ;;  %v7784_v42 = vcombine.low %v72_v31, %v80_v32  ;;  %v7799_v43 = vcombine.high %v87_v37, %v95_v38  ;;  %v192_v31 = vld [vmem:[%s12941_s1 + $0x4f8] sm:$0xff]  ;;  %v207_v37 = vld [vmem:[%s12941_s1 + $0x570] sm:$0xff] }
 0x174   :  { %3602 = vmatprep.subr.bf16.mxu1 %v8197_v44  ;;  %v7801_v44 = vcombine.high %v88_v39, %v96_v40  ;;  %v200_v38 = vld [vmem:[%s12941_s1 + $0x538] sm:$0xff] }
 0x176   :  { %3517 = vmatpush1.bf16.msra.mxu0 %v8194_v49  ;;  %v7800_v49 = vcombine.low %v88_v39, %v96_v40  ;;  %v208_v39 = vld [vmem:[%s12941_s1 + $0x578] sm:$0xff] }
 0x177   :  { %3603 = vmatpush1.bf16.msra.mxu1 %v8196_v50  ;;  %3518 = vmatprep.subr.bf16.mxu0 %v8211_v51  ;;  %v7815_v50 = vcombine.high %v103_v45, %v111_v46  ;;  %v223_v45 = vld [vmem:[%s12941_s1 + $0x5f0] sm:$0xff]  ;;  %v216_v46 = vld [vmem:[%s12941_s1 + $0x5b8] sm:$0xff] }
 0x178   :  { %3604 = vmatprep.subr.bf16.mxu1 %v8213_v52  ;;  %v119_v52 = vld [vmem:[%s12941_s1 + $0x2b0] sm:$0xff] }
 0x179   :  { %v7830_v2 = vcombine.low %v119_v52, %v127_v53 }
 0x17a   :  { %3519 = vmatpush1.bf16.msra.mxu0 %v8210_v57 }
 0x17b   :  { %3605 = vmatpush1.bf16.msra.mxu1 %v8212_v59  ;;  %3520 = vmatprep.subr.bf16.mxu0 %v8227_v60  ;;  %v7831_v59 = vcombine.high %v119_v52, %v127_v53  ;;  %v7833_v60 = vcombine.high %v120_v54, %v128_v55  ;;  %v239_v52 = vld [vmem:[%s12941_s1 + $0x670] sm:$0xff]  ;;  %v232_v53 = vld [vmem:[%s12941_s1 + $0x638] sm:$0xff] }
 0x17c   :  { %3606 = vmatprep.subr.bf16.mxu1 %v8229_v61  ;;  %v135_v61 = vld [vmem:[%s12941_s1 + $0x330] sm:$0xff] }
 0x17d   :  { %v7846_v13 = vcombine.low %v135_v61, %v143_v62 }
 0x17e   :  { %3521 = vmatpush1.bf16.msra.mxu0 %v8226_v5  ;;  %v7832_v5 = vcombine.low %v120_v54, %v128_v55  ;;  %v240_v54 = vld [vmem:[%s12941_s1 + $0x678] sm:$0xff] }
 0x17f   :  { %3607 = vmatpush1.bf16.msra.mxu1 %v8228_v7  ;;  %3522 = vmatprep.subr.bf16.mxu0 %v8243_v8  ;;  %v7847_v7 = vcombine.high %v135_v61, %v143_v62  ;;  %v7849_v8 = vcombine.high %v136_v0, %v144_v1  ;;  %v255_v61 = vld [vmem:[%s12941_s1 + $0x6f0] sm:$0xff]  ;;  %v248_v62 = vld [vmem:[%s12941_s1 + $0x6b8] sm:$0xff] }
 0x180   :  { %3608 = vmatprep.subr.bf16.mxu1 %v8245_v9  ;;  %v151_v9 = vld [vmem:[%s12941_s1 + $0x3b0] sm:$0xff] }
 0x181   :  { %v7862_v22 = vcombine.low %v151_v9, %v159_v10 }
 0x182   :  { %3523 = vmatpush1.bf16.msra.mxu0 %v8242_v14  ;;  %v7848_v14 = vcombine.low %v136_v0, %v144_v1  ;;  %v256_v0 = vld [vmem:[%s12941_s1 + $0x6f8] sm:$0xff] }
 0x183   :  { %3609 = vmatpush1.bf16.msra.mxu1 %v8244_v16  ;;  %3621 = vmatprep.subr.bf16.mxu0 %v7751_v17  ;;  %v7863_v16 = vcombine.high %v151_v9, %v159_v10  ;;  %v7865_v17 = vcombine.high %v152_v11, %v160_v12  ;;  %v271_v9 = vld [vmem:[%s12941_s1 + $0x770] sm:$0xff]  ;;  %v264_v10 = vld [vmem:[%s12941_s1 + $0x738] sm:$0xff] }
 0x184   :  { %3707 = vmatprep.subr.bf16.mxu1 %v7753_v18  ;;  %v167_v18 = vld [vmem:[%s12941_s1 + $0x430] sm:$0xff] }
 0x185   :  { %3525 = vmatmul.mubr.bf16.vlgmr.msra.gmra.mrb[8].mxu0 %v10142_v28  ;;  %v7878_v32 = vcombine.low %v167_v18, %v175_v19 }
 0x186   :  { %3611 = vmatmul.mubr.bf16.vlgmr.msra.gmra.mrb[8].mxu1 %v10142_v28  ;;  %3622 = vmatpush1.bf16.msra.mxu0 %v7750_v23  ;;  %v7864_v23 = vcombine.low %v152_v11, %v160_v12  ;;  %v272_v11 = vld [vmem:[%s12941_s1 + $0x778] sm:$0xff] }
 0x187   :  { %3708 = vmatpush1.bf16.msra.mxu1 %v7752_v24  ;;  %3623 = vmatprep.subr.bf16.mxu0 %v7767_v26  ;;  %v7879_v24 = vcombine.high %v167_v18, %v175_v19  ;;  %v7881_v26 = vcombine.high %v168_v20, %v176_v21  ;;  %v287_v18 = vld [vmem:[%s12941_s1 + $0x7f0] sm:$0xff]  ;;  %v280_v19 = vld [vmem:[%s12941_s1 + $0x7b8] sm:$0xff] }
 0x188   :  { %3709 = vmatprep.subr.bf16.mxu1 %v7769_v27  ;;  %3653 = vmatprep.mubr.bf16.mxu0 %v9794_v58  ;;  %v183_v27 = vld [vmem:[%s12941_s1 + $0x4b0] sm:$0xff] }
 0x189   :  { %3739 = vmatprep.mubr.bf16.mxu1 %v9794_v58  ;;  %v104_v58 = vld [vmem:[%s12941_s1 + $0x238] sm:$0xff]  ;;  %v7894_v40 = vcombine.low %v183_v27, %v191_v29 }
 0x18a   :  { %3624 = vmatpush1.bf16.msra.mxu0 %v7766_v33  ;;  %v7817_v51 = vcombine.high %v104_v58, %v112_v47  ;;  %v7816_v57 = vcombine.low %v104_v58, %v112_v47  ;;  %v7880_v33 = vcombine.low %v168_v20, %v176_v21  ;;  %v224_v58 = vld [vmem:[%s12941_s1 + $0x5f8] sm:$0xff] }
 0x18b   :  { %3710 = vmatpush1.bf16.msra.mxu1 %v7768_v34  ;;  %3625 = vmatprep.subr.bf16.mxu0 %v7783_v35  ;;  %v7895_v34 = vcombine.high %v183_v27, %v191_v29  ;;  %v7897_v35 = vcombine.high %v184_v30, %v192_v31  ;;  %v288_v20 = vld [vmem:[%s12941_s1 + $0x7f8] sm:$0xff]  ;;  %v303_v27 = vld [vmem:[%s12941_s1 + $0x870] sm:$0xff] }
 0x18c   :  { %3711 = vmatprep.subr.bf16.mxu1 %v7785_v36  ;;  %v199_v36 = vld [vmem:[%s12941_s1 + $0x530] sm:$0xff]  ;;  %v296_v29 = vld [vmem:[%s12941_s1 + $0x838] sm:$0xff] }
 0x18d   :  { %v7910_v47 = vcombine.low %v199_v36, %v207_v37 }
 0x18e   :  { %3626 = vmatpush1.bf16.msra.mxu0 %v7782_v41  ;;  %v7896_v41 = vcombine.low %v184_v30, %v192_v31  ;;  %v304_v30 = vld [vmem:[%s12941_s1 + $0x878] sm:$0xff] }
 0x18f   :  { %3712 = vmatpush1.bf16.msra.mxu1 %v7784_v42  ;;  %3627 = vmatprep.subr.bf16.mxu0 %v7799_v43  ;;  %v7911_v42 = vcombine.high %v199_v36, %v207_v37  ;;  %v7913_v43 = vcombine.high %v200_v38, %v208_v39  ;;  %v319_v36 = vld [vmem:[%s12941_s1 + $0x8f0] sm:$0xff]  ;;  %v312_v37 = vld [vmem:[%s12941_s1 + $0x8b8] sm:$0xff] }
 0x190   :  { %3713 = vmatprep.subr.bf16.mxu1 %v7801_v44  ;;  %v215_v44 = vld [vmem:[%s12941_s1 + $0x5b0] sm:$0xff] }
 0x191   :  { %v7926_v55 = vcombine.low %v215_v44, %v223_v45 }
 0x192   :  { %3628 = vmatpush1.bf16.msra.mxu0 %v7798_v48  ;;  %v7912_v48 = vcombine.low %v200_v38, %v208_v39  ;;  %v320_v38 = vld [vmem:[%s12941_s1 + $0x8f8] sm:$0xff] }
 0x193   :  { %3714 = vmatpush1.bf16.msra.mxu1 %v7800_v49  ;;  %3629 = vmatprep.subr.bf16.mxu0 %v7815_v50  ;;  %v7927_v49 = vcombine.high %v215_v44, %v223_v45  ;;  %v7929_v50 = vcombine.high %v216_v46, %v224_v58  ;;  %v335_v44 = vld [vmem:[%s12941_s1 + $0x970] sm:$0xff]  ;;  %v328_v45 = vld [vmem:[%s12941_s1 + $0x938] sm:$0xff] }
 0x194   :  { %3715 = vmatprep.subr.bf16.mxu1 %v7817_v51  ;;  %v231_v51 = vld [vmem:[%s12941_s1 + $0x630] sm:$0xff] }
 0x195   :  { %v7942_v1 = vcombine.low %v231_v51, %v239_v52 }
 0x196   :  { %3630 = vmatpush1.bf16.msra.mxu0 %v7814_v56  ;;  %v7928_v56 = vcombine.low %v216_v46, %v224_v58  ;;  %v336_v46 = vld [vmem:[%s12941_s1 + $0x978] sm:$0xff] }
 0x197   :  { %3716 = vmatpush1.bf16.msra.mxu1 %v7816_v57  ;;  %3631 = vmatprep.subr.bf16.mxu0 %v7831_v59  ;;  %v7943_v57 = vcombine.high %v231_v51, %v239_v52  ;;  %v7945_v59 = vcombine.high %v232_v53, %v240_v54  ;;  %v351_v51 = vld [vmem:[%s12941_s1 + $0x9f0] sm:$0xff]  ;;  %v352_v52 = vld [vmem:[%s12941_s1 + $0x9f8] sm:$0xff] }
 0x198   :  { %3717 = vmatprep.subr.bf16.mxu1 %v7833_v60  ;;  %v247_v60 = vld [vmem:[%s12941_s1 + $0x6b0] sm:$0xff] }
 0x199   :  { %v7958_v12 = vcombine.low %v247_v60, %v255_v61 }
 0x19a   :  { %3632 = vmatpush1.bf16.msra.mxu0 %v7830_v2  ;;  %v7944_v2 = vcombine.low %v232_v53, %v240_v54  ;;  %v8040_v54 = vcombine.low %v328_v45, %v336_v46 }
 0x19b   :  { %3718 = vmatpush1.bf16.msra.mxu1 %v7832_v5  ;;  %3633 = vmatprep.subr.bf16.mxu0 %v7847_v7  ;;  %v7959_v5 = vcombine.high %v247_v60, %v255_v61  ;;  %v7961_v7 = vcombine.high %v248_v62, %v256_v0  ;;  %v368_v60 = vld [vmem:[%s12941_s1 + $0xa78] sm:$0xff] }
 0x19c   :  { %3719 = vmatprep.subr.bf16.mxu1 %v7849_v8  ;;  %v263_v8 = vld [vmem:[%s12941_s1 + $0x730] sm:$0xff] }
 0x19d   :  { %v7974_v21 = vcombine.low %v263_v8, %v271_v9 }
 0x19e   :  { %3634 = vmatpush1.bf16.msra.mxu0 %v7846_v13  ;;  %v7960_v13 = vcombine.low %v248_v62, %v256_v0 }
 0x19f   :  { %3720 = vmatpush1.bf16.msra.mxu1 %v7848_v14  ;;  %3635 = vmatprep.subr.bf16.mxu0 %v7863_v16  ;;  %v7975_v14 = vcombine.high %v263_v8, %v271_v9  ;;  %v7977_v16 = vcombine.high %v264_v10, %v272_v11  ;;  %v384_v8 = vld [vmem:[%s12941_s1 + $0xaf8] sm:$0xff] }
 0x1a0   :  { %3721 = vmatprep.subr.bf16.mxu1 %v7865_v17  ;;  %v279_v17 = vld [vmem:[%s12941_s1 + $0x7b0] sm:$0xff] }
 0x1a1   :  { %v7990_v31 = vcombine.low %v279_v17, %v287_v18 }
 0x1a2   :  { %3636 = vmatpush1.bf16.msra.mxu0 %v7862_v22  ;;  %v7976_v22 = vcombine.low %v264_v10, %v272_v11 }
 0x1a3   :  { %3722 = vmatpush1.bf16.msra.mxu1 %v7864_v23  ;;  %3637 = vmatprep.subr.bf16.mxu0 %v7879_v24  ;;  %v7991_v23 = vcombine.high %v279_v17, %v287_v18  ;;  %v7993_v24 = vcombine.high %v280_v19, %v288_v20  ;;  %v400_v17 = vld [vmem:[%s12941_s1 + $0xb78] sm:$0xff] }
 0x1a4   :  { %3723 = vmatprep.subr.bf16.mxu1 %v7881_v26  ;;  %v295_v26 = vld [vmem:[%s12941_s1 + $0x830] sm:$0xff] }
 0x1a5   :  { %v8006_v39 = vcombine.low %v295_v26, %v303_v27 }
 0x1a6   :  { %3638 = vmatpush1.bf16.msra.mxu0 %v7878_v32  ;;  %v7992_v32 = vcombine.low %v280_v19, %v288_v20 }
 0x1a7   :  { %3724 = vmatpush1.bf16.msra.mxu1 %v7880_v33  ;;  %3639 = vmatprep.subr.bf16.mxu0 %v7895_v34  ;;  %v8007_v33 = vcombine.high %v295_v26, %v303_v27  ;;  %v8009_v34 = vcombine.high %v296_v29, %v304_v30  ;;  %v408_v26 = vld [vmem:[%s12941_s1 + $0xbb8] sm:$0xff] }
 0x1a8   :  { %3725 = vmatprep.subr.bf16.mxu1 %v7897_v35  ;;  %v311_v35 = vld [vmem:[%s12941_s1 + $0x8b0] sm:$0xff]  ;;  %v416_v27 = vld [vmem:[%s12941_s1 + $0xbf8] sm:$0xff] }
 0x1a9   :  { %v8022_v58 = vcombine.low %v311_v35, %v319_v36 }
 0x1aa   :  { %3640 = vmatpush1.bf16.msra.mxu0 %v7894_v40  ;;  %v8008_v40 = vcombine.low %v296_v29, %v304_v30 }
 0x1ab   :  { %3726 = vmatpush1.bf16.msra.mxu1 %v7896_v41  ;;  %3641 = vmatprep.subr.bf16.mxu0 %v7911_v42  ;;  %v8023_v41 = vcombine.high %v311_v35, %v319_v36  ;;  %v8025_v42 = vcombine.high %v312_v37, %v320_v38 }
 0x1ac   :  { %3727 = vmatprep.subr.bf16.mxu1 %v7913_v43  ;;  %v327_v43 = vld [vmem:[%s12941_s1 + $0x930] sm:$0xff] }
 0x1ad   :  { %v8038_v53 = vcombine.low %v327_v43, %v335_v44 }
 0x1ae   :  { %3642 = vmatpush1.bf16.msra.mxu0 %v7910_v47  ;;  %v8024_v47 = vcombine.low %v312_v37, %v320_v38 }
 0x1af   :  { %3728 = vmatpush1.bf16.msra.mxu1 %v7912_v48  ;;  %3643 = vmatprep.subr.bf16.mxu0 %v7927_v49  ;;  %v8039_v48 = vcombine.high %v327_v43, %v335_v44  ;;  %v8041_v49 = vcombine.high %v328_v45, %v336_v46 }
 0x1b0   :  { %3729 = vmatprep.subr.bf16.mxu1 %v7929_v50  ;;  %v343_v50 = vld [vmem:[%s12941_s1 + $0x9b0] sm:$0xff] }
 0x1b1   :  { %v8054_v61 = vcombine.low %v343_v50, %v351_v51 }
 0x1b2   :  { %3644 = vmatpush1.bf16.msra.mxu0 %v7926_v55  ;;  %v8055_v55 = vcombine.high %v343_v50, %v351_v51  ;;  %v424_v50 = vld [vmem:[%s12941_s1 + $0xc38] sm:$0xff] }
 0x1b3   :  { %3730 = vmatpush1.bf16.msra.mxu1 %v7928_v56  ;;  %3645 = vmatprep.subr.bf16.mxu0 %v7943_v57  ;;  %v359_v57 = vld [vmem:[%s12941_s1 + $0xa30] sm:$0xff]  ;;  %v432_v51 = vld [vmem:[%s12941_s1 + $0xc78] sm:$0xff] }
 0x1b4   :  { %3731 = vmatprep.subr.bf16.mxu1 %v7945_v59  ;;  %v367_v59 = vld [vmem:[%s12941_s1 + $0xa70] sm:$0xff] }
 0x1b5   :  { %v8071_v0 = vcombine.high %v359_v57, %v367_v59  ;;  %v8070_v9 = vcombine.low %v359_v57, %v367_v59  ;;  %v8137_v57 = vcombine.high %v424_v50, %v432_v51  ;;  %v439_v59 = vld [vmem:[%s12941_s1 + $0xcb0] sm:$0xff] }
 0x1b6   :  { %3646 = vmatpush1.bf16.msra.mxu0 %v7942_v1 }
 0x1b7   :  { %3732 = vmatpush1.bf16.msra.mxu1 %v7944_v2  ;;  %3647 = vmatprep.subr.bf16.mxu0 %v7959_v5  ;;  %v375_v2 = vld [vmem:[%s12941_s1 + $0xab0] sm:$0xff] }
 0x1b8   :  { %3733 = vmatprep.subr.bf16.mxu1 %v7961_v7  ;;  %v383_v5 = vld [vmem:[%s12941_s1 + $0xaf0] sm:$0xff]  ;;  %v376_v7 = vld [vmem:[%s12941_s1 + $0xab8] sm:$0xff] }
 0x1b9   :  { %v8087_v11 = vcombine.high %v375_v2, %v383_v5  ;;  %v8086_v18 = vcombine.low %v375_v2, %v383_v5  ;;  %v8088_v19 = vcombine.low %v376_v7, %v384_v8  ;;  %v455_v5 = vld [vmem:[%s12941_s1 + $0xd30] sm:$0xff] }
 0x1ba   :  { %3648 = vmatpush1.bf16.msra.mxu0 %v7958_v12  ;;  %v8089_v12 = vcombine.high %v376_v7, %v384_v8  ;;  %v463_v7 = vld [vmem:[%s12941_s1 + $0xd70] sm:$0xff]  ;;  %v456_v8 = vld [vmem:[%s12941_s1 + $0xd38] sm:$0xff] }
 0x1bb   :  { %3734 = vmatpush1.bf16.msra.mxu1 %v7960_v13  ;;  %3649 = vmatprep.subr.bf16.mxu0 %v7975_v14  ;;  %v391_v13 = vld [vmem:[%s12941_s1 + $0xb30] sm:$0xff] }
 0x1bc   :  { %3735 = vmatprep.subr.bf16.mxu1 %v7977_v16  ;;  %v399_v14 = vld [vmem:[%s12941_s1 + $0xb70] sm:$0xff]  ;;  %v392_v16 = vld [vmem:[%s12941_s1 + $0xb38] sm:$0xff] }
 0x1bd   :  { %v8103_v20 = vcombine.high %v391_v13, %v399_v14 }
 0x1be   :  { %3650 = vmatpush1.bf16.msra.mxu0 %v7974_v21  ;;  %v407_v21 = vld [vmem:[%s12941_s1 + $0xbb0] sm:$0xff] }
 0x1bf   :  { %3736 = vmatpush1.bf16.msra.mxu1 %v7976_v22  ;;  %3651 = vmatprep.subr.bf16.mxu0 %v7991_v23  ;;  %v8105_v23 = vcombine.high %v392_v16, %v400_v17 }
 0x1c0   :  { %3737 = vmatprep.subr.bf16.mxu1 %v7993_v24  ;;  %v415_v24 = vld [vmem:[%s12941_s1 + $0xbf0] sm:$0xff] }
 0x1c2   :  { %3652 = vmatpush1.bf16.msra.mxu0 %v7990_v31 }
 0x1c3   :  { %3738 = vmatpush1.bf16.msra.mxu1 %v7992_v32  ;;  %3664 = vmatprep.subr.bf16.mxu0 %v8007_v33  ;;  %v8102_v33 = vcombine.low %v391_v13, %v399_v14  ;;  %v471_v14 = vld [vmem:[%s12941_s1 + $0xdb0] sm:$0xff] }
 0x1c4   :  { %3750 = vmatprep.subr.bf16.mxu1 %v8009_v34  ;;  %v8104_v34 = vcombine.low %v392_v16, %v400_v17  ;;  %v479_v16 = vld [vmem:[%s12941_s1 + $0xdf0] sm:$0xff]  ;;  %v472_v17 = vld [vmem:[%s12941_s1 + $0xdb8] sm:$0xff] }
 0x1c5   :  { %3654 = vmatmul.mubr.bf16.vlgmr.msra.gmra.mrb[12].mxu0 %v9927_v15 }
 0x1c6   :  { %3665 = vmatpush1.bf16.msra.mxu0 %v8006_v39  ;;  %3740 = vmatmul.mubr.bf16.vlgmr.msra.gmra.mrb[12].mxu1 %v9927_v15  ;;  %v344_v15 = vld [vmem:[%s12941_s1 + $0x9b8] sm:$0xff]  ;;  %v8119_v39 = vcombine.high %v407_v21, %v415_v24 }
 0x1c7   :  { %3751 = vmatpush1.bf16.msra.mxu1 %v8008_v40  ;;  %3666 = vmatprep.subr.bf16.mxu0 %v8023_v41  ;;  %v8057_v56 = vcombine.high %v344_v15, %v352_v52  ;;  %v8056_v62 = vcombine.low %v344_v15, %v352_v52  ;;  %v8121_v40 = vcombine.high %v408_v26, %v416_v27  ;;  %v423_v41 = vld [vmem:[%s12941_s1 + $0xc30] sm:$0xff] }
 0x1c8   :  { %3752 = vmatprep.subr.bf16.mxu1 %v8025_v42  ;;  %3696 = vmatprep.mubr.bf16.mxu0 %v9944_v25 }
 0x1c9   :  { %3782 = vmatprep.mubr.bf16.mxu1 %v9944_v25  ;;  %v360_v25 = vld [vmem:[%s12941_s1 + $0xa38] sm:$0xff] }
 0x1ca   :  { %3667 = vmatpush1.bf16.msra.mxu0 %v8022_v58  ;;  %v8073_v1 = vcombine.high %v360_v25, %v368_v60  ;;  %v8072_v10 = vcombine.low %v360_v25, %v368_v60  ;;  %v431_v58 = vld [vmem:[%s12941_s1 + $0xc70] sm:$0xff]  ;;  %v440_v60 = vld [vmem:[%s12941_s1 + $0xcb8] sm:$0xff] }
 0x1cb   :  { %3753 = vmatpush1.bf16.msra.mxu1 %v8024_v47  ;;  %3668 = vmatprep.subr.bf16.mxu0 %v8039_v48  ;;  %v447_v25 = vld [vmem:[%s12941_s1 + $0xcf0] sm:$0xff] }
 0x1cc   :  { %3754 = vmatprep.subr.bf16.mxu1 %v8041_v49 }
 0x1ce   :  { %3669 = vmatpush1.bf16.msra.mxu0 %v8038_v53  ;;  %v8118_v53 = vcombine.low %v407_v21, %v415_v24  ;;  %v8183_v21 = vcombine.high %v471_v14, %v479_v16  ;;  %v495_v24 = vld [vmem:[%s12941_s1 + $0xe70] sm:$0xff] }
 0x1cf   :  { %3755 = vmatpush1.bf16.msra.mxu1 %v8040_v54  ;;  %3670 = vmatprep.subr.bf16.mxu0 %v8055_v55  ;;  %v8120_v55 = vcombine.low %v408_v26, %v416_v27  ;;  %v488_v26 = vld [vmem:[%s12941_s1 + $0xe38] sm:$0xff] }
 0x1d0   :  { %3756 = vmatprep.subr.bf16.mxu1 %v8057_v56  ;;  %v8135_v56 = vcombine.high %v423_v41, %v431_v58  ;;  %v496_v27 = vld [vmem:[%s12941_s1 + $0xe78] sm:$0xff] }
 0x1d2   :  { %3671 = vmatpush1.bf16.msra.mxu0 %v8054_v61  ;;  %v448_v61 = vld [vmem:[%s12941_s1 + $0xcf8] sm:$0xff] }
 0x1d3   :  { %3757 = vmatpush1.bf16.msra.mxu1 %v8056_v62  ;;  %3672 = vmatprep.subr.bf16.mxu0 %v8071_v0  ;;  %v8134_v62 = vcombine.low %v423_v41, %v431_v58  ;;  %v8136_v0 = vcombine.low %v424_v50, %v432_v51  ;;  %v8153_v2 = vcombine.high %v440_v60, %v448_v61  ;;  %v519_v41 = vld [vmem:[%s12941_s1 + $0xf30] sm:$0xff]  ;;  %v536_v51 = vld [vmem:[%s12941_s1 + $0xfb8] sm:$0xff] }
 0x1d4   :  { %3758 = vmatprep.subr.bf16.mxu1 %v8073_v1  ;;  %v8151_v1 = vcombine.high %v439_v59, %v447_v25  ;;  %v543_v50 = vld [vmem:[%s12941_s1 + $0xff0] sm:$0xff] }
 0x1d6   :  { %3673 = vmatpush1.bf16.msra.mxu0 %v8070_v9  ;;  %v464_v9 = vld [vmem:[%s12941_s1 + $0xd78] sm:$0xff] }
 0x1d7   :  { %3759 = vmatpush1.bf16.msra.mxu1 %v8072_v10  ;;  %3674 = vmatprep.subr.bf16.mxu0 %v8087_v11  ;;  %v8150_v10 = vcombine.low %v439_v59, %v447_v25  ;;  %v8152_v11 = vcombine.low %v440_v60, %v448_v61  ;;  %v8169_v13 = vcombine.high %v456_v8, %v464_v9  ;;  %v8863_v61 = vld [vmem:[%s12942_s2 + $0x4] ss:$16 sps:$4 sm:$0xff]  }
 0x1d8   :  { %v3354_v22 = vpop.f32.mrb[4].mxu0  ;;  %3760 = vmatprep.subr.bf16.mxu1 %v8089_v12  ;;  %v3440_v29 = vpop.f32.mrb[4].mxu1  ;;  %v8167_v12 = vcombine.high %v455_v5, %v463_v7 }
 0x1d9   :  { %v3356_v30 = vpop.f32.mrb[5].mxu0  ;;  %v3442_v31 = vpop.f32.mrb[5].mxu1  ;;  %v3797_v35 = vmax.f32 %v3354_v22, 0.0  ;;  %v3799_v42 = vmax.f32 %v3440_v29, 0.0  ;;  %v8182_v29 = vcombine.low %v471_v14, %v479_v16  ;;  %v8882_v14 = vld [vmem:[%s12942_s2 + $0x68] ss:$16 sps:$4 sm:$0xff]  }
 0x1da   :  { %v3358_v32 = vpop.f32.mrb[6].mxu0  ;;  %3675 = vmatpush1.bf16.msra.mxu0 %v8086_v18  ;;  %v3444_v37 = vpop.f32.mrb[6].mxu1  ;;  %v3798_v43 = vmax.f32 %v3356_v30, 0.0  ;;  %v3800_v47 = vmax.f32 %v3442_v31, 0.0  ;;  %v480_v18 = vld [vmem:[%s12941_s1 + $0xdf8] sm:$0xff] }
 0x1db   :  { %v3813_v36 = vmax.f32 %v3358_v32, 0.0  ;;  %3761 = vmatpush1.bf16.msra.mxu1 %v8088_v19  ;;  %v3360_v38 = vpop.f32.mrb[7].mxu0  ;;  %3676 = vmatprep.subr.bf16.mxu0 %v8103_v20  ;;  %v3815_v44 = vmax.f32 %v3444_v37, 0.0  ;;  %v3446_v46 = vpop.f32.mrb[7].mxu1  ;;  %v8166_v19 = vcombine.low %v455_v5, %v463_v7  ;;  %v8168_v20 = vcombine.low %v456_v8, %v464_v9  ;;  %v8872_v5 = vld [vmem:[%s12942_s2 + $0x2c] ss:$16 sps:$4 sm:$0xff]  }
 0x1dc   :  { %v3814_v45 = vmax.f32 %v3360_v38, 0.0  ;;  %3762 = vmatprep.subr.bf16.mxu1 %v8105_v23  ;;  %v3816_v49 = vmax.f32 %v3446_v46, 0.0  ;;  %v8185_v22 = vcombine.high %v472_v17, %v480_v18  ;;  %v487_v23 = vld [vmem:[%s12941_s1 + $0xe30] sm:$0xff]  ;;  %v8184_v30 = vcombine.low %v472_v17, %v480_v18  ;;  %v8870_v8 = vld [vmem:[%s12942_s2 + $0x28] ss:$16 sps:$4 sm:$0xff]  }
 0x1dd   :  { %v11214_v48 = vpack.c.bf16 %v3813_v36, %v3797_v35  ;;  %v11222_v15 = vpack.c.bf16 %v3815_v44, %v3799_v42  ;;  %v8199_v31 = vcombine.high %v487_v23, %v495_v24  ;;  %v8201_v32 = vcombine.high %v488_v26, %v496_v27  ;;  %v504_v35 = vld [vmem:[%s12941_s1 + $0xeb8] sm:$0xff]  ;;  %v527_v42 = vld [vmem:[%s12941_s1 + $0xf70] sm:$0xff] }
 0x1de   :  { %v11224_v52 = vpack.c.bf16 %v3814_v45, %v3798_v43  ;;  %3677 = vmatpush1.bf16.msra.mxu0 %v8102_v33  ;;  %v11226_v54 = vpack.c.bf16 %v3816_v49, %v3800_v47  ;;  %v503_v33 = vld [vmem:[%s12941_s1 + $0xeb0] sm:$0xff]  ;;  %v512_v36 = vld [vmem:[%s12941_s1 + $0xef8] sm:$0xff]  ;;  %v8198_v37 = vcombine.low %v487_v23, %v495_v24  ;;  %v8200_v38 = vcombine.low %v488_v26, %v496_v27 }
 0x1df   :  { %3763 = vmatpush1.bf16.msra.mxu1 %v8104_v34  ;;  %3678 = vmatprep.subr.bf16.mxu0 %v8119_v39  ;;  %v511_v34 = vld [vmem:[%s12941_s1 + $0xef0] sm:$0xff]  ;;  %v520_v43 = vld [vmem:[%s12941_s1 + $0xf38] sm:$0xff]  ;;  %v8216_v46 = vcombine.low %v504_v35, %v512_v36  ;;  %v8231_v58 = vcombine.high %v519_v41, %v527_v42 }
 0x1e0   :  { %3764 = vmatprep.subr.bf16.mxu1 %v8121_v40  ;;  %v8215_v39 = vcombine.high %v503_v33, %v511_v34  ;;  %v8217_v40 = vcombine.high %v504_v35, %v512_v36  ;;  %v528_v44 = vld [vmem:[%s12941_s1 + $0xf78] sm:$0xff]  ;;  %v8214_v45 = vcombine.low %v503_v33, %v511_v34  ;;  %v535_v49 = vld [vmem:[%s12941_s1 + $0xfb0] sm:$0xff] }
 0x1e1   :  { %v8233_v47 = vcombine.high %v520_v43, %v528_v44  ;;  %v8246_v25 = vcombine.low %v535_v49, %v543_v50  ;;  %v8867_v7 = vld [vmem:[%s12942_s2 + $0x20] ss:$16 sps:$4 sm:$0xff]   ;;  %v8875_v9 = vld [vmem:[%s12942_s2 + $0x44] ss:$16 sps:$4 sm:$0xff]   ;;  %v8890_v17 = vld [vmem:[%s12942_s2 + $0x8c] ss:$16 sps:$4 sm:$0xff]  }
 0x1e2   :  { %3679 = vmatpush1.bf16.msra.mxu0 %v8118_v53  ;;  %v544_v53 = vld [vmem:[%s12941_s1 + $0xff8] sm:$0xff]  ;;  %v8887_v16 = vld [vmem:[%s12942_s2 + $0x84] ss:$16 sps:$4 sm:$0xff]   ;;  %v8885_v18 = vld [vmem:[%s12942_s2 + $0x80] ss:$16 sps:$4 sm:$0xff]  }
 0x1e3   :  { %3765 = vmatpush1.bf16.msra.mxu1 %v8120_v55  ;;  %3680 = vmatprep.subr.bf16.mxu0 %v8135_v56  ;;  %v8230_v55 = vcombine.low %v519_v41, %v527_v42  ;;  %v8232_v56 = vcombine.low %v520_v43, %v528_v44  ;;  %v8249_v59 = vcombine.high %v536_v51, %v544_v53  ;;  %v8894_v23 = vld [vmem:[%s12942_s2 + $0xa8] ss:$16 sps:$4 sm:$0xff]   ;;  %v8899_v24 = vld [vmem:[%s12942_s2 + $0xc4] ss:$16 sps:$4 sm:$0xff]   ;;  %v8902_v26 = vld [vmem:[%s12942_s2 + $0xcc] ss:$16 sps:$4 sm:$0xff]  }
 0x1e4   :  { %3766 = vmatprep.subr.bf16.mxu1 %v8137_v57  ;;  %v8247_v57 = vcombine.high %v535_v49, %v543_v50  ;;  %v8248_v60 = vcombine.low %v536_v51, %v544_v53  ;;  %v8897_v27 = vld [vmem:[%s12942_s2 + $0xc0] ss:$16 sps:$4 sm:$0xff]   ;;  %v8906_v33 = vld [vmem:[%s12942_s2 + $0xe8] ss:$16 sps:$4 sm:$0xff]   ;;  %v8911_v34 = vld [vmem:[%s12942_s2 + $0x104] ss:$16 sps:$4 sm:$0xff]  }
 0x1e5   :  { %v8914_v35 = vld [vmem:[%s12942_s2 + $0x10c] ss:$16 sps:$4 sm:$0xff]   ;;  %v8909_v36 = vld [vmem:[%s12942_s2 + $0x100] ss:$16 sps:$4 sm:$0xff]   ;;  %v8918_v41 = vld [vmem:[%s12942_s2 + $0x128] ss:$16 sps:$4 sm:$0xff]  }
 0x1e6   :  { %3681 = vmatpush1.bf16.msra.mxu0 %v8134_v62  ;;  %v8866_v62 = vld [vmem:[%s12942_s2 + $0xc] ss:$16 sps:$4 sm:$0xff]   ;;  %v8923_v42 = vld [vmem:[%s12942_s2 + $0x144] ss:$16 sps:$4 sm:$0xff]   ;;  %v8921_v44 = vld [vmem:[%s12942_s2 + $0x140] ss:$16 sps:$4 sm:$0xff]  }
 0x1e7   :  { %3767 = vmatpush1.bf16.msra.mxu1 %v8136_v0  ;;  %3682 = vmatprep.subr.bf16.mxu0 %v8151_v1  ;;  %v8861_v0 = vld [vmem:[%s12942_s2] ss:$16 sps:$4 sm:$0xff]   ;;  %v8864_v1 = vld [vmem:[%s12942_s2 + $0x8] ss:$16 sps:$4 sm:$0xff]   ;;  %v8926_v43 = vld [vmem:[%s12942_s2 + $0x14c] ss:$16 sps:$4 sm:$0xff]  }
 0x1e8   :  { %3768 = vmatprep.subr.bf16.mxu1 %v8153_v2  ;;  %v8869_v2 = vld [vmem:[%s12942_s2 + $0x24] ss:$16 sps:$4 sm:$0xff]   ;;  %v8930_v49 = vld [vmem:[%s12942_s2 + $0x168] ss:$16 sps:$4 sm:$0xff]   ;;  %v8938_v51 = vld [vmem:[%s12942_s2 + $0x18c] ss:$16 sps:$4 sm:$0xff]  }
 0x1e9   :  { %v8935_v50 = vld [vmem:[%s12942_s2 + $0x184] ss:$16 sps:$4 sm:$0xff]   ;;  %v8933_v53 = vld [vmem:[%s12942_s2 + $0x180] ss:$16 sps:$4 sm:$0xff]  }
 0x1ea   :  { %3683 = vmatpush1.bf16.msra.mxu0 %v8150_v10  ;;  %v8873_v10 = vld [vmem:[%s12942_s2 + $0x40] ss:$16 sps:$4 sm:$0xff]  }
 0x1eb   :  { %3769 = vmatpush1.bf16.msra.mxu1 %v8152_v11  ;;  %3684 = vmatprep.subr.bf16.mxu0 %v8167_v12  ;;  %v8876_v11 = vld [vmem:[%s12942_s2 + $0x48] ss:$16 sps:$4 sm:$0xff]   ;;  %v8884_v12 = vld [vmem:[%s12942_s2 + $0x6c] ss:$16 sps:$4 sm:$0xff]  }
 0x1ec   :  { %3770 = vmatprep.subr.bf16.mxu1 %v8169_v13  ;;  %v8879_v13 = vld [vmem:[%s12942_s2 + $0x60] ss:$16 sps:$4 sm:$0xff]  }
 0x1ee   :  { %3685 = vmatpush1.bf16.msra.mxu0 %v8166_v19  ;;  %v8888_v19 = vld [vmem:[%s12942_s2 + $0x88] ss:$16 sps:$4 sm:$0xff]  }
 0x1ef   :  { %3771 = vmatpush1.bf16.msra.mxu1 %v8168_v20  ;;  %3686 = vmatprep.subr.bf16.mxu0 %v8183_v21  ;;  %v8893_v20 = vld [vmem:[%s12942_s2 + $0xa4] ss:$16 sps:$4 sm:$0xff]   ;;  %v8896_v21 = vld [vmem:[%s12942_s2 + $0xac] ss:$16 sps:$4 sm:$0xff]  }
 0x1f0   :  { %3772 = vmatprep.subr.bf16.mxu1 %v8185_v22  ;;  %v8891_v22 = vld [vmem:[%s12942_s2 + $0xa0] ss:$16 sps:$4 sm:$0xff]  }
 0x1f2   :  { %3687 = vmatpush1.bf16.msra.mxu0 %v8182_v29  ;;  %v8900_v29 = vld [vmem:[%s12942_s2 + $0xc8] ss:$16 sps:$4 sm:$0xff]  }
 0x1f3   :  { %3773 = vmatpush1.bf16.msra.mxu1 %v8184_v30  ;;  %3688 = vmatprep.subr.bf16.mxu0 %v8199_v31  ;;  %v8905_v30 = vld [vmem:[%s12942_s2 + $0xe4] ss:$16 sps:$4 sm:$0xff]   ;;  %v8908_v31 = vld [vmem:[%s12942_s2 + $0xec] ss:$16 sps:$4 sm:$0xff]  }
 0x1f4   :  { %3774 = vmatprep.subr.bf16.mxu1 %v8201_v32  ;;  %v8903_v32 = vld [vmem:[%s12942_s2 + $0xe0] ss:$16 sps:$4 sm:$0xff]  }
 0x1f6   :  { %3689 = vmatpush1.bf16.msra.mxu0 %v8198_v37  ;;  %v8912_v37 = vld [vmem:[%s12942_s2 + $0x108] ss:$16 sps:$4 sm:$0xff]  }
 0x1f7   :  { %3775 = vmatpush1.bf16.msra.mxu1 %v8200_v38  ;;  %3690 = vmatprep.subr.bf16.mxu0 %v8215_v39  ;;  %v8917_v38 = vld [vmem:[%s12942_s2 + $0x124] ss:$16 sps:$4 sm:$0xff]   ;;  %v8920_v39 = vld [vmem:[%s12942_s2 + $0x12c] ss:$16 sps:$4 sm:$0xff]  }
 0x1f8   :  { %3776 = vmatprep.subr.bf16.mxu1 %v8217_v40  ;;  %v8915_v40 = vld [vmem:[%s12942_s2 + $0x120] ss:$16 sps:$4 sm:$0xff]  }
 0x1fa   :  { %3691 = vmatpush1.bf16.msra.mxu0 %v8214_v45  ;;  %v8924_v45 = vld [vmem:[%s12942_s2 + $0x148] ss:$16 sps:$4 sm:$0xff]  }
 0x1fb   :  { %3777 = vmatpush1.bf16.msra.mxu1 %v8216_v46  ;;  %3692 = vmatprep.subr.bf16.mxu0 %v8231_v58  ;;  %v8929_v46 = vld [vmem:[%s12942_s2 + $0x164] ss:$16 sps:$4 sm:$0xff]   ;;  %v8932_v58 = vld [vmem:[%s12942_s2 + $0x16c] ss:$16 sps:$4 sm:$0xff]  }
 0x1fc   :  { %3778 = vmatprep.subr.bf16.mxu1 %v8233_v47  ;;  %v8927_v47 = vld [vmem:[%s12942_s2 + $0x160] ss:$16 sps:$4 sm:$0xff]  }
 0x1fe   :  { %3693 = vmatpush1.bf16.msra.mxu0 %v8230_v55  ;;  %v8936_v55 = vld [vmem:[%s12942_s2 + $0x188] ss:$16 sps:$4 sm:$0xff]  }
 0x1ff   :  { %3779 = vmatpush1.bf16.msra.mxu1 %v8232_v56  ;;  %3694 = vmatprep.subr.bf16.mxu0 %v8247_v57  ;;  %v8941_v56 = vld [vmem:[%s12942_s2 + $0x1a4] ss:$16 sps:$4 sm:$0xff]   ;;  %v8944_v57 = vld [vmem:[%s12942_s2 + $0x1ac] ss:$16 sps:$4 sm:$0xff]  }
 0x200   :  { %3780 = vmatprep.subr.bf16.mxu1 %v8249_v59  ;;  %v8939_v59 = vld [vmem:[%s12942_s2 + $0x1a0] ss:$16 sps:$4 sm:$0xff]  }
 0x202   :  { %3695 = vmatpush1.bf16.msra.mxu0 %v8246_v25  ;;  %v8942_v25 = vld [vmem:[%s12942_s2 + $0x1a8] ss:$16 sps:$4 sm:$0xff]  }
 0x203   :  { %3781 = vmatpush1.bf16.msra.mxu1 %v8248_v60  ;;  %6913 = vmatprep.subr.bf16.mxu0 %v8863_v61  ;;  %v8947_v60 = vld [vmem:[%s12942_s2 + $0x1c4] ss:$16 sps:$4 sm:$0xff]   ;;  %v8950_v61 = vld [vmem:[%s12942_s2 + $0x1cc] ss:$16 sps:$4 sm:$0xff]  }
 0x204   :  { %7257 = vmatprep.subr.bf16.mxu1 %v8866_v62  ;;  %v8945_v62 = vld [vmem:[%s12942_s2 + $0x1c0] ss:$16 sps:$4 sm:$0xff]  }
 0x205   :  { %3697 = vmatmul.mubr.bf16.vlgmr.msra.gmra.mrb[12].mxu0 %v10142_v28 }
 0x206   :  { %3783 = vmatmul.mubr.bf16.vlgmr.msra.gmra.mrb[12].mxu1 %v10142_v28  ;;  %6914 = vmatpush1.bf16.msra.mxu0 %v8861_v0  ;;  %v8878_v28 = vld [vmem:[%s12942_s2 + $0x4c] ss:$16 sps:$4 sm:$0xff]   ;;  %v8948_v0 = vld [vmem:[%s12942_s2 + $0x1c8] ss:$16 sps:$4 sm:$0xff]  }
 0x207   :  { %6945 = vmatprep.mubr.bf16.mxu0 %v10824_v4  ;;  %7258 = vmatpush1.bf16.msra.mxu1 %v8864_v1  ;;  %v8953_v1 = vld [vmem:[%s12942_s2 + $0x1e4] ss:$16 sps:$4 sm:$0xff]  }
 0x208   :  { %7289 = vmatprep.mubr.bf16.mxu1 %v10824_v4  ;;  %6915 = vmatprep.subr.bf16.mxu0 %v8869_v2  ;;  %v8881_v4 = vld [vmem:[%s12942_s2 + $0x64] ss:$16 sps:$4 sm:$0xff]   ;;  %v8956_v2 = vld [vmem:[%s12942_s2 + $0x1ec] ss:$16 sps:$4 sm:$0xff]  }
 0x209   :  { %7259 = vmatprep.subr.bf16.mxu1 %v8872_v5  ;;  %v8951_v5 = vld [vmem:[%s12942_s2 + $0x1e0] ss:$16 sps:$4 sm:$0xff]  }
 0x20a   :  { %6916 = vmatpush1.bf16.msra.mxu0 %v8867_v7  ;;  %v8954_v7 = vld [vmem:[%s12942_s2 + $0x1e8] ss:$16 sps:$4 sm:$0xff]  }
 0x20b   :  { %7260 = vmatpush1.bf16.msra.mxu1 %v8870_v8  ;;  %6917 = vmatprep.subr.bf16.mxu0 %v8875_v9  ;;  %v8959_v8 = vld [vmem:[%s12942_s2 + $0x204] ss:$16 sps:$4 sm:$0xff]   ;;  %v8962_v9 = vld [vmem:[%s12942_s2 + $0x20c] ss:$16 sps:$4 sm:$0xff]  }
 0x20c   :  { %7261 = vmatprep.subr.bf16.mxu1 %v8878_v28  ;;  %v8957_v28 = vld [vmem:[%s12942_s2 + $0x200] ss:$16 sps:$4 sm:$0xff]  }
 0x20e   :  { %6918 = vmatpush1.bf16.msra.mxu0 %v8873_v10  ;;  %v8960_v10 = vld [vmem:[%s12942_s2 + $0x208] ss:$16 sps:$4 sm:$0xff]  }
 0x20f   :  { %7262 = vmatpush1.bf16.msra.mxu1 %v8876_v11  ;;  %6919 = vmatprep.subr.bf16.mxu0 %v8881_v4  ;;  %v8965_v11 = vld [vmem:[%s12942_s2 + $0x224] ss:$16 sps:$4 sm:$0xff]   ;;  %v8968_v4 = vld [vmem:[%s12942_s2 + $0x22c] ss:$16 sps:$4 sm:$0xff]  }
 0x210   :  { %7263 = vmatprep.subr.bf16.mxu1 %v8884_v12  ;;  %v8963_v12 = vld [vmem:[%s12942_s2 + $0x220] ss:$16 sps:$4 sm:$0xff]  }
 0x212   :  { %6920 = vmatpush1.bf16.msra.mxu0 %v8879_v13  ;;  %v8966_v13 = vld [vmem:[%s12942_s2 + $0x228] ss:$16 sps:$4 sm:$0xff]  }
 0x213   :  { %7264 = vmatpush1.bf16.msra.mxu1 %v8882_v14  ;;  %6921 = vmatprep.subr.bf16.mxu0 %v8887_v16  ;;  %v8971_v14 = vld [vmem:[%s12942_s2 + $0x244] ss:$16 sps:$4 sm:$0xff]   ;;  %v8969_v16 = vld [vmem:[%s12942_s2 + $0x240] ss:$16 sps:$4 sm:$0xff]  }
 0x214   :  { %7265 = vmatprep.subr.bf16.mxu1 %v8890_v17  ;;  %v8972_v17 = vld [vmem:[%s12942_s2 + $0x248] ss:$16 sps:$4 sm:$0xff]  }
 0x216   :  { %6922 = vmatpush1.bf16.msra.mxu0 %v8885_v18  ;;  %v8980_v18 = vld [vmem:[%s12942_s2 + $0x26c] ss:$16 sps:$4 sm:$0xff]  }
 0x217   :  { %7266 = vmatpush1.bf16.msra.mxu1 %v8888_v19  ;;  %6923 = vmatprep.subr.bf16.mxu0 %v8893_v20  ;;  %v8975_v19 = vld [vmem:[%s12942_s2 + $0x260] ss:$16 sps:$4 sm:$0xff]   ;;  %v8978_v20 = vld [vmem:[%s12942_s2 + $0x268] ss:$16 sps:$4 sm:$0xff]  }
 0x218   :  { %7267 = vmatprep.subr.bf16.mxu1 %v8896_v21  ;;  %v8983_v21 = vld [vmem:[%s12942_s2 + $0x284] ss:$16 sps:$4 sm:$0xff]  }
 0x21a   :  { %6924 = vmatpush1.bf16.msra.mxu0 %v8891_v22  ;;  %v8986_v22 = vld [vmem:[%s12942_s2 + $0x28c] ss:$16 sps:$4 sm:$0xff]  }
 0x21b   :  { %7268 = vmatpush1.bf16.msra.mxu1 %v8894_v23  ;;  %6925 = vmatprep.subr.bf16.mxu0 %v8899_v24  ;;  %v8981_v23 = vld [vmem:[%s12942_s2 + $0x280] ss:$16 sps:$4 sm:$0xff]   ;;  %v8984_v24 = vld [vmem:[%s12942_s2 + $0x288] ss:$16 sps:$4 sm:$0xff]  }
 0x21c   :  { %7269 = vmatprep.subr.bf16.mxu1 %v8902_v26  ;;  %v8989_v26 = vld [vmem:[%s12942_s2 + $0x2a4] ss:$16 sps:$4 sm:$0xff]  }
 0x21e   :  { %6926 = vmatpush1.bf16.msra.mxu0 %v8897_v27  ;;  %v8992_v27 = vld [vmem:[%s12942_s2 + $0x2ac] ss:$16 sps:$4 sm:$0xff]  }
 0x21f   :  { %7270 = vmatpush1.bf16.msra.mxu1 %v8900_v29  ;;  %6927 = vmatprep.subr.bf16.mxu0 %v8905_v30  ;;  %v8987_v29 = vld [vmem:[%s12942_s2 + $0x2a0] ss:$16 sps:$4 sm:$0xff]   ;;  %v8990_v30 = vld [vmem:[%s12942_s2 + $0x2a8] ss:$16 sps:$4 sm:$0xff]  }
 0x220   :  { %7271 = vmatprep.subr.bf16.mxu1 %v8908_v31  ;;  %v8995_v31 = vld [vmem:[%s12942_s2 + $0x2c4] ss:$16 sps:$4 sm:$0xff]  }
 0x222   :  { %6928 = vmatpush1.bf16.msra.mxu0 %v8903_v32 }
 0x223   :  { %7272 = vmatpush1.bf16.msra.mxu1 %v8906_v33  ;;  %6929 = vmatprep.subr.bf16.mxu0 %v8911_v34  ;;  %v8998_v33 = vld [vmem:[%s12942_s2 + $0x2cc] ss:$16 sps:$4 sm:$0xff]  }
 0x224   :  { %7273 = vmatprep.subr.bf16.mxu1 %v8914_v35 }
 0x226   :  { %6930 = vmatpush1.bf16.msra.mxu0 %v8909_v36  ;;  %v8993_v36 = vld [vmem:[%s12942_s2 + $0x2c0] ss:$16 sps:$4 sm:$0xff]  }
 0x227   :  { %7274 = vmatpush1.bf16.msra.mxu1 %v8912_v37  ;;  %6931 = vmatprep.subr.bf16.mxu0 %v8917_v38 }
 0x228   :  { %7275 = vmatprep.subr.bf16.mxu1 %v8920_v39  ;;  %v8996_v39 = vld [vmem:[%s12942_s2 + $0x2c8] ss:$16 sps:$4 sm:$0xff]  }
 0x22a   :  { %6932 = vmatpush1.bf16.msra.mxu0 %v8915_v40  ;;  %v9001_v40 = vld [vmem:[%s12942_s2 + $0x2e4] ss:$16 sps:$4 sm:$0xff]  }
 0x22b   :  { %7276 = vmatpush1.bf16.msra.mxu1 %v8918_v41  ;;  %6933 = vmatprep.subr.bf16.mxu0 %v8923_v42 }
 0x22c   :  { %7277 = vmatprep.subr.bf16.mxu1 %v8926_v43 }
 0x22e   :  { %6934 = vmatpush1.bf16.msra.mxu0 %v8921_v44 }
 0x22f   :  { %7278 = vmatpush1.bf16.msra.mxu1 %v8924_v45  ;;  %6935 = vmatprep.subr.bf16.mxu0 %v8929_v46  ;;  %v9004_v45 = vld [vmem:[%s12942_s2 + $0x2ec] ss:$16 sps:$4 sm:$0xff]  }
 0x230   :  { %7279 = vmatprep.subr.bf16.mxu1 %v8932_v58 }
 0x232   :  { %6936 = vmatpush1.bf16.msra.mxu0 %v8927_v47 }
 0x233   :  { %7280 = vmatpush1.bf16.msra.mxu1 %v8930_v49  ;;  %6937 = vmatprep.subr.bf16.mxu0 %v8935_v50 }
 0x234   :  { %7281 = vmatprep.subr.bf16.mxu1 %v8938_v51 }
 0x236   :  { %6938 = vmatpush1.bf16.msra.mxu0 %v8933_v53 }
 0x237   :  { %7282 = vmatpush1.bf16.msra.mxu1 %v8936_v55  ;;  %6939 = vmatprep.subr.bf16.mxu0 %v8941_v56 }
 0x238   :  { %7283 = vmatprep.subr.bf16.mxu1 %v8944_v57 }
 0x23a   :  { %6940 = vmatpush1.bf16.msra.mxu0 %v8939_v59  ;;  %v8999_v59 = vld [vmem:[%s12942_s2 + $0x2e0] ss:$16 sps:$4 sm:$0xff]  }
 0x23b   :  { %7284 = vmatpush1.bf16.msra.mxu1 %v8942_v25  ;;  %6941 = vmatprep.subr.bf16.mxu0 %v8947_v60  ;;  %v9002_v60 = vld [vmem:[%s12942_s2 + $0x2e8] ss:$16 sps:$4 sm:$0xff]  }
 0x23c   :  { %7285 = vmatprep.subr.bf16.mxu1 %v8950_v61  ;;  %v9007_v61 = vld [vmem:[%s12942_s2 + $0x304] ss:$16 sps:$4 sm:$0xff]  }
 0x23e   :  { %6942 = vmatpush1.bf16.msra.mxu0 %v8945_v62  ;;  %v9010_v62 = vld [vmem:[%s12942_s2 + $0x30c] ss:$16 sps:$4 sm:$0xff]  }
 0x23f   :  { %7286 = vmatpush1.bf16.msra.mxu1 %v8948_v0  ;;  %6943 = vmatprep.subr.bf16.mxu0 %v8953_v1  ;;  %v9005_v0 = vld [vmem:[%s12942_s2 + $0x300] ss:$16 sps:$4 sm:$0xff]   ;;  %v9008_v1 = vld [vmem:[%s12942_s2 + $0x308] ss:$16 sps:$4 sm:$0xff]  }
 0x240   :  { %7287 = vmatprep.subr.bf16.mxu1 %v8956_v2  ;;  %v9013_v2 = vld [vmem:[%s12942_s2 + $0x324] ss:$16 sps:$4 sm:$0xff]  }
 0x242   :  { %6944 = vmatpush1.bf16.msra.mxu0 %v8951_v5  ;;  %v9016_v5 = vld [vmem:[%s12942_s2 + $0x32c] ss:$16 sps:$4 sm:$0xff]  }
 0x243   :  { %7288 = vmatpush1.bf16.msra.mxu1 %v8954_v7  ;;  %6956 = vmatprep.subr.bf16.mxu0 %v8959_v8  ;;  %v9011_v7 = vld [vmem:[%s12942_s2 + $0x320] ss:$16 sps:$4 sm:$0xff]   ;;  %v9014_v8 = vld [vmem:[%s12942_s2 + $0x328] ss:$16 sps:$4 sm:$0xff]  }
 0x244   :  { %7300 = vmatprep.subr.bf16.mxu1 %v8962_v9  ;;  %v9019_v9 = vld [vmem:[%s12942_s2 + $0x344] ss:$16 sps:$4 sm:$0xff]  }
 0x245   :  { %6946 = vmatmul.mubr.bf16.vlgmr.msra.gmra.mrb[16].mxu0 %v10814_v63 }
 0x246   :  { %7290 = vmatmul.mubr.bf16.vlgmr.msra.gmra.mrb[16].mxu1 %v10814_v63  ;;  %6957 = vmatpush1.bf16.msra.mxu0 %v8957_v28  ;;  %v8974_v63 = vld [vmem:[%s12942_s2 + $0x24c] ss:$16 sps:$4 sm:$0xff]  }
 0x247   :  { %6988 = vmatprep.mubr.bf16.mxu0 %v10826_v6  ;;  %7301 = vmatpush1.bf16.msra.mxu1 %v8960_v10  ;;  %v9022_v28 = vld [vmem:[%s12942_s2 + $0x34c] ss:$16 sps:$4 sm:$0xff]   ;;  %v9017_v10 = vld [vmem:[%s12942_s2 + $0x340] ss:$16 sps:$4 sm:$0xff]  }
 0x248   :  { %7332 = vmatprep.mubr.bf16.mxu1 %v10826_v6  ;;  %6958 = vmatprep.subr.bf16.mxu0 %v8965_v11  ;;  %v8977_v6 = vld [vmem:[%s12942_s2 + $0x264] ss:$16 sps:$4 sm:$0xff]   ;;  %v9020_v11 = vld [vmem:[%s12942_s2 + $0x348] ss:$16 sps:$4 sm:$0xff]  }
 0x249   :  { %7302 = vmatprep.subr.bf16.mxu1 %v8968_v4  ;;  %v9025_v4 = vld [vmem:[%s12942_s2 + $0x364] ss:$16 sps:$4 sm:$0xff]  }
 0x24a   :  { %6959 = vmatpush1.bf16.msra.mxu0 %v8963_v12  ;;  %v9028_v12 = vld [vmem:[%s12942_s2 + $0x36c] ss:$16 sps:$4 sm:$0xff]  }
 0x24b   :  { %7303 = vmatpush1.bf16.msra.mxu1 %v8966_v13  ;;  %6960 = vmatprep.subr.bf16.mxu0 %v8971_v14  ;;  %v9023_v13 = vld [vmem:[%s12942_s2 + $0x360] ss:$16 sps:$4 sm:$0xff]   ;;  %v9026_v14 = vld [vmem:[%s12942_s2 + $0x368] ss:$16 sps:$4 sm:$0xff]  }
 0x24c   :  { %7304 = vmatprep.subr.bf16.mxu1 %v8974_v63  ;;  %v9031_v63 = vld [vmem:[%s12942_s2 + $0x384] ss:$16 sps:$4 sm:$0xff]  }
 0x24e   :  { %6961 = vmatpush1.bf16.msra.mxu0 %v8969_v16  ;;  %v9034_v16 = vld [vmem:[%s12942_s2 + $0x38c] ss:$16 sps:$4 sm:$0xff]  }
 0x24f   :  { %7305 = vmatpush1.bf16.msra.mxu1 %v8972_v17  ;;  %6962 = vmatprep.subr.bf16.mxu0 %v8977_v6  ;;  %v9029_v17 = vld [vmem:[%s12942_s2 + $0x380] ss:$16 sps:$4 sm:$0xff]   ;;  %v9032_v6 = vld [vmem:[%s12942_s2 + $0x388] ss:$16 sps:$4 sm:$0xff]  }
 0x250   :  { %7306 = vmatprep.subr.bf16.mxu1 %v8980_v18  ;;  %v9037_v18 = vld [vmem:[%s12942_s2 + $0x3a4] ss:$16 sps:$4 sm:$0xff]  }
 0x252   :  { %6963 = vmatpush1.bf16.msra.mxu0 %v8975_v19  ;;  %v9040_v19 = vld [vmem:[%s12942_s2 + $0x3ac] ss:$16 sps:$4 sm:$0xff]  }
 0x253   :  { %7307 = vmatpush1.bf16.msra.mxu1 %v8978_v20  ;;  %6964 = vmatprep.subr.bf16.mxu0 %v8983_v21  ;;  %v9035_v20 = vld [vmem:[%s12942_s2 + $0x3a0] ss:$16 sps:$4 sm:$0xff]   ;;  %v9038_v21 = vld [vmem:[%s12942_s2 + $0x3a8] ss:$16 sps:$4 sm:$0xff]  }
 0x254   :  { %7308 = vmatprep.subr.bf16.mxu1 %v8986_v22  ;;  %v9043_v22 = vld [vmem:[%s12942_s2 + $0x3c4] ss:$16 sps:$4 sm:$0xff]  }
 0x256   :  { %6965 = vmatpush1.bf16.msra.mxu0 %v8981_v23  ;;  %v9046_v23 = vld [vmem:[%s12942_s2 + $0x3cc] ss:$16 sps:$4 sm:$0xff]  }
 0x257   :  { %7309 = vmatpush1.bf16.msra.mxu1 %v8984_v24  ;;  %6966 = vmatprep.subr.bf16.mxu0 %v8989_v26  ;;  %v9041_v24 = vld [vmem:[%s12942_s2 + $0x3c0] ss:$16 sps:$4 sm:$0xff]   ;;  %v9044_v26 = vld [vmem:[%s12942_s2 + $0x3c8] ss:$16 sps:$4 sm:$0xff]  }
 0x258   :  { %v3526_v32 = vpop.f32.mrb[8].mxu0  ;;  %7310 = vmatprep.subr.bf16.mxu1 %v8992_v27  ;;  %v9049_v27 = vld [vmem:[%s12942_s2 + $0x3e4] ss:$16 sps:$4 sm:$0xff]  }
 0x259   :  { %v3612_v34 = vpop.f32.mrb[8].mxu1  ;;  %v3528_v35 = vpop.f32.mrb[9].mxu0  ;;  %v3801_v41 = vmax.f32 %v3526_v32, 0.0  ;;  %v9055_v32 = vld [vmem:[%s12942_s2 + $0x404] ss:$16 sps:$4 sm:$0xff]  }
 0x25a   :  { %v3614_v37 = vpop.f32.mrb[9].mxu1  ;;  %v3530_v38 = vpop.f32.mrb[10].mxu0  ;;  %6967 = vmatpush1.bf16.msra.mxu0 %v8987_v29  ;;  %v3803_v46 = vmax.f32 %v3612_v34, 0.0  ;;  %v3802_v58 = vmax.f32 %v3528_v35, 0.0  ;;  %v9052_v29 = vld [vmem:[%s12942_s2 + $0x3ec] ss:$16 sps:$4 sm:$0xff]  }
 0x25b   :  { %v3817_v42 = vmax.f32 %v3530_v38, 0.0  ;;  %v3616_v43 = vpop.f32.mrb[10].mxu1  ;;  %7311 = vmatpush1.bf16.msra.mxu1 %v8990_v30  ;;  %v3532_v44 = vpop.f32.mrb[11].mxu0  ;;  %6968 = vmatprep.subr.bf16.mxu0 %v8995_v31  ;;  %v3804_v51 = vmax.f32 %v3614_v37, 0.0  ;;  %v9047_v30 = vld [vmem:[%s12942_s2 + $0x3e0] ss:$16 sps:$4 sm:$0xff]  }
 0x25c   :  { %v3819_v47 = vmax.f32 %v3616_v43, 0.0  ;;  %v3818_v49 = vmax.f32 %v3532_v44, 0.0  ;;  %v3618_v50 = vpop.f32.mrb[11].mxu1  ;;  %7312 = vmatprep.subr.bf16.mxu1 %v8998_v33  ;;  %v9050_v31 = vld [vmem:[%s12942_s2 + $0x3e8] ss:$16 sps:$4 sm:$0xff]  }
 0x25d   :  { %v11602_v53 = vpack.c.bf16 %v3817_v42, %v3801_v41  ;;  %v3820_v55 = vmax.f32 %v3618_v50, 0.0  ;;  %v9058_v33 = vld [vmem:[%s12942_s2 + $0x40c] ss:$16 sps:$4 sm:$0xff]   ;;  %v9053_v34 = vld [vmem:[%s12942_s2 + $0x400] ss:$16 sps:$4 sm:$0xff]  }
 0x25e   :  { %v11604_v56 = vpack.c.bf16 %v3819_v47, %v3803_v46  ;;  %v11606_v57 = vpack.c.bf16 %v3818_v49, %v3802_v58  ;;  %6969 = vmatpush1.bf16.msra.mxu0 %v8993_v36  ;;  %v9056_v35 = vld [vmem:[%s12942_s2 + $0x408] ss:$16 sps:$4 sm:$0xff]   ;;  %v9061_v36 = vld [vmem:[%s12942_s2 + $0x424] ss:$16 sps:$4 sm:$0xff]   ;;  %v9064_v37 = vld [vmem:[%s12942_s2 + $0x42c] ss:$16 sps:$4 sm:$0xff]  }
 0x25f   :  { %v11611_v25 = vpack.c.bf16 %v3820_v55, %v3804_v51  ;;  %7313 = vmatpush1.bf16.msra.mxu1 %v8996_v39  ;;  %6970 = vmatprep.subr.bf16.mxu0 %v9001_v40  ;;  %v9059_v38 = vld [vmem:[%s12942_s2 + $0x420] ss:$16 sps:$4 sm:$0xff]   ;;  %v9062_v39 = vld [vmem:[%s12942_s2 + $0x428] ss:$16 sps:$4 sm:$0xff]   ;;  %v9067_v40 = vld [vmem:[%s12942_s2 + $0x444] ss:$16 sps:$4 sm:$0xff]  }
 0x260   :  { %7314 = vmatprep.subr.bf16.mxu1 %v9004_v45  ;;  %v9065_v41 = vld [vmem:[%s12942_s2 + $0x440] ss:$16 sps:$4 sm:$0xff]   ;;  %v9068_v42 = vld [vmem:[%s12942_s2 + $0x448] ss:$16 sps:$4 sm:$0xff]   ;;  %v9076_v43 = vld [vmem:[%s12942_s2 + $0x46c] ss:$16 sps:$4 sm:$0xff]  }
 0x261   :  { %v9071_v44 = vld [vmem:[%s12942_s2 + $0x460] ss:$16 sps:$4 sm:$0xff]   ;;  %v9074_v45 = vld [vmem:[%s12942_s2 + $0x468] ss:$16 sps:$4 sm:$0xff]   ;;  %v9079_v46 = vld [vmem:[%s12942_s2 + $0x484] ss:$16 sps:$4 sm:$0xff]  }
 0x262   :  { %6971 = vmatpush1.bf16.msra.mxu0 %v8999_v59  ;;  %v9082_v58 = vld [vmem:[%s12942_s2 + $0x48c] ss:$16 sps:$4 sm:$0xff]   ;;  %v9077_v47 = vld [vmem:[%s12942_s2 + $0x480] ss:$16 sps:$4 sm:$0xff]   ;;  %v9080_v49 = vld [vmem:[%s12942_s2 + $0x488] ss:$16 sps:$4 sm:$0xff]  }
 0x263   :  { %7315 = vmatpush1.bf16.msra.mxu1 %v9002_v60  ;;  %6972 = vmatprep.subr.bf16.mxu0 %v9007_v61  ;;  %v9085_v50 = vld [vmem:[%s12942_s2 + $0x4a4] ss:$16 sps:$4 sm:$0xff]   ;;  %v9088_v51 = vld [vmem:[%s12942_s2 + $0x4ac] ss:$16 sps:$4 sm:$0xff]   ;;  %v9083_v55 = vld [vmem:[%s12942_s2 + $0x4a0] ss:$16 sps:$4 sm:$0xff]  }
 0x264   :  { %7316 = vmatprep.subr.bf16.mxu1 %v9010_v62  ;;  %v9086_v59 = vld [vmem:[%s12942_s2 + $0x4a8] ss:$16 sps:$4 sm:$0xff]   ;;  %v9091_v60 = vld [vmem:[%s12942_s2 + $0x4c4] ss:$16 sps:$4 sm:$0xff]   ;;  %v9094_v61 = vld [vmem:[%s12942_s2 + $0x4cc] ss:$16 sps:$4 sm:$0xff]  }
 0x265   :  { %v9089_v62 = vld [vmem:[%s12942_s2 + $0x4c0] ss:$16 sps:$4 sm:$0xff]  }
 0x266   :  { %6973 = vmatpush1.bf16.msra.mxu0 %v9005_v0  ;;  %v9092_v0 = vld [vmem:[%s12942_s2 + $0x4c8] ss:$16 sps:$4 sm:$0xff]  }
 0x267   :  { %7317 = vmatpush1.bf16.msra.mxu1 %v9008_v1  ;;  %6974 = vmatprep.subr.bf16.mxu0 %v9013_v2  ;;  %v9097_v1 = vld [vmem:[%s12942_s2 + $0x4e4] ss:$16 sps:$4 sm:$0xff]   ;;  %v9100_v2 = vld [vmem:[%s12942_s2 + $0x4ec] ss:$16 sps:$4 sm:$0xff]  }
 0x268   :  { %7318 = vmatprep.subr.bf16.mxu1 %v9016_v5  ;;  %v9095_v5 = vld [vmem:[%s12942_s2 + $0x4e0] ss:$16 sps:$4 sm:$0xff]  }
 0x26a   :  { %6975 = vmatpush1.bf16.msra.mxu0 %v9011_v7  ;;  %v9098_v7 = vld [vmem:[%s12942_s2 + $0x4e8] ss:$16 sps:$4 sm:$0xff]  }
 0x26b   :  { %7319 = vmatpush1.bf16.msra.mxu1 %v9014_v8  ;;  %6976 = vmatprep.subr.bf16.mxu0 %v9019_v9  ;;  %v9103_v8 = vld [vmem:[%s12942_s2 + $0x504] ss:$16 sps:$4 sm:$0xff]   ;;  %v9106_v9 = vld [vmem:[%s12942_s2 + $0x50c] ss:$16 sps:$4 sm:$0xff]  }
 0x26c   :  { %7320 = vmatprep.subr.bf16.mxu1 %v9022_v28  ;;  %v9101_v28 = vld [vmem:[%s12942_s2 + $0x500] ss:$16 sps:$4 sm:$0xff]  }
 0x26e   :  { %6977 = vmatpush1.bf16.msra.mxu0 %v9017_v10  ;;  %v9104_v10 = vld [vmem:[%s12942_s2 + $0x508] ss:$16 sps:$4 sm:$0xff]  }
 0x26f   :  { %7321 = vmatpush1.bf16.msra.mxu1 %v9020_v11  ;;  %6978 = vmatprep.subr.bf16.mxu0 %v9025_v4  ;;  %v9109_v11 = vld [vmem:[%s12942_s2 + $0x524] ss:$16 sps:$4 sm:$0xff]   ;;  %v9112_v4 = vld [vmem:[%s12942_s2 + $0x52c] ss:$16 sps:$4 sm:$0xff]  }
 0x270   :  { %7322 = vmatprep.subr.bf16.mxu1 %v9028_v12  ;;  %v9107_v12 = vld [vmem:[%s12942_s2 + $0x520] ss:$16 sps:$4 sm:$0xff]  }
 0x272   :  { %6979 = vmatpush1.bf16.msra.mxu0 %v9023_v13  ;;  %v9110_v13 = vld [vmem:[%s12942_s2 + $0x528] ss:$16 sps:$4 sm:$0xff]  }
 0x273   :  { %7323 = vmatpush1.bf16.msra.mxu1 %v9026_v14  ;;  %6980 = vmatprep.subr.bf16.mxu0 %v9031_v63  ;;  %v9115_v14 = vld [vmem:[%s12942_s2 + $0x544] ss:$16 sps:$4 sm:$0xff]   ;;  %v9118_v63 = vld [vmem:[%s12942_s2 + $0x54c] ss:$16 sps:$4 sm:$0xff]  }
 0x274   :  { %7324 = vmatprep.subr.bf16.mxu1 %v9034_v16  ;;  %v9113_v16 = vld [vmem:[%s12942_s2 + $0x540] ss:$16 sps:$4 sm:$0xff]  }
 0x276   :  { %6981 = vmatpush1.bf16.msra.mxu0 %v9029_v17  ;;  %v9116_v17 = vld [vmem:[%s12942_s2 + $0x548] ss:$16 sps:$4 sm:$0xff]  }
 0x277   :  { %7325 = vmatpush1.bf16.msra.mxu1 %v9032_v6  ;;  %6982 = vmatprep.subr.bf16.mxu0 %v9037_v18  ;;  %v9121_v6 = vld [vmem:[%s12942_s2 + $0x564] ss:$16 sps:$4 sm:$0xff]   ;;  %v9124_v18 = vld [vmem:[%s12942_s2 + $0x56c] ss:$16 sps:$4 sm:$0xff]  }
 0x278   :  { %7326 = vmatprep.subr.bf16.mxu1 %v9040_v19  ;;  %v9119_v19 = vld [vmem:[%s12942_s2 + $0x560] ss:$16 sps:$4 sm:$0xff]  }
 0x27a   :  { %6983 = vmatpush1.bf16.msra.mxu0 %v9035_v20  ;;  %v9122_v20 = vld [vmem:[%s12942_s2 + $0x568] ss:$16 sps:$4 sm:$0xff]  }
 0x27b   :  { %7327 = vmatpush1.bf16.msra.mxu1 %v9038_v21  ;;  %6984 = vmatprep.subr.bf16.mxu0 %v9043_v22  ;;  %v9127_v21 = vld [vmem:[%s12942_s2 + $0x584] ss:$16 sps:$4 sm:$0xff]   ;;  %v9130_v22 = vld [vmem:[%s12942_s2 + $0x58c] ss:$16 sps:$4 sm:$0xff]  }
 0x27c   :  { %7328 = vmatprep.subr.bf16.mxu1 %v9046_v23  ;;  %v9125_v23 = vld [vmem:[%s12942_s2 + $0x580] ss:$16 sps:$4 sm:$0xff]  }
 0x27e   :  { %6985 = vmatpush1.bf16.msra.mxu0 %v9041_v24  ;;  %v9128_v24 = vld [vmem:[%s12942_s2 + $0x588] ss:$16 sps:$4 sm:$0xff]  }
 0x27f   :  { %7329 = vmatpush1.bf16.msra.mxu1 %v9044_v26  ;;  %6986 = vmatprep.subr.bf16.mxu0 %v9049_v27  ;;  %v9133_v26 = vld [vmem:[%s12942_s2 + $0x5a4] ss:$16 sps:$4 sm:$0xff]   ;;  %v9136_v27 = vld [vmem:[%s12942_s2 + $0x5ac] ss:$16 sps:$4 sm:$0xff]  }
 0x280   :  { %7330 = vmatprep.subr.bf16.mxu1 %v9052_v29  ;;  %v9131_v29 = vld [vmem:[%s12942_s2 + $0x5a0] ss:$16 sps:$4 sm:$0xff]  }
 0x282   :  { %6987 = vmatpush1.bf16.msra.mxu0 %v9047_v30  ;;  %v9134_v30 = vld [vmem:[%s12942_s2 + $0x5a8] ss:$16 sps:$4 sm:$0xff]  }
 0x283   :  { %7331 = vmatpush1.bf16.msra.mxu1 %v9050_v31  ;;  %6999 = vmatprep.subr.bf16.mxu0 %v9055_v32  ;;  %v9139_v31 = vld [vmem:[%s12942_s2 + $0x5c4] ss:$16 sps:$4 sm:$0xff]   ;;  %v9142_v32 = vld [vmem:[%s12942_s2 + $0x5cc] ss:$16 sps:$4 sm:$0xff]  }
 0x284   :  { %7343 = vmatprep.subr.bf16.mxu1 %v9058_v33  ;;  %v9137_v33 = vld [vmem:[%s12942_s2 + $0x5c0] ss:$16 sps:$4 sm:$0xff]  }
 0x285   :  { %6989 = vmatmul.mubr.bf16.vlgmr.msra.gmra.mrb[16].mxu0 %v10822_v3 }
 0x286   :  { %7333 = vmatmul.mubr.bf16.vlgmr.msra.gmra.mrb[16].mxu1 %v10822_v3  ;;  %7000 = vmatpush1.bf16.msra.mxu0 %v9053_v34  ;;  %v9070_v3 = vld [vmem:[%s12942_s2 + $0x44c] ss:$16 sps:$4 sm:$0xff]   ;;  %v9140_v34 = vld [vmem:[%s12942_s2 + $0x5c8] ss:$16 sps:$4 sm:$0xff]  }
 0x287   :  { %7031 = vmatprep.mubr.bf16.mxu0 %v11224_v52  ;;  %7344 = vmatpush1.bf16.msra.mxu1 %v9056_v35  ;;  %v9145_v35 = vld [vmem:[%s12942_s2 + $0x5e4] ss:$16 sps:$4 sm:$0xff]  }
 0x288   :  { %7375 = vmatprep.mubr.bf16.mxu1 %v11224_v52  ;;  %7001 = vmatprep.subr.bf16.mxu0 %v9061_v36  ;;  %v9073_v52 = vld [vmem:[%s12942_s2 + $0x464] ss:$16 sps:$4 sm:$0xff]   ;;  %v9148_v36 = vld [vmem:[%s12942_s2 + $0x5ec] ss:$16 sps:$4 sm:$0xff]  }
 0x289   :  { %7345 = vmatprep.subr.bf16.mxu1 %v9064_v37  ;;  %v9143_v37 = vld [vmem:[%s12942_s2 + $0x5e0] ss:$16 sps:$4 sm:$0xff]  }
 0x28a   :  { %7002 = vmatpush1.bf16.msra.mxu0 %v9059_v38  ;;  %v9146_v38 = vld [vmem:[%s12942_s2 + $0x5e8] ss:$16 sps:$4 sm:$0xff]  }
 0x28b   :  { %7346 = vmatpush1.bf16.msra.mxu1 %v9062_v39  ;;  %7003 = vmatprep.subr.bf16.mxu0 %v9067_v40  ;;  %v9151_v39 = vld [vmem:[%s12942_s2 + $0x604] ss:$16 sps:$4 sm:$0xff]   ;;  %v9154_v40 = vld [vmem:[%s12942_s2 + $0x60c] ss:$16 sps:$4 sm:$0xff]  }
 0x28c   :  { %7347 = vmatprep.subr.bf16.mxu1 %v9070_v3  ;;  %v9149_v3 = vld [vmem:[%s12942_s2 + $0x600] ss:$16 sps:$4 sm:$0xff]  }
 0x28e   :  { %7004 = vmatpush1.bf16.msra.mxu0 %v9065_v41  ;;  %v9152_v41 = vld [vmem:[%s12942_s2 + $0x608] ss:$16 sps:$4 sm:$0xff]  }
 0x28f   :  { %7348 = vmatpush1.bf16.msra.mxu1 %v9068_v42  ;;  %7005 = vmatprep.subr.bf16.mxu0 %v9073_v52  ;;  %v9157_v42 = vld [vmem:[%s12942_s2 + $0x624] ss:$16 sps:$4 sm:$0xff]   ;;  %v9160_v52 = vld [vmem:[%s12942_s2 + $0x62c] ss:$16 sps:$4 sm:$0xff]  }
 0x290   :  { %7349 = vmatprep.subr.bf16.mxu1 %v9076_v43  ;;  %v9155_v43 = vld [vmem:[%s12942_s2 + $0x620] ss:$16 sps:$4 sm:$0xff]  }
 0x292   :  { %7006 = vmatpush1.bf16.msra.mxu0 %v9071_v44  ;;  %v9158_v44 = vld [vmem:[%s12942_s2 + $0x628] ss:$16 sps:$4 sm:$0xff]  }
 0x293   :  { %7350 = vmatpush1.bf16.msra.mxu1 %v9074_v45  ;;  %7007 = vmatprep.subr.bf16.mxu0 %v9079_v46  ;;  %v9163_v45 = vld [vmem:[%s12942_s2 + $0x644] ss:$16 sps:$4 sm:$0xff]   ;;  %v9161_v46 = vld [vmem:[%s12942_s2 + $0x640] ss:$16 sps:$4 sm:$0xff]  }
 0x294   :  { %7351 = vmatprep.subr.bf16.mxu1 %v9082_v58  ;;  %v9164_v58 = vld [vmem:[%s12942_s2 + $0x648] ss:$16 sps:$4 sm:$0xff]  }
 0x296   :  { %7008 = vmatpush1.bf16.msra.mxu0 %v9077_v47  ;;  %v9172_v47 = vld [vmem:[%s12942_s2 + $0x66c] ss:$16 sps:$4 sm:$0xff]  }
 0x297   :  { %7352 = vmatpush1.bf16.msra.mxu1 %v9080_v49  ;;  %7009 = vmatprep.subr.bf16.mxu0 %v9085_v50  ;;  %v9167_v49 = vld [vmem:[%s12942_s2 + $0x660] ss:$16 sps:$4 sm:$0xff]   ;;  %v9170_v50 = vld [vmem:[%s12942_s2 + $0x668] ss:$16 sps:$4 sm:$0xff]  }
 0x298   :  { %7353 = vmatprep.subr.bf16.mxu1 %v9088_v51  ;;  %v9175_v51 = vld [vmem:[%s12942_s2 + $0x684] ss:$16 sps:$4 sm:$0xff]  }
 0x29a   :  { %7010 = vmatpush1.bf16.msra.mxu0 %v9083_v55  ;;  %v9178_v55 = vld [vmem:[%s12942_s2 + $0x68c] ss:$16 sps:$4 sm:$0xff]  }
 0x29b   :  { %7354 = vmatpush1.bf16.msra.mxu1 %v9086_v59  ;;  %7011 = vmatprep.subr.bf16.mxu0 %v9091_v60  ;;  %v9173_v59 = vld [vmem:[%s12942_s2 + $0x680] ss:$16 sps:$4 sm:$0xff]   ;;  %v9176_v60 = vld [vmem:[%s12942_s2 + $0x688] ss:$16 sps:$4 sm:$0xff]  }
 0x29c   :  { %7355 = vmatprep.subr.bf16.mxu1 %v9094_v61  ;;  %v9181_v61 = vld [vmem:[%s12942_s2 + $0x6a4] ss:$16 sps:$4 sm:$0xff]  }
 0x29e   :  { %7012 = vmatpush1.bf16.msra.mxu0 %v9089_v62  ;;  %v9184_v62 = vld [vmem:[%s12942_s2 + $0x6ac] ss:$16 sps:$4 sm:$0xff]  }
 0x29f   :  { %7356 = vmatpush1.bf16.msra.mxu1 %v9092_v0  ;;  %7013 = vmatprep.subr.bf16.mxu0 %v9097_v1  ;;  %v9179_v0 = vld [vmem:[%s12942_s2 + $0x6a0] ss:$16 sps:$4 sm:$0xff]   ;;  %v9182_v1 = vld [vmem:[%s12942_s2 + $0x6a8] ss:$16 sps:$4 sm:$0xff]  }
 0x2a0   :  { %7357 = vmatprep.subr.bf16.mxu1 %v9100_v2  ;;  %v9187_v2 = vld [vmem:[%s12942_s2 + $0x6c4] ss:$16 sps:$4 sm:$0xff]  }
 0x2a2   :  { %7014 = vmatpush1.bf16.msra.mxu0 %v9095_v5 }
 0x2a3   :  { %7358 = vmatpush1.bf16.msra.mxu1 %v9098_v7  ;;  %7015 = vmatprep.subr.bf16.mxu0 %v9103_v8  ;;  %v9190_v7 = vld [vmem:[%s12942_s2 + $0x6cc] ss:$16 sps:$4 sm:$0xff]  }
 0x2a4   :  { %7359 = vmatprep.subr.bf16.mxu1 %v9106_v9 }
 0x2a6   :  { %7016 = vmatpush1.bf16.msra.mxu0 %v9101_v28  ;;  %v9185_v28 = vld [vmem:[%s12942_s2 + $0x6c0] ss:$16 sps:$4 sm:$0xff]  }
 0x2a7   :  { %7360 = vmatpush1.bf16.msra.mxu1 %v9104_v10  ;;  %7017 = vmatprep.subr.bf16.mxu0 %v9109_v11 }
 0x2a8   :  { %7361 = vmatprep.subr.bf16.mxu1 %v9112_v4  ;;  %v9188_v4 = vld [vmem:[%s12942_s2 + $0x6c8] ss:$16 sps:$4 sm:$0xff]  }
 0x2aa   :  { %7018 = vmatpush1.bf16.msra.mxu0 %v9107_v12  ;;  %v9193_v12 = vld [vmem:[%s12942_s2 + $0x6e4] ss:$16 sps:$4 sm:$0xff]  }
 0x2ab   :  { %7362 = vmatpush1.bf16.msra.mxu1 %v9110_v13  ;;  %7019 = vmatprep.subr.bf16.mxu0 %v9115_v14 }
 0x2ac   :  { %7363 = vmatprep.subr.bf16.mxu1 %v9118_v63 }
 0x2ae   :  { %7020 = vmatpush1.bf16.msra.mxu0 %v9113_v16 }
 0x2af   :  { %7364 = vmatpush1.bf16.msra.mxu1 %v9116_v17  ;;  %7021 = vmatprep.subr.bf16.mxu0 %v9121_v6  ;;  %v9196_v17 = vld [vmem:[%s12942_s2 + $0x6ec] ss:$16 sps:$4 sm:$0xff]  }
 0x2b0   :  { %7365 = vmatprep.subr.bf16.mxu1 %v9124_v18 }
 0x2b2   :  { %7022 = vmatpush1.bf16.msra.mxu0 %v9119_v19 }
 0x2b3   :  { %7366 = vmatpush1.bf16.msra.mxu1 %v9122_v20  ;;  %7023 = vmatprep.subr.bf16.mxu0 %v9127_v21 }
 0x2b4   :  { %7367 = vmatprep.subr.bf16.mxu1 %v9130_v22 }
 0x2b6   :  { %7024 = vmatpush1.bf16.msra.mxu0 %v9125_v23 }
 0x2b7   :  { %7368 = vmatpush1.bf16.msra.mxu1 %v9128_v24  ;;  %7025 = vmatprep.subr.bf16.mxu0 %v9133_v26 }
 0x2b8   :  { %7369 = vmatprep.subr.bf16.mxu1 %v9136_v27 }
 0x2ba   :  { %7026 = vmatpush1.bf16.msra.mxu0 %v9131_v29  ;;  %v9191_v29 = vld [vmem:[%s12942_s2 + $0x6e0] ss:$16 sps:$4 sm:$0xff]  }
 0x2bb   :  { %7370 = vmatpush1.bf16.msra.mxu1 %v9134_v30  ;;  %7027 = vmatprep.subr.bf16.mxu0 %v9139_v31  ;;  %v9194_v31 = vld [vmem:[%s12942_s2 + $0x6e8] ss:$16 sps:$4 sm:$0xff]  }
 0x2bc   :  { %7371 = vmatprep.subr.bf16.mxu1 %v9142_v32  ;;  %v9199_v32 = vld [vmem:[%s12942_s2 + $0x704] ss:$16 sps:$4 sm:$0xff]  }
 0x2be   :  { %7028 = vmatpush1.bf16.msra.mxu0 %v9137_v33  ;;  %v9202_v33 = vld [vmem:[%s12942_s2 + $0x70c] ss:$16 sps:$4 sm:$0xff]  }
 0x2bf   :  { %7372 = vmatpush1.bf16.msra.mxu1 %v9140_v34  ;;  %7029 = vmatprep.subr.bf16.mxu0 %v9145_v35  ;;  %v9197_v34 = vld [vmem:[%s12942_s2 + $0x700] ss:$16 sps:$4 sm:$0xff]   ;;  %v9200_v35 = vld [vmem:[%s12942_s2 + $0x708] ss:$16 sps:$4 sm:$0xff]  }
 0x2c0   :  { %7373 = vmatprep.subr.bf16.mxu1 %v9148_v36  ;;  %v9205_v36 = vld [vmem:[%s12942_s2 + $0x724] ss:$16 sps:$4 sm:$0xff]  }
 0x2c2   :  { %7030 = vmatpush1.bf16.msra.mxu0 %v9143_v37  ;;  %v9208_v37 = vld [vmem:[%s12942_s2 + $0x72c] ss:$16 sps:$4 sm:$0xff]  }
 0x2c3   :  { %7374 = vmatpush1.bf16.msra.mxu1 %v9146_v38  ;;  %7042 = vmatprep.subr.bf16.mxu0 %v9151_v39  ;;  %v9203_v38 = vld [vmem:[%s12942_s2 + $0x720] ss:$16 sps:$4 sm:$0xff]   ;;  %v9206_v39 = vld [vmem:[%s12942_s2 + $0x728] ss:$16 sps:$4 sm:$0xff]  }
 0x2c4   :  { %7386 = vmatprep.subr.bf16.mxu1 %v9154_v40  ;;  %v9211_v40 = vld [vmem:[%s12942_s2 + $0x744] ss:$16 sps:$4 sm:$0xff]  }
 0x2c5   :  { %7032 = vmatmul.mubr.bf16.vlgmr.msra.gmra.mrb[16].mxu0 %v11214_v48 }
 0x2c6   :  { %7376 = vmatmul.mubr.bf16.vlgmr.msra.gmra.mrb[16].mxu1 %v11214_v48  ;;  %7043 = vmatpush1.bf16.msra.mxu0 %v9149_v3  ;;  %v9166_v48 = vld [vmem:[%s12942_s2 + $0x64c] ss:$16 sps:$4 sm:$0xff]  }
 0x2c7   :  { %7074 = vmatprep.mubr.bf16.mxu0 %v11226_v54  ;;  %7387 = vmatpush1.bf16.msra.mxu1 %v9152_v41  ;;  %v9214_v3 = vld [vmem:[%s12942_s2 + $0x74c] ss:$16 sps:$4 sm:$0xff]   ;;  %v9209_v41 = vld [vmem:[%s12942_s2 + $0x740] ss:$16 sps:$4 sm:$0xff]  }
 0x2c8   :  { %7418 = vmatprep.mubr.bf16.mxu1 %v11226_v54  ;;  %7044 = vmatprep.subr.bf16.mxu0 %v9157_v42  ;;  %v9169_v54 = vld [vmem:[%s12942_s2 + $0x664] ss:$16 sps:$4 sm:$0xff]   ;;  %v9212_v42 = vld [vmem:[%s12942_s2 + $0x748] ss:$16 sps:$4 sm:$0xff]  }
 0x2c9   :  { %7388 = vmatprep.subr.bf16.mxu1 %v9160_v52  ;;  %v9217_v52 = vld [vmem:[%s12942_s2 + $0x764] ss:$16 sps:$4 sm:$0xff]  }
 0x2ca   :  { %7045 = vmatpush1.bf16.msra.mxu0 %v9155_v43  ;;  %v9220_v43 = vld [vmem:[%s12942_s2 + $0x76c] ss:$16 sps:$4 sm:$0xff]  }
 0x2cb   :  { %7389 = vmatpush1.bf16.msra.mxu1 %v9158_v44  ;;  %7046 = vmatprep.subr.bf16.mxu0 %v9163_v45  ;;  %v9215_v44 = vld [vmem:[%s12942_s2 + $0x760] ss:$16 sps:$4 sm:$0xff]   ;;  %v9218_v45 = vld [vmem:[%s12942_s2 + $0x768] ss:$16 sps:$4 sm:$0xff]  }
 0x2cc   :  { %7390 = vmatprep.subr.bf16.mxu1 %v9166_v48  ;;  %v9223_v48 = vld [vmem:[%s12942_s2 + $0x784] ss:$16 sps:$4 sm:$0xff]  }
 0x2ce   :  { %7047 = vmatpush1.bf16.msra.mxu0 %v9161_v46  ;;  %v9226_v46 = vld [vmem:[%s12942_s2 + $0x78c] ss:$16 sps:$4 sm:$0xff]  }
 0x2cf   :  { %7391 = vmatpush1.bf16.msra.mxu1 %v9164_v58  ;;  %7048 = vmatprep.subr.bf16.mxu0 %v9169_v54  ;;  %v9221_v58 = vld [vmem:[%s12942_s2 + $0x780] ss:$16 sps:$4 sm:$0xff]   ;;  %v9224_v54 = vld [vmem:[%s12942_s2 + $0x788] ss:$16 sps:$4 sm:$0xff]  }
 0x2d0   :  { %7392 = vmatprep.subr.bf16.mxu1 %v9172_v47  ;;  %v9229_v47 = vld [vmem:[%s12942_s2 + $0x7a4] ss:$16 sps:$4 sm:$0xff]  }
 0x2d2   :  { %7049 = vmatpush1.bf16.msra.mxu0 %v9167_v49  ;;  %v9232_v49 = vld [vmem:[%s12942_s2 + $0x7ac] ss:$16 sps:$4 sm:$0xff]  }
 0x2d3   :  { %7393 = vmatpush1.bf16.msra.mxu1 %v9170_v50  ;;  %7050 = vmatprep.subr.bf16.mxu0 %v9175_v51  ;;  %v9227_v50 = vld [vmem:[%s12942_s2 + $0x7a0] ss:$16 sps:$4 sm:$0xff]   ;;  %v9230_v51 = vld [vmem:[%s12942_s2 + $0x7a8] ss:$16 sps:$4 sm:$0xff]  }
 0x2d4   :  { %7394 = vmatprep.subr.bf16.mxu1 %v9178_v55  ;;  %v9235_v55 = vld [vmem:[%s12942_s2 + $0x7c4] ss:$16 sps:$4 sm:$0xff]  }
 0x2d6   :  { %7051 = vmatpush1.bf16.msra.mxu0 %v9173_v59  ;;  %v9238_v59 = vld [vmem:[%s12942_s2 + $0x7cc] ss:$16 sps:$4 sm:$0xff]  }
 0x2d7   :  { %7395 = vmatpush1.bf16.msra.mxu1 %v9176_v60  ;;  %7052 = vmatprep.subr.bf16.mxu0 %v9181_v61  ;;  %v9233_v60 = vld [vmem:[%s12942_s2 + $0x7c0] ss:$16 sps:$4 sm:$0xff]   ;;  %v9236_v61 = vld [vmem:[%s12942_s2 + $0x7c8] ss:$16 sps:$4 sm:$0xff]  }
 0x2d8   :  { %v3698_v5 = vpop.f32.mrb[12].mxu0  ;;  %7396 = vmatprep.subr.bf16.mxu1 %v9184_v62  ;;  %v9241_v62 = vld [vmem:[%s12942_s2 + $0x7e4] ss:$16 sps:$4 sm:$0xff]  }
 0x2d9   :  { %v3784_v8 = vpop.f32.mrb[12].mxu1  ;;  %v3700_v9 = vpop.f32.mrb[13].mxu0  ;;  %v3805_v13 = vmax.f32 %v3698_v5, 0.0  ;;  %v9247_v5 = vld [vmem:[%s12942_s2 + $0x804] ss:$16 sps:$4 sm:$0xff]  }
 0x2da   :  { %v3786_v10 = vpop.f32.mrb[13].mxu1  ;;  %v3702_v11 = vpop.f32.mrb[14].mxu0  ;;  %7053 = vmatpush1.bf16.msra.mxu0 %v9179_v0  ;;  %v3807_v6 = vmax.f32 %v3784_v8, 0.0  ;;  %v3806_v18 = vmax.f32 %v3700_v9, 0.0  ;;  %v9244_v0 = vld [vmem:[%s12942_s2 + $0x7ec] ss:$16 sps:$4 sm:$0xff]  }
 0x2db   :  { %v3821_v14 = vmax.f32 %v3702_v11, 0.0  ;;  %v3788_v63 = vpop.f32.mrb[14].mxu1  ;;  %7397 = vmatpush1.bf16.msra.mxu1 %v9182_v1  ;;  %v3704_v16 = vpop.f32.mrb[15].mxu0  ;;  %7054 = vmatprep.subr.bf16.mxu0 %v9187_v2  ;;  %v3808_v22 = vmax.f32 %v3786_v10, 0.0  ;;  %v9239_v1 = vld [vmem:[%s12942_s2 + $0x7e0] ss:$16 sps:$4 sm:$0xff]  }
 0x2dc   :  { %v3823_v19 = vmax.f32 %v3788_v63, 0.0  ;;  %v3822_v20 = vmax.f32 %v3704_v16, 0.0  ;;  %v3790_v21 = vpop.f32.mrb[15].mxu1  ;;  %7398 = vmatprep.subr.bf16.mxu1 %v9190_v7  ;;  %v9242_v2 = vld [vmem:[%s12942_s2 + $0x7e8] ss:$16 sps:$4 sm:$0xff]  }
 0x2dd   :  { %v12002_v23 = vpack.c.bf16 %v3821_v14, %v3805_v13  ;;  %v3824_v24 = vmax.f32 %v3790_v21, 0.0  ;;  %v9250_v7 = vld [vmem:[%s12942_s2 + $0x80c] ss:$16 sps:$4 sm:$0xff]   ;;  %v9245_v8 = vld [vmem:[%s12942_s2 + $0x800] ss:$16 sps:$4 sm:$0xff]  }
 0x2de   :  { %v12004_v26 = vpack.c.bf16 %v3823_v19, %v3807_v6  ;;  %v12006_v27 = vpack.c.bf16 %v3822_v20, %v3806_v18  ;;  %7055 = vmatpush1.bf16.msra.mxu0 %v9185_v28  ;;  %v9248_v9 = vld [vmem:[%s12942_s2 + $0x808] ss:$16 sps:$4 sm:$0xff]   ;;  %v9253_v28 = vld [vmem:[%s12942_s2 + $0x824] ss:$16 sps:$4 sm:$0xff]   ;;  %v9256_v10 = vld [vmem:[%s12942_s2 + $0x82c] ss:$16 sps:$4 sm:$0xff]  }
 0x2df   :  { %v12011_v30 = vpack.c.bf16 %v3824_v24, %v3808_v22  ;;  %7399 = vmatpush1.bf16.msra.mxu1 %v9188_v4  ;;  %7056 = vmatprep.subr.bf16.mxu0 %v9193_v12  ;;  %v9251_v11 = vld [vmem:[%s12942_s2 + $0x820] ss:$16 sps:$4 sm:$0xff]   ;;  %v9254_v4 = vld [vmem:[%s12942_s2 + $0x828] ss:$16 sps:$4 sm:$0xff]   ;;  %v9259_v12 = vld [vmem:[%s12942_s2 + $0x844] ss:$16 sps:$4 sm:$0xff]  }
 0x2e0   :  { %7400 = vmatprep.subr.bf16.mxu1 %v9196_v17  ;;  %v9257_v13 = vld [vmem:[%s12942_s2 + $0x840] ss:$16 sps:$4 sm:$0xff]   ;;  %v9260_v14 = vld [vmem:[%s12942_s2 + $0x848] ss:$16 sps:$4 sm:$0xff]   ;;  %v9268_v63 = vld [vmem:[%s12942_s2 + $0x86c] ss:$16 sps:$4 sm:$0xff]  }
 0x2e1   :  { %v9263_v16 = vld [vmem:[%s12942_s2 + $0x860] ss:$16 sps:$4 sm:$0xff]   ;;  %v9266_v17 = vld [vmem:[%s12942_s2 + $0x868] ss:$16 sps:$4 sm:$0xff]   ;;  %v9271_v6 = vld [vmem:[%s12942_s2 + $0x884] ss:$16 sps:$4 sm:$0xff]  }
 0x2e2   :  { %7057 = vmatpush1.bf16.msra.mxu0 %v9191_v29  ;;  %v9274_v18 = vld [vmem:[%s12942_s2 + $0x88c] ss:$16 sps:$4 sm:$0xff]   ;;  %v9269_v19 = vld [vmem:[%s12942_s2 + $0x880] ss:$16 sps:$4 sm:$0xff]   ;;  %v9272_v20 = vld [vmem:[%s12942_s2 + $0x888] ss:$16 sps:$4 sm:$0xff]  }
 0x2e3   :  { %7401 = vmatpush1.bf16.msra.mxu1 %v9194_v31  ;;  %7058 = vmatprep.subr.bf16.mxu0 %v9199_v32  ;;  %v9277_v21 = vld [vmem:[%s12942_s2 + $0x8a4] ss:$16 sps:$4 sm:$0xff]   ;;  %v9280_v22 = vld [vmem:[%s12942_s2 + $0x8ac] ss:$16 sps:$4 sm:$0xff]   ;;  %v9275_v24 = vld [vmem:[%s12942_s2 + $0x8a0] ss:$16 sps:$4 sm:$0xff]  }
 0x2e4   :  { %7402 = vmatprep.subr.bf16.mxu1 %v9202_v33  ;;  %v9278_v29 = vld [vmem:[%s12942_s2 + $0x8a8] ss:$16 sps:$4 sm:$0xff]   ;;  %v9283_v31 = vld [vmem:[%s12942_s2 + $0x8c4] ss:$16 sps:$4 sm:$0xff]   ;;  %v9286_v32 = vld [vmem:[%s12942_s2 + $0x8cc] ss:$16 sps:$4 sm:$0xff]  }
 0x2e5   :  { %v9281_v33 = vld [vmem:[%s12942_s2 + $0x8c0] ss:$16 sps:$4 sm:$0xff]  }
 0x2e6   :  { %7059 = vmatpush1.bf16.msra.mxu0 %v9197_v34  ;;  %v9284_v34 = vld [vmem:[%s12942_s2 + $0x8c8] ss:$16 sps:$4 sm:$0xff]  }
 0x2e7   :  { %7403 = vmatpush1.bf16.msra.mxu1 %v9200_v35  ;;  %7060 = vmatprep.subr.bf16.mxu0 %v9205_v36  ;;  %v9289_v35 = vld [vmem:[%s12942_s2 + $0x8e4] ss:$16 sps:$4 sm:$0xff]   ;;  %v9292_v36 = vld [vmem:[%s12942_s2 + $0x8ec] ss:$16 sps:$4 sm:$0xff]  }
 0x2e8   :  { %7404 = vmatprep.subr.bf16.mxu1 %v9208_v37  ;;  %v9287_v37 = vld [vmem:[%s12942_s2 + $0x8e0] ss:$16 sps:$4 sm:$0xff]  }
 0x2ea   :  { %7061 = vmatpush1.bf16.msra.mxu0 %v9203_v38  ;;  %v9290_v38 = vld [vmem:[%s12942_s2 + $0x8e8] ss:$16 sps:$4 sm:$0xff]  }
 0x2eb   :  { %7405 = vmatpush1.bf16.msra.mxu1 %v9206_v39  ;;  %7062 = vmatprep.subr.bf16.mxu0 %v9211_v40  ;;  %v9295_v39 = vld [vmem:[%s12942_s2 + $0x904] ss:$16 sps:$4 sm:$0xff]   ;;  %v9298_v40 = vld [vmem:[%s12942_s2 + $0x90c] ss:$16 sps:$4 sm:$0xff]  }
 0x2ec   :  { %7406 = vmatprep.subr.bf16.mxu1 %v9214_v3  ;;  %v9293_v3 = vld [vmem:[%s12942_s2 + $0x900] ss:$16 sps:$4 sm:$0xff]  }
 0x2ee   :  { %7063 = vmatpush1.bf16.msra.mxu0 %v9209_v41  ;;  %v9296_v41 = vld [vmem:[%s12942_s2 + $0x908] ss:$16 sps:$4 sm:$0xff]  }
 0x2ef   :  { %7407 = vmatpush1.bf16.msra.mxu1 %v9212_v42  ;;  %7064 = vmatprep.subr.bf16.mxu0 %v9217_v52  ;;  %v9301_v42 = vld [vmem:[%s12942_s2 + $0x924] ss:$16 sps:$4 sm:$0xff]   ;;  %v9304_v52 = vld [vmem:[%s12942_s2 + $0x92c] ss:$16 sps:$4 sm:$0xff]  }
 0x2f0   :  { %7408 = vmatprep.subr.bf16.mxu1 %v9220_v43  ;;  %v9299_v43 = vld [vmem:[%s12942_s2 + $0x920] ss:$16 sps:$4 sm:$0xff]  }
 0x2f2   :  { %7065 = vmatpush1.bf16.msra.mxu0 %v9215_v44  ;;  %v9302_v44 = vld [vmem:[%s12942_s2 + $0x928] ss:$16 sps:$4 sm:$0xff]  }
 0x2f3   :  { %7409 = vmatpush1.bf16.msra.mxu1 %v9218_v45  ;;  %7066 = vmatprep.subr.bf16.mxu0 %v9223_v48  ;;  %v9307_v45 = vld [vmem:[%s12942_s2 + $0x944] ss:$16 sps:$4 sm:$0xff]   ;;  %v9310_v48 = vld [vmem:[%s12942_s2 + $0x94c] ss:$16 sps:$4 sm:$0xff]  }
 0x2f4   :  { %7410 = vmatprep.subr.bf16.mxu1 %v9226_v46  ;;  %v9305_v46 = vld [vmem:[%s12942_s2 + $0x940] ss:$16 sps:$4 sm:$0xff]  }
 0x2f6   :  { %7067 = vmatpush1.bf16.msra.mxu0 %v9221_v58  ;;  %v9308_v58 = vld [vmem:[%s12942_s2 + $0x948] ss:$16 sps:$4 sm:$0xff]  }
 0x2f7   :  { %7411 = vmatpush1.bf16.msra.mxu1 %v9224_v54  ;;  %7068 = vmatprep.subr.bf16.mxu0 %v9229_v47  ;;  %v9313_v54 = vld [vmem:[%s12942_s2 + $0x964] ss:$16 sps:$4 sm:$0xff]   ;;  %v9316_v47 = vld [vmem:[%s12942_s2 + $0x96c] ss:$16 sps:$4 sm:$0xff]  }
 0x2f8   :  { %7412 = vmatprep.subr.bf16.mxu1 %v9232_v49  ;;  %v9311_v49 = vld [vmem:[%s12942_s2 + $0x960] ss:$16 sps:$4 sm:$0xff]  }
 0x2fa   :  { %7069 = vmatpush1.bf16.msra.mxu0 %v9227_v50  ;;  %v9314_v50 = vld [vmem:[%s12942_s2 + $0x968] ss:$16 sps:$4 sm:$0xff]  }
 0x2fb   :  { %7413 = vmatpush1.bf16.msra.mxu1 %v9230_v51  ;;  %7070 = vmatprep.subr.bf16.mxu0 %v9235_v55  ;;  %v9319_v51 = vld [vmem:[%s12942_s2 + $0x984] ss:$16 sps:$4 sm:$0xff]   ;;  %v9322_v55 = vld [vmem:[%s12942_s2 + $0x98c] ss:$16 sps:$4 sm:$0xff]  }
 0x2fc   :  { %7414 = vmatprep.subr.bf16.mxu1 %v9238_v59  ;;  %v9317_v59 = vld [vmem:[%s12942_s2 + $0x980] ss:$16 sps:$4 sm:$0xff]  }
 0x2fe   :  { %7071 = vmatpush1.bf16.msra.mxu0 %v9233_v60  ;;  %v9320_v60 = vld [vmem:[%s12942_s2 + $0x988] ss:$16 sps:$4 sm:$0xff]  }
 0x2ff   :  { %7415 = vmatpush1.bf16.msra.mxu1 %v9236_v61  ;;  %7072 = vmatprep.subr.bf16.mxu0 %v9241_v62  ;;  %v9325_v61 = vld [vmem:[%s12942_s2 + $0x9a4] ss:$16 sps:$4 sm:$0xff]   ;;  %v9328_v62 = vld [vmem:[%s12942_s2 + $0x9ac] ss:$16 sps:$4 sm:$0xff]  }
 0x300   :  { %7416 = vmatprep.subr.bf16.mxu1 %v9244_v0  ;;  %v9323_v0 = vld [vmem:[%s12942_s2 + $0x9a0] ss:$16 sps:$4 sm:$0xff]  }
 0x302   :  { %7073 = vmatpush1.bf16.msra.mxu0 %v9239_v1  ;;  %v9326_v1 = vld [vmem:[%s12942_s2 + $0x9a8] ss:$16 sps:$4 sm:$0xff]  }
 0x303   :  { %7417 = vmatpush1.bf16.msra.mxu1 %v9242_v2  ;;  %7085 = vmatprep.subr.bf16.mxu0 %v9247_v5  ;;  %v9331_v2 = vld [vmem:[%s12942_s2 + $0x9c4] ss:$16 sps:$4 sm:$0xff]   ;;  %v9334_v5 = vld [vmem:[%s12942_s2 + $0x9cc] ss:$16 sps:$4 sm:$0xff]  }
 0x304   :  { %7429 = vmatprep.subr.bf16.mxu1 %v9250_v7  ;;  %v9329_v7 = vld [vmem:[%s12942_s2 + $0x9c0] ss:$16 sps:$4 sm:$0xff]  }
 0x305   :  { %7075 = vmatmul.mubr.bf16.vlgmr.msra.gmra.mrb[16].mxu0 %v11222_v15 }
 0x306   :  { %7419 = vmatmul.mubr.bf16.vlgmr.msra.gmra.mrb[16].mxu1 %v11222_v15  ;;  %7086 = vmatpush1.bf16.msra.mxu0 %v9245_v8  ;;  %v9262_v15 = vld [vmem:[%s12942_s2 + $0x84c] ss:$16 sps:$4 sm:$0xff]   ;;  %v9332_v8 = vld [vmem:[%s12942_s2 + $0x9c8] ss:$16 sps:$4 sm:$0xff]  }
 0x307   :  { %7117 = vmatprep.mubr.bf16.mxu0 %v11606_v57  ;;  %7430 = vmatpush1.bf16.msra.mxu1 %v9248_v9  ;;  %v9337_v9 = vld [vmem:[%s12942_s2 + $0x9e4] ss:$16 sps:$4 sm:$0xff]  }
 0x308   :  { %7461 = vmatprep.mubr.bf16.mxu1 %v11606_v57  ;;  %7087 = vmatprep.subr.bf16.mxu0 %v9253_v28  ;;  %v9265_v57 = vld [vmem:[%s12942_s2 + $0x864] ss:$16 sps:$4 sm:$0xff]   ;;  %v9340_v28 = vld [vmem:[%s12942_s2 + $0x9ec] ss:$16 sps:$4 sm:$0xff]  }
 0x309   :  { %7431 = vmatprep.subr.bf16.mxu1 %v9256_v10  ;;  %v9335_v10 = vld [vmem:[%s12942_s2 + $0x9e0] ss:$16 sps:$4 sm:$0xff]  }
 0x30a   :  { %7088 = vmatpush1.bf16.msra.mxu0 %v9251_v11  ;;  %v9338_v11 = vld [vmem:[%s12942_s2 + $0x9e8] ss:$16 sps:$4 sm:$0xff]  }
 0x30b   :  { %7432 = vmatpush1.bf16.msra.mxu1 %v9254_v4  ;;  %7089 = vmatprep.subr.bf16.mxu0 %v9259_v12  ;;  %v9343_v4 = vld [vmem:[%s12942_s2 + $0xa04] ss:$16 sps:$4 sm:$0xff]   ;;  %v9346_v12 = vld [vmem:[%s12942_s2 + $0xa0c] ss:$16 sps:$4 sm:$0xff]  }
 0x30c   :  { %7433 = vmatprep.subr.bf16.mxu1 %v9262_v15  ;;  %v9341_v15 = vld [vmem:[%s12942_s2 + $0xa00] ss:$16 sps:$4 sm:$0xff]  }
 0x30e   :  { %7090 = vmatpush1.bf16.msra.mxu0 %v9257_v13  ;;  %v9344_v13 = vld [vmem:[%s12942_s2 + $0xa08] ss:$16 sps:$4 sm:$0xff]  }
 0x30f   :  { %7434 = vmatpush1.bf16.msra.mxu1 %v9260_v14  ;;  %7091 = vmatprep.subr.bf16.mxu0 %v9265_v57  ;;  %v9349_v14 = vld [vmem:[%s12942_s2 + $0xa24] ss:$16 sps:$4 sm:$0xff]   ;;  %v9352_v57 = vld [vmem:[%s12942_s2 + $0xa2c] ss:$16 sps:$4 sm:$0xff]  }
 0x310   :  { %7435 = vmatprep.subr.bf16.mxu1 %v9268_v63  ;;  %v9347_v63 = vld [vmem:[%s12942_s2 + $0xa20] ss:$16 sps:$4 sm:$0xff]  }
 0x312   :  { %7092 = vmatpush1.bf16.msra.mxu0 %v9263_v16  ;;  %v9350_v16 = vld [vmem:[%s12942_s2 + $0xa28] ss:$16 sps:$4 sm:$0xff]  }
 0x313   :  { %7436 = vmatpush1.bf16.msra.mxu1 %v9266_v17  ;;  %7093 = vmatprep.subr.bf16.mxu0 %v9271_v6  ;;  %v9355_v17 = vld [vmem:[%s12942_s2 + $0xa44] ss:$16 sps:$4 sm:$0xff]   ;;  %v9353_v6 = vld [vmem:[%s12942_s2 + $0xa40] ss:$16 sps:$4 sm:$0xff]  }
 0x314   :  { %7437 = vmatprep.subr.bf16.mxu1 %v9274_v18  ;;  %v9356_v18 = vld [vmem:[%s12942_s2 + $0xa48] ss:$16 sps:$4 sm:$0xff]  }
 0x316   :  { %7094 = vmatpush1.bf16.msra.mxu0 %v9269_v19  ;;  %v9364_v19 = vld [vmem:[%s12942_s2 + $0xa6c] ss:$16 sps:$4 sm:$0xff]  }
 0x317   :  { %7438 = vmatpush1.bf16.msra.mxu1 %v9272_v20  ;;  %7095 = vmatprep.subr.bf16.mxu0 %v9277_v21  ;;  %v9359_v20 = vld [vmem:[%s12942_s2 + $0xa60] ss:$16 sps:$4 sm:$0xff]   ;;  %v9362_v21 = vld [vmem:[%s12942_s2 + $0xa68] ss:$16 sps:$4 sm:$0xff]  }
 0x318   :  { %7439 = vmatprep.subr.bf16.mxu1 %v9280_v22  ;;  %v9367_v22 = vld [vmem:[%s12942_s2 + $0xa84] ss:$16 sps:$4 sm:$0xff]  }
 0x31a   :  { %7096 = vmatpush1.bf16.msra.mxu0 %v9275_v24  ;;  %v9370_v24 = vld [vmem:[%s12942_s2 + $0xa8c] ss:$16 sps:$4 sm:$0xff]  }
 0x31b   :  { %7440 = vmatpush1.bf16.msra.mxu1 %v9278_v29  ;;  %7097 = vmatprep.subr.bf16.mxu0 %v9283_v31  ;;  %v9365_v29 = vld [vmem:[%s12942_s2 + $0xa80] ss:$16 sps:$4 sm:$0xff]   ;;  %v9368_v31 = vld [vmem:[%s12942_s2 + $0xa88] ss:$16 sps:$4 sm:$0xff]  }
 0x31c   :  { %7441 = vmatprep.subr.bf16.mxu1 %v9286_v32  ;;  %v9373_v32 = vld [vmem:[%s12942_s2 + $0xaa4] ss:$16 sps:$4 sm:$0xff]  }
 0x31e   :  { %7098 = vmatpush1.bf16.msra.mxu0 %v9281_v33  ;;  %v9376_v33 = vld [vmem:[%s12942_s2 + $0xaac] ss:$16 sps:$4 sm:$0xff]  }
 0x31f   :  { %7442 = vmatpush1.bf16.msra.mxu1 %v9284_v34  ;;  %7099 = vmatprep.subr.bf16.mxu0 %v9289_v35  ;;  %v9371_v34 = vld [vmem:[%s12942_s2 + $0xaa0] ss:$16 sps:$4 sm:$0xff]   ;;  %v9374_v35 = vld [vmem:[%s12942_s2 + $0xaa8] ss:$16 sps:$4 sm:$0xff]  }
 0x320   :  { %7443 = vmatprep.subr.bf16.mxu1 %v9292_v36  ;;  %v9379_v36 = vld [vmem:[%s12942_s2 + $0xac4] ss:$16 sps:$4 sm:$0xff]  }
 0x322   :  { %7100 = vmatpush1.bf16.msra.mxu0 %v9287_v37  ;;  %v9382_v37 = vld [vmem:[%s12942_s2 + $0xacc] ss:$16 sps:$4 sm:$0xff]  }
 0x323   :  { %7444 = vmatpush1.bf16.msra.mxu1 %v9290_v38  ;;  %7101 = vmatprep.subr.bf16.mxu0 %v9295_v39  ;;  %v9377_v38 = vld [vmem:[%s12942_s2 + $0xac0] ss:$16 sps:$4 sm:$0xff]   ;;  %v9380_v39 = vld [vmem:[%s12942_s2 + $0xac8] ss:$16 sps:$4 sm:$0xff]  }
 0x324   :  { %7445 = vmatprep.subr.bf16.mxu1 %v9298_v40  ;;  %v9385_v40 = vld [vmem:[%s12942_s2 + $0xae4] ss:$16 sps:$4 sm:$0xff]  }
 0x326   :  { %7102 = vmatpush1.bf16.msra.mxu0 %v9293_v3  ;;  %v9388_v3 = vld [vmem:[%s12942_s2 + $0xaec] ss:$16 sps:$4 sm:$0xff]  }
 0x327   :  { %7446 = vmatpush1.bf16.msra.mxu1 %v9296_v41  ;;  %7103 = vmatprep.subr.bf16.mxu0 %v9301_v42  ;;  %v9383_v41 = vld [vmem:[%s12942_s2 + $0xae0] ss:$16 sps:$4 sm:$0xff]   ;;  %v9386_v42 = vld [vmem:[%s12942_s2 + $0xae8] ss:$16 sps:$4 sm:$0xff]  }
 0x328   :  { %7447 = vmatprep.subr.bf16.mxu1 %v9304_v52  ;;  %v9391_v52 = vld [vmem:[%s12942_s2 + $0xb04] ss:$16 sps:$4 sm:$0xff]  }
 0x32a   :  { %7104 = vmatpush1.bf16.msra.mxu0 %v9299_v43  ;;  %v9394_v43 = vld [vmem:[%s12942_s2 + $0xb0c] ss:$16 sps:$4 sm:$0xff]  }
 0x32b   :  { %7448 = vmatpush1.bf16.msra.mxu1 %v9302_v44  ;;  %7105 = vmatprep.subr.bf16.mxu0 %v9307_v45  ;;  %v9389_v44 = vld [vmem:[%s12942_s2 + $0xb00] ss:$16 sps:$4 sm:$0xff]   ;;  %v9392_v45 = vld [vmem:[%s12942_s2 + $0xb08] ss:$16 sps:$4 sm:$0xff]  }
 0x32c   :  { %7449 = vmatprep.subr.bf16.mxu1 %v9310_v48  ;;  %v9397_v48 = vld [vmem:[%s12942_s2 + $0xb24] ss:$16 sps:$4 sm:$0xff]  }
 0x32e   :  { %7106 = vmatpush1.bf16.msra.mxu0 %v9305_v46  ;;  %v9400_v46 = vld [vmem:[%s12942_s2 + $0xb2c] ss:$16 sps:$4 sm:$0xff]  }
 0x32f   :  { %7450 = vmatpush1.bf16.msra.mxu1 %v9308_v58  ;;  %7107 = vmatprep.subr.bf16.mxu0 %v9313_v54  ;;  %v9395_v58 = vld [vmem:[%s12942_s2 + $0xb20] ss:$16 sps:$4 sm:$0xff]   ;;  %v9398_v54 = vld [vmem:[%s12942_s2 + $0xb28] ss:$16 sps:$4 sm:$0xff]  }
 0x330   :  { %7451 = vmatprep.subr.bf16.mxu1 %v9316_v47  ;;  %v9403_v47 = vld [vmem:[%s12942_s2 + $0xb44] ss:$16 sps:$4 sm:$0xff]  }
 0x332   :  { %7108 = vmatpush1.bf16.msra.mxu0 %v9311_v49  ;;  %v9406_v49 = vld [vmem:[%s12942_s2 + $0xb4c] ss:$16 sps:$4 sm:$0xff]  }
 0x333   :  { %7452 = vmatpush1.bf16.msra.mxu1 %v9314_v50  ;;  %7109 = vmatprep.subr.bf16.mxu0 %v9319_v51  ;;  %v9401_v50 = vld [vmem:[%s12942_s2 + $0xb40] ss:$16 sps:$4 sm:$0xff]   ;;  %v9404_v51 = vld [vmem:[%s12942_s2 + $0xb48] ss:$16 sps:$4 sm:$0xff]  }
 0x334   :  { %7453 = vmatprep.subr.bf16.mxu1 %v9322_v55  ;;  %v9409_v55 = vld [vmem:[%s12942_s2 + $0xb64] ss:$16 sps:$4 sm:$0xff]  }
 0x336   :  { %7110 = vmatpush1.bf16.msra.mxu0 %v9317_v59  ;;  %v9412_v59 = vld [vmem:[%s12942_s2 + $0xb6c] ss:$16 sps:$4 sm:$0xff]  }
 0x337   :  { %7454 = vmatpush1.bf16.msra.mxu1 %v9320_v60  ;;  %7111 = vmatprep.subr.bf16.mxu0 %v9325_v61  ;;  %v9407_v60 = vld [vmem:[%s12942_s2 + $0xb60] ss:$16 sps:$4 sm:$0xff]   ;;  %v9410_v61 = vld [vmem:[%s12942_s2 + $0xb68] ss:$16 sps:$4 sm:$0xff]  }
 0x338   :  { %7455 = vmatprep.subr.bf16.mxu1 %v9328_v62  ;;  %v9415_v62 = vld [vmem:[%s12942_s2 + $0xb84] ss:$16 sps:$4 sm:$0xff]  }
 0x33a   :  { %7112 = vmatpush1.bf16.msra.mxu0 %v9323_v0  ;;  %v9418_v0 = vld [vmem:[%s12942_s2 + $0xb8c] ss:$16 sps:$4 sm:$0xff]  }
 0x33b   :  { %7456 = vmatpush1.bf16.msra.mxu1 %v9326_v1  ;;  %7113 = vmatprep.subr.bf16.mxu0 %v9331_v2  ;;  %v9413_v1 = vld [vmem:[%s12942_s2 + $0xb80] ss:$16 sps:$4 sm:$0xff]   ;;  %v9416_v2 = vld [vmem:[%s12942_s2 + $0xb88] ss:$16 sps:$4 sm:$0xff]  }
 0x33c   :  { %7457 = vmatprep.subr.bf16.mxu1 %v9334_v5  ;;  %v9421_v5 = vld [vmem:[%s12942_s2 + $0xba4] ss:$16 sps:$4 sm:$0xff]  }
 0x33e   :  { %7114 = vmatpush1.bf16.msra.mxu0 %v9329_v7  ;;  %v9424_v7 = vld [vmem:[%s12942_s2 + $0xbac] ss:$16 sps:$4 sm:$0xff]  }
 0x33f   :  { %7458 = vmatpush1.bf16.msra.mxu1 %v9332_v8  ;;  %7115 = vmatprep.subr.bf16.mxu0 %v9337_v9  ;;  %v9419_v8 = vld [vmem:[%s12942_s2 + $0xba0] ss:$16 sps:$4 sm:$0xff]   ;;  %v9422_v9 = vld [vmem:[%s12942_s2 + $0xba8] ss:$16 sps:$4 sm:$0xff]  }
 0x340   :  { %7459 = vmatprep.subr.bf16.mxu1 %v9340_v28  ;;  %v9427_v28 = vld [vmem:[%s12942_s2 + $0xbc4] ss:$16 sps:$4 sm:$0xff]  }
 0x342   :  { %7116 = vmatpush1.bf16.msra.mxu0 %v9335_v10  ;;  %v9430_v10 = vld [vmem:[%s12942_s2 + $0xbcc] ss:$16 sps:$4 sm:$0xff]  }
 0x343   :  { %7460 = vmatpush1.bf16.msra.mxu1 %v9338_v11  ;;  %7128 = vmatprep.subr.bf16.mxu0 %v9343_v4  ;;  %v9425_v11 = vld [vmem:[%s12942_s2 + $0xbc0] ss:$16 sps:$4 sm:$0xff]   ;;  %v9428_v4 = vld [vmem:[%s12942_s2 + $0xbc8] ss:$16 sps:$4 sm:$0xff]  }
 0x344   :  { %7472 = vmatprep.subr.bf16.mxu1 %v9346_v12  ;;  %v9433_v12 = vld [vmem:[%s12942_s2 + $0xbe4] ss:$16 sps:$4 sm:$0xff]  }
 0x345   :  { %7118 = vmatmul.mubr.bf16.vlgmr.msra.gmra.mrb[16].mxu0 %v11602_v53 }
 0x346   :  { %7462 = vmatmul.mubr.bf16.vlgmr.msra.gmra.mrb[16].mxu1 %v11602_v53  ;;  %7129 = vmatpush1.bf16.msra.mxu0 %v9341_v15  ;;  %v9358_v53 = vld [vmem:[%s12942_s2 + $0xa4c] ss:$16 sps:$4 sm:$0xff]  }
 0x347   :  { %7160 = vmatprep.mubr.bf16.mxu0 %v11611_v25  ;;  %7473 = vmatpush1.bf16.msra.mxu1 %v9344_v13  ;;  %v9436_v15 = vld [vmem:[%s12942_s2 + $0xbec] ss:$16 sps:$4 sm:$0xff]   ;;  %v9431_v13 = vld [vmem:[%s12942_s2 + $0xbe0] ss:$16 sps:$4 sm:$0xff]  }
 0x348   :  { %7504 = vmatprep.mubr.bf16.mxu1 %v11611_v25  ;;  %7130 = vmatprep.subr.bf16.mxu0 %v9349_v14  ;;  %v9361_v25 = vld [vmem:[%s12942_s2 + $0xa64] ss:$16 sps:$4 sm:$0xff]   ;;  %v9434_v14 = vld [vmem:[%s12942_s2 + $0xbe8] ss:$16 sps:$4 sm:$0xff]  }
 0x349   :  { %7474 = vmatprep.subr.bf16.mxu1 %v9352_v57  ;;  %v9439_v57 = vld [vmem:[%s12942_s2 + $0xc04] ss:$16 sps:$4 sm:$0xff]  }
 0x34a   :  { %7131 = vmatpush1.bf16.msra.mxu0 %v9347_v63  ;;  %v9442_v63 = vld [vmem:[%s12942_s2 + $0xc0c] ss:$16 sps:$4 sm:$0xff]  }
 0x34b   :  { %7475 = vmatpush1.bf16.msra.mxu1 %v9350_v16  ;;  %7132 = vmatprep.subr.bf16.mxu0 %v9355_v17  ;;  %v9437_v16 = vld [vmem:[%s12942_s2 + $0xc00] ss:$16 sps:$4 sm:$0xff]   ;;  %v9440_v17 = vld [vmem:[%s12942_s2 + $0xc08] ss:$16 sps:$4 sm:$0xff]  }
 0x34c   :  { %7476 = vmatprep.subr.bf16.mxu1 %v9358_v53  ;;  %v9445_v53 = vld [vmem:[%s12942_s2 + $0xc24] ss:$16 sps:$4 sm:$0xff]  }
 0x34e   :  { %7133 = vmatpush1.bf16.msra.mxu0 %v9353_v6  ;;  %v9448_v6 = vld [vmem:[%s12942_s2 + $0xc2c] ss:$16 sps:$4 sm:$0xff]  }
 0x34f   :  { %7477 = vmatpush1.bf16.msra.mxu1 %v9356_v18  ;;  %7134 = vmatprep.subr.bf16.mxu0 %v9361_v25  ;;  %v9443_v18 = vld [vmem:[%s12942_s2 + $0xc20] ss:$16 sps:$4 sm:$0xff]   ;;  %v9446_v25 = vld [vmem:[%s12942_s2 + $0xc28] ss:$16 sps:$4 sm:$0xff]  }
 0x350   :  { %7478 = vmatprep.subr.bf16.mxu1 %v9364_v19  ;;  %v9451_v19 = vld [vmem:[%s12942_s2 + $0xc44] ss:$16 sps:$4 sm:$0xff]  }
 0x352   :  { %7135 = vmatpush1.bf16.msra.mxu0 %v9359_v20  ;;  %v9449_v20 = vld [vmem:[%s12942_s2 + $0xc40] ss:$16 sps:$4 sm:$0xff]  }
 0x353   :  { %7479 = vmatpush1.bf16.msra.mxu1 %v9362_v21  ;;  %7136 = vmatprep.subr.bf16.mxu0 %v9367_v22  ;;  %v9452_v21 = vld [vmem:[%s12942_s2 + $0xc48] ss:$16 sps:$4 sm:$0xff]   ;;  %v9460_v22 = vld [vmem:[%s12942_s2 + $0xc6c] ss:$16 sps:$4 sm:$0xff]  }
 0x354   :  { %7480 = vmatprep.subr.bf16.mxu1 %v9370_v24  ;;  %v9455_v24 = vld [vmem:[%s12942_s2 + $0xc60] ss:$16 sps:$4 sm:$0xff]  }
 0x356   :  { %7137 = vmatpush1.bf16.msra.mxu0 %v9365_v29  ;;  %v9458_v29 = vld [vmem:[%s12942_s2 + $0xc68] ss:$16 sps:$4 sm:$0xff]  }
 0x357   :  { %7481 = vmatpush1.bf16.msra.mxu1 %v9368_v31  ;;  %7138 = vmatprep.subr.bf16.mxu0 %v9373_v32  ;;  %v9463_v31 = vld [vmem:[%s12942_s2 + $0xc84] ss:$16 sps:$4 sm:$0xff]   ;;  %v9466_v32 = vld [vmem:[%s12942_s2 + $0xc8c] ss:$16 sps:$4 sm:$0xff]  }
 0x358   :  { %7482 = vmatprep.subr.bf16.mxu1 %v9376_v33  ;;  %v9461_v33 = vld [vmem:[%s12942_s2 + $0xc80] ss:$16 sps:$4 sm:$0xff]  }
 0x35a   :  { %7139 = vmatpush1.bf16.msra.mxu0 %v9371_v34  ;;  %v9464_v34 = vld [vmem:[%s12942_s2 + $0xc88] ss:$16 sps:$4 sm:$0xff]  }
 0x35b   :  { %7483 = vmatpush1.bf16.msra.mxu1 %v9374_v35  ;;  %7140 = vmatprep.subr.bf16.mxu0 %v9379_v36  ;;  %v9469_v35 = vld [vmem:[%s12942_s2 + $0xca4] ss:$16 sps:$4 sm:$0xff]   ;;  %v9472_v36 = vld [vmem:[%s12942_s2 + $0xcac] ss:$16 sps:$4 sm:$0xff]  }
 0x35c   :  { %7484 = vmatprep.subr.bf16.mxu1 %v9382_v37  ;;  %v9467_v37 = vld [vmem:[%s12942_s2 + $0xca0] ss:$16 sps:$4 sm:$0xff]  }
 0x35e   :  { %7141 = vmatpush1.bf16.msra.mxu0 %v9377_v38  ;;  %v9470_v38 = vld [vmem:[%s12942_s2 + $0xca8] ss:$16 sps:$4 sm:$0xff]  }
 0x35f   :  { %7485 = vmatpush1.bf16.msra.mxu1 %v9380_v39  ;;  %7142 = vmatprep.subr.bf16.mxu0 %v9385_v40  ;;  %v9475_v39 = vld [vmem:[%s12942_s2 + $0xcc4] ss:$16 sps:$4 sm:$0xff]   ;;  %v9478_v40 = vld [vmem:[%s12942_s2 + $0xccc] ss:$16 sps:$4 sm:$0xff]  }
 0x360   :  { %7486 = vmatprep.subr.bf16.mxu1 %v9388_v3  ;;  %v9473_v3 = vld [vmem:[%s12942_s2 + $0xcc0] ss:$16 sps:$4 sm:$0xff]  }
 0x362   :  { %7143 = vmatpush1.bf16.msra.mxu0 %v9383_v41  ;;  %v9476_v41 = vld [vmem:[%s12942_s2 + $0xcc8] ss:$16 sps:$4 sm:$0xff]  }
 0x363   :  { %7487 = vmatpush1.bf16.msra.mxu1 %v9386_v42  ;;  %7144 = vmatprep.subr.bf16.mxu0 %v9391_v52  ;;  %v9481_v42 = vld [vmem:[%s12942_s2 + $0xce4] ss:$16 sps:$4 sm:$0xff]   ;;  %v9484_v52 = vld [vmem:[%s12942_s2 + $0xcec] ss:$16 sps:$4 sm:$0xff]  }
 0x364   :  { %7488 = vmatprep.subr.bf16.mxu1 %v9394_v43  ;;  %v9479_v43 = vld [vmem:[%s12942_s2 + $0xce0] ss:$16 sps:$4 sm:$0xff]  }
 0x366   :  { %7145 = vmatpush1.bf16.msra.mxu0 %v9389_v44  ;;  %v9482_v44 = vld [vmem:[%s12942_s2 + $0xce8] ss:$16 sps:$4 sm:$0xff]  }
 0x367   :  { %7489 = vmatpush1.bf16.msra.mxu1 %v9392_v45  ;;  %7146 = vmatprep.subr.bf16.mxu0 %v9397_v48  ;;  %v9487_v45 = vld [vmem:[%s12942_s2 + $0xd04] ss:$16 sps:$4 sm:$0xff]   ;;  %v9490_v48 = vld [vmem:[%s12942_s2 + $0xd0c] ss:$16 sps:$4 sm:$0xff]  }
 0x368   :  { %7490 = vmatprep.subr.bf16.mxu1 %v9400_v46  ;;  %v9485_v46 = vld [vmem:[%s12942_s2 + $0xd00] ss:$16 sps:$4 sm:$0xff]  }
 0x36a   :  { %7147 = vmatpush1.bf16.msra.mxu0 %v9395_v58  ;;  %v9488_v58 = vld [vmem:[%s12942_s2 + $0xd08] ss:$16 sps:$4 sm:$0xff]  }
 0x36b   :  { %7491 = vmatpush1.bf16.msra.mxu1 %v9398_v54  ;;  %7148 = vmatprep.subr.bf16.mxu0 %v9403_v47  ;;  %v9493_v54 = vld [vmem:[%s12942_s2 + $0xd24] ss:$16 sps:$4 sm:$0xff]   ;;  %v9496_v47 = vld [vmem:[%s12942_s2 + $0xd2c] ss:$16 sps:$4 sm:$0xff]  }
 0x36c   :  { %7492 = vmatprep.subr.bf16.mxu1 %v9406_v49  ;;  %v9491_v49 = vld [vmem:[%s12942_s2 + $0xd20] ss:$16 sps:$4 sm:$0xff]  }
 0x36e   :  { %7149 = vmatpush1.bf16.msra.mxu0 %v9401_v50  ;;  %v9494_v50 = vld [vmem:[%s12942_s2 + $0xd28] ss:$16 sps:$4 sm:$0xff]  }
 0x36f   :  { %7493 = vmatpush1.bf16.msra.mxu1 %v9404_v51  ;;  %7150 = vmatprep.subr.bf16.mxu0 %v9409_v55  ;;  %v9499_v51 = vld [vmem:[%s12942_s2 + $0xd44] ss:$16 sps:$4 sm:$0xff]   ;;  %v9502_v55 = vld [vmem:[%s12942_s2 + $0xd4c] ss:$16 sps:$4 sm:$0xff]  }
 0x370   :  { %7494 = vmatprep.subr.bf16.mxu1 %v9412_v59  ;;  %v9497_v59 = vld [vmem:[%s12942_s2 + $0xd40] ss:$16 sps:$4 sm:$0xff]  }
 0x372   :  { %7151 = vmatpush1.bf16.msra.mxu0 %v9407_v60  ;;  %v9500_v60 = vld [vmem:[%s12942_s2 + $0xd48] ss:$16 sps:$4 sm:$0xff]  }
 0x373   :  { %7495 = vmatpush1.bf16.msra.mxu1 %v9410_v61  ;;  %7152 = vmatprep.subr.bf16.mxu0 %v9415_v62  ;;  %v9505_v61 = vld [vmem:[%s12942_s2 + $0xd64] ss:$16 sps:$4 sm:$0xff]   ;;  %v9508_v62 = vld [vmem:[%s12942_s2 + $0xd6c] ss:$16 sps:$4 sm:$0xff]  }
 0x374   :  { %7496 = vmatprep.subr.bf16.mxu1 %v9418_v0  ;;  %v9503_v0 = vld [vmem:[%s12942_s2 + $0xd60] ss:$16 sps:$4 sm:$0xff]  }
 0x376   :  { %7153 = vmatpush1.bf16.msra.mxu0 %v9413_v1  ;;  %v9506_v1 = vld [vmem:[%s12942_s2 + $0xd68] ss:$16 sps:$4 sm:$0xff]  }
 0x377   :  { %7497 = vmatpush1.bf16.msra.mxu1 %v9416_v2  ;;  %7154 = vmatprep.subr.bf16.mxu0 %v9421_v5  ;;  %v9511_v2 = vld [vmem:[%s12942_s2 + $0xd84] ss:$16 sps:$4 sm:$0xff]   ;;  %v9514_v5 = vld [vmem:[%s12942_s2 + $0xd8c] ss:$16 sps:$4 sm:$0xff]  }
 0x378   :  { %7498 = vmatprep.subr.bf16.mxu1 %v9424_v7  ;;  %v9509_v7 = vld [vmem:[%s12942_s2 + $0xd80] ss:$16 sps:$4 sm:$0xff]  }
 0x37a   :  { %7155 = vmatpush1.bf16.msra.mxu0 %v9419_v8  ;;  %v9512_v8 = vld [vmem:[%s12942_s2 + $0xd88] ss:$16 sps:$4 sm:$0xff]  }
 0x37b   :  { %7499 = vmatpush1.bf16.msra.mxu1 %v9422_v9  ;;  %7156 = vmatprep.subr.bf16.mxu0 %v9427_v28  ;;  %v9517_v9 = vld [vmem:[%s12942_s2 + $0xda4] ss:$16 sps:$4 sm:$0xff]   ;;  %v9520_v28 = vld [vmem:[%s12942_s2 + $0xdac] ss:$16 sps:$4 sm:$0xff]  }
 0x37c   :  { %7500 = vmatprep.subr.bf16.mxu1 %v9430_v10  ;;  %v9515_v10 = vld [vmem:[%s12942_s2 + $0xda0] ss:$16 sps:$4 sm:$0xff]  }
 0x37e   :  { %7157 = vmatpush1.bf16.msra.mxu0 %v9425_v11  ;;  %v9518_v11 = vld [vmem:[%s12942_s2 + $0xda8] ss:$16 sps:$4 sm:$0xff]  }
 0x37f   :  { %7501 = vmatpush1.bf16.msra.mxu1 %v9428_v4  ;;  %7158 = vmatprep.subr.bf16.mxu0 %v9433_v12  ;;  %v9523_v4 = vld [vmem:[%s12942_s2 + $0xdc4] ss:$16 sps:$4 sm:$0xff]   ;;  %v9526_v12 = vld [vmem:[%s12942_s2 + $0xdcc] ss:$16 sps:$4 sm:$0xff]  }
 0x380   :  { %7502 = vmatprep.subr.bf16.mxu1 %v9436_v15  ;;  %v9521_v15 = vld [vmem:[%s12942_s2 + $0xdc0] ss:$16 sps:$4 sm:$0xff]  }
 0x382   :  { %7159 = vmatpush1.bf16.msra.mxu0 %v9431_v13  ;;  %v9524_v13 = vld [vmem:[%s12942_s2 + $0xdc8] ss:$16 sps:$4 sm:$0xff]  }
 0x383   :  { %7503 = vmatpush1.bf16.msra.mxu1 %v9434_v14  ;;  %7171 = vmatprep.subr.bf16.mxu0 %v9439_v57  ;;  %v9529_v14 = vld [vmem:[%s12942_s2 + $0xde4] ss:$16 sps:$4 sm:$0xff]   ;;  %v9532_v57 = vld [vmem:[%s12942_s2 + $0xdec] ss:$16 sps:$4 sm:$0xff]  }
 0x384   :  { %7515 = vmatprep.subr.bf16.mxu1 %v9442_v63  ;;  %v9527_v63 = vld [vmem:[%s12942_s2 + $0xde0] ss:$16 sps:$4 sm:$0xff]  }
 0x385   :  { %7161 = vmatmul.mubr.bf16.vlgmr.msra.gmra.mrb[16].mxu0 %v11604_v56 }
 0x386   :  { %7505 = vmatmul.mubr.bf16.vlgmr.msra.gmra.mrb[16].mxu1 %v11604_v56  ;;  %7172 = vmatpush1.bf16.msra.mxu0 %v9437_v16  ;;  %v9454_v56 = vld [vmem:[%s12942_s2 + $0xc4c] ss:$16 sps:$4 sm:$0xff]   ;;  %v9530_v16 = vld [vmem:[%s12942_s2 + $0xde8] ss:$16 sps:$4 sm:$0xff]  }
 0x387   :  { %7203 = vmatprep.mubr.bf16.mxu0 %v12006_v27  ;;  %7516 = vmatpush1.bf16.msra.mxu1 %v9440_v17  ;;  %v9535_v17 = vld [vmem:[%s12942_s2 + $0xe04] ss:$16 sps:$4 sm:$0xff]  }
 0x388   :  { %7547 = vmatprep.mubr.bf16.mxu1 %v12006_v27  ;;  %7173 = vmatprep.subr.bf16.mxu0 %v9445_v53  ;;  %v9457_v27 = vld [vmem:[%s12942_s2 + $0xc64] ss:$16 sps:$4 sm:$0xff]   ;;  %v9538_v53 = vld [vmem:[%s12942_s2 + $0xe0c] ss:$16 sps:$4 sm:$0xff]  }
 0x389   :  { %7517 = vmatprep.subr.bf16.mxu1 %v9448_v6  ;;  %v9533_v6 = vld [vmem:[%s12942_s2 + $0xe00] ss:$16 sps:$4 sm:$0xff]  }
 0x38a   :  { %7174 = vmatpush1.bf16.msra.mxu0 %v9443_v18  ;;  %v9536_v18 = vld [vmem:[%s12942_s2 + $0xe08] ss:$16 sps:$4 sm:$0xff]  }
 0x38b   :  { %7518 = vmatpush1.bf16.msra.mxu1 %v9446_v25  ;;  %7175 = vmatprep.subr.bf16.mxu0 %v9451_v19  ;;  %v9541_v25 = vld [vmem:[%s12942_s2 + $0xe24] ss:$16 sps:$4 sm:$0xff]   ;;  %v9544_v19 = vld [vmem:[%s12942_s2 + $0xe2c] ss:$16 sps:$4 sm:$0xff]  }
 0x38c   :  { %7519 = vmatprep.subr.bf16.mxu1 %v9454_v56  ;;  %v9539_v56 = vld [vmem:[%s12942_s2 + $0xe20] ss:$16 sps:$4 sm:$0xff]  }
 0x38e   :  { %7176 = vmatpush1.bf16.msra.mxu0 %v9449_v20  ;;  %v9542_v20 = vld [vmem:[%s12942_s2 + $0xe28] ss:$16 sps:$4 sm:$0xff]  }
 0x38f   :  { %7520 = vmatpush1.bf16.msra.mxu1 %v9452_v21  ;;  %7177 = vmatprep.subr.bf16.mxu0 %v9457_v27  ;;  %v9547_v21 = vld [vmem:[%s12942_s2 + $0xe44] ss:$16 sps:$4 sm:$0xff]   ;;  %v9545_v27 = vld [vmem:[%s12942_s2 + $0xe40] ss:$16 sps:$4 sm:$0xff]  }
 0x390   :  { %7521 = vmatprep.subr.bf16.mxu1 %v9460_v22  ;;  %v9548_v22 = vld [vmem:[%s12942_s2 + $0xe48] ss:$16 sps:$4 sm:$0xff]  }
 0x392   :  { %7178 = vmatpush1.bf16.msra.mxu0 %v9455_v24  ;;  %v9556_v24 = vld [vmem:[%s12942_s2 + $0xe6c] ss:$16 sps:$4 sm:$0xff]  }
 0x393   :  { %7522 = vmatpush1.bf16.msra.mxu1 %v9458_v29  ;;  %7179 = vmatprep.subr.bf16.mxu0 %v9463_v31  ;;  %v9551_v29 = vld [vmem:[%s12942_s2 + $0xe60] ss:$16 sps:$4 sm:$0xff]   ;;  %v9554_v31 = vld [vmem:[%s12942_s2 + $0xe68] ss:$16 sps:$4 sm:$0xff]  }
 0x394   :  { %7523 = vmatprep.subr.bf16.mxu1 %v9466_v32  ;;  %v9559_v32 = vld [vmem:[%s12942_s2 + $0xe84] ss:$16 sps:$4 sm:$0xff]  }
 0x396   :  { %7180 = vmatpush1.bf16.msra.mxu0 %v9461_v33  ;;  %v9562_v33 = vld [vmem:[%s12942_s2 + $0xe8c] ss:$16 sps:$4 sm:$0xff]  }
 0x397   :  { %7524 = vmatpush1.bf16.msra.mxu1 %v9464_v34  ;;  %7181 = vmatprep.subr.bf16.mxu0 %v9469_v35  ;;  %v9557_v34 = vld [vmem:[%s12942_s2 + $0xe80] ss:$16 sps:$4 sm:$0xff]   ;;  %v9560_v35 = vld [vmem:[%s12942_s2 + $0xe88] ss:$16 sps:$4 sm:$0xff]  }
 0x398   :  { %7525 = vmatprep.subr.bf16.mxu1 %v9472_v36  ;;  %v9565_v36 = vld [vmem:[%s12942_s2 + $0xea4] ss:$16 sps:$4 sm:$0xff]  }
 0x39a   :  { %7182 = vmatpush1.bf16.msra.mxu0 %v9467_v37  ;;  %v9568_v37 = vld [vmem:[%s12942_s2 + $0xeac] ss:$16 sps:$4 sm:$0xff]  }
 0x39b   :  { %7526 = vmatpush1.bf16.msra.mxu1 %v9470_v38  ;;  %7183 = vmatprep.subr.bf16.mxu0 %v9475_v39  ;;  %v9563_v38 = vld [vmem:[%s12942_s2 + $0xea0] ss:$16 sps:$4 sm:$0xff]   ;;  %v9566_v39 = vld [vmem:[%s12942_s2 + $0xea8] ss:$16 sps:$4 sm:$0xff]  }
 0x39c   :  { %7527 = vmatprep.subr.bf16.mxu1 %v9478_v40  ;;  %v9571_v40 = vld [vmem:[%s12942_s2 + $0xec4] ss:$16 sps:$4 sm:$0xff]  }
 0x39e   :  { %7184 = vmatpush1.bf16.msra.mxu0 %v9473_v3  ;;  %v9574_v3 = vld [vmem:[%s12942_s2 + $0xecc] ss:$16 sps:$4 sm:$0xff]  }
 0x39f   :  { %7528 = vmatpush1.bf16.msra.mxu1 %v9476_v41  ;;  %7185 = vmatprep.subr.bf16.mxu0 %v9481_v42  ;;  %v9569_v41 = vld [vmem:[%s12942_s2 + $0xec0] ss:$16 sps:$4 sm:$0xff]   ;;  %v9572_v42 = vld [vmem:[%s12942_s2 + $0xec8] ss:$16 sps:$4 sm:$0xff]  }
 0x3a0   :  { %7529 = vmatprep.subr.bf16.mxu1 %v9484_v52  ;;  %v9577_v52 = vld [vmem:[%s12942_s2 + $0xee4] ss:$16 sps:$4 sm:$0xff]  }
 0x3a2   :  { %7186 = vmatpush1.bf16.msra.mxu0 %v9479_v43  ;;  %v9580_v43 = vld [vmem:[%s12942_s2 + $0xeec] ss:$16 sps:$4 sm:$0xff]  }
 0x3a3   :  { %7530 = vmatpush1.bf16.msra.mxu1 %v9482_v44  ;;  %7187 = vmatprep.subr.bf16.mxu0 %v9487_v45  ;;  %v9575_v44 = vld [vmem:[%s12942_s2 + $0xee0] ss:$16 sps:$4 sm:$0xff]   ;;  %v9578_v45 = vld [vmem:[%s12942_s2 + $0xee8] ss:$16 sps:$4 sm:$0xff]  }
 0x3a4   :  { %7531 = vmatprep.subr.bf16.mxu1 %v9490_v48  ;;  %v9583_v48 = vld [vmem:[%s12942_s2 + $0xf04] ss:$16 sps:$4 sm:$0xff]  }
 0x3a6   :  { %7188 = vmatpush1.bf16.msra.mxu0 %v9485_v46  ;;  %v9586_v46 = vld [vmem:[%s12942_s2 + $0xf0c] ss:$16 sps:$4 sm:$0xff]  }
 0x3a7   :  { %7532 = vmatpush1.bf16.msra.mxu1 %v9488_v58  ;;  %7189 = vmatprep.subr.bf16.mxu0 %v9493_v54  ;;  %v9581_v58 = vld [vmem:[%s12942_s2 + $0xf00] ss:$16 sps:$4 sm:$0xff]   ;;  %v9584_v54 = vld [vmem:[%s12942_s2 + $0xf08] ss:$16 sps:$4 sm:$0xff]  }
 0x3a8   :  { %7533 = vmatprep.subr.bf16.mxu1 %v9496_v47  ;;  %v9589_v47 = vld [vmem:[%s12942_s2 + $0xf24] ss:$16 sps:$4 sm:$0xff]  }
 0x3aa   :  { %7190 = vmatpush1.bf16.msra.mxu0 %v9491_v49  ;;  %v9592_v49 = vld [vmem:[%s12942_s2 + $0xf2c] ss:$16 sps:$4 sm:$0xff]  }
 0x3ab   :  { %7534 = vmatpush1.bf16.msra.mxu1 %v9494_v50  ;;  %7191 = vmatprep.subr.bf16.mxu0 %v9499_v51  ;;  %v9587_v50 = vld [vmem:[%s12942_s2 + $0xf20] ss:$16 sps:$4 sm:$0xff]   ;;  %v9590_v51 = vld [vmem:[%s12942_s2 + $0xf28] ss:$16 sps:$4 sm:$0xff]  }
 0x3ac   :  { %7535 = vmatprep.subr.bf16.mxu1 %v9502_v55  ;;  %v9595_v55 = vld [vmem:[%s12942_s2 + $0xf44] ss:$16 sps:$4 sm:$0xff]  }
 0x3ae   :  { %7192 = vmatpush1.bf16.msra.mxu0 %v9497_v59  ;;  %v9598_v59 = vld [vmem:[%s12942_s2 + $0xf4c] ss:$16 sps:$4 sm:$0xff]  }
 0x3af   :  { %7536 = vmatpush1.bf16.msra.mxu1 %v9500_v60  ;;  %7193 = vmatprep.subr.bf16.mxu0 %v9505_v61  ;;  %v9593_v60 = vld [vmem:[%s12942_s2 + $0xf40] ss:$16 sps:$4 sm:$0xff]   ;;  %v9596_v61 = vld [vmem:[%s12942_s2 + $0xf48] ss:$16 sps:$4 sm:$0xff]  }
 0x3b0   :  { %7537 = vmatprep.subr.bf16.mxu1 %v9508_v62  ;;  %v9601_v62 = vld [vmem:[%s12942_s2 + $0xf64] ss:$16 sps:$4 sm:$0xff]  }
 0x3b2   :  { %7194 = vmatpush1.bf16.msra.mxu0 %v9503_v0  ;;  %v9604_v0 = vld [vmem:[%s12942_s2 + $0xf6c] ss:$16 sps:$4 sm:$0xff]  }
 0x3b3   :  { %7538 = vmatpush1.bf16.msra.mxu1 %v9506_v1  ;;  %7195 = vmatprep.subr.bf16.mxu0 %v9511_v2  ;;  %v9599_v1 = vld [vmem:[%s12942_s2 + $0xf60] ss:$16 sps:$4 sm:$0xff]   ;;  %v9602_v2 = vld [vmem:[%s12942_s2 + $0xf68] ss:$16 sps:$4 sm:$0xff]  }
 0x3b4   :  { %7539 = vmatprep.subr.bf16.mxu1 %v9514_v5  ;;  %v9607_v5 = vld [vmem:[%s12942_s2 + $0xf84] ss:$16 sps:$4 sm:$0xff]  }
 0x3b6   :  { %7196 = vmatpush1.bf16.msra.mxu0 %v9509_v7  ;;  %v9610_v7 = vld [vmem:[%s12942_s2 + $0xf8c] ss:$16 sps:$4 sm:$0xff]  }
 0x3b7   :  { %7540 = vmatpush1.bf16.msra.mxu1 %v9512_v8  ;;  %7197 = vmatprep.subr.bf16.mxu0 %v9517_v9  ;;  %v9605_v8 = vld [vmem:[%s12942_s2 + $0xf80] ss:$16 sps:$4 sm:$0xff]   ;;  %v9608_v9 = vld [vmem:[%s12942_s2 + $0xf88] ss:$16 sps:$4 sm:$0xff]  }
 0x3b8   :  { %7541 = vmatprep.subr.bf16.mxu1 %v9520_v28  ;;  %v9613_v28 = vld [vmem:[%s12942_s2 + $0xfa4] ss:$16 sps:$4 sm:$0xff]  }
 0x3ba   :  { %7198 = vmatpush1.bf16.msra.mxu0 %v9515_v10  ;;  %v9616_v10 = vld [vmem:[%s12942_s2 + $0xfac] ss:$16 sps:$4 sm:$0xff]  }
 0x3bb   :  { %7542 = vmatpush1.bf16.msra.mxu1 %v9518_v11  ;;  %7199 = vmatprep.subr.bf16.mxu0 %v9523_v4  ;;  %v9611_v11 = vld [vmem:[%s12942_s2 + $0xfa0] ss:$16 sps:$4 sm:$0xff]   ;;  %v9614_v4 = vld [vmem:[%s12942_s2 + $0xfa8] ss:$16 sps:$4 sm:$0xff]  }
 0x3bc   :  { %7543 = vmatprep.subr.bf16.mxu1 %v9526_v12  ;;  %v9619_v12 = vld [vmem:[%s12942_s2 + $0xfc4] ss:$16 sps:$4 sm:$0xff]  }
 0x3be   :  { %7200 = vmatpush1.bf16.msra.mxu0 %v9521_v15  ;;  %v9622_v15 = vld [vmem:[%s12942_s2 + $0xfcc] ss:$16 sps:$4 sm:$0xff]  }
 0x3bf   :  { %7544 = vmatpush1.bf16.msra.mxu1 %v9524_v13  ;;  %7201 = vmatprep.subr.bf16.mxu0 %v9529_v14  ;;  %v9617_v13 = vld [vmem:[%s12942_s2 + $0xfc0] ss:$16 sps:$4 sm:$0xff]   ;;  %v9620_v14 = vld [vmem:[%s12942_s2 + $0xfc8] ss:$16 sps:$4 sm:$0xff]  }
 0x3c0   :  { %7545 = vmatprep.subr.bf16.mxu1 %v9532_v57  ;;  %v9625_v57 = vld [vmem:[%s12942_s2 + $0xfe4] ss:$16 sps:$4 sm:$0xff]  }
 0x3c2   :  { %7202 = vmatpush1.bf16.msra.mxu0 %v9527_v63  ;;  %v9628_v63 = vld [vmem:[%s12942_s2 + $0xfec] ss:$16 sps:$4 sm:$0xff]  }
 0x3c3   :  { %7546 = vmatpush1.bf16.msra.mxu1 %v9530_v16  ;;  %7214 = vmatprep.subr.bf16.mxu0 %v9535_v17  ;;  %v9623_v16 = vld [vmem:[%s12942_s2 + $0xfe0] ss:$16 sps:$4 sm:$0xff]   ;;  %v9626_v17 = vld [vmem:[%s12942_s2 + $0xfe8] ss:$16 sps:$4 sm:$0xff]  }
 0x3c4   :  { %7558 = vmatprep.subr.bf16.mxu1 %v9538_v53 }
 0x3c5   :  { %7204 = vmatmul.mubr.bf16.vlgmr.msra.gmra.mrb[16].mxu0 %v12002_v23 }
 0x3c6   :  { %7548 = vmatmul.mubr.bf16.vlgmr.msra.gmra.mrb[16].mxu1 %v12002_v23  ;;  %7215 = vmatpush1.bf16.msra.mxu0 %v9533_v6  ;;  %v9550_v23 = vld [vmem:[%s12942_s2 + $0xe4c] ss:$16 sps:$4 sm:$0xff]   ;;  %v9633_v6 = vld [vmem:[%s12940_s0] sm:$0xff] }
 0x3c7   :  { %7246 = vmatprep.mubr.bf16.mxu0 %v12011_v30  ;;  %7559 = vmatpush1.bf16.msra.mxu1 %v9536_v18 }
 0x3c8   :  { %7590 = vmatprep.mubr.bf16.mxu1 %v12011_v30  ;;  %7216 = vmatprep.subr.bf16.mxu0 %v9541_v25  ;;  %v9553_v30 = vld [vmem:[%s12942_s2 + $0xe64] ss:$16 sps:$4 sm:$0xff]  }
 0x3c9   :  { %7560 = vmatprep.subr.bf16.mxu1 %v9544_v19 }
 0x3ca   :  { %7217 = vmatpush1.bf16.msra.mxu0 %v9539_v56  ;;  %v9634_v56 = vld [vmem:[%s12940_s0 + $0x8] sm:$0xff] }
 0x3cb   :  { %7561 = vmatpush1.bf16.msra.mxu1 %v9542_v20  ;;  %7218 = vmatprep.subr.bf16.mxu0 %v9547_v21 }
 0x3cc   :  { %7562 = vmatprep.subr.bf16.mxu1 %v9550_v23 }
 0x3ce   :  { %7219 = vmatpush1.bf16.msra.mxu0 %v9545_v27  ;;  %v9635_v27 = vld [vmem:[%s12940_s0 + $0x20] sm:$0xff] }
 0x3cf   :  { %7563 = vmatpush1.bf16.msra.mxu1 %v9548_v22  ;;  %7220 = vmatprep.subr.bf16.mxu0 %v9553_v30 }
 0x3d0   :  { %7564 = vmatprep.subr.bf16.mxu1 %v9556_v24  ;;  %v9636_v24 = vld [vmem:[%s12940_s0 + $0x10] sm:$0xff] }
 0x3d2   :  { %7221 = vmatpush1.bf16.msra.mxu0 %v9551_v29 }
 0x3d3   :  { %7565 = vmatpush1.bf16.msra.mxu1 %v9554_v31  ;;  %7222 = vmatprep.subr.bf16.mxu0 %v9559_v32  ;;  %v9637_v32 = vld [vmem:[%s12940_s0 + $0x28] sm:$0xff] }
 0x3d4   :  { %7566 = vmatprep.subr.bf16.mxu1 %v9562_v33 }
 0x3d6   :  { %7223 = vmatpush1.bf16.msra.mxu0 %v9557_v34 }
 0x3d7   :  { %7567 = vmatpush1.bf16.msra.mxu1 %v9560_v35  ;;  %7224 = vmatprep.subr.bf16.mxu0 %v9565_v36  ;;  %v9638_v35 = vld [vmem:[%s12940_s0 + $0x18] sm:$0xff] }
 0x3d8   :  { %7568 = vmatprep.subr.bf16.mxu1 %v9568_v37  ;;  %v9639_v37 = vld [vmem:[%s12940_s0 + $0x30] sm:$0xff] }
 0x3da   :  { %7225 = vmatpush1.bf16.msra.mxu0 %v9563_v38 }
 0x3db   :  { %7569 = vmatpush1.bf16.msra.mxu1 %v9566_v39  ;;  %7226 = vmatprep.subr.bf16.mxu0 %v9571_v40 }
 0x3dc   :  { %7570 = vmatprep.subr.bf16.mxu1 %v9574_v3 }
 0x3de   :  { %7227 = vmatpush1.bf16.msra.mxu0 %v9569_v41 }
 0x3df   :  { %7571 = vmatpush1.bf16.msra.mxu1 %v9572_v42  ;;  %7228 = vmatprep.subr.bf16.mxu0 %v9577_v52  ;;  %v9640_v42 = vld [vmem:[%s12940_s0 + $0x38] sm:$0xff] }
 0x3e0   :  { %7572 = vmatprep.subr.bf16.mxu1 %v9580_v43 }
 0x3e2   :  { %7229 = vmatpush1.bf16.msra.mxu0 %v9575_v44 }
 0x3e3   :  { %7573 = vmatpush1.bf16.msra.mxu1 %v9578_v45  ;;  %7230 = vmatprep.subr.bf16.mxu0 %v9583_v48 }
 0x3e4   :  { %7574 = vmatprep.subr.bf16.mxu1 %v9586_v46 }
 0x3e6   :  { %7231 = vmatpush1.bf16.msra.mxu0 %v9581_v58 }
 0x3e7   :  { %7575 = vmatpush1.bf16.msra.mxu1 %v9584_v54  ;;  %7232 = vmatprep.subr.bf16.mxu0 %v9589_v47 }
 0x3e8   :  { %7576 = vmatprep.subr.bf16.mxu1 %v9592_v49 }
 0x3ea   :  { %7233 = vmatpush1.bf16.msra.mxu0 %v9587_v50 }
 0x3eb   :  { %7577 = vmatpush1.bf16.msra.mxu1 %v9590_v51  ;;  %7234 = vmatprep.subr.bf16.mxu0 %v9595_v55 }
 0x3ec   :  { %7578 = vmatprep.subr.bf16.mxu1 %v9598_v59 }
 0x3ee   :  { %7235 = vmatpush1.bf16.msra.mxu0 %v9593_v60 }
 0x3ef   :  { %7579 = vmatpush1.bf16.msra.mxu1 %v9596_v61  ;;  %7236 = vmatprep.subr.bf16.mxu0 %v9601_v62 }
 0x3f0   :  { %7580 = vmatprep.subr.bf16.mxu1 %v9604_v0 }
 0x3f2   :  { %7237 = vmatpush1.bf16.msra.mxu0 %v9599_v1 }
 0x3f3   :  { %7581 = vmatpush1.bf16.msra.mxu1 %v9602_v2  ;;  %7238 = vmatprep.subr.bf16.mxu0 %v9607_v5 }
 0x3f4   :  { %7582 = vmatprep.subr.bf16.mxu1 %v9610_v7 }
 0x3f6   :  { %7239 = vmatpush1.bf16.msra.mxu0 %v9605_v8 }
 0x3f7   :  { %7583 = vmatpush1.bf16.msra.mxu1 %v9608_v9  ;;  %7240 = vmatprep.subr.bf16.mxu0 %v9613_v28 }
 0x3f8   :  { %7584 = vmatprep.subr.bf16.mxu1 %v9616_v10 }
 0x3fa   :  { %7241 = vmatpush1.bf16.msra.mxu0 %v9611_v11 }
 0x3fb   :  { %7585 = vmatpush1.bf16.msra.mxu1 %v9614_v4  ;;  %7242 = vmatprep.subr.bf16.mxu0 %v9619_v12 }
 0x3fc   :  { %7586 = vmatprep.subr.bf16.mxu1 %v9622_v15 }
 0x3fe   :  { %7243 = vmatpush1.bf16.msra.mxu0 %v9617_v13  ;;  %v7657_v13 = vlaneseq }
 0x3ff   :  { %7587 = vmatpush1.bf16.msra.mxu1 %v9620_v14  ;;  %7244 = vmatprep.subr.bf16.mxu0 %v9625_v57 }
 0x400   :  { %7588 = vmatprep.subr.bf16.mxu1 %v9628_v63 }
 0x402   :  { %7245 = vmatpush1.bf16.msra.mxu0 %v9623_v16  ;;  %v7658_v16 = vshrl.u32 %v7657_v13, 7 }
 0x403   :  { %7589 = vmatpush1.bf16.msra.mxu1 %v9626_v17 }
 0x405   :  { %7247 = vmatmul.mubr.bf16.vlgmr.msra.gmra.mrb[16].mxu0 %v12004_v26 }
 0x406   :  { %7591 = vmatmul.mubr.bf16.vlgmr.msra.gmra.mrb[16].mxu1 %v12004_v26 }
 0x4d8   :  { %v7248_v53 = vpop.f32.mrb[16].mxu0 }
 0x4d9   :  { %v8762_v18 = vadd.f32 %v9633_v6, %v7248_v53  ;;  %v7592_v25 = vpop.f32.mrb[16].mxu1  ;;  %v7250_v19 = vpop.f32.mrb[17].mxu0  ;;  %v7659_v53 = vsub.s32 0, %v7658_v16  ;;  %v7663_v6 = vsub.s32 1, %v7658_v16 }
 0x4da   :  { %v8763_v20 = vadd.f32 %v9634_v56, %v7250_v19  ;;  %v7594_v21 = vpop.f32.mrb[17].mxu1  ;;  %v7252_v23 = vpop.f32.mrb[18].mxu0  ;;  %v8766_v29 = vadd.f32 %v9636_v24, %v7592_v25  ;;  %v7671_v25 = vsub.s32 3, %v7658_v16  ;;  %v7601_v19 = vld [vmem:[%s12943_s3] sm:$0xf]  ;;  %s9665_s3 = smov [#allocation2]  }
 0x4db   :  { %v8764_v26 = vadd.f32 %v9635_v27, %v7252_v23  ;;  %v7596_v22 = vpop.f32.mrb[18].mxu1  ;;  %v7254_v30 = vpop.f32.mrb[19].mxu0  ;;  %v8767_v36 = vadd.f32 %v9638_v35, %v7594_v21  ;;  %v7602_v56 = vld [vmem:[%s12944_s4] sm:$0xf]  ;;  %v7664_v21 = vrot.slane %v7601_v19, %v7663_v6  ;;  %s7727_s4 = sshll.u32 %s9665_s3, 4  ;;  %s7728_s4 = int_to_ptr.vmem [resolvable:$true] %s7727_s4 }
 0x4dc   :  { %v7603_v31 = vadd.f32 %v8763_v20, %v8762_v18  ;;  %v8765_v33 = vadd.f32 %v9637_v32, %v7254_v30  ;;  %v7598_v34 = vpop.f32.mrb[19].mxu1  ;;  %v8768_v38 = vadd.f32 %v9639_v37, %v7596_v22  ;;  %v7672_v27 = vrot.slane %v7601_v19, %v7671_v25  ;;  %s9641_s10 = scalar_lea.vmem %s7728_s4, 1024  ;;  %p9646_p1 = scmp.lt.s32.totalorder %s7728_s4, %s7728_s4 }
 0x4dd   :  { %v8769_v52 = vadd.f32 %v9640_v42, %v7598_v34  ;;  %v7693_v32 = vrot.slane %v7602_v56, %v7663_v6  ;;  %v7701_v34 = vrot.slane %v7602_v56, %v7671_v25  ;;  %p9642_p0 = scmp.ne.s32.totalorder %s7728_s4, %s9641_s10  ;;  %p9647_p2 = scmp.lt.s32.totalorder %s9641_s10, %s9641_s10 }
 0x4de   :  { %v7608_v39 = vadd.f32 %v8765_v33, %v8764_v26  ;;  %v7604_v40 = vadd.f32 %v8766_v29, %v7603_v31  ;;  %v7689_v31 = vrot.slane %v7602_v56, %v7659_v53 }
 0x4df   :  { %p9648_p3 = por %p9647_p2, %p9646_p1 }
 0x4e0   :  { %v7605_v3 = vadd.f32 %v8767_v36, %v7604_v40  ;;  %v7609_v41 = vadd.f32 %v8768_v38, %v7608_v39 }
 0x4e1   :  { %p9649_p4 = pnand %p9648_p3, %p9642_p0 }
 0x4e2   :  { %7606 = vadd.xlane.f32.xlu0 %v7605_v3  ;;  %v7610_v43 = vadd.f32 %v8769_v52, %v7609_v41 }
 0x4e6   :  { %7611 = vadd.xlane.f32.xlu0 %v7610_v43 }
 0x56f   :  { %v7607_v44 = vpop.xlane.xlu0 %7606 }
 0x570   :  { %v7614_v45 = vmul.f32 0.001953125, %v7607_v44 }
 0x572   :  { %v7616_v48 = vsub.f32 %v8762_v18, %v7614_v45  ;;  %v7617_v46 = vsub.f32 %v8763_v20, %v7614_v45  ;;  %v7618_v58 = vsub.f32 %v8766_v29, %v7614_v45  ;;  %v7619_v47 = vsub.f32 %v8767_v36, %v7614_v45 }
 0x573   :  { %v7612_v54 = vpop.xlane.xlu0 %7611  ;;  %v7667_v18 = vsub.s32 2, %v7658_v16  ;;  %v7660_v20 = vrot.slane %v7601_v19, %v7659_v53 }
 0x574   :  { %v7615_v49 = vmul.f32 0.001953125, %v7612_v54  ;;  %v7624_v50 = vmul.f32 %v7616_v48, %v7616_v48  ;;  %v7625_v51 = vmul.f32 %v7617_v46, %v7617_v46  ;;  %v7626_v55 = vmul.f32 %v7618_v58, %v7618_v58 }
 0x575   :  { %v7627_v0 = vmul.f32 %v7619_v47, %v7619_v47  ;;  %v7668_v23 = vrot.slane %v7601_v19, %v7667_v18 }
 0x576   :  { %v7620_v59 = vsub.f32 %v8764_v26, %v7615_v49  ;;  %v7621_v60 = vsub.f32 %v8765_v33, %v7615_v49  ;;  %v7632_v61 = vadd.f32 %v7625_v51, %v7624_v50  ;;  %v7622_v62 = vsub.f32 %v8768_v38, %v7615_v49 }
 0x577   :  { %v7623_v2 = vsub.f32 %v8769_v52, %v7615_v49  ;;  %v7697_v33 = vrot.slane %v7602_v56, %v7667_v18 }
 0x578   :  { %v7633_v1 = vadd.f32 %v7632_v61, %v7626_v55  ;;  %v7628_v5 = vmul.f32 %v7620_v59, %v7620_v59  ;;  %v7629_v7 = vmul.f32 %v7621_v60, %v7621_v60  ;;  %v7630_v9 = vmul.f32 %v7622_v62, %v7622_v62 }
 0x579   :  { %v7631_v10 = vmul.f32 %v7623_v2, %v7623_v2 }
 0x57a   :  { %v7634_v8 = vadd.f32 %v7633_v1, %v7627_v0  ;;  %v7637_v28 = vadd.f32 %v7629_v7, %v7628_v5 }
 0x57c   :  { %7635 = vadd.xlane.f32.xlu1 %v7634_v8  ;;  %v7638_v11 = vadd.f32 %v7637_v28, %v7630_v9 }
 0x57e   :  { %v7639_v4 = vadd.f32 %v7638_v11, %v7631_v10 }
 0x580   :  { %7640 = vadd.xlane.f32.xlu1 %v7639_v4 }
 0x609   :  { %v7636_v12 = vpop.xlane.xlu1 %7635 }
 0x60a   :  { %v7642_v15 = vmul.f32 0.001953125, %v7636_v12 }
 0x60c   :  { %v7644_v14 = vadd.f32 1e-05, %v7642_v15 }
 0x60d   :  { %v7641_v57 = vpop.xlane.xlu1 %7640 }
 0x60e   :  { %9629 = vrsqrt.f32 %v7644_v14  ;;  %v7643_v63 = vmul.f32 0.001953125, %v7641_v57 }
 0x610   :  { %v7645_v17 = vadd.f32 1e-05, %v7643_v63 }
 0x612   :  { %9631 = vrsqrt.f32 %v7645_v17 }
 0x618   :  { %v9630_v26 = vpop.eup %9629 }
 0x619   :  { %v7648_v22 = vmul.f32 %v9630_v26, %v7616_v48  ;;  %v7649_v30 = vmul.f32 %v9630_v26, %v7617_v46  ;;  %v7650_v24 = vmul.f32 %v9630_v26, %v7618_v58  ;;  %v7651_v29 = vmul.f32 %v9630_v26, %v7619_v47 }
 0x61b   :  { %v7677_v35 = vmul.f32 %v7660_v20, %v7648_v22  ;;  %v7678_v36 = vmul.f32 %v7664_v21, %v7649_v30  ;;  %v7679_v37 = vmul.f32 %v7668_v23, %v7650_v24  ;;  %v7680_v38 = vmul.f32 %v7672_v27, %v7651_v29 }
 0x61c   :  { %v9632_v39 = vpop.eup %9631 }
 0x61d   :  { %v7652_v40 = vmul.f32 %v9632_v39, %v7620_v59  ;;  %v7653_v3 = vmul.f32 %v9632_v39, %v7621_v60  ;;  %v7654_v41 = vmul.f32 %v9632_v39, %v7622_v62  ;;  %v7655_v42 = vmul.f32 %v9632_v39, %v7623_v2 }
 0x61e   :  { %v7706_v52 = vadd.f32 %v7689_v31, %v7677_v35  ;;  %v7707_v43 = vadd.f32 %v7693_v32, %v7678_v36  ;;  %v7708_v44 = vadd.f32 %v7697_v33, %v7679_v37  ;;  %v7709_v45 = vadd.f32 %v7701_v34, %v7680_v38 }
 0x61f   :  { %v7681_v48 = vmul.f32 %v7660_v20, %v7652_v40  ;;  %v7682_v46 = vmul.f32 %v7664_v21, %v7653_v3  ;;  %v7683_v58 = vmul.f32 %v7668_v23, %v7654_v41  ;;  %v7684_v54 = vmul.f32 %v7672_v27, %v7655_v42 }
 0x620   :  { %7714 = vst [vmem:[#allocation2] sm:$0xff] %v7706_v52  ;;  %7715 = vst [vmem:[#allocation2 + $0x8] sm:$0xff] %v7707_v43 }
 0x621   :  { %7716 = vst [vmem:[#allocation2 + $0x10] sm:$0xff] %v7708_v44  ;;  %7717 = vst [vmem:[#allocation2 + $0x18] sm:$0xff] %v7709_v45  ;;  %v7710_v47 = vadd.f32 %v7689_v31, %v7681_v48  ;;  %v7711_v49 = vadd.f32 %v7693_v32, %v7682_v46  ;;  %v7712_v50 = vadd.f32 %v7697_v33, %v7683_v58 }
 0x622   :  { %v7713_v51 = vadd.f32 %v7701_v34, %v7684_v54 }
 0x623   :  { %7718 = vst [vmem:[#allocation2 + $0x20] sm:$0xff] %v7710_v47  ;;  %7719 = vst [vmem:[#allocation2 + $0x28] sm:$0xff] %v7711_v49 }
 0x624   :  { %7720 = vst [vmem:[#allocation2 + $0x30] sm:$0xff] %v7712_v50  ;;  %7721 = vst [vmem:[#allocation2 + $0x38] sm:$0xff] %v7713_v51 }
 0x625   :  { %9652 = shalt.err (!%p9649_p4)
}
 0x626   :  { %s9653_s12 = scalar_lea.hbm %s12945_s5, 1024 }
 0x627   :  { %p9654_p5 = scmp.ne.s32.totalorder %s12945_s5, %s9653_s12  ;;  %p9657_p6 = scmp.lt.u32.totalorder %s9653_s12, %s12945_s5 }
 0x629   :  { %p9659_p7 = pnand %p9657_p6, %p9654_p5 }
 0x62b   :  { %9662 = shalt.err (!%p9659_p7)
}
 0x62c   :  { %s9666_s17 = smov 512   ;;  %s9667_s18 = smov 32  }
 0x62d   :  { %7733 = dma.vmem_to_hbm [thread:$0]  %s7728_s4, 1024, %s12945_s5, [#allocation3], %s9666_s17, %s9666_s17, %s9667_s18  }
 0x62e   :  { %9663 = dma.done.wait [#allocation3], 1024  }
 0x62f   :  { %9664 = vsyncadd [#allocation3], 4294966272 }
 0x630   :  { %7737 = vsyncpa [#allocation3], 1 }

</bundles_post_ra>
